<compile_context>
chip_gen: v7x
topology: tpu7x:2x2x1
jax: 0.10.0
libtpu: 0.0.40
codegen_flags: <defaults>
</compile_context>

<pallas_src>
import jax
import jax.numpy as jnp
from jax.experimental import pallas as pl
from jax.experimental.pallas import tpu as pltpu

# TODO(synk): L_CONSTANT_DISC is an undefined global in the spec; assumed to be
# a compile-time constant (1.0) and folded into the last linear's weights.
L_CONSTANT_DISC = 1.0


def _elu(y):
    # ELU(alpha=1).  minimum() keeps the unselected exp branch finite.
    return jnp.where(y > 0.0, y, jnp.exp(jnp.minimum(y, 0.0)) - 1.0)


# ---------------------------------------------------------------------------
# In-kernel helpers (operate on the (rows=H, cols=W*C) slab layout).
# ---------------------------------------------------------------------------
def _stage_padded(pad_s, slab, pad, H, W, cin):
    """Write `slab` (H, W*cin) into the scratch with a `pad`-pixel zero border."""
    Hp, Wp = H + 2 * pad, W + 2 * pad
    if pad > 0:
        pad_s[0:Hp, 0:Wp * cin] = jnp.zeros((Hp, Wp * cin), jnp.float32)
    pad_s[pad:pad + H, pad * cin:pad * cin + W * cin] = slab


def _conv_taps(src, w_ref, b_ref, kh, kw, Ho, Wo, cin):
    """sum over taps of (contiguous tap slice) @ (block-diag tap weight), +bias, ELU.

    `src` may be the padded VMEM scratch ref or a plain value slab.
    Returns the (Ho, Wo*cout) activation slab.
    """
    acc = None
    for dy in range(kh):
        for dx in range(kw):
            t = dy * kw + dx
            tap = src[dy:dy + Ho, dx * cin:dx * cin + Wo * cin]      # (Ho, Wo*cin)
            r = jnp.dot(tap, w_ref[t], preferred_element_type=jnp.float32)
            acc = r if acc is None else acc + r
    return _elu(acc + b_ref[...])


# ---------------------------------------------------------------------------
# The single fused kernel: one batch element per grid step.
# ---------------------------------------------------------------------------
def _disc_kernel(feat_ref, img_ref, p_ref, q_ref,
                 w1, b1, w2, b2, w3, b3, w4, b4, w5, b5, w6, b6,
                 l1w, l1b, l2w, l2b, out_ref, pad_s):
    f = feat_ref[0]                                   # (1, 5)
    img = img_ref[0]                                  # (8, 16)

    # Input slab (8, 16*6): channels per pixel = [f0..f4, image].  Built with
    # two small MXU matmuls against constant scatter matrices P, Q.
    slab = (jnp.dot(img, p_ref[...], preferred_element_type=jnp.float32)
            + jnp.dot(f, q_ref[...], preferred_element_type=jnp.float32))

    # ---- encoder1 ---------------------------------------------------------
    _stage_padded(pad_s, slab, 1, 8, 16, 6)
    y = _conv_taps(pad_s, w1, b1, 3, 3, 8, 16, 6)     # (8, 16*16)
    _stage_padded(pad_s, y, 1, 8, 16, 16)
    y = _conv_taps(pad_s, w2, b2, 3, 3, 8, 16, 16)    # (8, 16*16)

    # ---- F.pad(H: +4/+4) + MaxPool(2,2), staged straight into conv3's
    #      padded input (pooled rows from the zero-padded H region stay 0) ---
    for j in range(8):                                # column (W) pooling, C=16
        pad_s[0:8, j * 16:(j + 1) * 16] = jnp.maximum(
            y[:, (2 * j) * 16:(2 * j + 1) * 16],
            y[:, (2 * j + 1) * 16:(2 * j + 2) * 16])
    cm = pad_s[0:8, 0:128]
    pad_s[0:10, 0:160] = jnp.zeros((10, 160), jnp.float32)
    for i in range(4):                                # row (H) pooling
        pad_s[3 + i:4 + i, 16:144] = jnp.maximum(cm[2 * i:2 * i + 1, :],
                                                 cm[2 * i + 1:2 * i + 2, :])

    # ---- encoder2 ---------------------------------------------------------
    y = _conv_taps(pad_s, w3, b3, 3, 3, 8, 8, 16)     # (8, 8*32)
    _stage_padded(pad_s, y, 1, 8, 8, 32)
    y = _conv_taps(pad_s, w4, b4, 3, 3, 8, 8, 32)     # (8, 8*32)

    # MaxPool(2,2): (8,8,32) -> (4,4,32), staged for conv5 (pad=0)
    for j in range(4):
        pad_s[0:8, j * 32:(j + 1) * 32] = jnp.maximum(
            y[:, (2 * j) * 32:(2 * j + 1) * 32],
            y[:, (2 * j + 1) * 32:(2 * j + 2) * 32])
    cm = pad_s[0:8, 0:128]
    for i in range(4):
        pad_s[i:i + 1, 0:128] = jnp.maximum(cm[2 * i:2 * i + 1, :],
                                            cm[2 * i + 1:2 * i + 2, :])

    y = _conv_taps(pad_s, w5, b5, 3, 3, 2, 2, 32)     # (2, 2*64)
    y = _conv_taps(y, w6, b6, 2, 2, 1, 1, 64)         # (1, 64)

    # ---- tail MLP: cat([features, conv_out]) realised as a split matmul ----
    h = _elu(jnp.dot(f, l1w[0:5, :], preferred_element_type=jnp.float32)
             + jnp.dot(y, l1w[5:69, :], preferred_element_type=jnp.float32)
             + l1b[...])                              # (1, 128)
    o = jnp.dot(h, l2w[...], preferred_element_type=jnp.float32) + l2b[...]
    out_ref[0] = o.astype(out_ref.dtype)              # lane-dense (1, 128) store


# ---------------------------------------------------------------------------
# One-time host-side parameter preparation (pure layout plumbing).
# ---------------------------------------------------------------------------
_PARAM_ORDER = ("p", "q", "w1", "b1", "w2", "b2", "w3", "b3", "w4", "b4",
                "w5", "b5", "w6", "b6", "l1w", "l1b", "l2w", "l2b")


def prepare_params(params):
    W = 16

    p = jnp.zeros((W, W * 6), jnp.float32)
    p = p.at[jnp.arange(W), jnp.arange(W) * 6 + 5].set(1.0)       # image -> c=5 slots
    q = jnp.zeros((5, W * 6), jnp.float32)
    xs = jnp.arange(W)
    for c in range(5):
        q = q.at[c, xs * 6 + c].set(1.0)                          # features -> c<5 slots

    def bd(w_hwio, wo):
        kh, kw, cin, cout = w_hwio.shape
        eye = jnp.eye(wo, dtype=jnp.float32)
        wt = w_hwio.reshape(kh * kw, cin, cout).astype(jnp.float32)
        return jnp.einsum('xz,tio->txizo', eye, wt).reshape(kh * kw, wo * cin, wo * cout)

    def tb(b, wo):
        return jnp.tile(b.astype(jnp.float32), (wo,)).reshape(1, -1)

    l2w = jnp.zeros((128, 128), jnp.float32).at[:, 0].set(
        params['l2_w'][:, 0].astype(jnp.float32) * L_CONSTANT_DISC)
    l2b = jnp.zeros((1, 128), jnp.float32).at[0, 0].set(
        params['l2_b'][0].astype(jnp.float32) * L_CONSTANT_DISC)

    return {
        'p': p, 'q': q,
        'w1': bd(params['c1_w'], 16), 'b1': tb(params['c1_b'], 16),
        'w2': bd(params['c2_w'], 16), 'b2': tb(params['c2_b'], 16),
        'w3': bd(params['c3_w'], 8),  'b3': tb(params['c3_b'], 8),
        'w4': bd(params['c4_w'], 8),  'b4': tb(params['c4_b'], 8),
        'w5': bd(params['c5_w'], 2),  'b5': tb(params['c5_b'], 2),
        'w6': bd(params['c6_w'], 1),  'b6': tb(params['c6_b'], 1),
        'l1w': params['l1_w'].astype(jnp.float32),
        'l1b': params['l1_b'].astype(jnp.float32).reshape(1, -1),
        'l2w': l2w, 'l2b': l2b,
    }


def _full_spec(a):
    return pl.BlockSpec(a.shape, lambda b, _z=(0,) * a.ndim: _z)


def discriminator_forward(prepared, features, image):
    B, K = features.shape
    _, H, W = image.shape
    assert (H, W, K) == (8, 16, 5), "architecture fixes image=(B,8,16), features=(B,5)"
    feats = features.reshape(B, 1, K).astype(jnp.float32)
    img = image.astype(jnp.float32)
    weights = [prepared[k] for k in _PARAM_ORDER]

    out = pl.pallas_call(
        _disc_kernel,
        out_shape=jax.ShapeDtypeStruct((B, 1, 128), jnp.float32),
        grid_spec=pltpu.PrefetchScalarGridSpec(
            num_scalar_prefetch=0,
            grid=(B,),
            in_specs=[pl.BlockSpec((1, 1, K), lambda b: (b, 0, 0)),
                      pl.BlockSpec((1, H, W), lambda b: (b, 0, 0))]
                     + [_full_spec(a) for a in weights],
            out_specs=pl.BlockSpec((1, 1, 128), lambda b: (b, 0, 0)),
            scratch_shapes=[pltpu.VMEM((16, 384), jnp.float32)],
        ),
        compiler_params=pltpu.CompilerParams(
            dimension_semantics=("parallel",),        # batch over both TCs on v7x
            vmem_limit_bytes=48 * 1024 * 1024,
        ),
    )(feats, img, *weights)
    return out[:, 0, :1]                              # (B, 1)


# ---------------------------------------------------------------------------
# Pure-JAX reference for correctness checking.
# ---------------------------------------------------------------------------
def _reference_forward(params, features, image):
    B, H, W = image.shape
    _, K = features.shape
    feat_map = jnp.broadcast_to(features[:, None, None, :], (B, H, W, K))
    x = jnp.concatenate([feat_map, image[:, :, :, None]], axis=-1)

    def conv(x, w, b, pad):
        y = jax.lax.conv_general_dilated(
            x, w, window_strides=(1, 1),
            padding=[(pad, pad), (pad, pad)],
            dimension_numbers=('NHWC', 'HWIO', 'NHWC'))
        return _elu(y + b)

    def pool(x):
        b_, h_, w_, c_ = x.shape
        return x.reshape(b_, h_ // 2, 2, w_ // 2, 2, c_).max(axis=(2, 4))

    x = conv(x, params['c1_w'], params['c1_b'], 1)
    x = conv(x, params['c2_w'], params['c2_b'], 1)
    x = jnp.pad(x, ((0, 0), (H // 2, H // 2), (0, 0), (0, 0)))
    x = pool(x)
    x = conv(x, params['c3_w'], params['c3_b'], 1)
    x = conv(x, params['c4_w'], params['c4_b'], 1)
    x = pool(x)
    x = conv(x, params['c5_w'], params['c5_b'], 0)
    x = conv(x, params['c6_w'], params['c6_b'], 0)
    x = x.reshape(B, -1)
    x = jnp.concatenate([features, x], axis=-1)
    x = _elu(x @ params['l1_w'] + params['l1_b'])
    x = x @ params['l2_w'] + params['l2_b']
    return L_CONSTANT_DISC * x


if __name__ == "__main__":
    # Spatial size is fixed by the architecture: the last conv must reach 1x1,
    # which requires image (B, 8, 16) and features (B, 5)  (5 + 64 = 69).
    B, H, W, K_FEAT = 2, 8, 16, 5

    key = jax.random.PRNGKey(0)
    keys = jax.random.split(key, 18)
    init = lambda k, s: 0.1 * jax.random.normal(k, s, dtype=jnp.float32)

    params = {
        'c1_w': init(keys[0],  (3, 3, 6, 16)),  'c1_b': init(keys[1],  (16,)),
        'c2_w': init(keys[2],  (3, 3, 16, 16)), 'c2_b': init(keys[3],  (16,)),
        'c3_w': init(keys[4],  (3, 3, 16, 32)), 'c3_b': init(keys[5],  (32,)),
        'c4_w': init(keys[6],  (3, 3, 32, 32)), 'c4_b': init(keys[7],  (32,)),
        'c5_w': init(keys[8],  (3, 3, 32, 64)), 'c5_b': init(keys[9],  (64,)),
        'c6_w': init(keys[10], (2, 2, 64, 64)), 'c6_b': init(keys[11], (64,)),
        'l1_w': init(keys[12], (69, 128)),      'l1_b': init(keys[13], (128,)),
        'l2_w': init(keys[14], (128, 1)),       'l2_b': init(keys[15], (1,)),
    }
    features = jax.random.normal(keys[16], (B, K_FEAT), dtype=jnp.float32)
    image = jax.random.normal(keys[17], (B, H, W), dtype=jnp.float32)

    prepared = prepare_params(params)              # one-time layout plumbing
    fwd = jax.jit(discriminator_forward)
    out = jax.block_until_ready(fwd(prepared, features, image))

    ref = _reference_forward(params, features, image)
    assert out.shape == (B, 1), out.shape
    assert out.dtype == jnp.float32
    assert jnp.allclose(out, ref, atol=2e-4, rtol=2e-4), (out, ref)
    print("KERNEL_OK")
</pallas_src>

<mosaic_0001>
module attributes {stable_mosaic.version = 11 : i64} {
  func.func @_disc_kernel(%arg0: i32, %arg1: memref<1x1x5xf32, #tpu.memory_space<vmem>>, %arg2: memref<1x8x16xf32, #tpu.memory_space<vmem>>, %arg3: memref<16x96xf32, #tpu.memory_space<vmem>>, %arg4: memref<5x96xf32, #tpu.memory_space<vmem>>, %arg5: memref<9x96x256xf32, #tpu.memory_space<vmem>>, %arg6: memref<1x256xf32, #tpu.memory_space<vmem>>, %arg7: memref<9x256x256xf32, #tpu.memory_space<vmem>>, %arg8: memref<1x256xf32, #tpu.memory_space<vmem>>, %arg9: memref<9x128x256xf32, #tpu.memory_space<vmem>>, %arg10: memref<1x256xf32, #tpu.memory_space<vmem>>, %arg11: memref<9x256x256xf32, #tpu.memory_space<vmem>>, %arg12: memref<1x256xf32, #tpu.memory_space<vmem>>, %arg13: memref<9x64x128xf32, #tpu.memory_space<vmem>>, %arg14: memref<1x128xf32, #tpu.memory_space<vmem>>, %arg15: memref<4x64x64xf32, #tpu.memory_space<vmem>>, %arg16: memref<1x64xf32, #tpu.memory_space<vmem>>, %arg17: memref<69x128xf32, #tpu.memory_space<vmem>>, %arg18: memref<1x128xf32, #tpu.memory_space<vmem>>, %arg19: memref<128x128xf32, #tpu.memory_space<vmem>>, %arg20: memref<1x128xf32, #tpu.memory_space<vmem>>, %arg21: memref<1x1x128xf32, #tpu.memory_space<vmem>>, %arg22: memref<16x384xf32, #tpu.memory_space<vmem>>) attributes {dimension_semantics = [#tpu.dimension_semantics<parallel>], iteration_bounds = array<i64: 2>, scalar_prefetch = 0 : i64, scratch_operands = 1 : i64, tpu.core_type = #tpu.core_type<tc>, window_params = [{transform_indices = @transform_0, window_bounds = array<i64: 1, 1, 5>}, {transform_indices = @transform_1, window_bounds = array<i64: 1, 8, 16>}, {pipeline_mode = #tpu.pipeline_mode<synchronous>, transform_indices = @transform_2, window_bounds = array<i64: 16, 96>}, {pipeline_mode = #tpu.pipeline_mode<synchronous>, transform_indices = @transform_3, window_bounds = array<i64: 5, 96>}, {pipeline_mode = #tpu.pipeline_mode<synchronous>, transform_indices = @transform_4, window_bounds = array<i64: 9, 96, 256>}, {pipeline_mode = #tpu.pipeline_mode<synchronous>, transform_indices = @transform_5, window_bounds = array<i64: 1, 256>}, {pipeline_mode = #tpu.pipeline_mode<synchronous>, transform_indices = @transform_6, window_bounds = array<i64: 9, 256, 256>}, {pipeline_mode = #tpu.pipeline_mode<synchronous>, transform_indices = @transform_7, window_bounds = array<i64: 1, 256>}, {pipeline_mode = #tpu.pipeline_mode<synchronous>, transform_indices = @transform_8, window_bounds = array<i64: 9, 128, 256>}, {pipeline_mode = #tpu.pipeline_mode<synchronous>, transform_indices = @transform_9, window_bounds = array<i64: 1, 256>}, {pipeline_mode = #tpu.pipeline_mode<synchronous>, transform_indices = @transform_10, window_bounds = array<i64: 9, 256, 256>}, {pipeline_mode = #tpu.pipeline_mode<synchronous>, transform_indices = @transform_11, window_bounds = array<i64: 1, 256>}, {pipeline_mode = #tpu.pipeline_mode<synchronous>, transform_indices = @transform_12, window_bounds = array<i64: 9, 64, 128>}, {pipeline_mode = #tpu.pipeline_mode<synchronous>, transform_indices = @transform_13, window_bounds = array<i64: 1, 128>}, {pipeline_mode = #tpu.pipeline_mode<synchronous>, transform_indices = @transform_14, window_bounds = array<i64: 4, 64, 64>}, {pipeline_mode = #tpu.pipeline_mode<synchronous>, transform_indices = @transform_15, window_bounds = array<i64: 1, 64>}, {pipeline_mode = #tpu.pipeline_mode<synchronous>, transform_indices = @transform_16, window_bounds = array<i64: 69, 128>}, {pipeline_mode = #tpu.pipeline_mode<synchronous>, transform_indices = @transform_17, window_bounds = array<i64: 1, 128>}, {pipeline_mode = #tpu.pipeline_mode<synchronous>, transform_indices = @transform_18, window_bounds = array<i64: 128, 128>}, {pipeline_mode = #tpu.pipeline_mode<synchronous>, transform_indices = @transform_19, window_bounds = array<i64: 1, 128>}, {transform_indices = @transform_20, window_bounds = array<i64: 1, 1, 128>}]} {
    %c0 = arith.constant 0 : index
    %c0_0 = arith.constant 0 : index
    %c0_1 = arith.constant 0 : index
    %0 = vector.load %arg1[%c0, %c0_0, %c0_1] : memref<1x1x5xf32, #tpu.memory_space<vmem>>, vector<1x1x5xf32>
    %1 = vector.shape_cast %0 : vector<1x1x5xf32> to vector<1x5xf32>
    %c0_2 = arith.constant 0 : index
    %c0_3 = arith.constant 0 : index
    %c0_4 = arith.constant 0 : index
    %2 = vector.load %arg2[%c0_2, %c0_3, %c0_4] : memref<1x8x16xf32, #tpu.memory_space<vmem>>, vector<1x8x16xf32>
    %3 = vector.shape_cast %2 : vector<1x8x16xf32> to vector<8x16xf32>
    %c0_5 = arith.constant 0 : index
    %c0_6 = arith.constant 0 : index
    %4 = vector.load %arg3[%c0_5, %c0_6] : memref<16x96xf32, #tpu.memory_space<vmem>>, vector<16x96xf32>
    %cst = arith.constant dense<0.000000e+00> : vector<8x96xf32>
    %5 = tpu.matmul %3, %4, %cst {dimension_numbers = #tpu.dot_dimension_numbers<[1], [0], [0], [1], [0, 0, 1, 1], [], []>} : vector<8x16xf32>, vector<16x96xf32>, vector<8x96xf32> -> vector<8x96xf32>
    %c0_7 = arith.constant 0 : index
    %c0_8 = arith.constant 0 : index
    %6 = vector.load %arg4[%c0_7, %c0_8] : memref<5x96xf32, #tpu.memory_space<vmem>>, vector<5x96xf32>
    %cst_9 = arith.constant dense<0.000000e+00> : vector<1x96xf32>
    %7 = tpu.matmul %1, %6, %cst_9 {dimension_numbers = #tpu.dot_dimension_numbers<[1], [0], [0], [1], [0, 0, 1, 1], [], []>} : vector<1x5xf32>, vector<5x96xf32>, vector<1x96xf32> -> vector<1x96xf32>
    %8 = vector.broadcast %7 : vector<1x96xf32> to vector<8x96xf32>
    %9 = arith.addf %5, %8 : vector<8x96xf32>
    %cst_10 = arith.constant 0.000000e+00 : f32
    %10 = vector.broadcast %cst_10 : f32 to vector<10x108xf32>
    %c0_11 = arith.constant 0 : index
    %c0_12 = arith.constant 0 : index
    %11 = vector.load %arg22[%c0_11, %c0_12] : memref<16x384xf32, #tpu.memory_space<vmem>>, vector<10x108xf32>
    tpu.vector_store %arg22[%c0_11, %c0_12], %10 {strides = array<i32>} : memref<16x384xf32, #tpu.memory_space<vmem>>, vector<10x108xf32>,
    %c1 = arith.constant 1 : index
    %c6 = arith.constant 6 : index
    %12 = vector.load %arg22[%c1, %c6] : memref<16x384xf32, #tpu.memory_space<vmem>>, vector<8x96xf32>
    tpu.vector_store %arg22[%c1, %c6], %9 {strides = array<i32>} : memref<16x384xf32, #tpu.memory_space<vmem>>, vector<8x96xf32>,
    %c0_13 = arith.constant 0 : index
    %c0_14 = arith.constant 0 : index
    %13 = vector.load %arg22[%c0_13, %c0_14] : memref<16x384xf32, #tpu.memory_space<vmem>>, vector<8x96xf32>
    %c0_15 = arith.constant 0 : index
    %c0_16 = arith.constant 0 : index
    %c0_17 = arith.constant 0 : index
    %14 = vector.load %arg5[%c0_15, %c0_16, %c0_17] : memref<9x96x256xf32, #tpu.memory_space<vmem>>, vector<1x96x256xf32>
    %15 = vector.shape_cast %14 : vector<1x96x256xf32> to vector<96x256xf32>
    %cst_18 = arith.constant dense<0.000000e+00> : vector<8x256xf32>
    %16 = tpu.matmul %13, %15, %cst_18 {dimension_numbers = #tpu.dot_dimension_numbers<[1], [0], [0], [1], [0, 0, 1, 1], [], []>} : vector<8x96xf32>, vector<96x256xf32>, vector<8x256xf32> -> vector<8x256xf32>
    %c0_19 = arith.constant 0 : index
    %c6_20 = arith.constant 6 : index
    %17 = vector.load %arg22[%c0_19, %c6_20] : memref<16x384xf32, #tpu.memory_space<vmem>>, vector<8x96xf32>
    %c1_21 = arith.constant 1 : index
    %c0_22 = arith.constant 0 : index
    %c0_23 = arith.constant 0 : index
    %18 = vector.load %arg5[%c1_21, %c0_22, %c0_23] : memref<9x96x256xf32, #tpu.memory_space<vmem>>, vector<1x96x256xf32>
    %19 = vector.shape_cast %18 : vector<1x96x256xf32> to vector<96x256xf32>
    %cst_24 = arith.constant dense<0.000000e+00> : vector<8x256xf32>
    %20 = tpu.matmul %17, %19, %cst_24 {dimension_numbers = #tpu.dot_dimension_numbers<[1], [0], [0], [1], [0, 0, 1, 1], [], []>} : vector<8x96xf32>, vector<96x256xf32>, vector<8x256xf32> -> vector<8x256xf32>
    %21 = arith.addf %16, %20 : vector<8x256xf32>
    %c0_25 = arith.constant 0 : index
    %c12 = arith.constant 12 : index
    %22 = vector.load %arg22[%c0_25, %c12] : memref<16x384xf32, #tpu.memory_space<vmem>>, vector<8x96xf32>
    %c2 = arith.constant 2 : index
    %c0_26 = arith.constant 0 : index
    %c0_27 = arith.constant 0 : index
    %23 = vector.load %arg5[%c2, %c0_26, %c0_27] : memref<9x96x256xf32, #tpu.memory_space<vmem>>, vector<1x96x256xf32>
    %24 = vector.shape_cast %23 : vector<1x96x256xf32> to vector<96x256xf32>
    %cst_28 = arith.constant dense<0.000000e+00> : vector<8x256xf32>
    %25 = tpu.matmul %22, %24, %cst_28 {dimension_numbers = #tpu.dot_dimension_numbers<[1], [0], [0], [1], [0, 0, 1, 1], [], []>} : vector<8x96xf32>, vector<96x256xf32>, vector<8x256xf32> -> vector<8x256xf32>
    %26 = arith.addf %21, %25 : vector<8x256xf32>
    %c1_29 = arith.constant 1 : index
    %c0_30 = arith.constant 0 : index
    %27 = vector.load %arg22[%c1_29, %c0_30] : memref<16x384xf32, #tpu.memory_space<vmem>>, vector<8x96xf32>
    %c3 = arith.constant 3 : index
    %c0_31 = arith.constant 0 : index
    %c0_32 = arith.constant 0 : index
    %28 = vector.load %arg5[%c3, %c0_31, %c0_32] : memref<9x96x256xf32, #tpu.memory_space<vmem>>, vector<1x96x256xf32>
    %29 = vector.shape_cast %28 : vector<1x96x256xf32> to vector<96x256xf32>
    %cst_33 = arith.constant dense<0.000000e+00> : vector<8x256xf32>
    %30 = tpu.matmul %27, %29, %cst_33 {dimension_numbers = #tpu.dot_dimension_numbers<[1], [0], [0], [1], [0, 0, 1, 1], [], []>} : vector<8x96xf32>, vector<96x256xf32>, vector<8x256xf32> -> vector<8x256xf32>
    %31 = arith.addf %26, %30 : vector<8x256xf32>
    %c1_34 = arith.constant 1 : index
    %c6_35 = arith.constant 6 : index
    %32 = vector.load %arg22[%c1_34, %c6_35] : memref<16x384xf32, #tpu.memory_space<vmem>>, vector<8x96xf32>
    %c4 = arith.constant 4 : index
    %c0_36 = arith.constant 0 : index
    %c0_37 = arith.constant 0 : index
    %33 = vector.load %arg5[%c4, %c0_36, %c0_37] : memref<9x96x256xf32, #tpu.memory_space<vmem>>, vector<1x96x256xf32>
    %34 = vector.shape_cast %33 : vector<1x96x256xf32> to vector<96x256xf32>
    %cst_38 = arith.constant dense<0.000000e+00> : vector<8x256xf32>
    %35 = tpu.matmul %32, %34, %cst_38 {dimension_numbers = #tpu.dot_dimension_numbers<[1], [0], [0], [1], [0, 0, 1, 1], [], []>} : vector<8x96xf32>, vector<96x256xf32>, vector<8x256xf32> -> vector<8x256xf32>
    %36 = arith.addf %31, %35 : vector<8x256xf32>
    %c1_39 = arith.constant 1 : index
    %c12_40 = arith.constant 12 : index
    %37 = vector.load %arg22[%c1_39, %c12_40] : memref<16x384xf32, #tpu.memory_space<vmem>>, vector<8x96xf32>
    %c5 = arith.constant 5 : index
    %c0_41 = arith.constant 0 : index
    %c0_42 = arith.constant 0 : index
    %38 = vector.load %arg5[%c5, %c0_41, %c0_42] : memref<9x96x256xf32, #tpu.memory_space<vmem>>, vector<1x96x256xf32>
    %39 = vector.shape_cast %38 : vector<1x96x256xf32> to vector<96x256xf32>
    %cst_43 = arith.constant dense<0.000000e+00> : vector<8x256xf32>
    %40 = tpu.matmul %37, %39, %cst_43 {dimension_numbers = #tpu.dot_dimension_numbers<[1], [0], [0], [1], [0, 0, 1, 1], [], []>} : vector<8x96xf32>, vector<96x256xf32>, vector<8x256xf32> -> vector<8x256xf32>
    %41 = arith.addf %36, %40 : vector<8x256xf32>
    %c2_44 = arith.constant 2 : index
    %c0_45 = arith.constant 0 : index
    %42 = vector.load %arg22[%c2_44, %c0_45] : memref<16x384xf32, #tpu.memory_space<vmem>>, vector<8x96xf32>
    %c6_46 = arith.constant 6 : index
    %c0_47 = arith.constant 0 : index
    %c0_48 = arith.constant 0 : index
    %43 = vector.load %arg5[%c6_46, %c0_47, %c0_48] : memref<9x96x256xf32, #tpu.memory_space<vmem>>, vector<1x96x256xf32>
    %44 = vector.shape_cast %43 : vector<1x96x256xf32> to vector<96x256xf32>
    %cst_49 = arith.constant dense<0.000000e+00> : vector<8x256xf32>
    %45 = tpu.matmul %42, %44, %cst_49 {dimension_numbers = #tpu.dot_dimension_numbers<[1], [0], [0], [1], [0, 0, 1, 1], [], []>} : vector<8x96xf32>, vector<96x256xf32>, vector<8x256xf32> -> vector<8x256xf32>
    %46 = arith.addf %41, %45 : vector<8x256xf32>
    %c2_50 = arith.constant 2 : index
    %c6_51 = arith.constant 6 : index
    %47 = vector.load %arg22[%c2_50, %c6_51] : memref<16x384xf32, #tpu.memory_space<vmem>>, vector<8x96xf32>
    %c7 = arith.constant 7 : index
    %c0_52 = arith.constant 0 : index
    %c0_53 = arith.constant 0 : index
    %48 = vector.load %arg5[%c7, %c0_52, %c0_53] : memref<9x96x256xf32, #tpu.memory_space<vmem>>, vector<1x96x256xf32>
    %49 = vector.shape_cast %48 : vector<1x96x256xf32> to vector<96x256xf32>
    %cst_54 = arith.constant dense<0.000000e+00> : vector<8x256xf32>
    %50 = tpu.matmul %47, %49, %cst_54 {dimension_numbers = #tpu.dot_dimension_numbers<[1], [0], [0], [1], [0, 0, 1, 1], [], []>} : vector<8x96xf32>, vector<96x256xf32>, vector<8x256xf32> -> vector<8x256xf32>
    %51 = arith.addf %46, %50 : vector<8x256xf32>
    %c2_55 = arith.constant 2 : index
    %c12_56 = arith.constant 12 : index
    %52 = vector.load %arg22[%c2_55, %c12_56] : memref<16x384xf32, #tpu.memory_space<vmem>>, vector<8x96xf32>
    %c8 = arith.constant 8 : index
    %c0_57 = arith.constant 0 : index
    %c0_58 = arith.constant 0 : index
    %53 = vector.load %arg5[%c8, %c0_57, %c0_58] : memref<9x96x256xf32, #tpu.memory_space<vmem>>, vector<1x96x256xf32>
    %54 = vector.shape_cast %53 : vector<1x96x256xf32> to vector<96x256xf32>
    %cst_59 = arith.constant dense<0.000000e+00> : vector<8x256xf32>
    %55 = tpu.matmul %52, %54, %cst_59 {dimension_numbers = #tpu.dot_dimension_numbers<[1], [0], [0], [1], [0, 0, 1, 1], [], []>} : vector<8x96xf32>, vector<96x256xf32>, vector<8x256xf32> -> vector<8x256xf32>
    %56 = arith.addf %51, %55 : vector<8x256xf32>
    %c0_60 = arith.constant 0 : index
    %c0_61 = arith.constant 0 : index
    %57 = vector.load %arg6[%c0_60, %c0_61] : memref<1x256xf32, #tpu.memory_space<vmem>>, vector<1x256xf32>
    %58 = vector.broadcast %57 : vector<1x256xf32> to vector<8x256xf32>
    %59 = arith.addf %56, %58 : vector<8x256xf32>
    %cst_62 = arith.constant 0.000000e+00 : f32
    %60 = vector.broadcast %cst_62 : f32 to vector<8x256xf32>
    %61 = arith.cmpf ogt, %59, %60 : vector<8x256xf32>
    %cst_63 = arith.constant 0.000000e+00 : f32
    %62 = vector.broadcast %cst_63 : f32 to vector<8x256xf32>
    %63 = arith.minimumf %59, %62 : vector<8x256xf32>
    %64 = math.exp %63 : vector<8x256xf32>
    %cst_64 = arith.constant 1.000000e+00 : f32
    %65 = vector.broadcast %cst_64 : f32 to vector<8x256xf32>
    %66 = arith.subf %64, %65 : vector<8x256xf32>
    %67 = arith.select %61, %59, %66 : vector<8x256xi1>, vector<8x256xf32>
    %cst_65 = arith.constant 0.000000e+00 : f32
    %68 = vector.broadcast %cst_65 : f32 to vector<10x288xf32>
    %c0_66 = arith.constant 0 : index
    %c0_67 = arith.constant 0 : index
    %69 = vector.load %arg22[%c0_66, %c0_67] : memref<16x384xf32, #tpu.memory_space<vmem>>, vector<10x288xf32>
    tpu.vector_store %arg22[%c0_66, %c0_67], %68 {strides = array<i32>} : memref<16x384xf32, #tpu.memory_space<vmem>>, vector<10x288xf32>,
    %c1_68 = arith.constant 1 : index
    %c16 = arith.constant 16 : index
    %70 = vector.load %arg22[%c1_68, %c16] : memref<16x384xf32, #tpu.memory_space<vmem>>, vector<8x256xf32>
    tpu.vector_store %arg22[%c1_68, %c16], %67 {strides = array<i32>} : memref<16x384xf32, #tpu.memory_space<vmem>>, vector<8x256xf32>,
    %c0_69 = arith.constant 0 : index
    %c0_70 = arith.constant 0 : index
    %71 = vector.load %arg22[%c0_69, %c0_70] : memref<16x384xf32, #tpu.memory_space<vmem>>, vector<8x256xf32>
    %c0_71 = arith.constant 0 : index
    %c0_72 = arith.constant 0 : index
    %c0_73 = arith.constant 0 : index
    %72 = vector.load %arg7[%c0_71, %c0_72, %c0_73] : memref<9x256x256xf32, #tpu.memory_space<vmem>>, vector<1x256x256xf32>
    %73 = vector.shape_cast %72 : vector<1x256x256xf32> to vector<256x256xf32>
    %cst_74 = arith.constant dense<0.000000e+00> : vector<8x256xf32>
    %74 = tpu.matmul %71, %73, %cst_74 {dimension_numbers = #tpu.dot_dimension_numbers<[1], [0], [0], [1], [0, 0, 1, 1], [], []>} : vector<8x256xf32>, vector<256x256xf32>, vector<8x256xf32> -> vector<8x256xf32>
    %c0_75 = arith.constant 0 : index
    %c16_76 = arith.constant 16 : index
    %75 = vector.load %arg22[%c0_75, %c16_76] : memref<16x384xf32, #tpu.memory_space<vmem>>, vector<8x256xf32>
    %c1_77 = arith.constant 1 : index
    %c0_78 = arith.constant 0 : index
    %c0_79 = arith.constant 0 : index
    %76 = vector.load %arg7[%c1_77, %c0_78, %c0_79] : memref<9x256x256xf32, #tpu.memory_space<vmem>>, vector<1x256x256xf32>
    %77 = vector.shape_cast %76 : vector<1x256x256xf32> to vector<256x256xf32>
    %cst_80 = arith.constant dense<0.000000e+00> : vector<8x256xf32>
    %78 = tpu.matmul %75, %77, %cst_80 {dimension_numbers = #tpu.dot_dimension_numbers<[1], [0], [0], [1], [0, 0, 1, 1], [], []>} : vector<8x256xf32>, vector<256x256xf32>, vector<8x256xf32> -> vector<8x256xf32>
    %79 = arith.addf %74, %78 : vector<8x256xf32>
    %c0_81 = arith.constant 0 : index
    %c32 = arith.constant 32 : index
    %80 = vector.load %arg22[%c0_81, %c32] : memref<16x384xf32, #tpu.memory_space<vmem>>, vector<8x256xf32>
    %c2_82 = arith.constant 2 : index
    %c0_83 = arith.constant 0 : index
    %c0_84 = arith.constant 0 : index
    %81 = vector.load %arg7[%c2_82, %c0_83, %c0_84] : memref<9x256x256xf32, #tpu.memory_space<vmem>>, vector<1x256x256xf32>
    %82 = vector.shape_cast %81 : vector<1x256x256xf32> to vector<256x256xf32>
    %cst_85 = arith.constant dense<0.000000e+00> : vector<8x256xf32>
    %83 = tpu.matmul %80, %82, %cst_85 {dimension_numbers = #tpu.dot_dimension_numbers<[1], [0], [0], [1], [0, 0, 1, 1], [], []>} : vector<8x256xf32>, vector<256x256xf32>, vector<8x256xf32> -> vector<8x256xf32>
    %84 = arith.addf %79, %83 : vector<8x256xf32>
    %c1_86 = arith.constant 1 : index
    %c0_87 = arith.constant 0 : index
    %85 = vector.load %arg22[%c1_86, %c0_87] : memref<16x384xf32, #tpu.memory_space<vmem>>, vector<8x256xf32>
    %c3_88 = arith.constant 3 : index
    %c0_89 = arith.constant 0 : index
    %c0_90 = arith.constant 0 : index
    %86 = vector.load %arg7[%c3_88, %c0_89, %c0_90] : memref<9x256x256xf32, #tpu.memory_space<vmem>>, vector<1x256x256xf32>
    %87 = vector.shape_cast %86 : vector<1x256x256xf32> to vector<256x256xf32>
    %cst_91 = arith.constant dense<0.000000e+00> : vector<8x256xf32>
    %88 = tpu.matmul %85, %87, %cst_91 {dimension_numbers = #tpu.dot_dimension_numbers<[1], [0], [0], [1], [0, 0, 1, 1], [], []>} : vector<8x256xf32>, vector<256x256xf32>, vector<8x256xf32> -> vector<8x256xf32>
    %89 = arith.addf %84, %88 : vector<8x256xf32>
    %c1_92 = arith.constant 1 : index
    %c16_93 = arith.constant 16 : index
    %90 = vector.load %arg22[%c1_92, %c16_93] : memref<16x384xf32, #tpu.memory_space<vmem>>, vector<8x256xf32>
    %c4_94 = arith.constant 4 : index
    %c0_95 = arith.constant 0 : index
    %c0_96 = arith.constant 0 : index
    %91 = vector.load %arg7[%c4_94, %c0_95, %c0_96] : memref<9x256x256xf32, #tpu.memory_space<vmem>>, vector<1x256x256xf32>
    %92 = vector.shape_cast %91 : vector<1x256x256xf32> to vector<256x256xf32>
    %cst_97 = arith.constant dense<0.000000e+00> : vector<8x256xf32>
    %93 = tpu.matmul %90, %92, %cst_97 {dimension_numbers = #tpu.dot_dimension_numbers<[1], [0], [0], [1], [0, 0, 1, 1], [], []>} : vector<8x256xf32>, vector<256x256xf32>, vector<8x256xf32> -> vector<8x256xf32>
    %94 = arith.addf %89, %93 : vector<8x256xf32>
    %c1_98 = arith.constant 1 : index
    %c32_99 = arith.constant 32 : index
    %95 = vector.load %arg22[%c1_98, %c32_99] : memref<16x384xf32, #tpu.memory_space<vmem>>, vector<8x256xf32>
    %c5_100 = arith.constant 5 : index
    %c0_101 = arith.constant 0 : index
    %c0_102 = arith.constant 0 : index
    %96 = vector.load %arg7[%c5_100, %c0_101, %c0_102] : memref<9x256x256xf32, #tpu.memory_space<vmem>>, vector<1x256x256xf32>
    %97 = vector.shape_cast %96 : vector<1x256x256xf32> to vector<256x256xf32>
    %cst_103 = arith.constant dense<0.000000e+00> : vector<8x256xf32>
    %98 = tpu.matmul %95, %97, %cst_103 {dimension_numbers = #tpu.dot_dimension_numbers<[1], [0], [0], [1], [0, 0, 1, 1], [], []>} : vector<8x256xf32>, vector<256x256xf32>, vector<8x256xf32> -> vector<8x256xf32>
    %99 = arith.addf %94, %98 : vector<8x256xf32>
    %c2_104 = arith.constant 2 : index
    %c0_105 = arith.constant 0 : index
    %100 = vector.load %arg22[%c2_104, %c0_105] : memref<16x384xf32, #tpu.memory_space<vmem>>, vector<8x256xf32>
    %c6_106 = arith.constant 6 : index
    %c0_107 = arith.constant 0 : index
    %c0_108 = arith.constant 0 : index
    %101 = vector.load %arg7[%c6_106, %c0_107, %c0_108] : memref<9x256x256xf32, #tpu.memory_space<vmem>>, vector<1x256x256xf32>
    %102 = vector.shape_cast %101 : vector<1x256x256xf32> to vector<256x256xf32>
    %cst_109 = arith.constant dense<0.000000e+00> : vector<8x256xf32>
    %103 = tpu.matmul %100, %102, %cst_109 {dimension_numbers = #tpu.dot_dimension_numbers<[1], [0], [0], [1], [0, 0, 1, 1], [], []>} : vector<8x256xf32>, vector<256x256xf32>, vector<8x256xf32> -> vector<8x256xf32>
    %104 = arith.addf %99, %103 : vector<8x256xf32>
    %c2_110 = arith.constant 2 : index
    %c16_111 = arith.constant 16 : index
    %105 = vector.load %arg22[%c2_110, %c16_111] : memref<16x384xf32, #tpu.memory_space<vmem>>, vector<8x256xf32>
    %c7_112 = arith.constant 7 : index
    %c0_113 = arith.constant 0 : index
    %c0_114 = arith.constant 0 : index
    %106 = vector.load %arg7[%c7_112, %c0_113, %c0_114] : memref<9x256x256xf32, #tpu.memory_space<vmem>>, vector<1x256x256xf32>
    %107 = vector.shape_cast %106 : vector<1x256x256xf32> to vector<256x256xf32>
    %cst_115 = arith.constant dense<0.000000e+00> : vector<8x256xf32>
    %108 = tpu.matmul %105, %107, %cst_115 {dimension_numbers = #tpu.dot_dimension_numbers<[1], [0], [0], [1], [0, 0, 1, 1], [], []>} : vector<8x256xf32>, vector<256x256xf32>, vector<8x256xf32> -> vector<8x256xf32>
    %109 = arith.addf %104, %108 : vector<8x256xf32>
    %c2_116 = arith.constant 2 : index
    %c32_117 = arith.constant 32 : index
    %110 = vector.load %arg22[%c2_116, %c32_117] : memref<16x384xf32, #tpu.memory_space<vmem>>, vector<8x256xf32>
    %c8_118 = arith.constant 8 : index
    %c0_119 = arith.constant 0 : index
    %c0_120 = arith.constant 0 : index
    %111 = vector.load %arg7[%c8_118, %c0_119, %c0_120] : memref<9x256x256xf32, #tpu.memory_space<vmem>>, vector<1x256x256xf32>
    %112 = vector.shape_cast %111 : vector<1x256x256xf32> to vector<256x256xf32>
    %cst_121 = arith.constant dense<0.000000e+00> : vector<8x256xf32>
    %113 = tpu.matmul %110, %112, %cst_121 {dimension_numbers = #tpu.dot_dimension_numbers<[1], [0], [0], [1], [0, 0, 1, 1], [], []>} : vector<8x256xf32>, vector<256x256xf32>, vector<8x256xf32> -> vector<8x256xf32>
    %114 = arith.addf %109, %113 : vector<8x256xf32>
    %c0_122 = arith.constant 0 : index
    %c0_123 = arith.constant 0 : index
    %115 = vector.load %arg8[%c0_122, %c0_123] : memref<1x256xf32, #tpu.memory_space<vmem>>, vector<1x256xf32>
    %116 = vector.broadcast %115 : vector<1x256xf32> to vector<8x256xf32>
    %117 = arith.addf %114, %116 : vector<8x256xf32>
    %cst_124 = arith.constant 0.000000e+00 : f32
    %118 = vector.broadcast %cst_124 : f32 to vector<8x256xf32>
    %119 = arith.cmpf ogt, %117, %118 : vector<8x256xf32>
    %cst_125 = arith.constant 0.000000e+00 : f32
    %120 = vector.broadcast %cst_125 : f32 to vector<8x256xf32>
    %121 = arith.minimumf %117, %120 : vector<8x256xf32>
    %122 = math.exp %121 : vector<8x256xf32>
    %cst_126 = arith.constant 1.000000e+00 : f32
    %123 = vector.broadcast %cst_126 : f32 to vector<8x256xf32>
    %124 = arith.subf %122, %123 : vector<8x256xf32>
    %125 = arith.select %119, %117, %124 : vector<8x256xi1>, vector<8x256xf32>
    %126 = vector.extract_strided_slice %125 {offsets = [0, 0], sizes = [8, 16], strides = [1, 1]} : vector<8x256xf32> to vector<8x16xf32>
    %127 = vector.extract_strided_slice %125 {offsets = [0, 16], sizes = [8, 16], strides = [1, 1]} : vector<8x256xf32> to vector<8x16xf32>
    %128 = arith.maximumf %126, %127 : vector<8x16xf32>
    %c0_127 = arith.constant 0 : index
    %c0_128 = arith.constant 0 : index
    %129 = vector.load %arg22[%c0_127, %c0_128] : memref<16x384xf32, #tpu.memory_space<vmem>>, vector<8x16xf32>
    tpu.vector_store %arg22[%c0_127, %c0_128], %128 {strides = array<i32>} : memref<16x384xf32, #tpu.memory_space<vmem>>, vector<8x16xf32>,
    %130 = vector.extract_strided_slice %125 {offsets = [0, 32], sizes = [8, 16], strides = [1, 1]} : vector<8x256xf32> to vector<8x16xf32>
    %131 = vector.extract_strided_slice %125 {offsets = [0, 48], sizes = [8, 16], strides = [1, 1]} : vector<8x256xf32> to vector<8x16xf32>
    %132 = arith.maximumf %130, %131 : vector<8x16xf32>
    %c0_129 = arith.constant 0 : index
    %c16_130 = arith.constant 16 : index
    %133 = vector.load %arg22[%c0_129, %c16_130] : memref<16x384xf32, #tpu.memory_space<vmem>>, vector<8x16xf32>
    tpu.vector_store %arg22[%c0_129, %c16_130], %132 {strides = array<i32>} : memref<16x384xf32, #tpu.memory_space<vmem>>, vector<8x16xf32>,
    %134 = vector.extract_strided_slice %125 {offsets = [0, 64], sizes = [8, 16], strides = [1, 1]} : vector<8x256xf32> to vector<8x16xf32>
    %135 = vector.extract_strided_slice %125 {offsets = [0, 80], sizes = [8, 16], strides = [1, 1]} : vector<8x256xf32> to vector<8x16xf32>
    %136 = arith.maximumf %134, %135 : vector<8x16xf32>
    %c0_131 = arith.constant 0 : index
    %c32_132 = arith.constant 32 : index
    %137 = vector.load %arg22[%c0_131, %c32_132] : memref<16x384xf32, #tpu.memory_space<vmem>>, vector<8x16xf32>
    tpu.vector_store %arg22[%c0_131, %c32_132], %136 {strides = array<i32>} : memref<16x384xf32, #tpu.memory_space<vmem>>, vector<8x16xf32>,
    %138 = vector.extract_strided_slice %125 {offsets = [0, 96], sizes = [8, 16], strides = [1, 1]} : vector<8x256xf32> to vector<8x16xf32>
    %139 = vector.extract_strided_slice %125 {offsets = [0, 112], sizes = [8, 16], strides = [1, 1]} : vector<8x256xf32> to vector<8x16xf32>
    %140 = arith.maximumf %138, %139 : vector<8x16xf32>
    %c0_133 = arith.constant 0 : index
    %c48 = arith.constant 48 : index
    %141 = vector.load %arg22[%c0_133, %c48] : memref<16x384xf32, #tpu.memory_space<vmem>>, vector<8x16xf32>
    tpu.vector_store %arg22[%c0_133, %c48], %140 {strides = array<i32>} : memref<16x384xf32, #tpu.memory_space<vmem>>, vector<8x16xf32>,
    %142 = vector.extract_strided_slice %125 {offsets = [0, 128], sizes = [8, 16], strides = [1, 1]} : vector<8x256xf32> to vector<8x16xf32>
    %143 = vector.extract_strided_slice %125 {offsets = [0, 144], sizes = [8, 16], strides = [1, 1]} : vector<8x256xf32> to vector<8x16xf32>
    %144 = arith.maximumf %142, %143 : vector<8x16xf32>
    %c0_134 = arith.constant 0 : index
    %c64 = arith.constant 64 : index
    %145 = vector.load %arg22[%c0_134, %c64] : memref<16x384xf32, #tpu.memory_space<vmem>>, vector<8x16xf32>
    tpu.vector_store %arg22[%c0_134, %c64], %144 {strides = array<i32>} : memref<16x384xf32, #tpu.memory_space<vmem>>, vector<8x16xf32>,
    %146 = vector.extract_strided_slice %125 {offsets = [0, 160], sizes = [8, 16], strides = [1, 1]} : vector<8x256xf32> to vector<8x16xf32>
    %147 = vector.extract_strided_slice %125 {offsets = [0, 176], sizes = [8, 16], strides = [1, 1]} : vector<8x256xf32> to vector<8x16xf32>
    %148 = arith.maximumf %146, %147 : vector<8x16xf32>
    %c0_135 = arith.constant 0 : index
    %c80 = arith.constant 80 : index
    %149 = vector.load %arg22[%c0_135, %c80] : memref<16x384xf32, #tpu.memory_space<vmem>>, vector<8x16xf32>
    tpu.vector_store %arg22[%c0_135, %c80], %148 {strides = array<i32>} : memref<16x384xf32, #tpu.memory_space<vmem>>, vector<8x16xf32>,
    %150 = vector.extract_strided_slice %125 {offsets = [0, 192], sizes = [8, 16], strides = [1, 1]} : vector<8x256xf32> to vector<8x16xf32>
    %151 = vector.extract_strided_slice %125 {offsets = [0, 208], sizes = [8, 16], strides = [1, 1]} : vector<8x256xf32> to vector<8x16xf32>
    %152 = arith.maximumf %150, %151 : vector<8x16xf32>
    %c0_136 = arith.constant 0 : index
    %c96 = arith.constant 96 : index
    %153 = vector.load %arg22[%c0_136, %c96] : memref<16x384xf32, #tpu.memory_space<vmem>>, vector<8x16xf32>
    tpu.vector_store %arg22[%c0_136, %c96], %152 {strides = array<i32>} : memref<16x384xf32, #tpu.memory_space<vmem>>, vector<8x16xf32>,
    %154 = vector.extract_strided_slice %125 {offsets = [0, 224], sizes = [8, 16], strides = [1, 1]} : vector<8x256xf32> to vector<8x16xf32>
    %155 = vector.extract_strided_slice %125 {offsets = [0, 240], sizes = [8, 16], strides = [1, 1]} : vector<8x256xf32> to vector<8x16xf32>
    %156 = arith.maximumf %154, %155 : vector<8x16xf32>
    %c0_137 = arith.constant 0 : index
    %c112 = arith.constant 112 : index
    %157 = vector.load %arg22[%c0_137, %c112] : memref<16x384xf32, #tpu.memory_space<vmem>>, vector<8x16xf32>
    tpu.vector_store %arg22[%c0_137, %c112], %156 {strides = array<i32>} : memref<16x384xf32, #tpu.memory_space<vmem>>, vector<8x16xf32>,
    %c0_138 = arith.constant 0 : index
    %c0_139 = arith.constant 0 : index
    %158 = vector.load %arg22[%c0_138, %c0_139] : memref<16x384xf32, #tpu.memory_space<vmem>>, vector<8x128xf32>
    %cst_140 = arith.constant 0.000000e+00 : f32
    %159 = vector.broadcast %cst_140 : f32 to vector<10x160xf32>
    %c0_141 = arith.constant 0 : index
    %c0_142 = arith.constant 0 : index
    %160 = vector.load %arg22[%c0_141, %c0_142] : memref<16x384xf32, #tpu.memory_space<vmem>>, vector<10x160xf32>
    tpu.vector_store %arg22[%c0_141, %c0_142], %159 {strides = array<i32>} : memref<16x384xf32, #tpu.memory_space<vmem>>, vector<10x160xf32>,
    %161 = vector.extract_strided_slice %158 {offsets = [0, 0], sizes = [1, 128], strides = [1, 1]} : vector<8x128xf32> to vector<1x128xf32>
    %162 = vector.extract_strided_slice %158 {offsets = [1, 0], sizes = [1, 128], strides = [1, 1]} : vector<8x128xf32> to vector<1x128xf32>
    %163 = arith.maximumf %161, %162 : vector<1x128xf32>
    %c3_143 = arith.constant 3 : index
    %c16_144 = arith.constant 16 : index
    %164 = vector.load %arg22[%c3_143, %c16_144] : memref<16x384xf32, #tpu.memory_space<vmem>>, vector<1x128xf32>
    tpu.vector_store %arg22[%c3_143, %c16_144], %163 {strides = array<i32>} : memref<16x384xf32, #tpu.memory_space<vmem>>, vector<1x128xf32>,
    %165 = vector.extract_strided_slice %158 {offsets = [2, 0], sizes = [1, 128], strides = [1, 1]} : vector<8x128xf32> to vector<1x128xf32>
    %166 = vector.extract_strided_slice %158 {offsets = [3, 0], sizes = [1, 128], strides = [1, 1]} : vector<8x128xf32> to vector<1x128xf32>
    %167 = arith.maximumf %165, %166 : vector<1x128xf32>
    %c4_145 = arith.constant 4 : index
    %c16_146 = arith.constant 16 : index
    %168 = vector.load %arg22[%c4_145, %c16_146] : memref<16x384xf32, #tpu.memory_space<vmem>>, vector<1x128xf32>
    tpu.vector_store %arg22[%c4_145, %c16_146], %167 {strides = array<i32>} : memref<16x384xf32, #tpu.memory_space<vmem>>, vector<1x128xf32>,
    %169 = vector.extract_strided_slice %158 {offsets = [4, 0], sizes = [1, 128], strides = [1, 1]} : vector<8x128xf32> to vector<1x128xf32>
    %170 = vector.extract_strided_slice %158 {offsets = [5, 0], sizes = [1, 128], strides = [1, 1]} : vector<8x128xf32> to vector<1x128xf32>
    %171 = arith.maximumf %169, %170 : vector<1x128xf32>
    %c5_147 = arith.constant 5 : index
    %c16_148 = arith.constant 16 : index
    %172 = vector.load %arg22[%c5_147, %c16_148] : memref<16x384xf32, #tpu.memory_space<vmem>>, vector<1x128xf32>
    tpu.vector_store %arg22[%c5_147, %c16_148], %171 {strides = array<i32>} : memref<16x384xf32, #tpu.memory_space<vmem>>, vector<1x128xf32>,
    %173 = vector.extract_strided_slice %158 {offsets = [6, 0], sizes = [1, 128], strides = [1, 1]} : vector<8x128xf32> to vector<1x128xf32>
    %174 = vector.extract_strided_slice %158 {offsets = [7, 0], sizes = [1, 128], strides = [1, 1]} : vector<8x128xf32> to vector<1x128xf32>
    %175 = arith.maximumf %173, %174 : vector<1x128xf32>
    %c6_149 = arith.constant 6 : index
    %c16_150 = arith.constant 16 : index
    %176 = vector.load %arg22[%c6_149, %c16_150] : memref<16x384xf32, #tpu.memory_space<vmem>>, vector<1x128xf32>
    tpu.vector_store %arg22[%c6_149, %c16_150], %175 {strides = array<i32>} : memref<16x384xf32, #tpu.memory_space<vmem>>, vector<1x128xf32>,
    %c0_151 = arith.constant 0 : index
    %c0_152 = arith.constant 0 : index
    %177 = vector.load %arg22[%c0_151, %c0_152] : memref<16x384xf32, #tpu.memory_space<vmem>>, vector<8x128xf32>
    %c0_153 = arith.constant 0 : index
    %c0_154 = arith.constant 0 : index
    %c0_155 = arith.constant 0 : index
    %178 = vector.load %arg9[%c0_153, %c0_154, %c0_155] : memref<9x128x256xf32, #tpu.memory_space<vmem>>, vector<1x128x256xf32>
    %179 = vector.shape_cast %178 : vector<1x128x256xf32> to vector<128x256xf32>
    %cst_156 = arith.constant dense<0.000000e+00> : vector<8x256xf32>
    %180 = tpu.matmul %177, %179, %cst_156 {dimension_numbers = #tpu.dot_dimension_numbers<[1], [0], [0], [1], [0, 0, 1, 1], [], []>} : vector<8x128xf32>, vector<128x256xf32>, vector<8x256xf32> -> vector<8x256xf32>
    %c0_157 = arith.constant 0 : index
    %c16_158 = arith.constant 16 : index
    %181 = vector.load %arg22[%c0_157, %c16_158] : memref<16x384xf32, #tpu.memory_space<vmem>>, vector<8x128xf32>
    %c1_159 = arith.constant 1 : index
    %c0_160 = arith.constant 0 : index
    %c0_161 = arith.constant 0 : index
    %182 = vector.load %arg9[%c1_159, %c0_160, %c0_161] : memref<9x128x256xf32, #tpu.memory_space<vmem>>, vector<1x128x256xf32>
    %183 = vector.shape_cast %182 : vector<1x128x256xf32> to vector<128x256xf32>
    %cst_162 = arith.constant dense<0.000000e+00> : vector<8x256xf32>
    %184 = tpu.matmul %181, %183, %cst_162 {dimension_numbers = #tpu.dot_dimension_numbers<[1], [0], [0], [1], [0, 0, 1, 1], [], []>} : vector<8x128xf32>, vector<128x256xf32>, vector<8x256xf32> -> vector<8x256xf32>
    %185 = arith.addf %180, %184 : vector<8x256xf32>
    %c0_163 = arith.constant 0 : index
    %c32_164 = arith.constant 32 : index
    %186 = vector.load %arg22[%c0_163, %c32_164] : memref<16x384xf32, #tpu.memory_space<vmem>>, vector<8x128xf32>
    %c2_165 = arith.constant 2 : index
    %c0_166 = arith.constant 0 : index
    %c0_167 = arith.constant 0 : index
    %187 = vector.load %arg9[%c2_165, %c0_166, %c0_167] : memref<9x128x256xf32, #tpu.memory_space<vmem>>, vector<1x128x256xf32>
    %188 = vector.shape_cast %187 : vector<1x128x256xf32> to vector<128x256xf32>
    %cst_168 = arith.constant dense<0.000000e+00> : vector<8x256xf32>
    %189 = tpu.matmul %186, %188, %cst_168 {dimension_numbers = #tpu.dot_dimension_numbers<[1], [0], [0], [1], [0, 0, 1, 1], [], []>} : vector<8x128xf32>, vector<128x256xf32>, vector<8x256xf32> -> vector<8x256xf32>
    %190 = arith.addf %185, %189 : vector<8x256xf32>
    %c1_169 = arith.constant 1 : index
    %c0_170 = arith.constant 0 : index
    %191 = vector.load %arg22[%c1_169, %c0_170] : memref<16x384xf32, #tpu.memory_space<vmem>>, vector<8x128xf32>
    %c3_171 = arith.constant 3 : index
    %c0_172 = arith.constant 0 : index
    %c0_173 = arith.constant 0 : index
    %192 = vector.load %arg9[%c3_171, %c0_172, %c0_173] : memref<9x128x256xf32, #tpu.memory_space<vmem>>, vector<1x128x256xf32>
    %193 = vector.shape_cast %192 : vector<1x128x256xf32> to vector<128x256xf32>
    %cst_174 = arith.constant dense<0.000000e+00> : vector<8x256xf32>
    %194 = tpu.matmul %191, %193, %cst_174 {dimension_numbers = #tpu.dot_dimension_numbers<[1], [0], [0], [1], [0, 0, 1, 1], [], []>} : vector<8x128xf32>, vector<128x256xf32>, vector<8x256xf32> -> vector<8x256xf32>
    %195 = arith.addf %190, %194 : vector<8x256xf32>
    %c1_175 = arith.constant 1 : index
    %c16_176 = arith.constant 16 : index
    %196 = vector.load %arg22[%c1_175, %c16_176] : memref<16x384xf32, #tpu.memory_space<vmem>>, vector<8x128xf32>
    %c4_177 = arith.constant 4 : index
    %c0_178 = arith.constant 0 : index
    %c0_179 = arith.constant 0 : index
    %197 = vector.load %arg9[%c4_177, %c0_178, %c0_179] : memref<9x128x256xf32, #tpu.memory_space<vmem>>, vector<1x128x256xf32>
    %198 = vector.shape_cast %197 : vector<1x128x256xf32> to vector<128x256xf32>
    %cst_180 = arith.constant dense<0.000000e+00> : vector<8x256xf32>
    %199 = tpu.matmul %196, %198, %cst_180 {dimension_numbers = #tpu.dot_dimension_numbers<[1], [0], [0], [1], [0, 0, 1, 1], [], []>} : vector<8x128xf32>, vector<128x256xf32>, vector<8x256xf32> -> vector<8x256xf32>
    %200 = arith.addf %195, %199 : vector<8x256xf32>
    %c1_181 = arith.constant 1 : index
    %c32_182 = arith.constant 32 : index
    %201 = vector.load %arg22[%c1_181, %c32_182] : memref<16x384xf32, #tpu.memory_space<vmem>>, vector<8x128xf32>
    %c5_183 = arith.constant 5 : index
    %c0_184 = arith.constant 0 : index
    %c0_185 = arith.constant 0 : index
    %202 = vector.load %arg9[%c5_183, %c0_184, %c0_185] : memref<9x128x256xf32, #tpu.memory_space<vmem>>, vector<1x128x256xf32>
    %203 = vector.shape_cast %202 : vector<1x128x256xf32> to vector<128x256xf32>
    %cst_186 = arith.constant dense<0.000000e+00> : vector<8x256xf32>
    %204 = tpu.matmul %201, %203, %cst_186 {dimension_numbers = #tpu.dot_dimension_numbers<[1], [0], [0], [1], [0, 0, 1, 1], [], []>} : vector<8x128xf32>, vector<128x256xf32>, vector<8x256xf32> -> vector<8x256xf32>
    %205 = arith.addf %200, %204 : vector<8x256xf32>
    %c2_187 = arith.constant 2 : index
    %c0_188 = arith.constant 0 : index
    %206 = vector.load %arg22[%c2_187, %c0_188] : memref<16x384xf32, #tpu.memory_space<vmem>>, vector<8x128xf32>
    %c6_189 = arith.constant 6 : index
    %c0_190 = arith.constant 0 : index
    %c0_191 = arith.constant 0 : index
    %207 = vector.load %arg9[%c6_189, %c0_190, %c0_191] : memref<9x128x256xf32, #tpu.memory_space<vmem>>, vector<1x128x256xf32>
    %208 = vector.shape_cast %207 : vector<1x128x256xf32> to vector<128x256xf32>
    %cst_192 = arith.constant dense<0.000000e+00> : vector<8x256xf32>
    %209 = tpu.matmul %206, %208, %cst_192 {dimension_numbers = #tpu.dot_dimension_numbers<[1], [0], [0], [1], [0, 0, 1, 1], [], []>} : vector<8x128xf32>, vector<128x256xf32>, vector<8x256xf32> -> vector<8x256xf32>
    %210 = arith.addf %205, %209 : vector<8x256xf32>
    %c2_193 = arith.constant 2 : index
    %c16_194 = arith.constant 16 : index
    %211 = vector.load %arg22[%c2_193, %c16_194] : memref<16x384xf32, #tpu.memory_space<vmem>>, vector<8x128xf32>
    %c7_195 = arith.constant 7 : index
    %c0_196 = arith.constant 0 : index
    %c0_197 = arith.constant 0 : index
    %212 = vector.load %arg9[%c7_195, %c0_196, %c0_197] : memref<9x128x256xf32, #tpu.memory_space<vmem>>, vector<1x128x256xf32>
    %213 = vector.shape_cast %212 : vector<1x128x256xf32> to vector<128x256xf32>
    %cst_198 = arith.constant dense<0.000000e+00> : vector<8x256xf32>
    %214 = tpu.matmul %211, %213, %cst_198 {dimension_numbers = #tpu.dot_dimension_numbers<[1], [0], [0], [1], [0, 0, 1, 1], [], []>} : vector<8x128xf32>, vector<128x256xf32>, vector<8x256xf32> -> vector<8x256xf32>
    %215 = arith.addf %210, %214 : vector<8x256xf32>
    %c2_199 = arith.constant 2 : index
    %c32_200 = arith.constant 32 : index
    %216 = vector.load %arg22[%c2_199, %c32_200] : memref<16x384xf32, #tpu.memory_space<vmem>>, vector<8x128xf32>
    %c8_201 = arith.constant 8 : index
    %c0_202 = arith.constant 0 : index
    %c0_203 = arith.constant 0 : index
    %217 = vector.load %arg9[%c8_201, %c0_202, %c0_203] : memref<9x128x256xf32, #tpu.memory_space<vmem>>, vector<1x128x256xf32>
    %218 = vector.shape_cast %217 : vector<1x128x256xf32> to vector<128x256xf32>
    %cst_204 = arith.constant dense<0.000000e+00> : vector<8x256xf32>
    %219 = tpu.matmul %216, %218, %cst_204 {dimension_numbers = #tpu.dot_dimension_numbers<[1], [0], [0], [1], [0, 0, 1, 1], [], []>} : vector<8x128xf32>, vector<128x256xf32>, vector<8x256xf32> -> vector<8x256xf32>
    %220 = arith.addf %215, %219 : vector<8x256xf32>
    %c0_205 = arith.constant 0 : index
    %c0_206 = arith.constant 0 : index
    %221 = vector.load %arg10[%c0_205, %c0_206] : memref<1x256xf32, #tpu.memory_space<vmem>>, vector<1x256xf32>
    %222 = vector.broadcast %221 : vector<1x256xf32> to vector<8x256xf32>
    %223 = arith.addf %220, %222 : vector<8x256xf32>
    %cst_207 = arith.constant 0.000000e+00 : f32
    %224 = vector.broadcast %cst_207 : f32 to vector<8x256xf32>
    %225 = arith.cmpf ogt, %223, %224 : vector<8x256xf32>
    %cst_208 = arith.constant 0.000000e+00 : f32
    %226 = vector.broadcast %cst_208 : f32 to vector<8x256xf32>
    %227 = arith.minimumf %223, %226 : vector<8x256xf32>
    %228 = math.exp %227 : vector<8x256xf32>
    %cst_209 = arith.constant 1.000000e+00 : f32
    %229 = vector.broadcast %cst_209 : f32 to vector<8x256xf32>
    %230 = arith.subf %228, %229 : vector<8x256xf32>
    %231 = arith.select %225, %223, %230 : vector<8x256xi1>, vector<8x256xf32>
    %cst_210 = arith.constant 0.000000e+00 : f32
    %232 = vector.broadcast %cst_210 : f32 to vector<10x320xf32>
    %c0_211 = arith.constant 0 : index
    %c0_212 = arith.constant 0 : index
    %233 = vector.load %arg22[%c0_211, %c0_212] : memref<16x384xf32, #tpu.memory_space<vmem>>, vector<10x320xf32>
    tpu.vector_store %arg22[%c0_211, %c0_212], %232 {strides = array<i32>} : memref<16x384xf32, #tpu.memory_space<vmem>>, vector<10x320xf32>,
    %c1_213 = arith.constant 1 : index
    %c32_214 = arith.constant 32 : index
    %234 = vector.load %arg22[%c1_213, %c32_214] : memref<16x384xf32, #tpu.memory_space<vmem>>, vector<8x256xf32>
    tpu.vector_store %arg22[%c1_213, %c32_214], %231 {strides = array<i32>} : memref<16x384xf32, #tpu.memory_space<vmem>>, vector<8x256xf32>,
    %c0_215 = arith.constant 0 : index
    %c0_216 = arith.constant 0 : index
    %235 = vector.load %arg22[%c0_215, %c0_216] : memref<16x384xf32, #tpu.memory_space<vmem>>, vector<8x256xf32>
    %c0_217 = arith.constant 0 : index
    %c0_218 = arith.constant 0 : index
    %c0_219 = arith.constant 0 : index
    %236 = vector.load %arg11[%c0_217, %c0_218, %c0_219] : memref<9x256x256xf32, #tpu.memory_space<vmem>>, vector<1x256x256xf32>
    %237 = vector.shape_cast %236 : vector<1x256x256xf32> to vector<256x256xf32>
    %cst_220 = arith.constant dense<0.000000e+00> : vector<8x256xf32>
    %238 = tpu.matmul %235, %237, %cst_220 {dimension_numbers = #tpu.dot_dimension_numbers<[1], [0], [0], [1], [0, 0, 1, 1], [], []>} : vector<8x256xf32>, vector<256x256xf32>, vector<8x256xf32> -> vector<8x256xf32>
    %c0_221 = arith.constant 0 : index
    %c32_222 = arith.constant 32 : index
    %239 = vector.load %arg22[%c0_221, %c32_222] : memref<16x384xf32, #tpu.memory_space<vmem>>, vector<8x256xf32>
    %c1_223 = arith.constant 1 : index
    %c0_224 = arith.constant 0 : index
    %c0_225 = arith.constant 0 : index
    %240 = vector.load %arg11[%c1_223, %c0_224, %c0_225] : memref<9x256x256xf32, #tpu.memory_space<vmem>>, vector<1x256x256xf32>
    %241 = vector.shape_cast %240 : vector<1x256x256xf32> to vector<256x256xf32>
    %cst_226 = arith.constant dense<0.000000e+00> : vector<8x256xf32>
    %242 = tpu.matmul %239, %241, %cst_226 {dimension_numbers = #tpu.dot_dimension_numbers<[1], [0], [0], [1], [0, 0, 1, 1], [], []>} : vector<8x256xf32>, vector<256x256xf32>, vector<8x256xf32> -> vector<8x256xf32>
    %243 = arith.addf %238, %242 : vector<8x256xf32>
    %c0_227 = arith.constant 0 : index
    %c64_228 = arith.constant 64 : index
    %244 = vector.load %arg22[%c0_227, %c64_228] : memref<16x384xf32, #tpu.memory_space<vmem>>, vector<8x256xf32>
    %c2_229 = arith.constant 2 : index
    %c0_230 = arith.constant 0 : index
    %c0_231 = arith.constant 0 : index
    %245 = vector.load %arg11[%c2_229, %c0_230, %c0_231] : memref<9x256x256xf32, #tpu.memory_space<vmem>>, vector<1x256x256xf32>
    %246 = vector.shape_cast %245 : vector<1x256x256xf32> to vector<256x256xf32>
    %cst_232 = arith.constant dense<0.000000e+00> : vector<8x256xf32>
    %247 = tpu.matmul %244, %246, %cst_232 {dimension_numbers = #tpu.dot_dimension_numbers<[1], [0], [0], [1], [0, 0, 1, 1], [], []>} : vector<8x256xf32>, vector<256x256xf32>, vector<8x256xf32> -> vector<8x256xf32>
    %248 = arith.addf %243, %247 : vector<8x256xf32>
    %c1_233 = arith.constant 1 : index
    %c0_234 = arith.constant 0 : index
    %249 = vector.load %arg22[%c1_233, %c0_234] : memref<16x384xf32, #tpu.memory_space<vmem>>, vector<8x256xf32>
    %c3_235 = arith.constant 3 : index
    %c0_236 = arith.constant 0 : index
    %c0_237 = arith.constant 0 : index
    %250 = vector.load %arg11[%c3_235, %c0_236, %c0_237] : memref<9x256x256xf32, #tpu.memory_space<vmem>>, vector<1x256x256xf32>
    %251 = vector.shape_cast %250 : vector<1x256x256xf32> to vector<256x256xf32>
    %cst_238 = arith.constant dense<0.000000e+00> : vector<8x256xf32>
    %252 = tpu.matmul %249, %251, %cst_238 {dimension_numbers = #tpu.dot_dimension_numbers<[1], [0], [0], [1], [0, 0, 1, 1], [], []>} : vector<8x256xf32>, vector<256x256xf32>, vector<8x256xf32> -> vector<8x256xf32>
    %253 = arith.addf %248, %252 : vector<8x256xf32>
    %c1_239 = arith.constant 1 : index
    %c32_240 = arith.constant 32 : index
    %254 = vector.load %arg22[%c1_239, %c32_240] : memref<16x384xf32, #tpu.memory_space<vmem>>, vector<8x256xf32>
    %c4_241 = arith.constant 4 : index
    %c0_242 = arith.constant 0 : index
    %c0_243 = arith.constant 0 : index
    %255 = vector.load %arg11[%c4_241, %c0_242, %c0_243] : memref<9x256x256xf32, #tpu.memory_space<vmem>>, vector<1x256x256xf32>
    %256 = vector.shape_cast %255 : vector<1x256x256xf32> to vector<256x256xf32>
    %cst_244 = arith.constant dense<0.000000e+00> : vector<8x256xf32>
    %257 = tpu.matmul %254, %256, %cst_244 {dimension_numbers = #tpu.dot_dimension_numbers<[1], [0], [0], [1], [0, 0, 1, 1], [], []>} : vector<8x256xf32>, vector<256x256xf32>, vector<8x256xf32> -> vector<8x256xf32>
    %258 = arith.addf %253, %257 : vector<8x256xf32>
    %c1_245 = arith.constant 1 : index
    %c64_246 = arith.constant 64 : index
    %259 = vector.load %arg22[%c1_245, %c64_246] : memref<16x384xf32, #tpu.memory_space<vmem>>, vector<8x256xf32>
    %c5_247 = arith.constant 5 : index
    %c0_248 = arith.constant 0 : index
    %c0_249 = arith.constant 0 : index
    %260 = vector.load %arg11[%c5_247, %c0_248, %c0_249] : memref<9x256x256xf32, #tpu.memory_space<vmem>>, vector<1x256x256xf32>
    %261 = vector.shape_cast %260 : vector<1x256x256xf32> to vector<256x256xf32>
    %cst_250 = arith.constant dense<0.000000e+00> : vector<8x256xf32>
    %262 = tpu.matmul %259, %261, %cst_250 {dimension_numbers = #tpu.dot_dimension_numbers<[1], [0], [0], [1], [0, 0, 1, 1], [], []>} : vector<8x256xf32>, vector<256x256xf32>, vector<8x256xf32> -> vector<8x256xf32>
    %263 = arith.addf %258, %262 : vector<8x256xf32>
    %c2_251 = arith.constant 2 : index
    %c0_252 = arith.constant 0 : index
    %264 = vector.load %arg22[%c2_251, %c0_252] : memref<16x384xf32, #tpu.memory_space<vmem>>, vector<8x256xf32>
    %c6_253 = arith.constant 6 : index
    %c0_254 = arith.constant 0 : index
    %c0_255 = arith.constant 0 : index
    %265 = vector.load %arg11[%c6_253, %c0_254, %c0_255] : memref<9x256x256xf32, #tpu.memory_space<vmem>>, vector<1x256x256xf32>
    %266 = vector.shape_cast %265 : vector<1x256x256xf32> to vector<256x256xf32>
    %cst_256 = arith.constant dense<0.000000e+00> : vector<8x256xf32>
    %267 = tpu.matmul %264, %266, %cst_256 {dimension_numbers = #tpu.dot_dimension_numbers<[1], [0], [0], [1], [0, 0, 1, 1], [], []>} : vector<8x256xf32>, vector<256x256xf32>, vector<8x256xf32> -> vector<8x256xf32>
    %268 = arith.addf %263, %267 : vector<8x256xf32>
    %c2_257 = arith.constant 2 : index
    %c32_258 = arith.constant 32 : index
    %269 = vector.load %arg22[%c2_257, %c32_258] : memref<16x384xf32, #tpu.memory_space<vmem>>, vector<8x256xf32>
    %c7_259 = arith.constant 7 : index
    %c0_260 = arith.constant 0 : index
    %c0_261 = arith.constant 0 : index
    %270 = vector.load %arg11[%c7_259, %c0_260, %c0_261] : memref<9x256x256xf32, #tpu.memory_space<vmem>>, vector<1x256x256xf32>
    %271 = vector.shape_cast %270 : vector<1x256x256xf32> to vector<256x256xf32>
    %cst_262 = arith.constant dense<0.000000e+00> : vector<8x256xf32>
    %272 = tpu.matmul %269, %271, %cst_262 {dimension_numbers = #tpu.dot_dimension_numbers<[1], [0], [0], [1], [0, 0, 1, 1], [], []>} : vector<8x256xf32>, vector<256x256xf32>, vector<8x256xf32> -> vector<8x256xf32>
    %273 = arith.addf %268, %272 : vector<8x256xf32>
    %c2_263 = arith.constant 2 : index
    %c64_264 = arith.constant 64 : index
    %274 = vector.load %arg22[%c2_263, %c64_264] : memref<16x384xf32, #tpu.memory_space<vmem>>, vector<8x256xf32>
    %c8_265 = arith.constant 8 : index
    %c0_266 = arith.constant 0 : index
    %c0_267 = arith.constant 0 : index
    %275 = vector.load %arg11[%c8_265, %c0_266, %c0_267] : memref<9x256x256xf32, #tpu.memory_space<vmem>>, vector<1x256x256xf32>
    %276 = vector.shape_cast %275 : vector<1x256x256xf32> to vector<256x256xf32>
    %cst_268 = arith.constant dense<0.000000e+00> : vector<8x256xf32>
    %277 = tpu.matmul %274, %276, %cst_268 {dimension_numbers = #tpu.dot_dimension_numbers<[1], [0], [0], [1], [0, 0, 1, 1], [], []>} : vector<8x256xf32>, vector<256x256xf32>, vector<8x256xf32> -> vector<8x256xf32>
    %278 = arith.addf %273, %277 : vector<8x256xf32>
    %c0_269 = arith.constant 0 : index
    %c0_270 = arith.constant 0 : index
    %279 = vector.load %arg12[%c0_269, %c0_270] : memref<1x256xf32, #tpu.memory_space<vmem>>, vector<1x256xf32>
    %280 = vector.broadcast %279 : vector<1x256xf32> to vector<8x256xf32>
    %281 = arith.addf %278, %280 : vector<8x256xf32>
    %cst_271 = arith.constant 0.000000e+00 : f32
    %282 = vector.broadcast %cst_271 : f32 to vector<8x256xf32>
    %283 = arith.cmpf ogt, %281, %282 : vector<8x256xf32>
    %cst_272 = arith.constant 0.000000e+00 : f32
    %284 = vector.broadcast %cst_272 : f32 to vector<8x256xf32>
    %285 = arith.minimumf %281, %284 : vector<8x256xf32>
    %286 = math.exp %285 : vector<8x256xf32>
    %cst_273 = arith.constant 1.000000e+00 : f32
    %287 = vector.broadcast %cst_273 : f32 to vector<8x256xf32>
    %288 = arith.subf %286, %287 : vector<8x256xf32>
    %289 = arith.select %283, %281, %288 : vector<8x256xi1>, vector<8x256xf32>
    %290 = vector.extract_strided_slice %289 {offsets = [0, 0], sizes = [8, 32], strides = [1, 1]} : vector<8x256xf32> to vector<8x32xf32>
    %291 = vector.extract_strided_slice %289 {offsets = [0, 32], sizes = [8, 32], strides = [1, 1]} : vector<8x256xf32> to vector<8x32xf32>
    %292 = arith.maximumf %290, %291 : vector<8x32xf32>
    %c0_274 = arith.constant 0 : index
    %c0_275 = arith.constant 0 : index
    %293 = vector.load %arg22[%c0_274, %c0_275] : memref<16x384xf32, #tpu.memory_space<vmem>>, vector<8x32xf32>
    tpu.vector_store %arg22[%c0_274, %c0_275], %292 {strides = array<i32>} : memref<16x384xf32, #tpu.memory_space<vmem>>, vector<8x32xf32>,
    %294 = vector.extract_strided_slice %289 {offsets = [0, 64], sizes = [8, 32], strides = [1, 1]} : vector<8x256xf32> to vector<8x32xf32>
    %295 = vector.extract_strided_slice %289 {offsets = [0, 96], sizes = [8, 32], strides = [1, 1]} : vector<8x256xf32> to vector<8x32xf32>
    %296 = arith.maximumf %294, %295 : vector<8x32xf32>
    %c0_276 = arith.constant 0 : index
    %c32_277 = arith.constant 32 : index
    %297 = vector.load %arg22[%c0_276, %c32_277] : memref<16x384xf32, #tpu.memory_space<vmem>>, vector<8x32xf32>
    tpu.vector_store %arg22[%c0_276, %c32_277], %296 {strides = array<i32>} : memref<16x384xf32, #tpu.memory_space<vmem>>, vector<8x32xf32>,
    %298 = vector.extract_strided_slice %289 {offsets = [0, 128], sizes = [8, 32], strides = [1, 1]} : vector<8x256xf32> to vector<8x32xf32>
    %299 = vector.extract_strided_slice %289 {offsets = [0, 160], sizes = [8, 32], strides = [1, 1]} : vector<8x256xf32> to vector<8x32xf32>
    %300 = arith.maximumf %298, %299 : vector<8x32xf32>
    %c0_278 = arith.constant 0 : index
    %c64_279 = arith.constant 64 : index
    %301 = vector.load %arg22[%c0_278, %c64_279] : memref<16x384xf32, #tpu.memory_space<vmem>>, vector<8x32xf32>
    tpu.vector_store %arg22[%c0_278, %c64_279], %300 {strides = array<i32>} : memref<16x384xf32, #tpu.memory_space<vmem>>, vector<8x32xf32>,
    %302 = vector.extract_strided_slice %289 {offsets = [0, 192], sizes = [8, 32], strides = [1, 1]} : vector<8x256xf32> to vector<8x32xf32>
    %303 = vector.extract_strided_slice %289 {offsets = [0, 224], sizes = [8, 32], strides = [1, 1]} : vector<8x256xf32> to vector<8x32xf32>
    %304 = arith.maximumf %302, %303 : vector<8x32xf32>
    %c0_280 = arith.constant 0 : index
    %c96_281 = arith.constant 96 : index
    %305 = vector.load %arg22[%c0_280, %c96_281] : memref<16x384xf32, #tpu.memory_space<vmem>>, vector<8x32xf32>
    tpu.vector_store %arg22[%c0_280, %c96_281], %304 {strides = array<i32>} : memref<16x384xf32, #tpu.memory_space<vmem>>, vector<8x32xf32>,
    %c0_282 = arith.constant 0 : index
    %c0_283 = arith.constant 0 : index
    %306 = vector.load %arg22[%c0_282, %c0_283] : memref<16x384xf32, #tpu.memory_space<vmem>>, vector<8x128xf32>
    %307 = vector.extract_strided_slice %306 {offsets = [0, 0], sizes = [1, 128], strides = [1, 1]} : vector<8x128xf32> to vector<1x128xf32>
    %308 = vector.extract_strided_slice %306 {offsets = [1, 0], sizes = [1, 128], strides = [1, 1]} : vector<8x128xf32> to vector<1x128xf32>
    %309 = arith.maximumf %307, %308 : vector<1x128xf32>
    %c0_284 = arith.constant 0 : index
    %c0_285 = arith.constant 0 : index
    %310 = vector.load %arg22[%c0_284, %c0_285] : memref<16x384xf32, #tpu.memory_space<vmem>>, vector<1x128xf32>
    tpu.vector_store %arg22[%c0_284, %c0_285], %309 {strides = array<i32>} : memref<16x384xf32, #tpu.memory_space<vmem>>, vector<1x128xf32>,
    %311 = vector.extract_strided_slice %306 {offsets = [2, 0], sizes = [1, 128], strides = [1, 1]} : vector<8x128xf32> to vector<1x128xf32>
    %312 = vector.extract_strided_slice %306 {offsets = [3, 0], sizes = [1, 128], strides = [1, 1]} : vector<8x128xf32> to vector<1x128xf32>
    %313 = arith.maximumf %311, %312 : vector<1x128xf32>
    %c1_286 = arith.constant 1 : index
    %c0_287 = arith.constant 0 : index
    %314 = vector.load %arg22[%c1_286, %c0_287] : memref<16x384xf32, #tpu.memory_space<vmem>>, vector<1x128xf32>
    tpu.vector_store %arg22[%c1_286, %c0_287], %313 {strides = array<i32>} : memref<16x384xf32, #tpu.memory_space<vmem>>, vector<1x128xf32>,
    %315 = vector.extract_strided_slice %306 {offsets = [4, 0], sizes = [1, 128], strides = [1, 1]} : vector<8x128xf32> to vector<1x128xf32>
    %316 = vector.extract_strided_slice %306 {offsets = [5, 0], sizes = [1, 128], strides = [1, 1]} : vector<8x128xf32> to vector<1x128xf32>
    %317 = arith.maximumf %315, %316 : vector<1x128xf32>
    %c2_288 = arith.constant 2 : index
    %c0_289 = arith.constant 0 : index
    %318 = vector.load %arg22[%c2_288, %c0_289] : memref<16x384xf32, #tpu.memory_space<vmem>>, vector<1x128xf32>
    tpu.vector_store %arg22[%c2_288, %c0_289], %317 {strides = array<i32>} : memref<16x384xf32, #tpu.memory_space<vmem>>, vector<1x128xf32>,
    %319 = vector.extract_strided_slice %306 {offsets = [6, 0], sizes = [1, 128], strides = [1, 1]} : vector<8x128xf32> to vector<1x128xf32>
    %320 = vector.extract_strided_slice %306 {offsets = [7, 0], sizes = [1, 128], strides = [1, 1]} : vector<8x128xf32> to vector<1x128xf32>
    %321 = arith.maximumf %319, %320 : vector<1x128xf32>
    %c3_290 = arith.constant 3 : index
    %c0_291 = arith.constant 0 : index
    %322 = vector.load %arg22[%c3_290, %c0_291] : memref<16x384xf32, #tpu.memory_space<vmem>>, vector<1x128xf32>
    tpu.vector_store %arg22[%c3_290, %c0_291], %321 {strides = array<i32>} : memref<16x384xf32, #tpu.memory_space<vmem>>, vector<1x128xf32>,
    %c0_292 = arith.constant 0 : index
    %c0_293 = arith.constant 0 : index
    %323 = vector.load %arg22[%c0_292, %c0_293] : memref<16x384xf32, #tpu.memory_space<vmem>>, vector<2x64xf32>
    %c0_294 = arith.constant 0 : index
    %c0_295 = arith.constant 0 : index
    %c0_296 = arith.constant 0 : index
    %324 = vector.load %arg13[%c0_294, %c0_295, %c0_296] : memref<9x64x128xf32, #tpu.memory_space<vmem>>, vector<1x64x128xf32>
    %325 = vector.shape_cast %324 : vector<1x64x128xf32> to vector<64x128xf32>
    %cst_297 = arith.constant dense<0.000000e+00> : vector<2x128xf32>
    %326 = tpu.matmul %323, %325, %cst_297 {dimension_numbers = #tpu.dot_dimension_numbers<[1], [0], [0], [1], [0, 0, 1, 1], [], []>} : vector<2x64xf32>, vector<64x128xf32>, vector<2x128xf32> -> vector<2x128xf32>
    %c0_298 = arith.constant 0 : index
    %c32_299 = arith.constant 32 : index
    %327 = vector.load %arg22[%c0_298, %c32_299] : memref<16x384xf32, #tpu.memory_space<vmem>>, vector<2x64xf32>
    %c1_300 = arith.constant 1 : index
    %c0_301 = arith.constant 0 : index
    %c0_302 = arith.constant 0 : index
    %328 = vector.load %arg13[%c1_300, %c0_301, %c0_302] : memref<9x64x128xf32, #tpu.memory_space<vmem>>, vector<1x64x128xf32>
    %329 = vector.shape_cast %328 : vector<1x64x128xf32> to vector<64x128xf32>
    %cst_303 = arith.constant dense<0.000000e+00> : vector<2x128xf32>
    %330 = tpu.matmul %327, %329, %cst_303 {dimension_numbers = #tpu.dot_dimension_numbers<[1], [0], [0], [1], [0, 0, 1, 1], [], []>} : vector<2x64xf32>, vector<64x128xf32>, vector<2x128xf32> -> vector<2x128xf32>
    %331 = arith.addf %326, %330 : vector<2x128xf32>
    %c0_304 = arith.constant 0 : index
    %c64_305 = arith.constant 64 : index
    %332 = vector.load %arg22[%c0_304, %c64_305] : memref<16x384xf32, #tpu.memory_space<vmem>>, vector<2x64xf32>
    %c2_306 = arith.constant 2 : index
    %c0_307 = arith.constant 0 : index
    %c0_308 = arith.constant 0 : index
    %333 = vector.load %arg13[%c2_306, %c0_307, %c0_308] : memref<9x64x128xf32, #tpu.memory_space<vmem>>, vector<1x64x128xf32>
    %334 = vector.shape_cast %333 : vector<1x64x128xf32> to vector<64x128xf32>
    %cst_309 = arith.constant dense<0.000000e+00> : vector<2x128xf32>
    %335 = tpu.matmul %332, %334, %cst_309 {dimension_numbers = #tpu.dot_dimension_numbers<[1], [0], [0], [1], [0, 0, 1, 1], [], []>} : vector<2x64xf32>, vector<64x128xf32>, vector<2x128xf32> -> vector<2x128xf32>
    %336 = arith.addf %331, %335 : vector<2x128xf32>
    %c1_310 = arith.constant 1 : index
    %c0_311 = arith.constant 0 : index
    %337 = vector.load %arg22[%c1_310, %c0_311] : memref<16x384xf32, #tpu.memory_space<vmem>>, vector<2x64xf32>
    %c3_312 = arith.constant 3 : index
    %c0_313 = arith.constant 0 : index
    %c0_314 = arith.constant 0 : index
    %338 = vector.load %arg13[%c3_312, %c0_313, %c0_314] : memref<9x64x128xf32, #tpu.memory_space<vmem>>, vector<1x64x128xf32>
    %339 = vector.shape_cast %338 : vector<1x64x128xf32> to vector<64x128xf32>
    %cst_315 = arith.constant dense<0.000000e+00> : vector<2x128xf32>
    %340 = tpu.matmul %337, %339, %cst_315 {dimension_numbers = #tpu.dot_dimension_numbers<[1], [0], [0], [1], [0, 0, 1, 1], [], []>} : vector<2x64xf32>, vector<64x128xf32>, vector<2x128xf32> -> vector<2x128xf32>
    %341 = arith.addf %336, %340 : vector<2x128xf32>
    %c1_316 = arith.constant 1 : index
    %c32_317 = arith.constant 32 : index
    %342 = vector.load %arg22[%c1_316, %c32_317] : memref<16x384xf32, #tpu.memory_space<vmem>>, vector<2x64xf32>
    %c4_318 = arith.constant 4 : index
    %c0_319 = arith.constant 0 : index
    %c0_320 = arith.constant 0 : index
    %343 = vector.load %arg13[%c4_318, %c0_319, %c0_320] : memref<9x64x128xf32, #tpu.memory_space<vmem>>, vector<1x64x128xf32>
    %344 = vector.shape_cast %343 : vector<1x64x128xf32> to vector<64x128xf32>
    %cst_321 = arith.constant dense<0.000000e+00> : vector<2x128xf32>
    %345 = tpu.matmul %342, %344, %cst_321 {dimension_numbers = #tpu.dot_dimension_numbers<[1], [0], [0], [1], [0, 0, 1, 1], [], []>} : vector<2x64xf32>, vector<64x128xf32>, vector<2x128xf32> -> vector<2x128xf32>
    %346 = arith.addf %341, %345 : vector<2x128xf32>
    %c1_322 = arith.constant 1 : index
    %c64_323 = arith.constant 64 : index
    %347 = vector.load %arg22[%c1_322, %c64_323] : memref<16x384xf32, #tpu.memory_space<vmem>>, vector<2x64xf32>
    %c5_324 = arith.constant 5 : index
    %c0_325 = arith.constant 0 : index
    %c0_326 = arith.constant 0 : index
    %348 = vector.load %arg13[%c5_324, %c0_325, %c0_326] : memref<9x64x128xf32, #tpu.memory_space<vmem>>, vector<1x64x128xf32>
    %349 = vector.shape_cast %348 : vector<1x64x128xf32> to vector<64x128xf32>
    %cst_327 = arith.constant dense<0.000000e+00> : vector<2x128xf32>
    %350 = tpu.matmul %347, %349, %cst_327 {dimension_numbers = #tpu.dot_dimension_numbers<[1], [0], [0], [1], [0, 0, 1, 1], [], []>} : vector<2x64xf32>, vector<64x128xf32>, vector<2x128xf32> -> vector<2x128xf32>
    %351 = arith.addf %346, %350 : vector<2x128xf32>
    %c2_328 = arith.constant 2 : index
    %c0_329 = arith.constant 0 : index
    %352 = vector.load %arg22[%c2_328, %c0_329] : memref<16x384xf32, #tpu.memory_space<vmem>>, vector<2x64xf32>
    %c6_330 = arith.constant 6 : index
    %c0_331 = arith.constant 0 : index
    %c0_332 = arith.constant 0 : index
    %353 = vector.load %arg13[%c6_330, %c0_331, %c0_332] : memref<9x64x128xf32, #tpu.memory_space<vmem>>, vector<1x64x128xf32>
    %354 = vector.shape_cast %353 : vector<1x64x128xf32> to vector<64x128xf32>
    %cst_333 = arith.constant dense<0.000000e+00> : vector<2x128xf32>
    %355 = tpu.matmul %352, %354, %cst_333 {dimension_numbers = #tpu.dot_dimension_numbers<[1], [0], [0], [1], [0, 0, 1, 1], [], []>} : vector<2x64xf32>, vector<64x128xf32>, vector<2x128xf32> -> vector<2x128xf32>
    %356 = arith.addf %351, %355 : vector<2x128xf32>
    %c2_334 = arith.constant 2 : index
    %c32_335 = arith.constant 32 : index
    %357 = vector.load %arg22[%c2_334, %c32_335] : memref<16x384xf32, #tpu.memory_space<vmem>>, vector<2x64xf32>
    %c7_336 = arith.constant 7 : index
    %c0_337 = arith.constant 0 : index
    %c0_338 = arith.constant 0 : index
    %358 = vector.load %arg13[%c7_336, %c0_337, %c0_338] : memref<9x64x128xf32, #tpu.memory_space<vmem>>, vector<1x64x128xf32>
    %359 = vector.shape_cast %358 : vector<1x64x128xf32> to vector<64x128xf32>
    %cst_339 = arith.constant dense<0.000000e+00> : vector<2x128xf32>
    %360 = tpu.matmul %357, %359, %cst_339 {dimension_numbers = #tpu.dot_dimension_numbers<[1], [0], [0], [1], [0, 0, 1, 1], [], []>} : vector<2x64xf32>, vector<64x128xf32>, vector<2x128xf32> -> vector<2x128xf32>
    %361 = arith.addf %356, %360 : vector<2x128xf32>
    %c2_340 = arith.constant 2 : index
    %c64_341 = arith.constant 64 : index
    %362 = vector.load %arg22[%c2_340, %c64_341] : memref<16x384xf32, #tpu.memory_space<vmem>>, vector<2x64xf32>
    %c8_342 = arith.constant 8 : index
    %c0_343 = arith.constant 0 : index
    %c0_344 = arith.constant 0 : index
    %363 = vector.load %arg13[%c8_342, %c0_343, %c0_344] : memref<9x64x128xf32, #tpu.memory_space<vmem>>, vector<1x64x128xf32>
    %364 = vector.shape_cast %363 : vector<1x64x128xf32> to vector<64x128xf32>
    %cst_345 = arith.constant dense<0.000000e+00> : vector<2x128xf32>
    %365 = tpu.matmul %362, %364, %cst_345 {dimension_numbers = #tpu.dot_dimension_numbers<[1], [0], [0], [1], [0, 0, 1, 1], [], []>} : vector<2x64xf32>, vector<64x128xf32>, vector<2x128xf32> -> vector<2x128xf32>
    %366 = arith.addf %361, %365 : vector<2x128xf32>
    %c0_346 = arith.constant 0 : index
    %c0_347 = arith.constant 0 : index
    %367 = vector.load %arg14[%c0_346, %c0_347] : memref<1x128xf32, #tpu.memory_space<vmem>>, vector<1x128xf32>
    %368 = vector.broadcast %367 : vector<1x128xf32> to vector<2x128xf32>
    %369 = arith.addf %366, %368 : vector<2x128xf32>
    %cst_348 = arith.constant 0.000000e+00 : f32
    %370 = vector.broadcast %cst_348 : f32 to vector<2x128xf32>
    %371 = arith.cmpf ogt, %369, %370 : vector<2x128xf32>
    %cst_349 = arith.constant 0.000000e+00 : f32
    %372 = vector.broadcast %cst_349 : f32 to vector<2x128xf32>
    %373 = arith.minimumf %369, %372 : vector<2x128xf32>
    %374 = math.exp %373 : vector<2x128xf32>
    %cst_350 = arith.constant 1.000000e+00 : f32
    %375 = vector.broadcast %cst_350 : f32 to vector<2x128xf32>
    %376 = arith.subf %374, %375 : vector<2x128xf32>
    %377 = arith.select %371, %369, %376 : vector<2x128xi1>, vector<2x128xf32>
    %378 = vector.extract_strided_slice %377 {offsets = [0, 0], sizes = [1, 64], strides = [1, 1]} : vector<2x128xf32> to vector<1x64xf32>
    %c0_351 = arith.constant 0 : index
    %c0_352 = arith.constant 0 : index
    %c0_353 = arith.constant 0 : index
    %379 = vector.load %arg15[%c0_351, %c0_352, %c0_353] : memref<4x64x64xf32, #tpu.memory_space<vmem>>, vector<1x64x64xf32>
    %380 = vector.shape_cast %379 : vector<1x64x64xf32> to vector<64x64xf32>
    %cst_354 = arith.constant dense<0.000000e+00> : vector<1x64xf32>
    %381 = tpu.matmul %378, %380, %cst_354 {dimension_numbers = #tpu.dot_dimension_numbers<[1], [0], [0], [1], [0, 0, 1, 1], [], []>} : vector<1x64xf32>, vector<64x64xf32>, vector<1x64xf32> -> vector<1x64xf32>
    %382 = vector.extract_strided_slice %377 {offsets = [0, 64], sizes = [1, 64], strides = [1, 1]} : vector<2x128xf32> to vector<1x64xf32>
    %c1_355 = arith.constant 1 : index
    %c0_356 = arith.constant 0 : index
    %c0_357 = arith.constant 0 : index
    %383 = vector.load %arg15[%c1_355, %c0_356, %c0_357] : memref<4x64x64xf32, #tpu.memory_space<vmem>>, vector<1x64x64xf32>
    %384 = vector.shape_cast %383 : vector<1x64x64xf32> to vector<64x64xf32>
    %cst_358 = arith.constant dense<0.000000e+00> : vector<1x64xf32>
    %385 = tpu.matmul %382, %384, %cst_358 {dimension_numbers = #tpu.dot_dimension_numbers<[1], [0], [0], [1], [0, 0, 1, 1], [], []>} : vector<1x64xf32>, vector<64x64xf32>, vector<1x64xf32> -> vector<1x64xf32>
    %386 = arith.addf %381, %385 : vector<1x64xf32>
    %387 = vector.extract_strided_slice %377 {offsets = [1, 0], sizes = [1, 64], strides = [1, 1]} : vector<2x128xf32> to vector<1x64xf32>
    %c2_359 = arith.constant 2 : index
    %c0_360 = arith.constant 0 : index
    %c0_361 = arith.constant 0 : index
    %388 = vector.load %arg15[%c2_359, %c0_360, %c0_361] : memref<4x64x64xf32, #tpu.memory_space<vmem>>, vector<1x64x64xf32>
    %389 = vector.shape_cast %388 : vector<1x64x64xf32> to vector<64x64xf32>
    %cst_362 = arith.constant dense<0.000000e+00> : vector<1x64xf32>
    %390 = tpu.matmul %387, %389, %cst_362 {dimension_numbers = #tpu.dot_dimension_numbers<[1], [0], [0], [1], [0, 0, 1, 1], [], []>} : vector<1x64xf32>, vector<64x64xf32>, vector<1x64xf32> -> vector<1x64xf32>
    %391 = arith.addf %386, %390 : vector<1x64xf32>
    %392 = vector.extract_strided_slice %377 {offsets = [1, 64], sizes = [1, 64], strides = [1, 1]} : vector<2x128xf32> to vector<1x64xf32>
    %c3_363 = arith.constant 3 : index
    %c0_364 = arith.constant 0 : index
    %c0_365 = arith.constant 0 : index
    %393 = vector.load %arg15[%c3_363, %c0_364, %c0_365] : memref<4x64x64xf32, #tpu.memory_space<vmem>>, vector<1x64x64xf32>
    %394 = vector.shape_cast %393 : vector<1x64x64xf32> to vector<64x64xf32>
    %cst_366 = arith.constant dense<0.000000e+00> : vector<1x64xf32>
    %395 = tpu.matmul %392, %394, %cst_366 {dimension_numbers = #tpu.dot_dimension_numbers<[1], [0], [0], [1], [0, 0, 1, 1], [], []>} : vector<1x64xf32>, vector<64x64xf32>, vector<1x64xf32> -> vector<1x64xf32>
    %396 = arith.addf %391, %395 : vector<1x64xf32>
    %c0_367 = arith.constant 0 : index
    %c0_368 = arith.constant 0 : index
    %397 = vector.load %arg16[%c0_367, %c0_368] : memref<1x64xf32, #tpu.memory_space<vmem>>, vector<1x64xf32>
    %398 = arith.addf %396, %397 : vector<1x64xf32>
    %cst_369 = arith.constant 0.000000e+00 : f32
    %399 = vector.broadcast %cst_369 : f32 to vector<1x64xf32>
    %400 = arith.cmpf ogt, %398, %399 : vector<1x64xf32>
    %cst_370 = arith.constant 0.000000e+00 : f32
    %401 = vector.broadcast %cst_370 : f32 to vector<1x64xf32>
    %402 = arith.minimumf %398, %401 : vector<1x64xf32>
    %403 = math.exp %402 : vector<1x64xf32>
    %cst_371 = arith.constant 1.000000e+00 : f32
    %404 = vector.broadcast %cst_371 : f32 to vector<1x64xf32>
    %405 = arith.subf %403, %404 : vector<1x64xf32>
    %406 = arith.select %400, %398, %405 : vector<1x64xi1>, vector<1x64xf32>
    %c0_372 = arith.constant 0 : index
    %c0_373 = arith.constant 0 : index
    %407 = vector.load %arg17[%c0_372, %c0_373] : memref<69x128xf32, #tpu.memory_space<vmem>>, vector<5x128xf32>
    %cst_374 = arith.constant dense<0.000000e+00> : vector<1x128xf32>
    %408 = tpu.matmul %1, %407, %cst_374 {dimension_numbers = #tpu.dot_dimension_numbers<[1], [0], [0], [1], [0, 0, 1, 1], [], []>} : vector<1x5xf32>, vector<5x128xf32>, vector<1x128xf32> -> vector<1x128xf32>
    %c5_375 = arith.constant 5 : index
    %c0_376 = arith.constant 0 : index
    %409 = vector.load %arg17[%c5_375, %c0_376] : memref<69x128xf32, #tpu.memory_space<vmem>>, vector<64x128xf32>
    %cst_377 = arith.constant dense<0.000000e+00> : vector<1x128xf32>
    %410 = tpu.matmul %406, %409, %cst_377 {dimension_numbers = #tpu.dot_dimension_numbers<[1], [0], [0], [1], [0, 0, 1, 1], [], []>} : vector<1x64xf32>, vector<64x128xf32>, vector<1x128xf32> -> vector<1x128xf32>
    %411 = arith.addf %408, %410 : vector<1x128xf32>
    %c0_378 = arith.constant 0 : index
    %c0_379 = arith.constant 0 : index
    %412 = vector.load %arg18[%c0_378, %c0_379] : memref<1x128xf32, #tpu.memory_space<vmem>>, vector<1x128xf32>
    %413 = arith.addf %411, %412 : vector<1x128xf32>
    %cst_380 = arith.constant 0.000000e+00 : f32
    %414 = vector.broadcast %cst_380 : f32 to vector<1x128xf32>
    %415 = arith.cmpf ogt, %413, %414 : vector<1x128xf32>
    %cst_381 = arith.constant 0.000000e+00 : f32
    %416 = vector.broadcast %cst_381 : f32 to vector<1x128xf32>
    %417 = arith.minimumf %413, %416 : vector<1x128xf32>
    %418 = math.exp %417 : vector<1x128xf32>
    %cst_382 = arith.constant 1.000000e+00 : f32
    %419 = vector.broadcast %cst_382 : f32 to vector<1x128xf32>
    %420 = arith.subf %418, %419 : vector<1x128xf32>
    %421 = arith.select %415, %413, %420 : vector<1x128xi1>, vector<1x128xf32>
    %c0_383 = arith.constant 0 : index
    %c0_384 = arith.constant 0 : index
    %422 = vector.load %arg19[%c0_383, %c0_384] : memref<128x128xf32, #tpu.memory_space<vmem>>, vector<128x128xf32>
    %cst_385 = arith.constant dense<0.000000e+00> : vector<1x128xf32>
    %423 = tpu.matmul %421, %422, %cst_385 {dimension_numbers = #tpu.dot_dimension_numbers<[1], [0], [0], [1], [0, 0, 1, 1], [], []>} : vector<1x128xf32>, vector<128x128xf32>, vector<1x128xf32> -> vector<1x128xf32>
    %c0_386 = arith.constant 0 : index
    %c0_387 = arith.constant 0 : index
    %424 = vector.load %arg20[%c0_386, %c0_387] : memref<1x128xf32, #tpu.memory_space<vmem>>, vector<1x128xf32>
    %425 = arith.addf %423, %424 : vector<1x128xf32>
    %c0_388 = arith.constant 0 : index
    %c0_389 = arith.constant 0 : index
    %c0_390 = arith.constant 0 : index
    %426 = vector.load %arg21[%c0_388, %c0_389, %c0_390] : memref<1x1x128xf32, #tpu.memory_space<vmem>>, vector<1x1x128xf32>
    %427 = vector.shape_cast %426 : vector<1x1x128xf32> to vector<1x128xf32>
    %428 = vector.shape_cast %425 : vector<1x128xf32> to vector<1x1x128xf32>
    tpu.vector_store %arg21[%c0_388, %c0_389, %c0_390], %428 {strides = array<i32>} : memref<1x1x128xf32, #tpu.memory_space<vmem>>, vector<1x1x128xf32>,
    return
  }
  func.func @transform_0(%arg0: i32) -> (i32, i32, i32) {
    %c0_i32 = arith.constant 0 : i32
    %c0_i32_0 = arith.constant 0 : i32
    %c0_i32_1 = arith.constant 0 : i32
    return %arg0, %c0_i32, %c0_i32_0 : i32, i32, i32
  }
  func.func @transform_1(%arg0: i32) -> (i32, i32, i32) {
    %c0_i32 = arith.constant 0 : i32
    %c0_i32_0 = arith.constant 0 : i32
    %c0_i32_1 = arith.constant 0 : i32
    return %arg0, %c0_i32, %c0_i32_0 : i32, i32, i32
  }
  func.func @transform_2(%arg0: i32) -> (i32, i32) {
    %c0_i32 = arith.constant 0 : i32
    %c0_i32_0 = arith.constant 0 : i32
    %c0_i32_1 = arith.constant 0 : i32
    return %c0_i32, %c0_i32_0 : i32, i32
  }
  func.func @transform_3(%arg0: i32) -> (i32, i32) {
    %c0_i32 = arith.constant 0 : i32
    %c0_i32_0 = arith.constant 0 : i32
    %c0_i32_1 = arith.constant 0 : i32
    return %c0_i32, %c0_i32_0 : i32, i32
  }
  func.func @transform_4(%arg0: i32) -> (i32, i32, i32) {
    %c0_i32 = arith.constant 0 : i32
    %c0_i32_0 = arith.constant 0 : i32
    %c0_i32_1 = arith.constant 0 : i32
    %c0_i32_2 = arith.constant 0 : i32
    return %c0_i32, %c0_i32_0, %c0_i32_1 : i32, i32, i32
  }
  func.func @transform_5(%arg0: i32) -> (i32, i32) {
    %c0_i32 = arith.constant 0 : i32
    %c0_i32_0 = arith.constant 0 : i32
    %c0_i32_1 = arith.constant 0 : i32
    return %c0_i32, %c0_i32_0 : i32, i32
  }
  func.func @transform_6(%arg0: i32) -> (i32, i32, i32) {
    %c0_i32 = arith.constant 0 : i32
    %c0_i32_0 = arith.constant 0 : i32
    %c0_i32_1 = arith.constant 0 : i32
    %c0_i32_2 = arith.constant 0 : i32
    return %c0_i32, %c0_i32_0, %c0_i32_1 : i32, i32, i32
  }
  func.func @transform_7(%arg0: i32) -> (i32, i32) {
    %c0_i32 = arith.constant 0 : i32
    %c0_i32_0 = arith.constant 0 : i32
    %c0_i32_1 = arith.constant 0 : i32
    return %c0_i32, %c0_i32_0 : i32, i32
  }
  func.func @transform_8(%arg0: i32) -> (i32, i32, i32) {
    %c0_i32 = arith.constant 0 : i32
    %c0_i32_0 = arith.constant 0 : i32
    %c0_i32_1 = arith.constant 0 : i32
    %c0_i32_2 = arith.constant 0 : i32
    return %c0_i32, %c0_i32_0, %c0_i32_1 : i32, i32, i32
  }
  func.func @transform_9(%arg0: i32) -> (i32, i32) {
    %c0_i32 = arith.constant 0 : i32
    %c0_i32_0 = arith.constant 0 : i32
    %c0_i32_1 = arith.constant 0 : i32
    return %c0_i32, %c0_i32_0 : i32, i32
  }
  func.func @transform_10(%arg0: i32) -> (i32, i32, i32) {
    %c0_i32 = arith.constant 0 : i32
    %c0_i32_0 = arith.constant 0 : i32
    %c0_i32_1 = arith.constant 0 : i32
    %c0_i32_2 = arith.constant 0 : i32
    return %c0_i32, %c0_i32_0, %c0_i32_1 : i32, i32, i32
  }
  func.func @transform_11(%arg0: i32) -> (i32, i32) {
    %c0_i32 = arith.constant 0 : i32
    %c0_i32_0 = arith.constant 0 : i32
    %c0_i32_1 = arith.constant 0 : i32
    return %c0_i32, %c0_i32_0 : i32, i32
  }
  func.func @transform_12(%arg0: i32) -> (i32, i32, i32) {
    %c0_i32 = arith.constant 0 : i32
    %c0_i32_0 = arith.constant 0 : i32
    %c0_i32_1 = arith.constant 0 : i32
    %c0_i32_2 = arith.constant 0 : i32
    return %c0_i32, %c0_i32_0, %c0_i32_1 : i32, i32, i32
  }
  func.func @transform_13(%arg0: i32) -> (i32, i32) {
    %c0_i32 = arith.constant 0 : i32
    %c0_i32_0 = arith.constant 0 : i32
    %c0_i32_1 = arith.constant 0 : i32
    return %c0_i32, %c0_i32_0 : i32, i32
  }
  func.func @transform_14(%arg0: i32) -> (i32, i32, i32) {
    %c0_i32 = arith.constant 0 : i32
    %c0_i32_0 = arith.constant 0 : i32
    %c0_i32_1 = arith.constant 0 : i32
    %c0_i32_2 = arith.constant 0 : i32
    return %c0_i32, %c0_i32_0, %c0_i32_1 : i32, i32, i32
  }
  func.func @transform_15(%arg0: i32) -> (i32, i32) {
    %c0_i32 = arith.constant 0 : i32
    %c0_i32_0 = arith.constant 0 : i32
    %c0_i32_1 = arith.constant 0 : i32
    return %c0_i32, %c0_i32_0 : i32, i32
  }
  func.func @transform_16(%arg0: i32) -> (i32, i32) {
    %c0_i32 = arith.constant 0 : i32
    %c0_i32_0 = arith.constant 0 : i32
    %c0_i32_1 = arith.constant 0 : i32
    return %c0_i32, %c0_i32_0 : i32, i32
  }
  func.func @transform_17(%arg0: i32) -> (i32, i32) {
    %c0_i32 = arith.constant 0 : i32
    %c0_i32_0 = arith.constant 0 : i32
    %c0_i32_1 = arith.constant 0 : i32
    return %c0_i32, %c0_i32_0 : i32, i32
  }
  func.func @transform_18(%arg0: i32) -> (i32, i32) {
    %c0_i32 = arith.constant 0 : i32
    %c0_i32_0 = arith.constant 0 : i32
    %c0_i32_1 = arith.constant 0 : i32
    return %c0_i32, %c0_i32_0 : i32, i32
  }
  func.func @transform_19(%arg0: i32) -> (i32, i32) {
    %c0_i32 = arith.constant 0 : i32
    %c0_i32_0 = arith.constant 0 : i32
    %c0_i32_1 = arith.constant 0 : i32
    return %c0_i32, %c0_i32_0 : i32, i32
  }
  func.func @transform_20(%arg0: i32) -> (i32, i32, i32) {
    %c0_i32 = arith.constant 0 : i32
    %c0_i32_0 = arith.constant 0 : i32
    %c0_i32_1 = arith.constant 0 : i32
    return %arg0, %c0_i32, %c0_i32_0 : i32, i32, i32
  }
}

</mosaic_0001>

<bundles_post_ra>
// kernel: discriminator_forward.1
= control target key start
LH: loop header
LB: loop body
LE: loop exit
PB: predicated region body
PF: predicated region fallthrough
CT: control target
= control target key end

     0   :  { %s12442_s0 = inlined_call_operand.hbm [shape: f32[2,1,5], index: 0, kind: input, shape index: {}]   ;;  %s12443_s1 = inlined_call_operand.hbm [shape: f32[2,8,16], index: 1, kind: input, shape index: {}]   ;;  %s12444_s2 = inlined_call_operand.hbm [shape: f32[16,96], index: 2, kind: input, shape index: {}]   ;;  %s12445_s3 = inlined_call_operand.hbm [shape: f32[5,96], index: 3, kind: input, shape index: {}]   ;;  %s12446_s4 = inlined_call_operand.hbm [shape: f32[9,96,256], index: 4, kind: input, shape index: {}]   ;;  %s12447_s5 = inlined_call_operand.hbm [shape: f32[1,256], index: 5, kind: input, shape index: {}]   ;;  %s12448_s6 = inlined_call_operand.hbm [shape: f32[9,256,256], index: 6, kind: input, shape index: {}]   ;;  %s12449_s7 = inlined_call_operand.hbm [shape: f32[1,256], index: 7, kind: input, shape index: {}]   ;;  %s12450_s8 = inlined_call_operand.hbm [shape: f32[9,128,256], index: 8, kind: input, shape index: {}]   ;;  %s12451_s9 = inlined_call_operand.hbm [shape: f32[1,256], index: 9, kind: input, shape index: {}]   ;;  %s12452_s10 = inlined_call_operand.hbm [shape: f32[9,256,256], index: 10, kind: input, shape index: {}]   ;;  %s12453_s11 = inlined_call_operand.hbm [shape: f32[1,256], index: 11, kind: input, shape index: {}]   ;;  %s12454_s12 = inlined_call_operand.hbm [shape: f32[9,64,128], index: 12, kind: input, shape index: {}]   ;;  %s12455_s13 = inlined_call_operand.hbm [shape: f32[1,128], index: 13, kind: input, shape index: {}]   ;;  %s12456_s14 = inlined_call_operand.hbm [shape: f32[4,64,64], index: 14, kind: input, shape index: {}]   ;;  %s12457_s15 = inlined_call_operand.hbm [shape: f32[1,64], index: 15, kind: input, shape index: {}]   ;;  %s12458_s16 = inlined_call_operand.hbm [shape: f32[69,128], index: 16, kind: input, shape index: {}]   ;;  %s12459_s17 = inlined_call_operand.hbm [shape: f32[1,128], index: 17, kind: input, shape index: {}]   ;;  %s12460_s18 = inlined_call_operand.hbm [shape: f32[128,128], index: 18, kind: input, shape index: {}]   ;;  %s12461_s19 = inlined_call_operand.hbm [shape: f32[1,128], index: 19, kind: input, shape index: {}]   ;;  %s12462_s20 = inlined_call_operand.vmem [shape: f32[2,1,128], index: 20, kind: output, shape index: {}]  }
   0x1   :  { %12489 = sst [smem:[#allocation52_spill]] %s12442_s0 }
   0x2   :  { %12490 = sst [smem:[#allocation53_spill]] %s12443_s1 }
   0x3   :  { %12491 = sst [smem:[#allocation54_spill]] %s12444_s2 }
   0x4   :  { %12492 = sst [smem:[#allocation55_spill]] %s12445_s3 }
   0x5   :  { %12493 = sst [smem:[#allocation56_spill]] %s12446_s4 }
   0x6   :  { %12494 = sst [smem:[#allocation57_spill]] %s12447_s5 }
   0x7   :  { %12495 = sst [smem:[#allocation58_spill]] %s12448_s6 }
   0x8   :  { %12496 = sst [smem:[#allocation59_spill]] %s12449_s7 }
   0x9   :  { %12497 = sst [smem:[#allocation60_spill]] %s12450_s8 }
   0xa   :  { %12498 = sst [smem:[#allocation61_spill]] %s12451_s9 }
   0xb   :  { %12499 = sst [smem:[#allocation62_spill]] %s12458_s16 }
   0xc   :  { %12500 = sst [smem:[#allocation63_spill]] %s12460_s18 }
   0xd   :  { %12501 = sst [smem:[#allocation64_spill]] %s12461_s19 }
   0xe   :  { %12502 = sst [smem:[#allocation65_spill]] %s12462_s20 }
   0xf   :  { %25 = vsyncpa [#allocation4], 0 }
  0x10   :  { %27 = vsyncpa [#allocation4 + $0x1], 0 }
  0x11   :  { %28 = vsyncpa [#allocation6], 0 }
  0x12   :  { %30 = vsyncpa [#allocation6 + $0x1], 0 }
  0x13   :  { %31 = vsyncpa [#allocation9], 0 }
  0x14   :  { %32 = vsyncpa [#allocation12], 0 }
  0x15   :  { %33 = vsyncpa [#allocation15], 0 }
  0x16   :  { %34 = vsyncpa [#allocation18], 0 }
  0x17   :  { %35 = vsyncpa [#allocation21], 0 }
  0x18   :  { %36 = vsyncpa [#allocation24], 0 }
  0x19   :  { %37 = vsyncpa [#allocation27], 0 }
  0x1a   :  { %38 = vsyncpa [#allocation30], 0 }
  0x1b   :  { %39 = vsyncpa [#allocation33], 0  ;;  %s11323_s1 = smov 0   ;;  %s11325_s22 = smov 0  }
  0x1c   :  { %s11327_s23 = smov 0   ;;  %s11329_s24 = smov 0  }
  0x1d LB: > { %12503 = sst [smem:[#allocation46_spill]] %s11167_s1  ;;  %s11181_s2 = smov [#allocation7]   ;;  %s11179_s24 = sphi %s11329_s24, %s12571_s24   ;;  %s11175_s23 = sphi %s11327_s23, %s12570_s23   ;;  %s11171_s22 = sphi %s11325_s22, %s12569_s22   ;;  %s11167_s1 = sphi %s11323_s1, %s12566_s1  }
  0x1e   : > { %12504 = sst [smem:[#allocation47_spill]] %s11171_s22  ;;  %s518_s25 = sshll.u32 %s11181_s2, 4  ;;  %s11349_s25 = int_to_ptr.vmem [resolvable:$true] %s518_s25 }
  0x1f   : > { %12505 = sst [smem:[#allocation48_spill]] %s11175_s23  ;;  %s11344_s3 = sadd.s32 4294967295, %s11179_s24  }
  0x20   : > { %12506 = sst [smem:[#allocation49_spill]] %s11179_s24  ;;  %p7707_p0 = scmp.ge.s32.totalorder %s11179_s24, 1 }
  0x21   : > { %12507 = sst [smem:[#allocation50_spill]] %s11344_s3  ;;  %p12478_p1 = scmp.eq.s32.totalorder %s11344_s3, 0 }
  0x22   : > { %p506_p2 = scmp.lt.s32.totalorder %s11179_s24, 3  ;;  %s11182_s27 = smov [#allocation8]  }
  0x23   : > { %s532_s28 = sshll.u32 %s11182_s27, 4  ;;  %s11183_s29 = smov [#allocation11]   ;;  %s11363_s28 = int_to_ptr.vmem [resolvable:$true] %s532_s28 }
  0x24   : > { %p11351_p3 = pnand %p7707_p0, %p506_p2  ;;  %s556_s30 = sshll.u32 %s11183_s29, 4  ;;  %s11365_s30 = int_to_ptr.vmem [resolvable:$true] %s556_s30 }
  0x25   : > { %s12511_s2 = sld [smem:[#allocation54_spill]] }
  0x26   : > { %s12508_s26 = scalar_select %p11351_p3, 1, 0 }
  0x27   : > { %p10251_p4 = pneg %p11351_p3 }
  0x28   : > { %12509 = sst [smem:[#allocation51_spill]] %s12508_s26 }
  0x29   : > { %p11359_p5 = pnand %p10251_p4, %p12478_p1 }
  0x2b   : > { %s10537_s20 = scalar_lea.hbm %s12511_s2, 256  ;;  %p11375_p7 = pneg %p11359_p5 }
  0x2c   : > { %p10538_p6 = scmp.ne.s32.totalorder %s12511_s2, %s10537_s20  ;;  %p10544_p10 = scmp.lt.u32.totalorder %s10537_s20, %s12511_s2 }
  0x2e   : > { %p10540_p8 = pnand %p11375_p7, %p10538_p6 }
  0x30   : > { %p10541_p9 = pneg %p10540_p8 }
  0x32   : > { %p10546_p11 = pnand %p10544_p10, %p10541_p9 }
  0x34   : > { %10549 = shalt.err (!%p10546_p11)
}
  0x35   : > { %s10550_s1 = scalar_lea.vmem %s11349_s25, 256  ;;  %p10558_p2 = scmp.lt.s32.totalorder %s11349_s25, %s11349_s25 }
  0x36   : > { %p10551_p12 = scmp.ne.s32.totalorder %s11349_s25, %s10550_s1  ;;  %p10559_p4 = scmp.lt.s32.totalorder %s10550_s1, %s10550_s1 }
  0x38   : > { %p10553_p13 = pnand %p10551_p12, %p11375_p7  ;;  %p10560_p6 = por %p10559_p4, %p10558_p2 }
  0x3a   : > { %p10554_p0 = pneg %p10553_p13 }
  0x3c   : > { %p10561_p8 = pnand %p10560_p6, %p10554_p0 }
  0x3e   : > { %10564 = shalt.err (!%p10561_p8)
}
  0x3f   : > { %s12480_s26 = smov 128   ;;  %s12482_s20 = smov 8  }
  0x40   : > { %10254 = dma.hbm_to_vmem [thread:$0]  (!%p11359_p5), %s12511_s2, 256, %s11349_s25, [#allocation6], %s12480_s26, %s12480_s26, %s12482_s20  }
  0x41   : > { %s12513_s22 = sld [smem:[#allocation55_spill]] }
  0x47   : > { %s12514_s19 = smov %s12513_s22  ;;  %s10565_s1 = scalar_lea.hbm %s12513_s22, 128 }
  0x48   : > { %p10566_p9 = scmp.ne.s32.totalorder %s12514_s19, %s10565_s1  ;;  %p10572_p12 = scmp.lt.u32.totalorder %s10565_s1, %s12514_s19 }
  0x4a   : > { %p10568_p10 = pnand %p10566_p9, %p11375_p7 }
  0x4c   : > { %p10569_p11 = pneg %p10568_p10 }
  0x4e   : > { %p10574_p13 = pnand %p10572_p12, %p10569_p11 }
  0x50   : > { %10577 = shalt.err (!%p10574_p13)
}
  0x51   : > { %s10578_s25 = scalar_lea.vmem %s11363_s28, 128  ;;  %p10586_p6 = scmp.lt.s32.totalorder %s11363_s28, %s11363_s28 }
  0x52   : > { %p10579_p0 = scmp.ne.s32.totalorder %s11363_s28, %s10578_s25  ;;  %p10587_p8 = scmp.lt.s32.totalorder %s10578_s25, %s10578_s25 }
  0x54   : > { %p10581_p2 = pnand %p10579_p0, %p11375_p7  ;;  %p10588_p9 = por %p10587_p8, %p10586_p6 }
  0x56   : > { %p10582_p4 = pneg %p10581_p2 }
  0x58   : > { %p10589_p10 = pnand %p10588_p9, %p10582_p4 }
  0x5a   : > { %10592 = shalt.err (!%p10589_p10)
}
  0x5b   : > { %10257 = dma.hbm_to_vmem [thread:$0]  (!%p11359_p5), %s12514_s19, 128, %s11363_s28, [#allocation9]  }
  0x5c   : > { %s12515_s5 = sld [smem:[#allocation57_spill]] }
  0x62   : > { %s10593_s24 = scalar_lea.hbm %s12515_s5, 32 }
  0x63   : > { %p10594_p11 = scmp.ne.s32.totalorder %s12515_s5, %s10593_s24  ;;  %p10600_p0 = scmp.lt.u32.totalorder %s10593_s24, %s12515_s5 }
  0x65   : > { %p10596_p12 = pnand %p10594_p11, %p11375_p7 }
  0x67   : > { %p10597_p13 = pneg %p10596_p12 }
  0x69   : > { %p10602_p2 = pnand %p10600_p0, %p10597_p13 }
  0x6b   : > { %10605 = shalt.err (!%p10602_p2)
}
  0x6c   : > { %s10606_s28 = scalar_lea.vmem %s11365_s30, 32  ;;  %p10614_p9 = scmp.lt.s32.totalorder %s11365_s30, %s11365_s30 }
  0x6d   : > { %p10607_p4 = scmp.ne.s32.totalorder %s11365_s30, %s10606_s28  ;;  %p10615_p10 = scmp.lt.s32.totalorder %s10606_s28, %s10606_s28 }
  0x6f   : > { %p10609_p6 = pnand %p10607_p4, %p11375_p7  ;;  %p10616_p11 = por %p10615_p10, %p10614_p9 }
  0x71   : > { %p10610_p8 = pneg %p10609_p6 }
  0x73   : > { %p10617_p12 = pnand %p10616_p11, %p10610_p8 }
  0x75   : > { %10620 = shalt.err (!%p10617_p12)
}
  0x76   : > { %10263 = dma.hbm_to_vmem [thread:$0]  (!%p11359_p5), %s12515_s5, 32, %s11365_s30, [#allocation12]  }
  0x77   : > { %s11186_s16 = smov [#allocation14]   ;;  %s11187_s22 = smov [#allocation17]  }
  0x78   : > { %s580_s18 = sshll.u32 %s11186_s16, 4  ;;  %s604_s23 = sshll.u32 %s11187_s22, 4  ;;  %s581_s18 = int_to_ptr.vmem [resolvable:$true] %s580_s18  ;;  %s605_s23 = int_to_ptr.vmem [resolvable:$true] %s604_s23 }
  0x79   : > { %s12516_s7 = sld [smem:[#allocation59_spill]] }
  0x7f   : > { %s10621_s0 = scalar_lea.hbm %s12516_s7, 32 }
  0x80   : > { %p10622_p13 = scmp.ne.s32.totalorder %s12516_s7, %s10621_s0  ;;  %p10628_p4 = scmp.lt.u32.totalorder %s10621_s0, %s12516_s7 }
  0x82   : > { %p10624_p0 = pnand %p10622_p13, %p11375_p7 }
  0x84   : > { %p10625_p2 = pneg %p10624_p0 }
  0x86   : > { %p10630_p6 = pnand %p10628_p4, %p10625_p2 }
  0x88   : > { %10633 = shalt.err (!%p10630_p6)
}
  0x89   : > { %s10634_s30 = scalar_lea.vmem %s581_s18, 32  ;;  %p10642_p11 = scmp.lt.s32.totalorder %s581_s18, %s581_s18 }
  0x8a   : > { %p10635_p8 = scmp.ne.s32.totalorder %s581_s18, %s10634_s30  ;;  %p10643_p12 = scmp.lt.s32.totalorder %s10634_s30, %s10634_s30 }
  0x8c   : > { %p10637_p9 = pnand %p10635_p8, %p11375_p7  ;;  %p10644_p1 = por %p10643_p12, %p10642_p11 }
  0x8e   : > { %p10638_p10 = pneg %p10637_p9 }
  0x90   : > { %p10645_p3 = pnand %p10644_p1, %p10638_p10 }
  0x92   : > { %10648 = shalt.err (!%p10645_p3)
}
  0x93   : > { %10269 = dma.hbm_to_vmem [thread:$0]  (!%p11359_p5), %s12516_s7, 32, %s581_s18, [#allocation15]  }
  0x94   : > { %s12517_s9 = sld [smem:[#allocation61_spill]] }
  0x9a   : > { %s10649_s3 = scalar_lea.hbm %s12517_s9, 32 }
  0x9b   : > { %p10650_p13 = scmp.ne.s32.totalorder %s12517_s9, %s10649_s3  ;;  %p10656_p3 = scmp.lt.u32.totalorder %s10649_s3, %s12517_s9 }
  0x9d   : > { %p10652_p0 = pnand %p10650_p13, %p11375_p7 }
  0x9f   : > { %p10653_p1 = pneg %p10652_p0 }
  0xa1   : > { %p10658_p2 = pnand %p10656_p3, %p10653_p1 }
  0xa3   : > { %10661 = shalt.err (!%p10658_p2)
}
  0xa4   : > { %s10662_s1 = scalar_lea.vmem %s605_s23, 32  ;;  %p10670_p9 = scmp.lt.s32.totalorder %s605_s23, %s605_s23 }
  0xa5   : > { %p10663_p4 = scmp.ne.s32.totalorder %s605_s23, %s10662_s1  ;;  %p10671_p10 = scmp.lt.s32.totalorder %s10662_s1, %s10662_s1 }
  0xa7   : > { %p10665_p6 = pnand %p10663_p4, %p11375_p7  ;;  %p10672_p11 = por %p10671_p10, %p10670_p9 }
  0xa9   : > { %p10666_p8 = pneg %p10665_p6 }
  0xab   : > { %p10673_p12 = pnand %p10672_p11, %p10666_p8 }
  0xad   : > { %10676 = shalt.err (!%p10673_p12)
}
  0xae   : > { %10275 = dma.hbm_to_vmem [thread:$0]  (!%p11359_p5), %s12517_s9, 32, %s605_s23, [#allocation18]  }
  0xaf   : > { %s11188_s25 = smov [#allocation20]   ;;  %s11189_s22 = smov [#allocation23]  }
  0xb0   : > { %s628_s16 = sshll.u32 %s11188_s25, 4  ;;  %s652_s24 = sshll.u32 %s11189_s22, 4  ;;  %s629_s16 = int_to_ptr.vmem [resolvable:$true] %s628_s16  ;;  %s653_s24 = int_to_ptr.vmem [resolvable:$true] %s652_s24 }
  0xb1   : > { %s10677_s21 = scalar_lea.hbm %s12453_s11, 32 }
  0xb2   : > { %p10678_p13 = scmp.ne.s32.totalorder %s12453_s11, %s10677_s21  ;;  %p10684_p3 = scmp.lt.u32.totalorder %s10677_s21, %s12453_s11 }
  0xb4   : > { %p10680_p0 = pnand %p10678_p13, %p11375_p7 }
  0xb6   : > { %p10681_p1 = pneg %p10680_p0 }
  0xb8   : > { %p10686_p2 = pnand %p10684_p3, %p10681_p1 }
  0xba   : > { %10689 = shalt.err (!%p10686_p2)
}
  0xbb   : > { %s10690_s23 = scalar_lea.vmem %s629_s16, 32  ;;  %p10698_p9 = scmp.lt.s32.totalorder %s629_s16, %s629_s16 }
  0xbc   : > { %p10691_p4 = scmp.ne.s32.totalorder %s629_s16, %s10690_s23  ;;  %p10699_p10 = scmp.lt.s32.totalorder %s10690_s23, %s10690_s23 }
  0xbe   : > { %p10693_p6 = pnand %p10691_p4, %p11375_p7  ;;  %p10700_p11 = por %p10699_p10, %p10698_p9 }
  0xc0   : > { %p10694_p8 = pneg %p10693_p6 }
  0xc2   : > { %p10701_p12 = pnand %p10700_p11, %p10694_p8 }
  0xc4   : > { %10704 = shalt.err (!%p10701_p12)
}
  0xc5   : > { %10281 = dma.hbm_to_vmem [thread:$0]  (!%p11359_p5), %s12453_s11, 32, %s629_s16, [#allocation21]  }
  0xc6   : > { %s10705_s0 = scalar_lea.hbm %s12455_s13, 16 }
  0xc7   : > { %p10706_p13 = scmp.ne.s32.totalorder %s12455_s13, %s10705_s0  ;;  %p10712_p3 = scmp.lt.u32.totalorder %s10705_s0, %s12455_s13 }
  0xc9   : > { %p10708_p0 = pnand %p10706_p13, %p11375_p7 }
  0xcb   : > { %p10709_p1 = pneg %p10708_p0 }
  0xcd   : > { %p10714_p2 = pnand %p10712_p3, %p10709_p1 }
  0xcf   : > { %10717 = shalt.err (!%p10714_p2)
}
  0xd0   : > { %s10718_s18 = scalar_lea.vmem %s653_s24, 16  ;;  %s10725_s16 = scalar_lea.vmem %s653_s24, 32 }
  0xd1   : > { %p10719_p4 = scmp.ne.s32.totalorder %s653_s24, %s10718_s18  ;;  %p10726_p9 = scmp.lt.s32.totalorder %s653_s24, %s653_s24 }
  0xd2   : > { %p10727_p10 = scmp.lt.s32.totalorder %s10725_s16, %s10718_s18 }
  0xd3   : > { %p10721_p6 = pnand %p10719_p4, %p11375_p7 }
  0xd4   : > { %p10728_p11 = por %p10727_p10, %p10726_p9 }
  0xd5   : > { %p10722_p8 = pneg %p10721_p6 }
  0xd7   : > { %p10729_p12 = pnand %p10728_p11, %p10722_p8 }
  0xd9   : > { %10732 = shalt.err (!%p10729_p12)
}
  0xda   : > { %10287 = dma.hbm_to_vmem [thread:$0]  (!%p11359_p5), %s12455_s13, 16, %s653_s24, [#allocation24]  }
  0xdb   : > { %s11190_s25 = smov [#allocation26]   ;;  %s11191_s3 = smov [#allocation29]  }
  0xdc   : > { %s676_s22 = sshll.u32 %s11190_s25, 4  ;;  %s700_s0 = sshll.u32 %s11191_s3, 4  ;;  %s677_s22 = int_to_ptr.vmem [resolvable:$true] %s676_s22  ;;  %s701_s0 = int_to_ptr.vmem [resolvable:$true] %s700_s0 }
  0xdd   : > { %s10733_s28 = scalar_lea.hbm %s12457_s15, 16 }
  0xde   : > { %p10734_p13 = scmp.ne.s32.totalorder %s12457_s15, %s10733_s28  ;;  %p10740_p3 = scmp.lt.u32.totalorder %s10733_s28, %s12457_s15 }
  0xe0   : > { %p10736_p0 = pnand %p10734_p13, %p11375_p7 }
  0xe2   : > { %p10737_p1 = pneg %p10736_p0 }
  0xe4   : > { %p10742_p2 = pnand %p10740_p3, %p10737_p1 }
  0xe6   : > { %10745 = shalt.err (!%p10742_p2)
}
  0xe7   : > { %s10746_s24 = scalar_lea.vmem %s677_s22, 16  ;;  %s10753_s30 = scalar_lea.vmem %s677_s22, 32 }
  0xe8   : > { %p10747_p4 = scmp.ne.s32.totalorder %s677_s22, %s10746_s24  ;;  %p10754_p9 = scmp.lt.s32.totalorder %s677_s22, %s677_s22 }
  0xe9   : > { %p10755_p10 = scmp.lt.s32.totalorder %s10753_s30, %s10746_s24 }
  0xea   : > { %p10749_p6 = pnand %p10747_p4, %p11375_p7 }
  0xeb   : > { %p10756_p11 = por %p10755_p10, %p10754_p9 }
  0xec   : > { %p10750_p8 = pneg %p10749_p6 }
  0xee   : > { %p10757_p12 = pnand %p10756_p11, %p10750_p8 }
  0xf0   : > { %10760 = shalt.err (!%p10757_p12)
}
  0xf1   : > { %10293 = dma.hbm_to_vmem [thread:$0]  (!%p11359_p5), %s12457_s15, 16, %s677_s22, [#allocation27]  }
  0xf2   : > { %s10761_s28 = scalar_lea.hbm %s12459_s17, 16 }
  0xf3   : > { %p10762_p13 = scmp.ne.s32.totalorder %s12459_s17, %s10761_s28  ;;  %p10768_p3 = scmp.lt.u32.totalorder %s10761_s28, %s12459_s17 }
  0xf5   : > { %p10764_p0 = pnand %p10762_p13, %p11375_p7 }
  0xf7   : > { %p10765_p1 = pneg %p10764_p0 }
  0xf9   : > { %p10770_p2 = pnand %p10768_p3, %p10765_p1 }
  0xfb   : > { %10773 = shalt.err (!%p10770_p2)
}
  0xfc   : > { %s10774_s24 = scalar_lea.vmem %s701_s0, 16  ;;  %s10781_s22 = scalar_lea.vmem %s701_s0, 32 }
  0xfd   : > { %p10775_p4 = scmp.ne.s32.totalorder %s701_s0, %s10774_s24  ;;  %p10782_p9 = scmp.lt.s32.totalorder %s701_s0, %s701_s0 }
  0xfe   : > { %p10783_p10 = scmp.lt.s32.totalorder %s10781_s22, %s10774_s24 }
  0xff   : > { %p10777_p6 = pnand %p10775_p4, %p11375_p7 }
 0x100   : > { %p10784_p11 = por %p10783_p10, %p10782_p9 }
 0x101   : > { %p10778_p8 = pneg %p10777_p6 }
 0x103   : > { %p10785_p12 = pnand %p10784_p11, %p10778_p8 }
 0x105   : > { %10788 = shalt.err (!%p10785_p12)
}
 0x106   : > { %10299 = dma.hbm_to_vmem [thread:$0]  (!%p11359_p5), %s12459_s17, 16, %s701_s0, [#allocation30]  }
 0x107   : > { %s11192_s3 = smov [#allocation10]   ;;  %s12518_s1 = sld [smem:[#allocation56_spill]] }
 0x108   : > { %s542_s21 = sshll.u32 %s11192_s3, 4  ;;  %s543_s21 = int_to_ptr.vmem [resolvable:$true] %s542_s21 }
 0x10d   : > { %s12519_s18 = smov %s12518_s1  ;;  %s10789_s16 = scalar_lea.hbm %s12518_s1, 27648 }
 0x10e   : > { %p10790_p13 = scmp.ne.s32.totalorder %s12519_s18, %s10789_s16  ;;  %p10796_p3 = scmp.lt.u32.totalorder %s10789_s16, %s12519_s18 }
 0x110   : > { %p10792_p0 = pnand %p10790_p13, %p11375_p7 }
 0x112   : > { %p10793_p1 = pneg %p10792_p0 }
 0x114   : > { %p10798_p2 = pnand %p10796_p3, %p10793_p1 }
 0x116   : > { %10801 = shalt.err (!%p10798_p2)
}
 0x117   : > { %s10802_s0 = scalar_lea.vmem %s543_s21, 27648  ;;  %p10810_p9 = scmp.lt.s32.totalorder %s543_s21, %s543_s21 }
 0x118   : > { %p10803_p4 = scmp.ne.s32.totalorder %s543_s21, %s10802_s0  ;;  %p10811_p10 = scmp.lt.s32.totalorder %s10802_s0, %s10802_s0 }
 0x11a   : > { %p10805_p6 = pnand %p10803_p4, %p11375_p7  ;;  %p10812_p11 = por %p10811_p10, %p10810_p9 }
 0x11c   : > { %p10806_p8 = pneg %p10805_p6 }
 0x11e   : > { %p10813_p12 = pnand %p10812_p11, %p10806_p8 }
 0x120   : > { %10816 = shalt.err (!%p10813_p12)
}
 0x121   : > { %s11193_s26 = smov 256   ;;  %s11194_s30 = smov 16  }
 0x122   : > { %10260 = dma.hbm_to_vmem [thread:$0]  (!%p11359_p5), %s12519_s18, 27648, %s543_s21, [#allocation9], %s11193_s26, %s11193_s26, %s11194_s30  }
 0x123   : > { %s11195_s29 = smov [#allocation13]   ;;  %s11196_s1 = smov [#allocation16]  }
 0x124   : > { %s566_s28 = sshll.u32 %s11195_s29, 4  ;;  %s590_s16 = sshll.u32 %s11196_s1, 4  ;;  %s567_s28 = int_to_ptr.vmem [resolvable:$true] %s566_s28  ;;  %s11574_s16 = int_to_ptr.vmem [resolvable:$true] %s590_s16 }
 0x125   : > { %s12520_s6 = sld [smem:[#allocation58_spill]] }
 0x12b   : > { %s10817_s22 = scalar_lea.hbm %s12520_s6, 73728 }
 0x12c   : > { %p10818_p13 = scmp.ne.s32.totalorder %s12520_s6, %s10817_s22  ;;  %p10824_p3 = scmp.lt.u32.totalorder %s10817_s22, %s12520_s6 }
 0x12e   : > { %p10820_p0 = pnand %p10818_p13, %p11375_p7 }
 0x130   : > { %p10821_p1 = pneg %p10820_p0 }
 0x132   : > { %p10826_p2 = pnand %p10824_p3, %p10821_p1 }
 0x134   : > { %10829 = shalt.err (!%p10826_p2)
}
 0x135   : > { %s10830_s3 = scalar_lea.vmem %s567_s28, 73728  ;;  %p10838_p9 = scmp.lt.s32.totalorder %s567_s28, %s567_s28 }
 0x136   : > { %p10831_p4 = scmp.ne.s32.totalorder %s567_s28, %s10830_s3  ;;  %p10839_p10 = scmp.lt.s32.totalorder %s10830_s3, %s10830_s3 }
 0x138   : > { %p10833_p6 = pnand %p10831_p4, %p11375_p7  ;;  %p10840_p11 = por %p10839_p10, %p10838_p9 }
 0x13a   : > { %p10834_p8 = pneg %p10833_p6 }
 0x13c   : > { %p10841_p12 = pnand %p10840_p11, %p10834_p8 }
 0x13e   : > { %10844 = shalt.err (!%p10841_p12)
}
 0x13f   : > { %10266 = dma.hbm_to_vmem [thread:$0]  (!%p11359_p5), %s12520_s6, 73728, %s567_s28, [#allocation12], %s11193_s26, %s11193_s26, %s11194_s30  }
 0x140   : > { %s12521_s8 = sld [smem:[#allocation60_spill]] }
 0x146   : > { %s10845_s24 = scalar_lea.hbm %s12521_s8, 36864 }
 0x147   : > { %p10846_p13 = scmp.ne.s32.totalorder %s12521_s8, %s10845_s24  ;;  %p10852_p3 = scmp.lt.u32.totalorder %s10845_s24, %s12521_s8 }
 0x149   : > { %p10848_p0 = pnand %p10846_p13, %p11375_p7 }
 0x14b   : > { %p10849_p1 = pneg %p10848_p0 }
 0x14d   : > { %p10854_p2 = pnand %p10852_p3, %p10849_p1 }
 0x14f   : > { %10857 = shalt.err (!%p10854_p2)
}
 0x150   : > { %s10858_s28 = scalar_lea.vmem %s11574_s16, 36864  ;;  %p10866_p9 = scmp.lt.s32.totalorder %s11574_s16, %s11574_s16 }
 0x151   : > { %p10859_p4 = scmp.ne.s32.totalorder %s11574_s16, %s10858_s28  ;;  %p10867_p10 = scmp.lt.s32.totalorder %s10858_s28, %s10858_s28 }
 0x153   : > { %p10861_p6 = pnand %p10859_p4, %p11375_p7  ;;  %p10868_p11 = por %p10867_p10, %p10866_p9 }
 0x155   : > { %p10862_p8 = pneg %p10861_p6 }
 0x157   : > { %p10869_p12 = pnand %p10868_p11, %p10862_p8 }
 0x159   : > { %10872 = shalt.err (!%p10869_p12)
}
 0x15a   : > { %10272 = dma.hbm_to_vmem [thread:$0]  (!%p11359_p5), %s12521_s8, 36864, %s11574_s16, [#allocation15], %s11193_s26, %s11193_s26, %s11194_s30  }
 0x15b   : > { %s11197_s29 = smov [#allocation19]   ;;  %s11198_s23 = smov [#allocation22]  }
 0x15c   : > { %s614_s1 = sshll.u32 %s11197_s29, 4  ;;  %s638_s24 = sshll.u32 %s11198_s23, 4  ;;  %s615_s1 = int_to_ptr.vmem [resolvable:$true] %s614_s1  ;;  %s11623_s24 = int_to_ptr.vmem [resolvable:$true] %s638_s24 }
 0x15d   : > { %s10873_s25 = scalar_lea.hbm %s12452_s10, 73728 }
 0x15e   : > { %p10874_p13 = scmp.ne.s32.totalorder %s12452_s10, %s10873_s25  ;;  %p10880_p3 = scmp.lt.u32.totalorder %s10873_s25, %s12452_s10 }
 0x160   : > { %p10876_p0 = pnand %p10874_p13, %p11375_p7 }
 0x162   : > { %p10877_p1 = pneg %p10876_p0 }
 0x164   : > { %p10882_p2 = pnand %p10880_p3, %p10877_p1 }
 0x166   : > { %10885 = shalt.err (!%p10882_p2)
}
 0x167   : > { %s10886_s20 = scalar_lea.vmem %s615_s1, 73728  ;;  %p10894_p9 = scmp.lt.s32.totalorder %s615_s1, %s615_s1 }
 0x168   : > { %p10887_p4 = scmp.ne.s32.totalorder %s615_s1, %s10886_s20  ;;  %p10895_p10 = scmp.lt.s32.totalorder %s10886_s20, %s10886_s20 }
 0x16a   : > { %p10889_p6 = pnand %p10887_p4, %p11375_p7  ;;  %p10896_p11 = por %p10895_p10, %p10894_p9 }
 0x16c   : > { %p10890_p8 = pneg %p10889_p6 }
 0x16e   : > { %p10897_p12 = pnand %p10896_p11, %p10890_p8 }
 0x170   : > { %10900 = shalt.err (!%p10897_p12)
}
 0x171   : > { %10278 = dma.hbm_to_vmem [thread:$0]  (!%p11359_p5), %s12452_s10, 73728, %s615_s1, [#allocation18], %s11193_s26, %s11193_s26, %s11194_s30  }
 0x172   : > { %s10901_s25 = scalar_lea.hbm %s12454_s12, 9216 }
 0x173   : > { %p10902_p13 = scmp.ne.s32.totalorder %s12454_s12, %s10901_s25  ;;  %p10908_p3 = scmp.lt.u32.totalorder %s10901_s25, %s12454_s12 }
 0x175   : > { %p10904_p0 = pnand %p10902_p13, %p11375_p7 }
 0x177   : > { %p10905_p1 = pneg %p10904_p0 }
 0x179   : > { %p10910_p2 = pnand %p10908_p3, %p10905_p1 }
 0x17b   : > { %10913 = shalt.err (!%p10910_p2)
}
 0x17c   : > { %s10914_s26 = scalar_lea.vmem %s11623_s24, 9216  ;;  %p10922_p9 = scmp.lt.s32.totalorder %s11623_s24, %s11623_s24 }
 0x17d   : > { %p10915_p4 = scmp.ne.s32.totalorder %s11623_s24, %s10914_s26  ;;  %p10923_p10 = scmp.lt.s32.totalorder %s10914_s26, %s10914_s26 }
 0x17f   : > { %p10917_p6 = pnand %p10915_p4, %p11375_p7  ;;  %p10924_p11 = por %p10923_p10, %p10922_p9 }
 0x181   : > { %p10918_p8 = pneg %p10917_p6 }
 0x183   : > { %p10925_p12 = pnand %p10924_p11, %p10918_p8 }
 0x185   : > { %10928 = shalt.err (!%p10925_p12)
}
 0x186   : > { %s12522_s30 = smov 8   ;;  %s12523_s1 = smov 128  }
 0x187   : > { %10284 = dma.hbm_to_vmem [thread:$0]  (!%p11359_p5), %s12454_s12, 9216, %s11623_s24, [#allocation21], %s12523_s1, %s12523_s1, %s12522_s30  }
 0x188   : > { %s11199_s23 = smov [#allocation25]   ;;  %s11200_s0 = smov [#allocation28]  }
 0x189   : > { %s662_s22 = sshll.u32 %s11199_s23, 4  ;;  %s686_s25 = sshll.u32 %s11200_s0, 4  ;;  %s663_s22 = int_to_ptr.vmem [resolvable:$true] %s662_s22  ;;  %s11672_s25 = int_to_ptr.vmem [resolvable:$true] %s686_s25 }
 0x18a   : > { %s10929_s3 = scalar_lea.hbm %s12456_s14, 4096 }
 0x18b   : > { %p10930_p13 = scmp.ne.s32.totalorder %s12456_s14, %s10929_s3  ;;  %p10936_p3 = scmp.lt.u32.totalorder %s10929_s3, %s12456_s14 }
 0x18d   : > { %p10932_p0 = pnand %p10930_p13, %p11375_p7 }
 0x18f   : > { %p10933_p1 = pneg %p10932_p0 }
 0x191   : > { %p10938_p2 = pnand %p10936_p3, %p10933_p1 }
 0x193   : > { %10941 = shalt.err (!%p10938_p2)
}
 0x194   : > { %s10942_s29 = scalar_lea.vmem %s663_s22, 4096  ;;  %p10950_p9 = scmp.lt.s32.totalorder %s663_s22, %s663_s22 }
 0x195   : > { %p10943_p4 = scmp.ne.s32.totalorder %s663_s22, %s10942_s29  ;;  %p10951_p10 = scmp.lt.s32.totalorder %s10942_s29, %s10942_s29 }
 0x197   : > { %p10945_p6 = pnand %p10943_p4, %p11375_p7  ;;  %p10952_p11 = por %p10951_p10, %p10950_p9 }
 0x199   : > { %p10946_p8 = pneg %p10945_p6 }
 0x19b   : > { %p10953_p12 = pnand %p10952_p11, %p10946_p8 }
 0x19d   : > { %10956 = shalt.err (!%p10953_p12)
}
 0x19e   : > { %10290 = dma.hbm_to_vmem [thread:$0]  (!%p11359_p5), %s12456_s14, 4096, %s663_s22, [#allocation24], %s12523_s1, %s12523_s1, %s12522_s30  }
 0x19f   : > { %s12524_s3 = sld [smem:[#allocation62_spill]] }
 0x1a5   : > { %s10957_s16 = scalar_lea.hbm %s12524_s3, 1152 }
 0x1a6   : > { %p10958_p13 = scmp.ne.s32.totalorder %s12524_s3, %s10957_s16  ;;  %p10964_p3 = scmp.lt.u32.totalorder %s10957_s16, %s12524_s3 }
 0x1a8   : > { %p10960_p0 = pnand %p10958_p13, %p11375_p7 }
 0x1aa   : > { %p10961_p1 = pneg %p10960_p0 }
 0x1ac   : > { %p10966_p2 = pnand %p10964_p3, %p10961_p1 }
 0x1ae   : > { %10969 = shalt.err (!%p10966_p2)
}
 0x1af   : > { %s10970_s22 = scalar_lea.vmem %s11672_s25, 1152  ;;  %p10978_p9 = scmp.lt.s32.totalorder %s11672_s25, %s11672_s25 }
 0x1b0   : > { %p10971_p4 = scmp.ne.s32.totalorder %s11672_s25, %s10970_s22  ;;  %p10979_p10 = scmp.lt.s32.totalorder %s10970_s22, %s10970_s22 }
 0x1b2   : > { %p10973_p6 = pnand %p10971_p4, %p11375_p7  ;;  %p10980_p11 = por %p10979_p10, %p10978_p9 }
 0x1b4   : > { %p10974_p8 = pneg %p10973_p6 }
 0x1b6   : > { %p10981_p12 = pnand %p10980_p11, %p10974_p8 }
 0x1b8   : > { %10984 = shalt.err (!%p10981_p12)
}
 0x1b9   : > { %10296 = dma.hbm_to_vmem [thread:$0]  (!%p11359_p5), %s12524_s3, 1152, %s11672_s25, [#allocation27], %s12523_s1, %s12523_s1, %s12522_s30  }
 0x1ba   : > { %s11201_s21 = smov [#allocation31]   ;;  %s11202_s16 = smov [#allocation32]  }
 0x1bb   : > { %s710_s28 = sshll.u32 %s11201_s21, 4  ;;  %s724_s26 = sshll.u32 %s11202_s16, 4  ;;  %s711_s28 = int_to_ptr.vmem [resolvable:$true] %s710_s28  ;;  %s11721_s26 = int_to_ptr.vmem [resolvable:$true] %s724_s26 }
 0x1bc   : > { %s12525_s29 = sld [smem:[#allocation63_spill]] }
 0x1c2   : > { %s10985_s22 = scalar_lea.hbm %s12525_s29, 2048 }
 0x1c3   : > { %p10986_p13 = scmp.ne.s32.totalorder %s12525_s29, %s10985_s22  ;;  %p10992_p3 = scmp.lt.u32.totalorder %s10985_s22, %s12525_s29 }
 0x1c5   : > { %p10988_p0 = pnand %p10986_p13, %p11375_p7 }
 0x1c7   : > { %p10989_p1 = pneg %p10988_p0 }
 0x1c9   : > { %p10994_p2 = pnand %p10992_p3, %p10989_p1 }
 0x1cb   : > { %10997 = shalt.err (!%p10994_p2)
}
 0x1cc   : > { %s10998_s0 = scalar_lea.vmem %s711_s28, 2048  ;;  %p11006_p9 = scmp.lt.s32.totalorder %s711_s28, %s711_s28 }
 0x1cd   : > { %p10999_p4 = scmp.ne.s32.totalorder %s711_s28, %s10998_s0  ;;  %p11007_p10 = scmp.lt.s32.totalorder %s10998_s0, %s10998_s0 }
 0x1cf   : > { %p11001_p6 = pnand %p10999_p4, %p11375_p7  ;;  %p11008_p11 = por %p11007_p10, %p11006_p9 }
 0x1d1   : > { %p11002_p8 = pneg %p11001_p6 }
 0x1d3   : > { %p11009_p12 = pnand %p11008_p11, %p11002_p8 }
 0x1d5   : > { %11012 = shalt.err (!%p11009_p12)
}
 0x1d6   : > { %10302 = dma.hbm_to_vmem [thread:$0]  (!%p11359_p5), %s12525_s29, 2048, %s711_s28, [#allocation30], %s12523_s1, %s12523_s1, %s12522_s30  }
 0x1d7   : > { %s12526_s20 = sld [smem:[#allocation64_spill]] }
 0x1dd   : > { %s11013_s24 = scalar_lea.hbm %s12526_s20, 16 }
 0x1de   : > { %p11014_p13 = scmp.ne.s32.totalorder %s12526_s20, %s11013_s24  ;;  %p11020_p3 = scmp.lt.u32.totalorder %s11013_s24, %s12526_s20 }
 0x1e0   : > { %p11016_p0 = pnand %p11014_p13, %p11375_p7 }
 0x1e2   : > { %p11017_p1 = pneg %p11016_p0 }
 0x1e4   : > { %p11022_p2 = pnand %p11020_p3, %p11017_p1 }
 0x1e6   : > { %11025 = shalt.err (!%p11022_p2)
}
 0x1e7   : > { %s11026_s30 = scalar_lea.vmem %s11721_s26, 16  ;;  %s11033_s1 = scalar_lea.vmem %s11721_s26, 32 }
 0x1e8   : > { %p11027_p4 = scmp.ne.s32.totalorder %s11721_s26, %s11026_s30  ;;  %p11034_p9 = scmp.lt.s32.totalorder %s11721_s26, %s11721_s26 }
 0x1e9   : > { %p11035_p10 = scmp.lt.s32.totalorder %s11033_s1, %s11026_s30 }
 0x1ea   : > { %p11029_p6 = pnand %p11027_p4, %p11375_p7 }
 0x1eb   : > { %p11036_p11 = por %p11035_p10, %p11034_p9 }
 0x1ec   : > { %p11030_p8 = pneg %p11029_p6 }
 0x1ee   : > { %p11037_p12 = pnand %p11036_p11, %p11030_p8 }
 0x1f0   : > { %11040 = shalt.err (!%p11037_p12)
}
 0x1f1   : > { %s12527_s2 = sld [smem:[#allocation49_spill]]  ;;  %s12528_s21 = sld [smem:[#allocation48_spill]] }
 0x1f2   : > { %s12529_s16 = sld [smem:[#allocation47_spill]]  ;;  %s12530_s27 = sld [smem:[#allocation46_spill]] }
 0x1f3   : > { %s12531_s24 = sld [smem:[#allocation50_spill]]  ;;  %s12534_s5 = sld [smem:[#allocation52_spill]] }
 0x1f4   : > { %10305 = dma.hbm_to_vmem [thread:$0]  (!%p11359_p5), %s12526_s20, 16, %s11721_s26, [#allocation33]  }
 0x1f7   : > { %s11769_s22 = sadd.s32 1, %s12527_s2   ;;  %s52_s4 = sadd.s32 1, %s12528_s21 }
 0x1f8   : > { %s49_s23 = ssub.s32 %s12527_s2, %s11769_s22  ;;  %p59_p7 = scmp.ne.s32.totalorder %s12528_s21, %s12529_s16 }
 0x1f9   : > { %p50_p13 = scmp.eq.s32.totalorder %s49_s23, 0  ;;  %p60_p0 = scmp.eq.s32.totalorder %s12527_s2, 0 }
 0x1fa   : > { %p65_p1 = scmp.ne.s32.totalorder %s12529_s16, %s12530_s27  ;;  %p10331_p3 = scmp.lt.s32.totalorder %s12527_s2, 2 }
 0x1fb   : > { %s11781_s25 = scalar_select %p50_p13, %s12528_s21, %s52_s4  }
 0x1fc   : > { %p61_p2 = por %p60_p0, %p59_p7  ;;  %p12532_p4 = scmp.eq.s32.totalorder %s12531_s24, 0 }
 0x1fd   : > { %s11790_s26 = sand.u32 1, %s12528_s21   ;;  %s7727_s30 = sshll.u32 %s12527_s2, 4 }
 0x1fe   : > { %p11785_p6 = por %p12532_p4, %p65_p1  ;;  %s11796_s23 = scalar_lea.hbm %s12534_s5, %s7727_s30 }
 0x1ff   : > { %s738_s16 = scalar_lea.vmem [#allocation3], %s11790_s26  ;;  %p11801_p5 = pnand %p10331_p3, %p61_p2 }
 0x200   : > { %s12533_s0 = scalar_select %p11785_p6, 1, 0 }
 0x201   : > { %s745_s27 = sshll.u32 %s738_s16, 4  ;;  %s736_s3 = scalar_lea.sflag [#allocation4], %s11790_s26  ;;  %s11799_s27 = int_to_ptr.vmem [resolvable:$true] %s745_s27 }
 0x202   : > { %s11041_s1 = scalar_lea.hbm %s11796_s23, 16  ;;  %p11043_p9 = pneg %p11801_p5 }
 0x203   : > { %p11042_p8 = scmp.ne.s32.totalorder %s11796_s23, %s11041_s1  ;;  %s11046_s16 = scalar_lea.hbm %s12534_s5, 32 }
 0x204   : > { %p11047_p12 = scmp.lt.u32.totalorder %s11796_s23, %s12534_s5  ;;  %p11048_p7 = scmp.lt.u32.totalorder %s11046_s16, %s11041_s1 }
 0x205   : > { %p11044_p10 = pnand %p11043_p9, %p11042_p8  ;;  %p11050_p0 = scmp.lt.u32.totalorder %s11041_s1, %s11796_s23 }
 0x206   : > { %p11049_p13 = por %p11048_p7, %p11047_p12 }
 0x207   : > { %p11045_p11 = pneg %p11044_p10 }
 0x208   : > { %p11051_p1 = por %p11050_p0, %p11049_p13 }
 0x20a   : > { %p11052_p3 = pnand %p11051_p1, %p11045_p11 }
 0x20c   : > { %11055 = shalt.err (!%p11052_p3)
}
 0x20d   : > { %s11056_s24 = scalar_lea.vmem %s11799_s27, 16  ;;  %s11203_s30 = smov [#allocation3]  }
 0x20e   : > { %p11057_p2 = scmp.ne.s32.totalorder %s11799_s27, %s11056_s24  ;;  %s11061_s28 = sshll.u32 %s11203_s30, 4  ;;  %s11062_s28 = int_to_ptr.vmem [resolvable:$false] %s11061_s28 }
 0x20f   : > { %s11063_s6 = scalar_lea.vmem %s11062_s28, 32  ;;  %p11064_p10 = scmp.lt.s32.totalorder %s11799_s27, %s11062_s28 }
 0x210   : > { %p11059_p4 = pnand %p11057_p2, %p11043_p9  ;;  %p11065_p12 = scmp.lt.s32.totalorder %s11063_s6, %s11056_s24 }
 0x212   : > { %p11060_p8 = pneg %p11059_p4  ;;  %p11066_p7 = por %p11065_p12, %p11064_p10 }
 0x214   : > { %p11067_p13 = pnand %p11066_p7, %p11060_p8 }
 0x216   : > { %11070 = shalt.err (!%p11067_p13)
}
 0x217   : > { %10309 = dma.hbm_to_vmem [thread:$0]  (!%p11801_p5), %s11796_s23, 16, %s11799_s27, %s736_s3  }
 0x218   : > { %s7729_s7 = sshll.u32 %s12527_s2, 7  ;;  %s12536_s30 = sld [smem:[#allocation53_spill]] }
 0x219   : > { %s12537_s28 = sshll.u32 %s11790_s26, 3  ;;  %s12538_s5 = sand.u32 1, %s12527_s2  }
 0x21a   : > { %s756_s24 = scalar_lea.vmem [#allocation5], %s12537_s28  ;;  %s753_s8 = scalar_lea.sflag [#allocation6], %s12538_s5 }
 0x21b   : > { %s763_s6 = sshll.u32 %s756_s24, 4  ;;  %s764_s6 = int_to_ptr.vmem [resolvable:$true] %s763_s6 }
 0x21e   : > { %s11837_s4 = scalar_lea.hbm %s12536_s30, %s7729_s7  ;;  %s11076_s27 = scalar_lea.hbm %s12536_s30, 256 }
 0x21f   : > { %s11071_s9 = scalar_lea.hbm %s11837_s4, 128  ;;  %p11077_p3 = scmp.lt.u32.totalorder %s11837_s4, %s12536_s30 }
 0x220   : > { %p11072_p11 = scmp.ne.s32.totalorder %s11837_s4, %s11071_s9  ;;  %p11078_p2 = scmp.lt.u32.totalorder %s11076_s27, %s11071_s9 }
 0x221   : > { %p11080_p8 = scmp.lt.u32.totalorder %s11071_s9, %s11837_s4 }
 0x222   : > { %p11074_p0 = pnand %p11072_p11, %p11043_p9  ;;  %p11079_p4 = por %p11078_p2, %p11077_p3 }
 0x224   : > { %p11075_p1 = pneg %p11074_p0  ;;  %p11081_p10 = por %p11080_p8, %p11079_p4 }
 0x226   : > { %p11082_p12 = pnand %p11081_p10, %p11075_p1 }
 0x228   : > { %11085 = shalt.err (!%p11082_p12)
}
 0x229   : > { %s11086_s2 = scalar_lea.vmem %s764_s6, 128  ;;  %s11204_s5 = smov [#allocation5]  }
 0x22a   : > { %p11087_p7 = scmp.ne.s32.totalorder %s764_s6, %s11086_s2  ;;  %s11091_s1 = sshll.u32 %s11204_s5, 4  ;;  %s11092_s1 = int_to_ptr.vmem [resolvable:$false] %s11091_s1 }
 0x22b   : > { %s11093_s16 = scalar_lea.vmem %s11092_s1, 256  ;;  %p11094_p0 = scmp.lt.s32.totalorder %s764_s6, %s11092_s1 }
 0x22c   : > { %p11089_p13 = pnand %p11087_p7, %p11043_p9  ;;  %p11095_p6 = scmp.lt.s32.totalorder %s11093_s16, %s11086_s2 }
 0x22e   : > { %p11090_p11 = pneg %p11089_p13  ;;  %p11096_p2 = por %p11095_p6, %p11094_p0 }
 0x230   : > { %p11097_p3 = pnand %p11096_p2, %p11090_p11 }
 0x232   : > { %11100 = shalt.err (!%p11097_p3)
}
 0x233   : > { %10312 = dma.hbm_to_vmem [thread:$0]  (!%p11801_p5), %s11837_s4, 128, %s764_s6, %s753_s8  }
 0x234   : > { %s12539_s9 = sld [smem:[#allocation51_spill]] }
 0x23a   : > { %p12540_p1 = scmp.ne.s32.totalorder %s12539_s9, 0 }
 0x23b   : > { %s12541_s28 = sld [smem:[#allocation47_spill]] (!%p12540_p1)  ;;  %p12542_p9 = scmp.ne.s32.totalorder (!%p12540_p1), %s12533_s0, 0 }
 0x23c   : > { %772 = sbr.rel (%p12540_p1) target bundleno = 5943 (0x1737), region = 100 }
 0x241   : > { %s11865_s24 = sand.u32 (!%p12540_p1), 1, %s12541_s28  }
 0x242   : > { %s775_s3 = scalar_lea.sflag (!%p12540_p1), [#allocation4], %s11865_s24  ;;  %s777_s23 = scalar_lea.vmem (!%p12540_p1), [#allocation3], %s11865_s24 }
 0x243   : > { %11118 = dma.done.wait (%p12542_p9), %s775_s3, 16  }
 0x244   : > { %11120 = vsyncadd (%p12542_p9), %s775_s3, 4294967280  ;;  %s12543_s27 = sld [smem:[#allocation50_spill]]  ;;  %s7731_s21 = sshll.u32 %s11865_s24, 3 }
 0x245   : > { %s11875_s6 = scalar_lea.vmem [#allocation5], %s7731_s21 }
 0x24a   : > { %s782_s8 = sand.u32 1, %s12543_s27  }
 0x24b   : > { %s783_s4 = scalar_lea.sflag [#allocation6], %s782_s8 }
 0x24c   : > { %11122 = dma.done.wait (%p12542_p9), %s783_s4, 128  }
 0x24d   : > { %11124 = vsyncadd (%p12542_p9), %s783_s4, 4294967168  ;;  %p12544_p6 = scmp.eq.s32.totalorder %s12543_s27, 0 }
 0x24f   : > { %11126 = dma.done.wait (%p12544_p6), [#allocation6], 256   ;;  %p12545_p5 = pmov %p12544_p6 }
 0x251   : > { %11128 = vsyncadd (%p12545_p5), [#allocation6], 4294967040  ;;  %p12546_p4 = pmov %p12545_p5 }
 0x253   : > { %11130 = dma.done.wait (%p12546_p4), [#allocation9], 27776   ;;  %p12547_p8 = pmov %p12546_p4 }
 0x254   : > { %p12548_p10 = pmov %p12546_p4 }
 0x255   : > { %11132 = vsyncadd (%p12547_p8), [#allocation9], 4294939520 }
 0x256   : > { %11134 = dma.done.wait (%p12548_p10), [#allocation12], 73760   ;;  %p12549_p12 = pmov %p12546_p4 }
 0x257   : > { %p12550_p7 = pmov %p12546_p4 }
 0x258   : > { %11136 = vsyncadd (%p12549_p12), [#allocation12], 4294893536 }
 0x259   : > { %11138 = dma.done.wait (%p12550_p7), [#allocation15], 36896   ;;  %p12551_p13 = pmov %p12546_p4 }
 0x25a   : > { %p12552_p11 = pmov %p12546_p4 }
 0x25b   : > { %11140 = vsyncadd (%p12551_p13), [#allocation15], 4294930400 }
 0x25c   : > { %11142 = dma.done.wait (%p12552_p11), [#allocation18], 73760   ;;  %p12553_p0 = pmov %p12546_p4 }
 0x25e   : > { %11144 = vsyncadd (%p12553_p0), [#allocation18], 4294893536  ;;  %p12554_p2 = pmov %p12553_p0 }
 0x25f   : > { %p12555_p3 = pmov %p12553_p0 }
 0x260   : > { %11146 = dma.done.wait (%p12554_p2), [#allocation21], 9248  }
 0x261   : > { %11148 = vsyncadd (%p12555_p3), [#allocation21], 4294958048  ;;  %p12556_p1 = pmov %p12553_p0 }
 0x262   : > { %p12557_p9 = pmov %p12553_p0 }
 0x263   : > { %11150 = dma.done.wait (%p12556_p1), [#allocation24], 4112  }
 0x264   : > { %11152 = vsyncadd (%p12557_p9), [#allocation24], 4294963184  ;;  %p12558_p6 = pmov %p12553_p0 }
 0x265   : > { %p12559_p5 = pmov %p12553_p0 }
 0x266   : > { %11154 = dma.done.wait (%p12558_p6), [#allocation27], 1168  }
 0x267   : > { %11156 = vsyncadd (%p12559_p5), [#allocation27], 4294966128  ;;  %p12560_p4 = pmov %p12553_p0 }
 0x268   : > { %p12561_p8 = pmov %p12553_p0 }
 0x269   : > { %11158 = dma.done.wait (%p12560_p4), [#allocation30], 2064  }
 0x26a   : > { %11160 = vsyncadd (%p12561_p8), [#allocation30], 4294965232  ;;  %p12562_p10 = pmov %p12553_p0 }
 0x26b   : > { %p12563_p12 = pmov %p12553_p0 }
 0x26c   : > { %11162 = dma.done.wait (%p12562_p10), [#allocation33], 16  }
 0x26d   : > { %11164 = vsyncadd (%p12563_p12), [#allocation33], 4294967280  ;;  %v11205_v0 = vmov 0.0   ;;  %vm11206_vm0 = vmmov 0   ;;  %vm929_vm1 = vcmask 1044480   ;;  %vm12488_vm2 = vcmask 39936  }
 0x26e   : > { %7942 = vmatprep.subr.mxu0 %v11205_v0  ;;  %2047 = vst [vmem:[#allocation2 + $0x8] sm:$0xff] %v11205_v0  ;;  %2051 = vst [vmem:[#allocation2 + $0x20] sm:$0x3] %v11205_v0  ;;  %7944 = vmatprep.mubr.msk.f32.mxu0 %vm11206_vm0, %v11205_v0  ;;  %v924_v1 = vld [vmem:[#allocation8] sm:$0x1f]  ;;  %v922_v3 = vld [vmem:[#allocation7] sm:$0xff]  ;;  %v1003_v8 = vlaneseq }
 0x26f   : > { %v920_v2 = vld [vmem:[%s777_s23] sm:$0x1]  ;;  %7943 = vmatpush3.msk.msra.mxu0 %vm929_vm1, %v924_v1  ;;  %v923_v4 = vld [vmem:[#allocation7 + $0x8] sm:$0xff]  ;;  %v11207_v5 = vmov 0.0|0.0   ;;  %vm1007_vm3 = vcmask 130048   ;;  %vm1081_vm4 = vcmask 883712  }
 0x270   : > { %7945 = vmatmul.mubr.msk.f32.vlgmr.msra.gmra.mrb[0].mxu0 %vm12488_vm2, %v920_v2  ;;  %8260 = vmatprep.subr.bf16.mxu0 %v11207_v5  ;;  %v8261_v6 = vpack.c.bf16 %v923_v4, %v922_v3  ;;  %v921_v7 = vld [vmem:[%s11875_s6] sm:$0xff]  ;;  %vm1083_vm5 = vcmask 877568   ;;  %1082 = vst.msk [vmem:[#allocation2] sm:$0xff] %vm1081_vm4, %v11205_v0  ;;  %v11938_v9 = vshrl.u32 %v1003_v8, 7  ;;  %s11208_s0 = smov 6   ;;  %v1121_v18 = vld [vmem:[#allocation10 + $0xc8] sm:$0xff] }
 0x271   : > { %7951 = vmatprep.mubr.msk.f32.mxu0 %vm11206_vm0, %v11205_v0  ;;  %1084 = vst.msk [vmem:[#allocation2 + $0x18] sm:$0x3] %vm1083_vm5, %v11205_v0  ;;  %v1123_v19 = vld [vmem:[#allocation10 + $0xd8] sm:$0xff]  ;;  %v1120_v20 = vld [vmem:[#allocation10 + $0xc0] sm:$0xff]  ;;  %v1122_v22 = vld [vmem:[#allocation10 + $0xd0] sm:$0xff]  ;;  %vm1090_vm6 = vcmask 834609  }
 0x272   : > { %8262 = vmatpush3.bf16.msra.mxu0 %v8261_v6  ;;  %v11941_v11 = vsub.s32 0, %v11938_v9  ;;  %v8263_v21 = vpack.c.bf16 %v1123_v19, %v1121_v18  ;;  %v1125_v23 = vld [vmem:[#allocation10 + $0xe8] sm:$0xff]  ;;  %v1127_v24 = vld [vmem:[#allocation10 + $0xf8] sm:$0xff]  ;;  %v8265_v25 = vpack.c.bf16 %v1122_v22, %v1120_v20  ;;  %v1124_v27 = vld [vmem:[#allocation10 + $0xe0] sm:$0xff]  ;;  %vm1092_vm7 = vcmask 827440   ;;  %s11209_s26 = smov 116  }
 0x273   : > { %v8267_v26 = vpack.c.bf16 %v1127_v24, %v1125_v23  ;;  %v1126_v28 = vld [vmem:[#allocation10 + $0xf0] sm:$0xff]  ;;  %v1129_v29 = vld [vmem:[#allocation10 + $0x108] sm:$0xff]  ;;  %v1131_v30 = vld [vmem:[#allocation10 + $0x118] sm:$0xff]  ;;  %vm1425_vm8 = vcmask 1046528   ;;  %s11210_s7 = smov 122   ;;  %vm1737_vm9 = vcmask 1045504  }
 0x274   : > { %8264 = vmatprep.subr.bf16.mxu0 %v8263_v21  ;;  %v8269_v31 = vpack.c.bf16 %v1126_v28, %v1124_v27  ;;  %v8271_v32 = vpack.c.bf16 %v1131_v30, %v1129_v29  ;;  %v1128_v33 = vld [vmem:[#allocation10 + $0x100] sm:$0xff]  ;;  %v1130_v34 = vld [vmem:[#allocation10 + $0x110] sm:$0xff]  ;;  %v1133_v35 = vld [vmem:[#allocation10 + $0x128] sm:$0xff]  ;;  %vm1147_vm10 = vcmask 785408   ;;  %vm2048_vm11 = vcmask 261120   ;;  %s11211_s2 = smov 16  }
 0x275   : > { %7952 = vmatmul.mubr.msk.f32.vlgmr.msra.gmra.mrb[2].mxu0 %vm1007_vm3, %v921_v7  ;;  %v1135_v36 = vld [vmem:[#allocation10 + $0x138] sm:$0xff]  ;;  %v8273_v37 = vpack.c.bf16 %v1130_v34, %v1128_v33  ;;  %v1132_v39 = vld [vmem:[#allocation10 + $0x120] sm:$0xff]  ;;  %v1134_v40 = vld [vmem:[#allocation10 + $0x130] sm:$0xff]  ;;  %vm2052_vm12 = vcmask 254976   ;;  %vm2066_vm15 = vcmask 1047681   ;;  %vm2071_vm4 = vcmask 1040512  }
 0x276   : > { %1214 = vmatprep.mubr.f32.mxu0 %v11205_v0  ;;  %8266 = vmatpush1.bf16.msra.mxu0 %v8265_v25  ;;  %v8275_v38 = vpack.c.bf16 %v1135_v36, %v1133_v35  ;;  %v1137_v41 = vld [vmem:[#allocation10 + $0x148] sm:$0xff]  ;;  %v1139_v42 = vld [vmem:[#allocation10 + $0x158] sm:$0xff]  ;;  %v8277_v43 = vpack.c.bf16 %v1134_v40, %v1132_v39  ;;  %v1136_v45 = vld [vmem:[#allocation10 + $0x140] sm:$0xff]  ;;  %vm2069_vm5 = vcmask 130049   ;;  %s11212_s5 = smov 112   ;;  %s11213_s1 = smov 96  }
 0x277   : > { %8268 = vmatprep.subr.bf16.mxu0 %v8267_v26  ;;  %v8279_v44 = vpack.c.bf16 %v1139_v42, %v1137_v41  ;;  %v1138_v46 = vld [vmem:[#allocation10 + $0x150] sm:$0xff]  ;;  %v1141_v47 = vld [vmem:[#allocation10 + $0x168] sm:$0xff]  ;;  %v1143_v48 = vld [vmem:[#allocation10 + $0x178] sm:$0xff]  ;;  %s11214_s16 = smov 80   ;;  %s11215_s9 = smov 64   ;;  %vm3526_vm2 = vcmask 1048448  }
 0x278   : > { %v8281_v49 = vpack.c.bf16 %v1138_v46, %v1136_v45  ;;  %v8283_v50 = vpack.c.bf16 %v1143_v48, %v1141_v47  ;;  %v1140_v51 = vld [vmem:[#allocation10 + $0x160] sm:$0xff]  ;;  %v1142_v52 = vld [vmem:[#allocation10 + $0x170] sm:$0xff]  ;;  %v1096_v53 = vld [vmem:[#allocation10 + $0x8] sm:$0xff]  ;;  %s11216_s28 = smov 48   ;;  %s11217_s3 = smov 32  }
 0x279   : > { %v1098_v54 = vld [vmem:[#allocation10 + $0x18] sm:$0xff]  ;;  %v8285_v55 = vpack.c.bf16 %v1142_v52, %v1140_v51  ;;  %v1095_v7 = vld [vmem:[#allocation10] sm:$0xff]  ;;  %v1097_v8 = vld [vmem:[#allocation10 + $0x10] sm:$0xff]  ;;  %p917_p7 = scmp.lt.s32.totalorder %s12543_s27, 1  ;;  %s12565_s8 = sld [smem:[#allocation65_spill]] }
 0x27a   : > { %8270 = vmatpush1.bf16.msra.mxu0 %v8269_v31  ;;  %v8287_v56 = vpack.c.bf16 %v1098_v54, %v1096_v53  ;;  %v1104_v18 = vld [vmem:[#allocation10 + $0x48] sm:$0xff]  ;;  %v1106_v19 = vld [vmem:[#allocation10 + $0x58] sm:$0xff]  ;;  %v1103_v22 = vld [vmem:[#allocation10 + $0x40] sm:$0xff] }
 0x27b   : > { %8272 = vmatprep.subr.bf16.mxu0 %v8271_v32  ;;  %v8295_v21 = vpack.c.bf16 %v1106_v19, %v1104_v18  ;;  %v1105_v23 = vld [vmem:[#allocation10 + $0x50] sm:$0xff]  ;;  %v1108_v24 = vld [vmem:[#allocation10 + $0x68] sm:$0xff]  ;;  %v1110_v25 = vld [vmem:[#allocation10 + $0x78] sm:$0xff]  ;;  %s12573_s27 = smov (!%p917_p7, %s12543_s27), 1 }
 0x27c   : > { %v8297_v26 = vpack.c.bf16 %v1105_v23, %v1103_v22  ;;  %v8299_v27 = vpack.c.bf16 %v1110_v25, %v1108_v24  ;;  %v1107_v28 = vld [vmem:[#allocation10 + $0x60] sm:$0xff]  ;;  %v1109_v29 = vld [vmem:[#allocation10 + $0x70] sm:$0xff]  ;;  %v1112_v30 = vld [vmem:[#allocation10 + $0x88] sm:$0xff] }
 0x27d   : > { %v1114_v31 = vld [vmem:[#allocation10 + $0x98] sm:$0xff]  ;;  %v8301_v32 = vpack.c.bf16 %v1109_v29, %v1107_v28  ;;  %v1111_v34 = vld [vmem:[#allocation10 + $0x80] sm:$0xff]  ;;  %v1113_v35 = vld [vmem:[#allocation10 + $0x90] sm:$0xff] }
 0x27e   : > { %8274 = vmatpush1.bf16.msra.mxu0 %v8273_v37  ;;  %v8303_v33 = vpack.c.bf16 %v1114_v31, %v1112_v30  ;;  %v1116_v36 = vld [vmem:[#allocation10 + $0xa8] sm:$0xff]  ;;  %v1118_v37 = vld [vmem:[#allocation10 + $0xb8] sm:$0xff]  ;;  %v1115_v40 = vld [vmem:[#allocation10 + $0xa0] sm:$0xff] }
 0x27f   : > { %8276 = vmatprep.subr.bf16.mxu0 %v8275_v38  ;;  %v8305_v38 = vpack.c.bf16 %v1113_v35, %v1111_v34  ;;  %v8307_v39 = vpack.c.bf16 %v1118_v37, %v1116_v36  ;;  %v1117_v41 = vld [vmem:[#allocation10 + $0xb0] sm:$0xff]  ;;  %v1296_v42 = vld [vmem:[#allocation10 + $0x188] sm:$0xff]  ;;  %v1295_v46 = vld [vmem:[#allocation10 + $0x180] sm:$0xff]  ;;  %s919_s21 = scalar_lea.vmem %s12565_s8, %s12573_s27 }
 0x280   : > { %v1297_v47 = vld [vmem:[#allocation10 + $0x190] sm:$0xff]  ;;  %v1300_v48 = vld [vmem:[#allocation10 + $0x1a8] sm:$0xff]  ;;  %v1299_v52 = vld [vmem:[#allocation10 + $0x1a0] sm:$0xff] }
 0x281   : > { %v1301_v53 = vld [vmem:[#allocation10 + $0x1b0] sm:$0xff]  ;;  %v1304_v54 = vld [vmem:[#allocation10 + $0x1c8] sm:$0xff]  ;;  %v1315_v18 = vld [vmem:[#allocation10 + $0x220] sm:$0xff] }
 0x282   : > { %8278 = vmatpush1.bf16.msra.mxu0 %v8277_v43  ;;  %v1298_v43 = vld [vmem:[#allocation10 + $0x198] sm:$0xff]  ;;  %v1317_v19 = vld [vmem:[#allocation10 + $0x230] sm:$0xff]  ;;  %v1399_v24 = vld [vmem:[#allocation10 + $0x240] sm:$0xff] }
 0x283   : > { %8280 = vmatprep.subr.bf16.mxu0 %v8279_v44  ;;  %v8309_v44 = vpack.c.bf16 %v1117_v41, %v1115_v40  ;;  %v8311_v45 = vpack.c.bf16 %v1298_v43, %v1296_v42  ;;  %v8333_v22 = vpack.c.bf16 %v1317_v19, %v1315_v18  ;;  %v1401_v25 = vld [vmem:[#allocation10 + $0x250] sm:$0xff]  ;;  %v1403_v30 = vld [vmem:[#allocation10 + $0x260] sm:$0xff]  ;;  %v1410_v34 = vld [vmem:[#allocation10 + $0x298] sm:$0xff] }
 0x284   : > { %v8337_v28 = vpack.c.bf16 %v1401_v25, %v1399_v24  ;;  %v1405_v31 = vld [vmem:[#allocation10 + $0x270] sm:$0xff]  ;;  %v1407_v37 = vld [vmem:[#allocation10 + $0x280] sm:$0xff]  ;;  %v1414_v40 = vld [vmem:[#allocation10 + $0x2b8] sm:$0xff] }
 0x285   : > { %v8341_v35 = vpack.c.bf16 %v1405_v31, %v1403_v30  ;;  %v1411_v43 = vld [vmem:[#allocation10 + $0x2a0] sm:$0xff]  ;;  %v1520_v18 = vld [vmem:[#allocation10 + $0x378] sm:$0xff] }
 0x286   : > { %8282 = vmatpush1.bf16.msra.mxu0 %v8281_v49  ;;  %v1302_v49 = vld [vmem:[#allocation10 + $0x1b8] sm:$0xff] }
 0x287   : > { %8284 = vmatprep.subr.bf16.mxu0 %v8283_v50  ;;  %v8313_v50 = vpack.c.bf16 %v1297_v47, %v1295_v46  ;;  %v8315_v51 = vpack.c.bf16 %v1302_v49, %v1300_v48  ;;  %v1418_v46 = vld [vmem:[#allocation10 + $0x2d8] sm:$0xff]  ;;  %v1415_v49 = vld [vmem:[#allocation10 + $0x2c0] sm:$0xff] }
 0x288   : > { %v1524_v24 = vld [vmem:[#allocation10 + $0x398] sm:$0xff] }
 0x28a   : > { %8286 = vmatpush1.bf16.msra.mxu0 %v8285_v55  ;;  %v1306_v55 = vld [vmem:[#allocation10 + $0x1d8] sm:$0xff] }
 0x28b   : > { %8288 = vmatprep.subr.bf16.mxu0 %v8287_v56  ;;  %v8317_v56 = vpack.c.bf16 %v1301_v53, %v1299_v52  ;;  %v1422_v52 = vld [vmem:[#allocation10 + $0x2f8] sm:$0xff] }
 0x343   : > { %v999_v10 = vpop.f32.mrb[0].mxu0 }
 0x344   : > { %v7946_v12 = vpop.f32.mrb[1].mxu0  ;;  %v1006_v13 = vrot.slane %v999_v10, %v11941_v11  ;;  %v1100_v10 = vld [vmem:[#allocation10 + $0x28] sm:$0xff] }
 0x345   : > { %v1102_v12 = vld [vmem:[#allocation10 + $0x38] sm:$0xff] }
 0x348   : > { %v1077_v14 = vpop.f32.mrb[2].mxu0 }
 0x349   : > { %v1078_v15 = vadd.f32 %v1077_v14, %v1006_v13  ;;  %v7953_v16 = vpop.f32.mrb[3].mxu0  ;;  %v8289_v13 = vpack.c.bf16 %v1097_v8, %v1095_v7  ;;  %v8291_v14 = vpack.c.bf16 %v1102_v12, %v1100_v10  ;;  %v1312_v7 = vld [vmem:[#allocation10 + $0x208] sm:$0xff]  ;;  %v1314_v8 = vld [vmem:[#allocation10 + $0x218] sm:$0xff]  ;;  %v1311_v12 = vld [vmem:[#allocation10 + $0x200] sm:$0xff] }
 0x34a   : > { %v1101_v16 = vld [vmem:[#allocation10 + $0x30] sm:$0xff]  ;;  %v8327_v10 = vpack.c.bf16 %v1314_v8, %v1312_v7  ;;  %v1509_v8 = vld [vmem:[#allocation10 + $0x320] sm:$0xff] }
 0x34b   : > { %v1086_v17 = vrot.slane %v1078_v15, 7  ;;  %v1099_v15 = vld [vmem:[#allocation10 + $0x20] sm:$0xff] }
 0x34c   : > { %v8293_v20 = vpack.c.bf16 %v1101_v16, %v1099_v15  ;;  %v1318_v15 = vld [vmem:[#allocation10 + $0x238] sm:$0xff] }
 0x34d   : > { %1087 = vrot.lane.b32.xlu0 %v1086_v17, %s11208_s0 }
 0x3bf   : > { %v1088_v57 = vpop.permute.xlu0 %1087 }
 0x3c0   : > { %1091 = vst.msk [vmem:[#allocation2] sm:$0xfe] %vm1090_vm6, %v1088_v57  ;;  %vm2074_vm6 = vcmask 122880  }
 0x3c1   : > { %1093 = vst.msk [vmem:[#allocation2 + $0x18] sm:$0x1] %vm1092_vm7, %v1088_v57  ;;  %v8319_v57 = vpack.c.bf16 %v1306_v55, %v1304_v54  ;;  %v1419_v55 = vld [vmem:[#allocation10 + $0x2e0] sm:$0xff]  ;;  %vm2217_vm7 = vcmask 916480  }
 0x3c7   : > { %v1396_v58 = vld [vmem:[#allocation2] sm:$0xfe] }
 0x3c8   : > { %v1397_v59 = vld [vmem:[#allocation2 + $0x18] sm:$0x1]  ;;  %v1708_v60 = vld [vmem:[#allocation2] sm:$0xfc]  ;;  %v1426_v63 = vrot.slane %v1396_v58, 1  ;;  %v1303_v58 = vld [vmem:[#allocation10 + $0x1c0] sm:$0xff] }
 0x3c9   : > { %v1709_v61 = vld [vmem:[#allocation2 + $0x18] sm:$0x3]  ;;  %v11944_v62 = vld [vmem:[#allocation2] sm:$0xff]  ;;  %v1427_v1 = vrot.slane %v1397_v59, 1  ;;  %v1738_v3 = vrot.slane %v1708_v60, 2  ;;  %v1305_v59 = vld [vmem:[#allocation10 + $0x1d0] sm:$0xff] }
 0x3ca   : > { %2050 = vst [vmem:[#allocation2 + $0x18] sm:$0x3] %v11205_v0  ;;  %1319 = vrot.lane.b32.xlu1 %v11944_v62, %s11209_s26  ;;  %2046 = vst [vmem:[#allocation2] sm:$0xff] %v11205_v0  ;;  %1145 = vrot.lane.b32.xlu0 %v11944_v62, %s11210_s7  ;;  %v1739_v4 = vrot.slane %v1709_v61, 2  ;;  %v1308_v60 = vld [vmem:[#allocation10 + $0x1e8] sm:$0xff]  ;;  %v1310_v61 = vld [vmem:[#allocation10 + $0x1f8] sm:$0xff] }
 0x3cb   : > { %v11951_v2 = vsel %vm1425_vm8, %v1426_v63, %v1427_v1  ;;  %v8321_v63 = vpack.c.bf16 %v1305_v59, %v1303_v58  ;;  %v8323_v1 = vpack.c.bf16 %v1310_v61, %v1308_v60  ;;  %v1508_v58 = vld [vmem:[#allocation10 + $0x318] sm:$0xff]  ;;  %v1505_v61 = vld [vmem:[#allocation10 + $0x300] sm:$0xff] }
 0x3cc   : > { %v11956_v6 = vsel %vm1737_vm9, %v1738_v3, %v1739_v4  ;;  %v1307_v3 = vld [vmem:[#allocation10 + $0x1e0] sm:$0xff]  ;;  %v1309_v4 = vld [vmem:[#allocation10 + $0x1f0] sm:$0xff] }
 0x3ce   : > { %1529 = vrot.lane.b32.xlu1 %v11951_v2, %s11210_s7  ;;  %1631 = vrot.lane.b32.xlu0 %v11951_v2, %s11209_s26 }
 0x3d2   : > { %1841 = vrot.lane.b32.xlu1 %v11956_v6, %s11210_s7  ;;  %1943 = vrot.lane.b32.xlu0 %v11956_v6, %s11209_s26 }
 0x43c   : > { %v1146_v17 = vpop.permute.xlu0 %1145 }
 0x43d   : > { %7753 = vmatmul.mubr.msk.f32.vlgmr.msra.gmra.mrb[4].mxu0 %vm1147_vm10, %v1146_v17 }
 0x43e   : > { %8290 = vmatpush1.bf16.msra.mxu0 %v8289_v13  ;;  %1287 = vmatprep.mubr.f32.mxu0 %v11205_v0  ;;  %v1313_v13 = vld [vmem:[#allocation10 + $0x210] sm:$0xff] }
 0x43f   : > { %8292 = vmatprep.subr.bf16.mxu0 %v8291_v14  ;;  %v1316_v14 = vld [vmem:[#allocation10 + $0x228] sm:$0xff]  ;;  %v8329_v16 = vpack.c.bf16 %v1313_v13, %v1311_v12  ;;  %v1516_v12 = vld [vmem:[#allocation10 + $0x358] sm:$0xff] }
 0x440   : > { %v8331_v17 = vpack.c.bf16 %v1318_v15, %v1316_v14  ;;  %v1513_v15 = vld [vmem:[#allocation10 + $0x340] sm:$0xff] }
 0x442   : > { %8294 = vmatpush1.bf16.msra.mxu0 %v8293_v20  ;;  %v1400_v20 = vld [vmem:[#allocation10 + $0x248] sm:$0xff] }
 0x443   : > { %8296 = vmatprep.subr.bf16.mxu0 %v8295_v21  ;;  %v1402_v21 = vld [vmem:[#allocation10 + $0x258] sm:$0xff] }
 0x444   : > { %v8335_v23 = vpack.c.bf16 %v1402_v21, %v1400_v20  ;;  %v1517_v21 = vld [vmem:[#allocation10 + $0x360] sm:$0xff] }
 0x446   : > { %8298 = vmatpush1.bf16.msra.mxu0 %v8297_v26  ;;  %v1404_v26 = vld [vmem:[#allocation10 + $0x268] sm:$0xff] }
 0x447   : > { %8300 = vmatprep.subr.bf16.mxu0 %v8299_v27  ;;  %v1406_v27 = vld [vmem:[#allocation10 + $0x278] sm:$0xff] }
 0x448   : > { %v8339_v29 = vpack.c.bf16 %v1406_v27, %v1404_v26  ;;  %v1521_v26 = vld [vmem:[#allocation10 + $0x380] sm:$0xff]  ;;  %v1523_v27 = vld [vmem:[#allocation10 + $0x390] sm:$0xff] }
 0x449   : > { %v8377_v30 = vpack.c.bf16 %v1523_v27, %v1521_v26  ;;  %v1722_v26 = vld [vmem:[#allocation10 + $0x4d8] sm:$0xff] }
 0x44a   : > { %8302 = vmatpush1.bf16.msra.mxu0 %v8301_v32  ;;  %v1320_v32 = vpop.permute.xlu1 %1319 }
 0x44b   : > { %8304 = vmatprep.subr.bf16.mxu0 %v8303_v33  ;;  %v1408_v33 = vld [vmem:[#allocation10 + $0x288] sm:$0xff] }
 0x44c   : > { %v8343_v36 = vpack.c.bf16 %v1410_v34, %v1408_v33  ;;  %v1527_v33 = vld [vmem:[#allocation10 + $0x3b0] sm:$0xff]  ;;  %v1608_v34 = vld [vmem:[#allocation10 + $0x3c8] sm:$0xff] }
 0x44e   : > { %8306 = vmatpush1.bf16.msra.mxu0 %v8305_v38  ;;  %v1409_v38 = vld [vmem:[#allocation10 + $0x290] sm:$0xff] }
 0x44f   : > { %8308 = vmatprep.subr.bf16.mxu0 %v8307_v39  ;;  %v1412_v39 = vld [vmem:[#allocation10 + $0x2a8] sm:$0xff]  ;;  %v8345_v41 = vpack.c.bf16 %v1409_v38, %v1407_v37  ;;  %v1607_v38 = vld [vmem:[#allocation10 + $0x3c0] sm:$0xff] }
 0x450   : > { %v8347_v42 = vpack.c.bf16 %v1414_v40, %v1412_v39  ;;  %v1609_v39 = vld [vmem:[#allocation10 + $0x3d0] sm:$0xff]  ;;  %v1612_v40 = vld [vmem:[#allocation10 + $0x3e8] sm:$0xff] }
 0x452   : > { %8310 = vmatpush1.bf16.msra.mxu0 %v8309_v44  ;;  %v1413_v44 = vld [vmem:[#allocation10 + $0x2b0] sm:$0xff] }
 0x453   : > { %8312 = vmatprep.subr.bf16.mxu0 %v8311_v45  ;;  %v1416_v45 = vld [vmem:[#allocation10 + $0x2c8] sm:$0xff]  ;;  %v8349_v47 = vpack.c.bf16 %v1413_v44, %v1411_v43  ;;  %v1611_v44 = vld [vmem:[#allocation10 + $0x3e0] sm:$0xff] }
 0x454   : > { %v8351_v48 = vpack.c.bf16 %v1418_v46, %v1416_v45  ;;  %v1613_v45 = vld [vmem:[#allocation10 + $0x3f0] sm:$0xff]  ;;  %v1530_v46 = vpop.permute.xlu1 %1529 }
 0x455   : > { %7754 = vmatmul.mubr.msk.f32.vlgmr.msra.gmra.mrb[4].mxu0 %vm1147_vm10, %v11944_v62  ;;  %v8325_v62 = vpack.c.bf16 %v1309_v4, %v1307_v3  ;;  %v1512_v3 = vld [vmem:[#allocation10 + $0x338] sm:$0xff] }
 0x456   : > { %8314 = vmatpush1.bf16.msra.mxu0 %v8313_v50  ;;  %1387 = vmatprep.mubr.f32.mxu0 %v11205_v0  ;;  %v1417_v50 = vld [vmem:[#allocation10 + $0x2d0] sm:$0xff] }
 0x457   : > { %8316 = vmatprep.subr.bf16.mxu0 %v8315_v51  ;;  %v1420_v51 = vld [vmem:[#allocation10 + $0x2e8] sm:$0xff]  ;;  %v8353_v53 = vpack.c.bf16 %v1417_v50, %v1415_v49  ;;  %v8389_v49 = vpack.c.bf16 %v1613_v45, %v1611_v44  ;;  %v1734_v44 = vld [vmem:[#allocation10 + $0x538] sm:$0xff] }
 0x458   : > { %v8355_v54 = vpack.c.bf16 %v1422_v52, %v1420_v51  ;;  %v1615_v51 = vld [vmem:[#allocation10 + $0x400] sm:$0xff]  ;;  %v1617_v52 = vld [vmem:[#allocation10 + $0x410] sm:$0xff] }
 0x45a   : > { %8318 = vmatpush1.bf16.msra.mxu0 %v8317_v56  ;;  %v1421_v56 = vld [vmem:[#allocation10 + $0x2f0] sm:$0xff] }
 0x45b   : > { %8320 = vmatprep.subr.bf16.mxu0 %v8319_v57  ;;  %v1506_v57 = vld [vmem:[#allocation10 + $0x308] sm:$0xff]  ;;  %v8357_v59 = vpack.c.bf16 %v1421_v56, %v1419_v55  ;;  %v8393_v55 = vpack.c.bf16 %v1617_v52, %v1615_v51 }
 0x45c   : > { %v8359_v60 = vpack.c.bf16 %v1508_v58, %v1506_v57  ;;  %v1619_v57 = vld [vmem:[#allocation10 + $0x420] sm:$0xff]  ;;  %v1621_v58 = vld [vmem:[#allocation10 + $0x430] sm:$0xff] }
 0x45e   : > { %8322 = vmatpush1.bf16.msra.mxu0 %v8321_v63  ;;  %v1507_v63 = vld [vmem:[#allocation10 + $0x310] sm:$0xff] }
 0x45f   : > { %8324 = vmatprep.subr.bf16.mxu0 %v8323_v1  ;;  %v1510_v1 = vld [vmem:[#allocation10 + $0x328] sm:$0xff]  ;;  %v8361_v4 = vpack.c.bf16 %v1507_v63, %v1505_v61  ;;  %v8397_v61 = vpack.c.bf16 %v1621_v58, %v1619_v57 }
 0x460   : > { %v8363_v7 = vpack.c.bf16 %v1512_v3, %v1510_v1  ;;  %v1623_v1 = vld [vmem:[#allocation10 + $0x440] sm:$0xff]  ;;  %v1625_v3 = vld [vmem:[#allocation10 + $0x450] sm:$0xff] }
 0x462   : > { %8326 = vmatpush1.bf16.msra.mxu0 %v8325_v62  ;;  %v1511_v62 = vld [vmem:[#allocation10 + $0x330] sm:$0xff] }
 0x463   : > { %8328 = vmatprep.subr.bf16.mxu0 %v8327_v10  ;;  %v1514_v10 = vld [vmem:[#allocation10 + $0x348] sm:$0xff]  ;;  %v8365_v13 = vpack.c.bf16 %v1511_v62, %v1509_v8  ;;  %v8401_v8 = vpack.c.bf16 %v1625_v3, %v1623_v1 }
 0x464   : > { %v8367_v14 = vpack.c.bf16 %v1516_v12, %v1514_v10  ;;  %v1627_v10 = vld [vmem:[#allocation10 + $0x460] sm:$0xff]  ;;  %v1629_v12 = vld [vmem:[#allocation10 + $0x470] sm:$0xff] }
 0x466   : > { %8330 = vmatpush1.bf16.msra.mxu0 %v8329_v16  ;;  %v1515_v16 = vld [vmem:[#allocation10 + $0x350] sm:$0xff] }
 0x467   : > { %8332 = vmatprep.subr.bf16.mxu0 %v8331_v17  ;;  %v1518_v17 = vld [vmem:[#allocation10 + $0x368] sm:$0xff]  ;;  %v8369_v19 = vpack.c.bf16 %v1515_v16, %v1513_v15  ;;  %v8405_v15 = vpack.c.bf16 %v1629_v12, %v1627_v10 }
 0x468   : > { %v8371_v20 = vpack.c.bf16 %v1520_v18, %v1518_v17  ;;  %v1711_v17 = vld [vmem:[#allocation10 + $0x480] sm:$0xff]  ;;  %v1713_v18 = vld [vmem:[#allocation10 + $0x490] sm:$0xff] }
 0x46a   : > { %8334 = vmatpush1.bf16.msra.mxu0 %v8333_v22  ;;  %v1519_v22 = vld [vmem:[#allocation10 + $0x370] sm:$0xff] }
 0x46b   : > { %8336 = vmatprep.subr.bf16.mxu0 %v8335_v23  ;;  %v1522_v23 = vld [vmem:[#allocation10 + $0x388] sm:$0xff] }
 0x46c   : > { %v8375_v25 = vpack.c.bf16 %v1524_v24, %v1522_v23  ;;  %v1715_v23 = vld [vmem:[#allocation10 + $0x4a0] sm:$0xff]  ;;  %v1717_v24 = vld [vmem:[#allocation10 + $0x4b0] sm:$0xff] }
 0x46d   : > { %7755 = vmatmul.mubr.msk.f32.vlgmr.msra.gmra.mrb[4].mxu0 %vm1147_vm10, %v1320_v32  ;;  %v1525_v32 = vld [vmem:[#allocation10 + $0x3a0] sm:$0xff]  ;;  %v8413_v27 = vpack.c.bf16 %v1717_v24, %v1715_v23 }
 0x46e   : > { %8338 = vmatpush1.bf16.msra.mxu0 %v8337_v28  ;;  %1495 = vmatprep.mubr.f32.mxu0 %v11205_v0  ;;  %v1526_v28 = vld [vmem:[#allocation10 + $0x3a8] sm:$0xff]  ;;  %v1837_v24 = vld [vmem:[#allocation10 + $0x5e0] sm:$0xff] }
 0x46f   : > { %8340 = vmatprep.subr.bf16.mxu0 %v8339_v29  ;;  %v1528_v29 = vld [vmem:[#allocation10 + $0x3b8] sm:$0xff] }
 0x470   : > { %v8379_v31 = vpack.c.bf16 %v1528_v29, %v1526_v28  ;;  %v1719_v29 = vld [vmem:[#allocation10 + $0x4c0] sm:$0xff] }
 0x472   : > { %8342 = vmatpush1.bf16.msra.mxu0 %v8341_v35  ;;  %v1610_v35 = vld [vmem:[#allocation10 + $0x3d8] sm:$0xff] }
 0x473   : > { %8344 = vmatprep.subr.bf16.mxu0 %v8343_v36  ;;  %v8381_v36 = vpack.c.bf16 %v1527_v33, %v1525_v32  ;;  %v8383_v37 = vpack.c.bf16 %v1610_v35, %v1608_v34  ;;  %v1726_v32 = vld [vmem:[#allocation10 + $0x4f8] sm:$0xff]  ;;  %v1723_v35 = vld [vmem:[#allocation10 + $0x4e0] sm:$0xff] }
 0x476   : > { %8346 = vmatpush1.bf16.msra.mxu0 %v8345_v41  ;;  %v1614_v41 = vld [vmem:[#allocation10 + $0x3f8] sm:$0xff] }
 0x477   : > { %8348 = vmatprep.subr.bf16.mxu0 %v8347_v42  ;;  %v8385_v42 = vpack.c.bf16 %v1609_v39, %v1607_v38  ;;  %v8387_v43 = vpack.c.bf16 %v1614_v41, %v1612_v40  ;;  %v1730_v38 = vld [vmem:[#allocation10 + $0x518] sm:$0xff]  ;;  %v1727_v41 = vld [vmem:[#allocation10 + $0x500] sm:$0xff] }
 0x47a   : > { %8350 = vmatpush1.bf16.msra.mxu0 %v8349_v47  ;;  %v1616_v47 = vld [vmem:[#allocation10 + $0x408] sm:$0xff] }
 0x47b   : > { %8352 = vmatprep.subr.bf16.mxu0 %v8351_v48  ;;  %v1618_v48 = vld [vmem:[#allocation10 + $0x418] sm:$0xff] }
 0x47c   : > { %v8391_v50 = vpack.c.bf16 %v1618_v48, %v1616_v47  ;;  %v1731_v47 = vld [vmem:[#allocation10 + $0x520] sm:$0xff]  ;;  %v1733_v48 = vld [vmem:[#allocation10 + $0x530] sm:$0xff] }
 0x47d   : > { %v8429_v51 = vpack.c.bf16 %v1733_v48, %v1731_v47  ;;  %v1931_v48 = vld [vmem:[#allocation10 + $0x660] sm:$0xff] }
 0x47e   : > { %8354 = vmatpush1.bf16.msra.mxu0 %v8353_v53  ;;  %v1620_v53 = vld [vmem:[#allocation10 + $0x428] sm:$0xff] }
 0x47f   : > { %8356 = vmatprep.subr.bf16.mxu0 %v8355_v54  ;;  %v1622_v54 = vld [vmem:[#allocation10 + $0x438] sm:$0xff] }
 0x480   : > { %v8395_v56 = vpack.c.bf16 %v1622_v54, %v1620_v53  ;;  %v1817_v53 = vld [vmem:[#allocation10 + $0x540] sm:$0xff]  ;;  %v1819_v54 = vld [vmem:[#allocation10 + $0x550] sm:$0xff] }
 0x481   : > { %v8433_v57 = vpack.c.bf16 %v1819_v54, %v1817_v53  ;;  %v1935_v54 = vld [vmem:[#allocation10 + $0x680] sm:$0xff] }
 0x482   : > { %8358 = vmatpush1.bf16.msra.mxu0 %v8357_v59  ;;  %v1624_v59 = vld [vmem:[#allocation10 + $0x448] sm:$0xff] }
 0x483   : > { %8360 = vmatprep.subr.bf16.mxu0 %v8359_v60  ;;  %v1626_v60 = vld [vmem:[#allocation10 + $0x458] sm:$0xff] }
 0x484   : > { %v8399_v63 = vpack.c.bf16 %v1626_v60, %v1624_v59  ;;  %v1821_v59 = vld [vmem:[#allocation10 + $0x560] sm:$0xff]  ;;  %v1823_v60 = vld [vmem:[#allocation10 + $0x570] sm:$0xff] }
 0x485   : > { %7756 = vmatmul.mubr.msk.f32.vlgmr.msra.gmra.mrb[4].mxu0 %vm1147_vm10, %v11951_v2  ;;  %v8373_v2 = vpack.c.bf16 %v1519_v22, %v1517_v21  ;;  %v8409_v21 = vpack.c.bf16 %v1713_v18, %v1711_v17  ;;  %v8437_v1 = vpack.c.bf16 %v1823_v60, %v1821_v59  ;;  %v1833_v18 = vld [vmem:[#allocation10 + $0x5c0] sm:$0xff]  ;;  %v1941_v60 = vld [vmem:[#allocation10 + $0x6b0] sm:$0xff] }
 0x486   : > { %8362 = vmatpush1.bf16.msra.mxu0 %v8361_v4  ;;  %1597 = vmatprep.mubr.f32.mxu0 %v11205_v0  ;;  %v1628_v4 = vld [vmem:[#allocation10 + $0x468] sm:$0xff]  ;;  %v1939_v59 = vld [vmem:[#allocation10 + $0x6a0] sm:$0xff] }
 0x487   : > { %8364 = vmatprep.subr.bf16.mxu0 %v8363_v7  ;;  %v1630_v7 = vld [vmem:[#allocation10 + $0x478] sm:$0xff] }
 0x488   : > { %v8403_v62 = vpack.c.bf16 %v1630_v7, %v1628_v4  ;;  %v1825_v4 = vld [vmem:[#allocation10 + $0x580] sm:$0xff]  ;;  %v1827_v7 = vld [vmem:[#allocation10 + $0x590] sm:$0xff] }
 0x489   : > { %v8441_v10 = vpack.c.bf16 %v1827_v7, %v1825_v4  ;;  %v11984_v4 = vsub.s32 1, %v11938_v9 }
 0x48a   : > { %8366 = vmatpush1.bf16.msra.mxu0 %v8365_v13  ;;  %v1712_v13 = vld [vmem:[#allocation10 + $0x488] sm:$0xff] }
 0x48b   : > { %8368 = vmatprep.subr.bf16.mxu0 %v8367_v14  ;;  %v1714_v14 = vld [vmem:[#allocation10 + $0x498] sm:$0xff] }
 0x48c   : > { %v8407_v16 = vpack.c.bf16 %v1714_v14, %v1712_v13  ;;  %v1829_v13 = vld [vmem:[#allocation10 + $0x5a0] sm:$0xff]  ;;  %v1831_v14 = vld [vmem:[#allocation10 + $0x5b0] sm:$0xff] }
 0x48e   : > { %8370 = vmatpush1.bf16.msra.mxu0 %v8369_v19  ;;  %v1716_v19 = vld [vmem:[#allocation10 + $0x4a8] sm:$0xff] }
 0x48f   : > { %8372 = vmatprep.subr.bf16.mxu0 %v8371_v20  ;;  %v1718_v20 = vld [vmem:[#allocation10 + $0x4b8] sm:$0xff] }
 0x490   : > { %v8411_v22 = vpack.c.bf16 %v1718_v20, %v1716_v19  ;;  %v1835_v19 = vld [vmem:[#allocation10 + $0x5d0] sm:$0xff]  ;;  %v1838_v20 = vld [vmem:[#allocation10 + $0x5e8] sm:$0xff] }
 0x492   : > { %8374 = vmatpush1.bf16.msra.mxu0 %v8373_v2  ;;  %v1632_v2 = vpop.permute.xlu0 %1631 }
 0x493   : > { %8376 = vmatprep.subr.bf16.mxu0 %v8375_v25  ;;  %v1720_v25 = vld [vmem:[#allocation10 + $0x4c8] sm:$0xff] }
 0x494   : > { %v8415_v28 = vpack.c.bf16 %v1722_v26, %v1720_v25  ;;  %v1920_v25 = vld [vmem:[#allocation10 + $0x608] sm:$0xff]  ;;  %v1922_v26 = vld [vmem:[#allocation10 + $0x618] sm:$0xff] }
 0x496   : > { %8378 = vmatpush1.bf16.msra.mxu0 %v8377_v30  ;;  %v1721_v30 = vld [vmem:[#allocation10 + $0x4d0] sm:$0xff] }
 0x497   : > { %8380 = vmatprep.subr.bf16.mxu0 %v8379_v31  ;;  %v1724_v31 = vld [vmem:[#allocation10 + $0x4e8] sm:$0xff]  ;;  %v8417_v33 = vpack.c.bf16 %v1721_v30, %v1719_v29  ;;  %v1919_v29 = vld [vmem:[#allocation10 + $0x600] sm:$0xff]  ;;  %v1921_v30 = vld [vmem:[#allocation10 + $0x610] sm:$0xff] }
 0x498   : > { %v8419_v34 = vpack.c.bf16 %v1726_v32, %v1724_v31  ;;  %v1924_v31 = vld [vmem:[#allocation10 + $0x628] sm:$0xff]  ;;  %v1926_v32 = vld [vmem:[#allocation10 + $0x638] sm:$0xff] }
 0x49a   : > { %8382 = vmatpush1.bf16.msra.mxu0 %v8381_v36  ;;  %v1725_v36 = vld [vmem:[#allocation10 + $0x4f0] sm:$0xff] }
 0x49b   : > { %8384 = vmatprep.subr.bf16.mxu0 %v8383_v37  ;;  %v1728_v37 = vld [vmem:[#allocation10 + $0x508] sm:$0xff]  ;;  %v8421_v39 = vpack.c.bf16 %v1725_v36, %v1723_v35  ;;  %v1923_v35 = vld [vmem:[#allocation10 + $0x620] sm:$0xff]  ;;  %v1925_v36 = vld [vmem:[#allocation10 + $0x630] sm:$0xff] }
 0x49c   : > { %v8423_v40 = vpack.c.bf16 %v1730_v38, %v1728_v37  ;;  %v1842_v37 = vpop.permute.xlu1 %1841  ;;  %v1928_v38 = vld [vmem:[#allocation10 + $0x648] sm:$0xff] }
 0x49d   : > { %7757 = vmatmul.mubr.msk.f32.vlgmr.msra.gmra.mrb[4].mxu0 %vm1147_vm10, %v1530_v46 }
 0x49e   : > { %8386 = vmatpush1.bf16.msra.mxu0 %v8385_v42  ;;  %1699 = vmatprep.mubr.f32.mxu0 %v11205_v0  ;;  %v1729_v42 = vld [vmem:[#allocation10 + $0x510] sm:$0xff] }
 0x49f   : > { %8388 = vmatprep.subr.bf16.mxu0 %v8387_v43  ;;  %v1732_v43 = vld [vmem:[#allocation10 + $0x528] sm:$0xff]  ;;  %v8425_v45 = vpack.c.bf16 %v1729_v42, %v1727_v41  ;;  %v1927_v42 = vld [vmem:[#allocation10 + $0x640] sm:$0xff] }
 0x4a0   : > { %v8427_v46 = vpack.c.bf16 %v1734_v44, %v1732_v43  ;;  %v1929_v43 = vld [vmem:[#allocation10 + $0x650] sm:$0xff]  ;;  %v1932_v44 = vld [vmem:[#allocation10 + $0x668] sm:$0xff] }
 0x4a2   : > { %8390 = vmatpush1.bf16.msra.mxu0 %v8389_v49  ;;  %v1818_v49 = vld [vmem:[#allocation10 + $0x548] sm:$0xff] }
 0x4a3   : > { %8392 = vmatprep.subr.bf16.mxu0 %v8391_v50  ;;  %v1820_v50 = vld [vmem:[#allocation10 + $0x558] sm:$0xff] }
 0x4a4   : > { %v8431_v52 = vpack.c.bf16 %v1820_v50, %v1818_v49  ;;  %v1933_v49 = vld [vmem:[#allocation10 + $0x670] sm:$0xff]  ;;  %v1936_v50 = vld [vmem:[#allocation10 + $0x688] sm:$0xff] }
 0x4a6   : > { %8394 = vmatpush1.bf16.msra.mxu0 %v8393_v55  ;;  %v1822_v55 = vld [vmem:[#allocation10 + $0x568] sm:$0xff] }
 0x4a7   : > { %8396 = vmatprep.subr.bf16.mxu0 %v8395_v56  ;;  %v1824_v56 = vld [vmem:[#allocation10 + $0x578] sm:$0xff] }
 0x4a8   : > { %v8435_v58 = vpack.c.bf16 %v1824_v56, %v1822_v55  ;;  %v1940_v55 = vld [vmem:[#allocation10 + $0x6a8] sm:$0xff]  ;;  %v1942_v56 = vld [vmem:[#allocation10 + $0x6b8] sm:$0xff] }
 0x4aa   : > { %8398 = vmatpush1.bf16.msra.mxu0 %v8397_v61  ;;  %v1826_v61 = vld [vmem:[#allocation10 + $0x588] sm:$0xff] }
 0x4ab   : > { %8400 = vmatprep.subr.bf16.mxu0 %v8399_v63  ;;  %v1828_v63 = vld [vmem:[#allocation10 + $0x598] sm:$0xff] }
 0x4ac   : > { %v8439_v3 = vpack.c.bf16 %v1828_v63, %v1826_v61  ;;  %v8477_v61 = vpack.c.bf16 %v1941_v60, %v1939_v59  ;;  %v1944_v63 = vpop.permute.xlu0 %1943 }
 0x4ae   : > { %8402 = vmatpush1.bf16.msra.mxu0 %v8401_v8  ;;  %v1830_v8 = vld [vmem:[#allocation10 + $0x5a8] sm:$0xff] }
 0x4af   : > { %8404 = vmatprep.subr.bf16.mxu0 %v8403_v62  ;;  %v1832_v62 = vld [vmem:[#allocation10 + $0x5b8] sm:$0xff] }
 0x4b0   : > { %v8443_v12 = vpack.c.bf16 %v1832_v62, %v1830_v8 }
 0x4b2   : > { %8406 = vmatpush1.bf16.msra.mxu0 %v8405_v15  ;;  %v1834_v15 = vld [vmem:[#allocation10 + $0x5c8] sm:$0xff] }
 0x4b3   : > { %8408 = vmatprep.subr.bf16.mxu0 %v8407_v16  ;;  %v1836_v16 = vld [vmem:[#allocation10 + $0x5d8] sm:$0xff] }
 0x4b4   : > { %v8447_v17 = vpack.c.bf16 %v1836_v16, %v1834_v15 }
 0x4b5   : > { %7758 = vmatmul.mubr.msk.f32.vlgmr.msra.gmra.mrb[4].mxu0 %vm1147_vm10, %v1632_v2  ;;  %v1839_v2 = vld [vmem:[#allocation10 + $0x5f0] sm:$0xff] }
 0x4b6   : > { %8410 = vmatpush1.bf16.msra.mxu0 %v8409_v21  ;;  %1807 = vmatprep.mubr.f32.mxu0 %v11205_v0  ;;  %v1840_v21 = vld [vmem:[#allocation10 + $0x5f8] sm:$0xff] }
 0x4b7   : > { %8412 = vmatprep.subr.bf16.mxu0 %v8411_v22  ;;  %v8449_v22 = vpack.c.bf16 %v1835_v19, %v1833_v18  ;;  %v8451_v23 = vpack.c.bf16 %v1840_v21, %v1838_v20 }
 0x4ba   : > { %8414 = vmatpush1.bf16.msra.mxu0 %v8413_v27  ;;  %v8453_v27 = vpack.c.bf16 %v1839_v2, %v1837_v24  ;;  %v2145_v24 = vld [vmem:[#allocation13 + $0x208] sm:$0xff]  ;;  %v2147_v2 = vld [vmem:[#allocation13 + $0x218] sm:$0xff] }
 0x4bb   : > { %8416 = vmatprep.subr.bf16.mxu0 %v8415_v28  ;;  %v8455_v28 = vpack.c.bf16 %v1922_v26, %v1920_v25  ;;  %v2144_v25 = vld [vmem:[#allocation13 + $0x200] sm:$0xff]  ;;  %v8479_v26 = vpack.c.bf16 %v2147_v2, %v2145_v24  ;;  %v2187_v24 = vld [vmem:[#allocation13 + $0x358] sm:$0xff] }
 0x4bd   : > { %8480 = vmatprep.subr.bf16.mxu1 %v8479_v26  ;;  %v2184_v26 = vld [vmem:[#allocation13 + $0x340] sm:$0xff] }
 0x4be   : > { %8418 = vmatpush1.bf16.msra.mxu0 %v8417_v33  ;;  %v8457_v33 = vpack.c.bf16 %v1921_v30, %v1919_v29  ;;  %v2151_v29 = vld [vmem:[#allocation13 + $0x238] sm:$0xff] }
 0x4bf   : > { %8420 = vmatprep.subr.bf16.mxu0 %v8419_v34  ;;  %v8459_v34 = vpack.c.bf16 %v1926_v32, %v1924_v31  ;;  %v2148_v32 = vld [vmem:[#allocation13 + $0x220] sm:$0xff] }
 0x4c2   : > { %8422 = vmatpush1.bf16.msra.mxu0 %v8421_v39  ;;  %v1930_v39 = vld [vmem:[#allocation10 + $0x658] sm:$0xff] }
 0x4c3   : > { %8424 = vmatprep.subr.bf16.mxu0 %v8423_v40  ;;  %v8461_v40 = vpack.c.bf16 %v1925_v36, %v1923_v35  ;;  %v8463_v41 = vpack.c.bf16 %v1930_v39, %v1928_v38  ;;  %v2155_v35 = vld [vmem:[#allocation13 + $0x258] sm:$0xff]  ;;  %v2152_v38 = vld [vmem:[#allocation13 + $0x240] sm:$0xff]  ;;  %v2154_v39 = vld [vmem:[#allocation13 + $0x250] sm:$0xff] }
 0x4c6   : > { %8426 = vmatpush1.bf16.msra.mxu0 %v8425_v45  ;;  %v1934_v45 = vld [vmem:[#allocation10 + $0x678] sm:$0xff] }
 0x4c7   : > { %8428 = vmatprep.subr.bf16.mxu0 %v8427_v46  ;;  %v8465_v46 = vpack.c.bf16 %v1929_v43, %v1927_v42  ;;  %v8467_v47 = vpack.c.bf16 %v1934_v45, %v1932_v44  ;;  %v8489_v42 = vpack.c.bf16 %v2154_v39, %v2152_v38  ;;  %v2156_v44 = vld [vmem:[#allocation13 + $0x260] sm:$0xff]  ;;  %v2158_v45 = vld [vmem:[#allocation13 + $0x270] sm:$0xff] }
 0x4c8   : > { %v2192_v38 = vld [vmem:[#allocation13 + $0x380] sm:$0xff]  ;;  %v2194_v39 = vld [vmem:[#allocation13 + $0x390] sm:$0xff] }
 0x4ca   : > { %8430 = vmatpush1.bf16.msra.mxu0 %v8429_v51  ;;  %v1938_v51 = vld [vmem:[#allocation10 + $0x698] sm:$0xff] }
 0x4cb   : > { %8432 = vmatprep.subr.bf16.mxu0 %v8431_v52  ;;  %v8469_v52 = vpack.c.bf16 %v1933_v49, %v1931_v48  ;;  %v8471_v53 = vpack.c.bf16 %v1938_v51, %v1936_v50  ;;  %v8493_v48 = vpack.c.bf16 %v2158_v45, %v2156_v44  ;;  %v2160_v50 = vld [vmem:[#allocation13 + $0x280] sm:$0xff]  ;;  %v2162_v51 = vld [vmem:[#allocation13 + $0x290] sm:$0xff] }
 0x4cc   : > { %v2196_v44 = vld [vmem:[#allocation13 + $0x3a0] sm:$0xff]  ;;  %v2198_v45 = vld [vmem:[#allocation13 + $0x3b0] sm:$0xff] }
 0x4cd   : > { %7759 = vmatmul.mubr.msk.f32.vlgmr.msra.gmra.mrb[4].mxu0 %vm1147_vm10, %v11956_v6  ;;  %v8445_v6 = vpack.c.bf16 %v1831_v14, %v1829_v13 }
 0x4ce   : > { %8434 = vmatpush1.bf16.msra.mxu0 %v8433_v57  ;;  %1909 = vmatprep.mubr.f32.mxu0 %v11205_v0 }
 0x4cf   : > { %8436 = vmatprep.subr.bf16.mxu0 %v8435_v58  ;;  %v8475_v58 = vpack.c.bf16 %v1942_v56, %v1940_v55  ;;  %v2164_v55 = vld [vmem:[#allocation13 + $0x2a0] sm:$0xff]  ;;  %v2166_v56 = vld [vmem:[#allocation13 + $0x2b0] sm:$0xff] }
 0x4d0   : > { %v8501_v59 = vpack.c.bf16 %v2166_v56, %v2164_v55  ;;  %v2204_v56 = vld [vmem:[#allocation13 + $0x3e0] sm:$0xff] }
 0x4d2   : > { %8438 = vmatpush1.bf16.msra.mxu0 %v8437_v1  ;;  %v11980_v1 = vld [vmem:[#allocation2 + $0x8] sm:$0xff] }
 0x4d3   : > { %8440 = vmatprep.subr.bf16.mxu0 %v8439_v3  ;;  %v2020_v3 = vld [vmem:[#allocation11] sm:$0x3]  ;;  %2049 = vst.msk [vmem:[#allocation2 + $0x10] sm:$0xff] %vm2048_vm11, %v11980_v1 }
 0x4d4   : > { %v2025_v7 = vrot.slane %v2020_v3, %v11941_v11  ;;  %v2029_v8 = vrot.slane %v2020_v3, %v11984_v4  ;;  %2053 = vst.msk [vmem:[#allocation2 + $0x28] sm:$0x3] %vm2052_vm12, %v11980_v1  ;;  %v2173_v3 = vld [vmem:[#allocation13 + $0x2e8] sm:$0xff] }
 0x4d6   : > { %8442 = vmatpush1.bf16.msra.mxu0 %v8441_v10 }
 0x4d7   : > { %8444 = vmatprep.subr.bf16.mxu0 %v8443_v12 }
 0x4da   : > { %8446 = vmatpush1.bf16.msra.mxu0 %v8445_v6 }
 0x4db   : > { %8448 = vmatprep.subr.bf16.mxu0 %v8447_v17 }
 0x4de   : > { %8450 = vmatpush1.bf16.msra.mxu0 %v8449_v22 }
 0x4df   : > { %8452 = vmatprep.subr.bf16.mxu0 %v8451_v23 }
 0x4e2   : > { %8454 = vmatpush1.bf16.msra.mxu0 %v8453_v27  ;;  %v2146_v27 = vld [vmem:[#allocation13 + $0x210] sm:$0xff] }
 0x4e3   : > { %8456 = vmatprep.subr.bf16.mxu0 %v8455_v28  ;;  %v2149_v28 = vld [vmem:[#allocation13 + $0x228] sm:$0xff]  ;;  %v8481_v30 = vpack.c.bf16 %v2146_v27, %v2144_v25  ;;  %v2186_v27 = vld [vmem:[#allocation13 + $0x350] sm:$0xff] }
 0x4e4   : > { %v8483_v31 = vpack.c.bf16 %v2151_v29, %v2149_v28  ;;  %v2189_v28 = vld [vmem:[#allocation13 + $0x368] sm:$0xff]  ;;  %v2191_v29 = vld [vmem:[#allocation13 + $0x378] sm:$0xff] }
 0x4e5   : > { %7760 = vmatmul.mubr.msk.f32.vlgmr.msra.gmra.mrb[4].mxu0 %vm1147_vm10, %v1842_v37  ;;  %8482 = vmatpush1.bf16.msra.mxu1 %v8481_v30  ;;  %v8521_v30 = vpack.c.bf16 %v2186_v27, %v2184_v26 }
 0x4e6   : > { %8458 = vmatpush1.bf16.msra.mxu0 %v8457_v33  ;;  %2011 = vmatprep.mubr.f32.mxu0 %v11205_v0  ;;  %v1937_v0 = vld [vmem:[#allocation10 + $0x690] sm:$0xff] }
 0x4e7   : > { %8460 = vmatprep.subr.bf16.mxu0 %v8459_v34  ;;  %v8473_v57 = vpack.c.bf16 %v1937_v0, %v1935_v54  ;;  %v2150_v33 = vld [vmem:[#allocation13 + $0x230] sm:$0xff]  ;;  %v2153_v34 = vld [vmem:[#allocation13 + $0x248] sm:$0xff]  ;;  %8484 = vmatprep.subr.bf16.mxu1 %v8483_v31  ;;  %v8497_v54 = vpack.c.bf16 %v2162_v51, %v2160_v50  ;;  %v8523_v31 = vpack.c.bf16 %v2191_v29, %v2189_v28  ;;  %v2200_v50 = vld [vmem:[#allocation13 + $0x3c0] sm:$0xff] }
 0x4e8   : > { %v8485_v36 = vpack.c.bf16 %v2150_v33, %v2148_v32  ;;  %v8487_v37 = vpack.c.bf16 %v2155_v35, %v2153_v34  ;;  %v2188_v32 = vld [vmem:[#allocation13 + $0x360] sm:$0xff]  ;;  %v2190_v33 = vld [vmem:[#allocation13 + $0x370] sm:$0xff]  ;;  %v2193_v34 = vld [vmem:[#allocation13 + $0x388] sm:$0xff] }
 0x4e9   : > { %v2195_v35 = vld [vmem:[#allocation13 + $0x398] sm:$0xff]  ;;  %v2202_v51 = vld [vmem:[#allocation13 + $0x3d0] sm:$0xff] }
 0x4ea   : > { %8462 = vmatpush1.bf16.msra.mxu0 %v8461_v40  ;;  %v2157_v40 = vld [vmem:[#allocation13 + $0x268] sm:$0xff]  ;;  %8486 = vmatpush1.bf16.msra.mxu1 %v8485_v36  ;;  %v8525_v36 = vpack.c.bf16 %v2190_v33, %v2188_v32 }
 0x4eb   : > { %8464 = vmatprep.subr.bf16.mxu0 %v8463_v41  ;;  %v2159_v41 = vld [vmem:[#allocation13 + $0x278] sm:$0xff]  ;;  %8488 = vmatprep.subr.bf16.mxu1 %v8487_v37  ;;  %v8527_v37 = vpack.c.bf16 %v2195_v35, %v2193_v34 }
 0x4ec   : > { %v8491_v43 = vpack.c.bf16 %v2159_v41, %v2157_v40  ;;  %v2197_v40 = vld [vmem:[#allocation13 + $0x3a8] sm:$0xff]  ;;  %v2199_v41 = vld [vmem:[#allocation13 + $0x3b8] sm:$0xff] }
 0x4ee   : > { %8466 = vmatpush1.bf16.msra.mxu0 %v8465_v46  ;;  %v2161_v46 = vld [vmem:[#allocation13 + $0x288] sm:$0xff]  ;;  %8490 = vmatpush1.bf16.msra.mxu1 %v8489_v42  ;;  %v8529_v42 = vpack.c.bf16 %v2194_v39, %v2192_v38 }
 0x4ef   : > { %8468 = vmatprep.subr.bf16.mxu0 %v8467_v47  ;;  %v2163_v47 = vld [vmem:[#allocation13 + $0x298] sm:$0xff]  ;;  %8492 = vmatprep.subr.bf16.mxu1 %v8491_v43  ;;  %v8531_v43 = vpack.c.bf16 %v2199_v41, %v2197_v40 }
 0x4f0   : > { %v8495_v49 = vpack.c.bf16 %v2163_v47, %v2161_v46  ;;  %v2201_v46 = vld [vmem:[#allocation13 + $0x3c8] sm:$0xff]  ;;  %v2203_v47 = vld [vmem:[#allocation13 + $0x3d8] sm:$0xff] }
 0x4f2   : > { %8470 = vmatpush1.bf16.msra.mxu0 %v8469_v52  ;;  %v2165_v52 = vld [vmem:[#allocation13 + $0x2a8] sm:$0xff]  ;;  %8494 = vmatpush1.bf16.msra.mxu1 %v8493_v48  ;;  %v8533_v48 = vpack.c.bf16 %v2198_v45, %v2196_v44 }
 0x4f3   : > { %8472 = vmatprep.subr.bf16.mxu0 %v8471_v53  ;;  %v2167_v53 = vld [vmem:[#allocation13 + $0x2b8] sm:$0xff]  ;;  %8496 = vmatprep.subr.bf16.mxu1 %v8495_v49  ;;  %v8535_v49 = vpack.c.bf16 %v2203_v47, %v2201_v46  ;;  %v2078_v47 = vld [vmem:[#allocation13] sm:$0xff] }
 0x4f4   : > { %v8499_v0 = vpack.c.bf16 %v2167_v53, %v2165_v52  ;;  %v2205_v52 = vld [vmem:[#allocation13 + $0x3e8] sm:$0xff]  ;;  %v8537_v53 = vpack.c.bf16 %v2202_v51, %v2200_v50  ;;  %v2085_v51 = vld [vmem:[#allocation13 + $0x38] sm:$0xff] }
 0x4f5   : > { %v2083_v50 = vld [vmem:[#allocation13 + $0x28] sm:$0xff] }
 0x4f6   : > { %8474 = vmatpush1.bf16.msra.mxu0 %v8473_v57  ;;  %v2169_v57 = vld [vmem:[#allocation13 + $0x2c8] sm:$0xff]  ;;  %8498 = vmatpush1.bf16.msra.mxu1 %v8497_v54  ;;  %v2207_v54 = vld [vmem:[#allocation13 + $0x3f8] sm:$0xff] }
 0x4f7   : > { %8476 = vmatprep.subr.bf16.mxu0 %v8475_v58  ;;  %v2171_v58 = vld [vmem:[#allocation13 + $0x2d8] sm:$0xff]  ;;  %8500 = vmatprep.subr.bf16.mxu1 %v8499_v0  ;;  %v8539_v0 = vpack.c.bf16 %v2207_v54, %v2205_v52 }
 0x4f8   : > { %v8503_v60 = vpack.c.bf16 %v2171_v58, %v2169_v57  ;;  %v2206_v57 = vld [vmem:[#allocation13 + $0x3f0] sm:$0xff]  ;;  %v2079_v58 = vld [vmem:[#allocation13 + $0x8] sm:$0xff] }
 0x4fa   : > { %8478 = vmatpush1.bf16.msra.mxu0 %v8477_v61  ;;  %v2168_v61 = vld [vmem:[#allocation13 + $0x2c0] sm:$0xff]  ;;  %8502 = vmatpush1.bf16.msra.mxu1 %v8501_v59 }
 0x4fb   : > { %8504 = vmatprep.subr.bf16.mxu1 %v8503_v60  ;;  %v8541_v60 = vpack.c.bf16 %v2206_v57, %v2204_v56  ;;  %v8547_v57 = vpack.c.bf16 %v2085_v51, %v2083_v50  ;;  %v2115_v50 = vld [vmem:[#allocation13 + $0x128] sm:$0xff]  ;;  %v2117_v51 = vld [vmem:[#allocation13 + $0x138] sm:$0xff] }
 0x4fd   : > { %7761 = vmatmul.mubr.msk.f32.vlgmr.msra.gmra.mrb[4].mxu0 %vm1147_vm10, %v1944_v63  ;;  %v2170_v63 = vld [vmem:[#allocation13 + $0x2d0] sm:$0xff] }
 0x4fe   : > { %3700 = vmatprep.mubr.f32.mxu0 %v11980_v1 }
 0x5d0   : > { %v2013_v62 = vpop.f32.mrb[4].mxu0 }
 0x5d1   : > { %v2032_v10 = vadd.f32 %v2025_v7, %v2013_v62  ;;  %v2015_v12 = vpop.f32.mrb[5].mxu0  ;;  %v2175_v7 = vld [vmem:[#allocation13 + $0x2f8] sm:$0xff] }
 0x5d2   : > { %v2033_v13 = vadd.f32 %v2029_v8, %v2015_v12  ;;  %v8505_v8 = vpack.c.bf16 %v2170_v63, %v2168_v61  ;;  %v8507_v62 = vpack.c.bf16 %v2175_v7, %v2173_v3  ;;  %v2174_v12 = vld [vmem:[#allocation13 + $0x2f0] sm:$0xff]  ;;  %v2081_v61 = vld [vmem:[#allocation13 + $0x18] sm:$0xff] }
 0x5d3   : > { %v2036_v14 = vmin.f32 %v2032_v10, 0.0  ;;  %vm2034_vm13 = vcmp.gt.f32.partialorder %v2032_v10, 0.0  ;;  %v8543_v3 = vpack.c.bf16 %v2081_v61, %v2079_v58  ;;  %v2082_v58 = vld [vmem:[#allocation13 + $0x20] sm:$0xff]  ;;  %v2089_v61 = vld [vmem:[#allocation13 + $0x58] sm:$0xff] }
 0x5d4   : > { %v2037_v15 = vmin.f32 %v2033_v13, 0.0  ;;  %vm2035_vm14 = vcmp.gt.f32.partialorder %v2033_v13, 0.0  ;;  %8506 = vmatpush1.bf16.msra.mxu1 %v8505_v8 }
 0x5d5   : > { %v2038_v16 = vmul.f32 1.442695, %v2036_v14  ;;  %v2179_v14 = vld [vmem:[#allocation13 + $0x318] sm:$0xff]  ;;  %8508 = vmatprep.subr.bf16.mxu1 %v8507_v62 }
 0x5d6   : > { %v2040_v6 = vmul.f32 1.442695, %v2037_v15 }
 0x5d7   : > { %10512 = vpow2.f32 %v2038_v16 }
 0x5d8   : > { %10514 = vpow2.f32 %v2040_v6  ;;  %v2176_v6 = vld [vmem:[#allocation13 + $0x300] sm:$0xff] }
 0x5e1   : > { %v10513_v9 = vpop.eup %10512 }
 0x5e2   : > { %v10515_v17 = vpop.eup %10514  ;;  %v7762_v18 = vadd.f32 -1.0, %v10513_v9  ;;  %v2178_v9 = vld [vmem:[#allocation13 + $0x310] sm:$0xff] }
 0x5e3   : > { %v7763_v19 = vadd.f32 -1.0, %v10515_v17  ;;  %v2181_v17 = vld [vmem:[#allocation13 + $0x328] sm:$0xff] }
 0x5e4   : > { %v2044_v20 = vsel %vm2034_vm13, %v2032_v10, %v7762_v18  ;;  %v2172_v10 = vld [vmem:[#allocation13 + $0x2e0] sm:$0xff]  ;;  %v2183_v18 = vld [vmem:[#allocation13 + $0x338] sm:$0xff] }
 0x5e5   : > { %v2056_v21 = vrot.slane %v2044_v20, 7  ;;  %v2045_v22 = vsel %vm2035_vm14, %v2033_v13, %v7763_v19  ;;  %v2177_v13 = vld [vmem:[#allocation13 + $0x308] sm:$0xff]  ;;  %v8509_v15 = vpack.c.bf16 %v2174_v12, %v2172_v10  ;;  %v8513_v19 = vpack.c.bf16 %v2178_v9, %v2176_v6 }
 0x5e6   : > { %v2057_v23 = vrot.slane %v2045_v22, 7  ;;  %v8511_v16 = vpack.c.bf16 %v2179_v14, %v2177_v13  ;;  %v8515_v20 = vpack.c.bf16 %v2183_v18, %v2181_v17  ;;  %v2182_v22 = vld [vmem:[#allocation13 + $0x330] sm:$0xff]  ;;  %vm3490_vm14 = vcmask 261248  }
 0x5e7   : > { %2058 = vrot.lane.b32.xlu1 %v2056_v21, %s11211_s2  ;;  %8510 = vmatpush1.bf16.msra.mxu1 %v8509_v15  ;;  %v2180_v21 = vld [vmem:[#allocation13 + $0x320] sm:$0xff] }
 0x5e8   : > { %2060 = vrot.lane.b32.xlu0 %v2057_v23, %s11211_s2  ;;  %8512 = vmatprep.subr.bf16.mxu1 %v8511_v16  ;;  %v2185_v23 = vld [vmem:[#allocation13 + $0x348] sm:$0xff]  ;;  %v8517_v2 = vpack.c.bf16 %v2182_v22, %v2180_v21 }
 0x5e9   : > { %v8519_v25 = vpack.c.bf16 %v2187_v24, %v2185_v23 }
 0x5eb   : > { %8514 = vmatpush1.bf16.msra.mxu1 %v8513_v19 }
 0x5ec   : > { %8516 = vmatprep.subr.bf16.mxu1 %v8515_v20 }
 0x5ef   : > { %8518 = vmatpush1.bf16.msra.mxu1 %v8517_v2 }
 0x5f0   : > { %8520 = vmatprep.subr.bf16.mxu1 %v8519_v25 }
 0x5f3   : > { %8522 = vmatpush1.bf16.msra.mxu1 %v8521_v30 }
 0x5f4   : > { %8524 = vmatprep.subr.bf16.mxu1 %v8523_v31 }
 0x5f7   : > { %8526 = vmatpush1.bf16.msra.mxu1 %v8525_v36 }
 0x5f8   : > { %8528 = vmatprep.subr.bf16.mxu1 %v8527_v37 }
 0x5fb   : > { %8530 = vmatpush1.bf16.msra.mxu1 %v8529_v42 }
 0x5fc   : > { %8532 = vmatprep.subr.bf16.mxu1 %v8531_v43 }
 0x5ff   : > { %8534 = vmatpush1.bf16.msra.mxu1 %v8533_v48  ;;  %v2080_v48 = vld [vmem:[#allocation13 + $0x10] sm:$0xff] }
 0x600   : > { %8536 = vmatprep.subr.bf16.mxu1 %v8535_v49 }
 0x603   : > { %8538 = vmatpush1.bf16.msra.mxu1 %v8537_v53 }
 0x604   : > { %8540 = vmatprep.subr.bf16.mxu1 %v8539_v0  ;;  %v8545_v0 = vpack.c.bf16 %v2080_v48, %v2078_v47  ;;  %v2110_v48 = vld [vmem:[#allocation13 + $0x100] sm:$0xff] }
 0x607   : > { %8542 = vmatpush1.bf16.msra.mxu1 %v8541_v60  ;;  %v2087_v60 = vld [vmem:[#allocation13 + $0x48] sm:$0xff] }
 0x608   : > { %8544 = vmatprep.subr.bf16.mxu1 %v8543_v3  ;;  %v8551_v3 = vpack.c.bf16 %v2089_v61, %v2087_v60  ;;  %v2120_v60 = vld [vmem:[#allocation13 + $0x150] sm:$0xff]  ;;  %v2123_v61 = vld [vmem:[#allocation13 + $0x168] sm:$0xff] }
 0x659   : > { %v2059_v55 = vpop.permute.xlu1 %2058 }
 0x65a   : > { %2067 = vst.msk [vmem:[#allocation2] sm:$0xfe] %vm2066_vm15, %v2059_v55  ;;  %v2061_v59 = vpop.permute.xlu0 %2060  ;;  %vm3495_vm15 = vcmask 392448  }
 0x65b   : > { %2072 = vst.msk [vmem:[#allocation2 + $0x18] sm:$0x1] %vm2071_vm4, %v2059_v55  ;;  %v2062_v63 = vsel %vm1007_vm3, %v2059_v55, %v2061_v59 }
 0x65c   : > { %2070 = vst.msk [vmem:[#allocation2 + $0x10] sm:$0xfe] %vm2069_vm5, %v2061_v59  ;;  %2068 = vst [vmem:[#allocation2 + $0x8] sm:$0xfe] %v2062_v63  ;;  %vm3511_vm5 = vcmask 654848  }
 0x65d   : > { %2075 = vst.msk [vmem:[#allocation2 + $0x28] sm:$0x1] %vm2074_vm6, %v2061_v59  ;;  %2073 = vst [vmem:[#allocation2 + $0x20] sm:$0x1] %v2062_v63  ;;  %v2084_v59 = vld [vmem:[#allocation13 + $0x30] sm:$0xff] }
 0x65e   : > { %v8549_v63 = vpack.c.bf16 %v2084_v59, %v2082_v58  ;;  %v2118_v59 = vld [vmem:[#allocation13 + $0x140] sm:$0xff] }
 0x661   : > { %v2666_v7 = vld [vmem:[#allocation2] sm:$0xfe] }
 0x662   : > { %v11997_v8 = vld [vmem:[#allocation2] sm:$0xff]  ;;  %v2669_v12 = vld [vmem:[#allocation2 + $0x18] sm:$0x1]  ;;  %v2743_v19 = vrot.slane %v2666_v7, 1 }
 0x663   : > { %v2142_v62 = vld [vmem:[#allocation2 + $0x10] sm:$0xff]  ;;  %2211 = vrot.lane.b32.xlu0 %v11997_v8, %s11212_s5  ;;  %v12001_v10 = vld [vmem:[#allocation2 + $0x8] sm:$0xff]  ;;  %v2744_v20 = vrot.slane %v2669_v12, 1  ;;  %v3137_v28 = vld [vmem:[#allocation2] sm:$0xfc] }
 0x664   : > { %v2667_v13 = vld [vmem:[#allocation2 + $0x8] sm:$0xfe]  ;;  %v10417_v14 = vpack.i.bf16 %v2142_v62, %v12001_v10  ;;  %v2668_v15 = vld [vmem:[#allocation2 + $0x10] sm:$0xfe]  ;;  %v2670_v16 = vld [vmem:[#allocation2 + $0x20] sm:$0x1] }
 0x665   : > { %v2671_v6 = vld [vmem:[#allocation2 + $0x28] sm:$0x1]  ;;  %v2746_v9 = vrot.slane %v2667_v13, 1  ;;  %v2747_v17 = vrot.slane %v2670_v16, 1  ;;  %v2749_v18 = vrot.slane %v2668_v15, 1  ;;  %v2745_v2 = vsel %vm1425_vm8, %v2743_v19, %v2744_v20  ;;  %v2086_v7 = vld [vmem:[#allocation13 + $0x40] sm:$0xff] }
 0x666   : > { %10418 = vrot.lane.b32.xlu1 %v10417_v14, %s11212_s5  ;;  %v2750_v21 = vrot.slane %v2671_v6, 1  ;;  %v3138_v24 = vld [vmem:[#allocation2 + $0x8] sm:$0xfc]  ;;  %v3139_v25 = vld [vmem:[#allocation2 + $0x10] sm:$0xfc]  ;;  %v3214_v35 = vrot.slane %v3137_v28, 2 }
 0x667   : > { %2429 = vrot.lane.b32.xlu0 %v11997_v8, %s11213_s1  ;;  %v2748_v22 = vsel %vm1425_vm8, %v2746_v9, %v2747_v17  ;;  %v3141_v26 = vld [vmem:[#allocation2 + $0x20] sm:$0x3]  ;;  %v3142_v27 = vld [vmem:[#allocation2 + $0x28] sm:$0x3]  ;;  %v3140_v29 = vld [vmem:[#allocation2 + $0x18] sm:$0x3] }
 0x668   : > { %v2751_v23 = vsel %vm1425_vm8, %v2749_v18, %v2750_v21  ;;  %v3217_v31 = vrot.slane %v3138_v24, 2  ;;  %v3218_v32 = vrot.slane %v3141_v26, 2  ;;  %v3220_v33 = vrot.slane %v3139_v25, 2  ;;  %v12014_v37 = vld [vmem:[#allocation2 + $0x8] sm:$0xfe]  ;;  %v2093_v13 = vld [vmem:[#allocation13 + $0x78] sm:$0xff] }
 0x669   : > { %v10427_v30 = vpack.i.bf16 %v2751_v23, %v2748_v22  ;;  %v3221_v34 = vrot.slane %v3142_v27, 2  ;;  %v3215_v36 = vrot.slane %v3140_v29, 2  ;;  %v12016_v38 = vld [vmem:[#allocation2 + $0x20] sm:$0x1]  ;;  %v12018_v39 = vld [vmem:[#allocation2 + $0x8] sm:$0xfc] }
 0x66a   : > { %10423 = vrot.lane.b32.xlu1 %v10417_v14, %s11213_s1  ;;  %v12020_v40 = vld [vmem:[#allocation2 + $0x18] sm:$0x1]  ;;  %v12022_v41 = vld [vmem:[#allocation2 + $0x20] sm:$0x3]  ;;  %3530 = vst.msk [vmem:[#allocation2 + $0x8] sm:$0xff] %vm2048_vm11, %v11980_v1  ;;  %v3219_v43 = vsel %vm1737_vm9, %v3217_v31, %v3218_v32  ;;  %v2088_v62 = vld [vmem:[#allocation13 + $0x50] sm:$0xff] }
 0x66b   : > { %2752 = vrot.lane.b32.xlu0 %v2745_v2, %s11212_s5  ;;  %v12026_v42 = vld [vmem:[#allocation2 + $0x18] sm:$0x3]  ;;  %v3222_v44 = vsel %vm1737_vm9, %v3220_v33, %v3221_v34  ;;  %3532 = vst.msk [vmem:[#allocation2 + $0x20] sm:$0x3] %vm2052_vm12, %v11980_v1  ;;  %v3216_v45 = vsel %vm1737_vm9, %v3214_v35, %v3215_v36  ;;  %v2091_v12 = vld [vmem:[#allocation13 + $0x68] sm:$0xff]  ;;  %v8553_v14 = vpack.c.bf16 %v2088_v62, %v2086_v7  ;;  %v2090_v16 = vld [vmem:[#allocation13 + $0x60] sm:$0xff] }
 0x66c   : > { %3531 = vst [vmem:[#allocation2 + $0x18] sm:$0x3] %v11980_v1  ;;  %v10437_v46 = vpack.i.bf16 %v3222_v44, %v3219_v43  ;;  %v8555_v15 = vpack.c.bf16 %v2093_v13, %v2091_v12  ;;  %v2092_v6 = vld [vmem:[#allocation13 + $0x70] sm:$0xff]  ;;  %v2095_v9 = vld [vmem:[#allocation13 + $0x88] sm:$0xff]  ;;  %v2097_v17 = vld [vmem:[#allocation13 + $0x98] sm:$0xff] }
 0x66d   : > { %v8557_v18 = vpack.c.bf16 %v2092_v6, %v2090_v16  ;;  %v8559_v19 = vpack.c.bf16 %v2097_v17, %v2095_v9  ;;  %v2096_v20 = vld [vmem:[#allocation13 + $0x90] sm:$0xff]  ;;  %v2099_v21 = vld [vmem:[#allocation13 + $0xa8] sm:$0xff]  ;;  %v2101_v22 = vld [vmem:[#allocation13 + $0xb8] sm:$0xff] }
 0x66e   : > { %10428 = vrot.lane.b32.xlu1 %v10427_v30, %s11212_s5  ;;  %v8563_v24 = vpack.c.bf16 %v2101_v22, %v2099_v21  ;;  %v2100_v25 = vld [vmem:[#allocation13 + $0xb0] sm:$0xff]  ;;  %v2103_v26 = vld [vmem:[#allocation13 + $0xc8] sm:$0xff]  ;;  %v2105_v27 = vld [vmem:[#allocation13 + $0xd8] sm:$0xff] }
 0x66f   : > { %2900 = vrot.lane.b32.xlu0 %v2745_v2, %s11213_s1  ;;  %v2098_v2 = vld [vmem:[#allocation13 + $0xa0] sm:$0xff]  ;;  %v8567_v29 = vpack.c.bf16 %v2105_v27, %v2103_v26  ;;  %v2104_v31 = vld [vmem:[#allocation13 + $0xd0] sm:$0xff]  ;;  %v2107_v32 = vld [vmem:[#allocation13 + $0xe8] sm:$0xff] }
 0x670   : > { %v8565_v28 = vpack.c.bf16 %v2100_v25, %v2098_v2  ;;  %v2109_v33 = vld [vmem:[#allocation13 + $0xf8] sm:$0xff]  ;;  %v2106_v36 = vld [vmem:[#allocation13 + $0xe0] sm:$0xff]  ;;  %v2108_v43 = vld [vmem:[#allocation13 + $0xf0] sm:$0xff] }
 0x671   : > { %v8571_v35 = vpack.c.bf16 %v2109_v33, %v2107_v32  ;;  %v2111_v44 = vld [vmem:[#allocation13 + $0x108] sm:$0xff]  ;;  %v2122_v62 = vld [vmem:[#allocation13 + $0x160] sm:$0xff]  ;;  %v2124_v12 = vld [vmem:[#allocation13 + $0x170] sm:$0xff] }
 0x672   : > { %10433 = vrot.lane.b32.xlu1 %v10427_v30, %s11213_s1  ;;  %v2102_v30 = vld [vmem:[#allocation13 + $0xc0] sm:$0xff]  ;;  %v2127_v13 = vld [vmem:[#allocation13 + $0x188] sm:$0xff]  ;;  %v2128_v9 = vld [vmem:[#allocation13 + $0x190] sm:$0xff] }
 0x673   : > { %3223 = vrot.lane.b32.xlu0 %v3216_v45, %s11212_s5  ;;  %v8569_v34 = vpack.c.bf16 %v2104_v31, %v2102_v30  ;;  %v2126_v6 = vld [vmem:[#allocation13 + $0x180] sm:$0xff]  ;;  %v2131_v17 = vld [vmem:[#allocation13 + $0x1a8] sm:$0xff]  ;;  %v2132_v21 = vld [vmem:[#allocation13 + $0x1b0] sm:$0xff] }
 0x674   : > { %v2135_v22 = vld [vmem:[#allocation13 + $0x1c8] sm:$0xff]  ;;  %v2134_v25 = vld [vmem:[#allocation13 + $0x1c0] sm:$0xff]  ;;  %v2136_v26 = vld [vmem:[#allocation13 + $0x1d0] sm:$0xff] }
 0x675   : > { %v2139_v27 = vld [vmem:[#allocation13 + $0x1e8] sm:$0xff]  ;;  %v2138_v31 = vld [vmem:[#allocation13 + $0x1e0] sm:$0xff]  ;;  %v2140_v32 = vld [vmem:[#allocation13 + $0x1f0] sm:$0xff] }
 0x676   : > { %10438 = vrot.lane.b32.xlu1 %v10437_v46, %s11212_s5  ;;  %v2366_v33 = vld [vmem:[#allocation13 + $0x408] sm:$0xff] }
 0x677   : > { %3371 = vrot.lane.b32.xlu0 %v3216_v45, %s11213_s1  ;;  %v2113_v45 = vld [vmem:[#allocation13 + $0x118] sm:$0xff] }
 0x678   : > { %v8575_v47 = vpack.c.bf16 %v2113_v45, %v2111_v44  ;;  %v2365_v44 = vld [vmem:[#allocation13 + $0x400] sm:$0xff]  ;;  %v2367_v45 = vld [vmem:[#allocation13 + $0x410] sm:$0xff] }
 0x67a   : > { %10443 = vrot.lane.b32.xlu1 %v10437_v46, %s11213_s1  ;;  %v8573_v46 = vpack.c.bf16 %v2108_v43, %v2106_v36  ;;  %v8605_v36 = vpack.c.bf16 %v2140_v32, %v2138_v31  ;;  %v2398_v31 = vld [vmem:[#allocation13 + $0x508] sm:$0xff]  ;;  %v2400_v32 = vld [vmem:[#allocation13 + $0x518] sm:$0xff] }
 0x6d5   : > { %v2212_v54 = vpop.permute.xlu0 %2211 }
 0x6d8   : > { %v10419_v49 = vpop.permute.xlu1 %10418 }
 0x6d9   : > { %v10421_v52 = vunpack.i.h.bf16 %v10419_v49  ;;  %v10420_v53 = vunpack.i.l.bf16 %v10419_v49  ;;  %v2112_v49 = vld [vmem:[#allocation13 + $0x110] sm:$0xff] }
 0x6db   : > { %v2219_v55 = vsel %vm2217_vm7, %v10420_v53, %v10421_v52  ;;  %v2218_v56 = vsel %vm2217_vm7, %v2212_v54, %v10420_v53  ;;  %v8577_v52 = vpack.c.bf16 %v2112_v49, %v2110_v48  ;;  %v8579_v53 = vpack.c.bf16 %v2117_v51, %v2115_v50  ;;  %v2114_v54 = vld [vmem:[#allocation13 + $0x120] sm:$0xff] }
 0x6dc   : > { %2286 = vmatprep.mubr.f32.mxu1 %v2219_v55  ;;  %v2119_v55 = vld [vmem:[#allocation13 + $0x148] sm:$0xff]  ;;  %v8609_v50 = vpack.c.bf16 %v2367_v45, %v2365_v44  ;;  %v2404_v45 = vld [vmem:[#allocation13 + $0x538] sm:$0xff] }
 0x6dd   : > { %2287 = vmatmul.mubr.f32.vlgmr.msra.gmra.mrb[0].mxu1 %v2218_v56  ;;  %v2121_v56 = vld [vmem:[#allocation13 + $0x158] sm:$0xff]  ;;  %v2402_v44 = vld [vmem:[#allocation13 + $0x528] sm:$0xff] }
 0x6de   : > { %8546 = vmatpush1.bf16.msra.mxu1 %v8545_v0  ;;  %2357 = vmatprep.mubr.f32.mxu1 %v12001_v10  ;;  %v2094_v10 = vld [vmem:[#allocation13 + $0x80] sm:$0xff]  ;;  %v2116_v0 = vld [vmem:[#allocation13 + $0x130] sm:$0xff]  ;;  %v8583_v58 = vpack.c.bf16 %v2121_v56, %v2119_v55 }
 0x6df   : > { %8548 = vmatprep.subr.bf16.mxu1 %v8547_v57  ;;  %v8561_v23 = vpack.c.bf16 %v2096_v20, %v2094_v10  ;;  %v8581_v57 = vpack.c.bf16 %v2116_v0, %v2114_v54  ;;  %v2130_v20 = vld [vmem:[#allocation13 + $0x1a0] sm:$0xff]  ;;  %v2374_v54 = vld [vmem:[#allocation13 + $0x448] sm:$0xff]  ;;  %v2376_v0 = vld [vmem:[#allocation13 + $0x458] sm:$0xff] }
 0x6e2   : > { %8550 = vmatpush1.bf16.msra.mxu1 %v8549_v63  ;;  %v2125_v63 = vld [vmem:[#allocation13 + $0x178] sm:$0xff] }
 0x6e3   : > { %8552 = vmatprep.subr.bf16.mxu1 %v8551_v3  ;;  %v8585_v3 = vpack.c.bf16 %v2120_v60, %v2118_v59  ;;  %v8587_v7 = vpack.c.bf16 %v2125_v63, %v2123_v61  ;;  %v2375_v59 = vld [vmem:[#allocation13 + $0x450] sm:$0xff]  ;;  %v2378_v60 = vld [vmem:[#allocation13 + $0x468] sm:$0xff]  ;;  %v2380_v61 = vld [vmem:[#allocation13 + $0x478] sm:$0xff] }
 0x6e6   : > { %8554 = vmatpush1.bf16.msra.mxu1 %v8553_v14  ;;  %v2129_v14 = vld [vmem:[#allocation13 + $0x198] sm:$0xff] }
 0x6e7   : > { %8556 = vmatprep.subr.bf16.mxu1 %v8555_v15  ;;  %v8589_v15 = vpack.c.bf16 %v2124_v12, %v2122_v62  ;;  %v8591_v16 = vpack.c.bf16 %v2129_v14, %v2127_v13  ;;  %v2379_v62 = vld [vmem:[#allocation13 + $0x470] sm:$0xff]  ;;  %v2384_v12 = vld [vmem:[#allocation13 + $0x498] sm:$0xff] }
 0x6ea   : > { %8558 = vmatpush1.bf16.msra.mxu1 %v8557_v18  ;;  %v2133_v18 = vld [vmem:[#allocation13 + $0x1b8] sm:$0xff] }
 0x6eb   : > { %8560 = vmatprep.subr.bf16.mxu1 %v8559_v19  ;;  %v8593_v19 = vpack.c.bf16 %v2128_v9, %v2126_v6  ;;  %v8595_v10 = vpack.c.bf16 %v2133_v18, %v2131_v17  ;;  %v2386_v6 = vld [vmem:[#allocation13 + $0x4a8] sm:$0xff]  ;;  %v2388_v9 = vld [vmem:[#allocation13 + $0x4b8] sm:$0xff] }
 0x6ec   : > { %v8627_v18 = vpack.c.bf16 %v2388_v9, %v2386_v6  ;;  %v2417_v6 = vld [vmem:[#allocation13 + $0x5a0] sm:$0xff]  ;;  %v2419_v9 = vld [vmem:[#allocation13 + $0x5b0] sm:$0xff] }
 0x6ee   : > { %8562 = vmatpush1.bf16.msra.mxu1 %v8561_v23  ;;  %v2137_v23 = vld [vmem:[#allocation13 + $0x1d8] sm:$0xff] }
 0x6ef   : > { %8564 = vmatprep.subr.bf16.mxu1 %v8563_v24  ;;  %v8597_v24 = vpack.c.bf16 %v2132_v21, %v2130_v20  ;;  %v8599_v2 = vpack.c.bf16 %v2137_v23, %v2135_v22  ;;  %v2390_v20 = vld [vmem:[#allocation13 + $0x4c8] sm:$0xff]  ;;  %v2392_v21 = vld [vmem:[#allocation13 + $0x4d8] sm:$0xff] }
 0x6f0   : > { %v8631_v23 = vpack.c.bf16 %v2392_v21, %v2390_v20  ;;  %v2421_v20 = vld [vmem:[#allocation13 + $0x5c0] sm:$0xff]  ;;  %v2423_v21 = vld [vmem:[#allocation13 + $0x5d0] sm:$0xff] }
 0x6f2   : > { %8566 = vmatpush1.bf16.msra.mxu1 %v8565_v28  ;;  %v2141_v28 = vld [vmem:[#allocation13 + $0x1f8] sm:$0xff] }
 0x6f3   : > { %8568 = vmatprep.subr.bf16.mxu1 %v8567_v29  ;;  %v8601_v29 = vpack.c.bf16 %v2136_v26, %v2134_v25  ;;  %v8603_v30 = vpack.c.bf16 %v2141_v28, %v2139_v27  ;;  %v2394_v25 = vld [vmem:[#allocation13 + $0x4e8] sm:$0xff]  ;;  %v2396_v26 = vld [vmem:[#allocation13 + $0x4f8] sm:$0xff] }
 0x6f4   : > { %v8635_v28 = vpack.c.bf16 %v2396_v26, %v2394_v25  ;;  %v2425_v25 = vld [vmem:[#allocation13 + $0x5e0] sm:$0xff]  ;;  %v2427_v26 = vld [vmem:[#allocation13 + $0x5f0] sm:$0xff] }
 0x6f6   : > { %8570 = vmatpush1.bf16.msra.mxu1 %v8569_v34  ;;  %v2368_v34 = vld [vmem:[#allocation13 + $0x418] sm:$0xff] }
 0x6f7   : > { %8572 = vmatprep.subr.bf16.mxu1 %v8571_v35  ;;  %v12042_v35 = vpop.permute.xlu1 %10423  ;;  %v8607_v43 = vpack.c.bf16 %v2368_v34, %v2366_v33  ;;  %v8639_v34 = vpack.c.bf16 %v2400_v32, %v2398_v31  ;;  %v2517_v31 = vld [vmem:[#allocation13 + $0x600] sm:$0xff]  ;;  %v2519_v32 = vld [vmem:[#allocation13 + $0x610] sm:$0xff] }
 0x6f8   : > { %v10426_v48 = vunpack.i.h.bf16 %v12042_v35  ;;  %v10425_v49 = vunpack.i.l.bf16 %v12042_v35 }
 0x6fa   : > { %8574 = vmatpush1.bf16.msra.mxu1 %v8573_v46  ;;  %v2370_v46 = vld [vmem:[#allocation13 + $0x428] sm:$0xff]  ;;  %v2436_v55 = vsel %vm1147_vm10, %v10425_v49, %v10426_v48  ;;  %v2401_v48 = vld [vmem:[#allocation13 + $0x520] sm:$0xff] }
 0x6fb   : > { %8576 = vmatprep.subr.bf16.mxu1 %v8575_v47  ;;  %v2372_v47 = vld [vmem:[#allocation13 + $0x438] sm:$0xff] }
 0x6fc   : > { %v8611_v51 = vpack.c.bf16 %v2372_v47, %v2370_v46  ;;  %v8643_v47 = vpack.c.bf16 %v2404_v45, %v2402_v44  ;;  %v8673_v44 = vpack.c.bf16 %v2519_v32, %v2517_v31  ;;  %v2430_v45 = vpop.permute.xlu0 %2429  ;;  %v2556_v31 = vld [vmem:[#allocation13 + $0x738] sm:$0xff] }
 0x6fe   : > { %8578 = vmatpush1.bf16.msra.mxu1 %v8577_v52  ;;  %v2369_v52 = vld [vmem:[#allocation13 + $0x420] sm:$0xff] }
 0x6ff   : > { %8580 = vmatprep.subr.bf16.mxu1 %v8579_v53  ;;  %v2371_v53 = vld [vmem:[#allocation13 + $0x430] sm:$0xff] }
 0x700   : > { %v8613_v56 = vpack.c.bf16 %v2371_v53, %v2369_v52  ;;  %v2408_v52 = vld [vmem:[#allocation13 + $0x558] sm:$0xff] }
 0x702   : > { %8582 = vmatpush1.bf16.msra.mxu1 %v8581_v57  ;;  %v8615_v57 = vpack.c.bf16 %v2376_v0, %v2374_v54  ;;  %v2405_v0 = vld [vmem:[#allocation13 + $0x540] sm:$0xff] }
 0x703   : > { %8584 = vmatprep.subr.bf16.mxu1 %v8583_v58  ;;  %v2373_v58 = vld [vmem:[#allocation13 + $0x440] sm:$0xff] }
 0x704   : > { %v8617_v63 = vpack.c.bf16 %v2375_v59, %v2373_v58 }
 0x706   : > { %8586 = vmatpush1.bf16.msra.mxu1 %v8585_v3  ;;  %v8619_v3 = vpack.c.bf16 %v2380_v61, %v2378_v60  ;;  %v2409_v60 = vld [vmem:[#allocation13 + $0x560] sm:$0xff]  ;;  %v2411_v61 = vld [vmem:[#allocation13 + $0x570] sm:$0xff] }
 0x707   : > { %8588 = vmatprep.subr.bf16.mxu1 %v8587_v7  ;;  %v2377_v7 = vld [vmem:[#allocation13 + $0x460] sm:$0xff] }
 0x708   : > { %v8621_v13 = vpack.c.bf16 %v2379_v62, %v2377_v7  ;;  %v8653_v7 = vpack.c.bf16 %v2411_v61, %v2409_v60  ;;  %v2536_v60 = vld [vmem:[#allocation13 + $0x698] sm:$0xff] }
 0x70a   : > { %8590 = vmatpush1.bf16.msra.mxu1 %v8589_v15  ;;  %v2381_v15 = vld [vmem:[#allocation13 + $0x480] sm:$0xff] }
 0x70b   : > { %8592 = vmatprep.subr.bf16.mxu1 %v8591_v16  ;;  %v2383_v16 = vld [vmem:[#allocation13 + $0x490] sm:$0xff] }
 0x70c   : > { %v8625_v17 = vpack.c.bf16 %v2383_v16, %v2381_v15 }
 0x70e   : > { %8594 = vmatpush1.bf16.msra.mxu1 %v8593_v19  ;;  %v2385_v19 = vld [vmem:[#allocation13 + $0x4a0] sm:$0xff] }
 0x70f   : > { %8596 = vmatprep.subr.bf16.mxu1 %v8595_v10  ;;  %v2387_v10 = vld [vmem:[#allocation13 + $0x4b0] sm:$0xff] }
 0x710   : > { %v8629_v22 = vpack.c.bf16 %v2387_v10, %v2385_v19  ;;  %v8661_v19 = vpack.c.bf16 %v2419_v9, %v2417_v6  ;;  %v2544_v6 = vld [vmem:[#allocation13 + $0x6d8] sm:$0xff] }
 0x712   : > { %8598 = vmatpush1.bf16.msra.mxu1 %v8597_v24  ;;  %v2389_v24 = vld [vmem:[#allocation13 + $0x4c0] sm:$0xff] }
 0x713   : > { %8600 = vmatprep.subr.bf16.mxu1 %v8599_v2  ;;  %v2391_v2 = vld [vmem:[#allocation13 + $0x4d0] sm:$0xff] }
 0x714   : > { %v8633_v27 = vpack.c.bf16 %v2391_v2, %v2389_v24  ;;  %v8665_v24 = vpack.c.bf16 %v2423_v21, %v2421_v20  ;;  %v2548_v20 = vld [vmem:[#allocation13 + $0x6f8] sm:$0xff] }
 0x716   : > { %8602 = vmatpush1.bf16.msra.mxu1 %v8601_v29  ;;  %v2393_v29 = vld [vmem:[#allocation13 + $0x4e0] sm:$0xff] }
 0x717   : > { %8604 = vmatprep.subr.bf16.mxu1 %v8603_v30  ;;  %v2395_v30 = vld [vmem:[#allocation13 + $0x4f0] sm:$0xff] }
 0x718   : > { %v8637_v33 = vpack.c.bf16 %v2395_v30, %v2393_v29  ;;  %v8669_v29 = vpack.c.bf16 %v2427_v26, %v2425_v25  ;;  %v2552_v25 = vld [vmem:[#allocation13 + $0x718] sm:$0xff] }
 0x71a   : > { %8606 = vmatpush1.bf16.msra.mxu1 %v8605_v36  ;;  %v2397_v36 = vld [vmem:[#allocation13 + $0x500] sm:$0xff] }
 0x71b   : > { %8608 = vmatprep.subr.bf16.mxu1 %v8607_v43  ;;  %v2399_v43 = vld [vmem:[#allocation13 + $0x510] sm:$0xff] }
 0x71c   : > { %v8641_v46 = vpack.c.bf16 %v2399_v43, %v2397_v36  ;;  %v2588_v36 = vrot.slane %v12014_v37, 1  ;;  %v2589_v43 = vrot.slane %v12016_v38, 1 }
 0x71d   : > { %2358 = vmatmul.mubr.f32.vlgmr.msra.gmra.mrb[0].mxu1 %v11997_v8  ;;  %v2382_v8 = vld [vmem:[#allocation13 + $0x488] sm:$0xff] }
 0x71e   : > { %8610 = vmatpush1.bf16.msra.mxu1 %v8609_v50  ;;  %2503 = vmatprep.mubr.f32.mxu1 %v2436_v55  ;;  %v8623_v14 = vpack.c.bf16 %v2384_v12, %v2382_v8  ;;  %v2403_v50 = vld [vmem:[#allocation13 + $0x530] sm:$0xff]  ;;  %v2413_v8 = vld [vmem:[#allocation13 + $0x580] sm:$0xff] }
 0x71f   : > { %8612 = vmatprep.subr.bf16.mxu1 %v8611_v51  ;;  %v2406_v51 = vld [vmem:[#allocation13 + $0x548] sm:$0xff]  ;;  %v8645_v53 = vpack.c.bf16 %v2403_v50, %v2401_v48  ;;  %v2407_v55 = vld [vmem:[#allocation13 + $0x550] sm:$0xff]  ;;  %v2435_v50 = vsel %vm1147_vm10, %v2430_v45, %v10425_v49 }
 0x720   : > { %v8647_v54 = vpack.c.bf16 %v2408_v52, %v2406_v51  ;;  %v8649_v58 = vpack.c.bf16 %v2407_v55, %v2405_v0  ;;  %v2415_v12 = vld [vmem:[#allocation13 + $0x590] sm:$0xff]  ;;  %v2526_v51 = vld [vmem:[#allocation13 + $0x648] sm:$0xff]  ;;  %v2528_v52 = vld [vmem:[#allocation13 + $0x658] sm:$0xff] }
 0x721   : > { %v8657_v15 = vpack.c.bf16 %v2415_v12, %v2413_v8  ;;  %v2523_v48 = vld [vmem:[#allocation13 + $0x630] sm:$0xff]  ;;  %v8679_v38 = vpack.c.bf16 %v2528_v52, %v2526_v51  ;;  %v2530_v55 = vld [vmem:[#allocation13 + $0x668] sm:$0xff]  ;;  %v2540_v8 = vld [vmem:[#allocation13 + $0x6b8] sm:$0xff] }
 0x722   : > { %8614 = vmatpush1.bf16.msra.mxu1 %v8613_v56  ;;  %v2410_v56 = vld [vmem:[#allocation13 + $0x568] sm:$0xff]  ;;  %v2527_v0 = vld [vmem:[#allocation13 + $0x650] sm:$0xff]  ;;  %v2564_v51 = vld [vmem:[#allocation13 + $0x778] sm:$0xff] }
 0x723   : > { %8616 = vmatprep.subr.bf16.mxu1 %v8615_v57  ;;  %v2412_v57 = vld [vmem:[#allocation13 + $0x578] sm:$0xff]  ;;  %v2531_v49 = vld [vmem:[#allocation13 + $0x670] sm:$0xff] }
 0x724   : > { %v8651_v59 = vpack.c.bf16 %v2412_v57, %v2410_v56  ;;  %v2532_v56 = vld [vmem:[#allocation13 + $0x678] sm:$0xff] }
 0x725   : > { %v8683_v35 = vpack.c.bf16 %v2532_v56, %v2530_v55 }
 0x726   : > { %8618 = vmatpush1.bf16.msra.mxu1 %v8617_v63  ;;  %v2414_v63 = vld [vmem:[#allocation13 + $0x588] sm:$0xff] }
 0x727   : > { %8620 = vmatprep.subr.bf16.mxu1 %v8619_v3  ;;  %v2416_v3 = vld [vmem:[#allocation13 + $0x598] sm:$0xff] }
 0x728   : > { %v8655_v62 = vpack.c.bf16 %v2416_v3, %v2414_v63  ;;  %v2533_v3 = vld [vmem:[#allocation13 + $0x680] sm:$0xff] }
 0x72a   : > { %8622 = vmatpush1.bf16.msra.mxu1 %v8621_v13  ;;  %v2418_v13 = vld [vmem:[#allocation13 + $0x5a8] sm:$0xff] }
 0x72b   : > { %8624 = vmatprep.subr.bf16.mxu1 %v8623_v14  ;;  %v2420_v14 = vld [vmem:[#allocation13 + $0x5b8] sm:$0xff] }
 0x72c   : > { %v8659_v16 = vpack.c.bf16 %v2420_v14, %v2418_v13  ;;  %v2537_v14 = vld [vmem:[#allocation13 + $0x6a0] sm:$0xff] }
 0x72e   : > { %8626 = vmatpush1.bf16.msra.mxu1 %v8625_v17  ;;  %v2422_v17 = vld [vmem:[#allocation13 + $0x5c8] sm:$0xff] }
 0x72f   : > { %8628 = vmatprep.subr.bf16.mxu1 %v8627_v18  ;;  %v2424_v18 = vld [vmem:[#allocation13 + $0x5d8] sm:$0xff] }
 0x730   : > { %v8663_v10 = vpack.c.bf16 %v2424_v18, %v2422_v17  ;;  %v2541_v18 = vld [vmem:[#allocation13 + $0x6c0] sm:$0xff] }
 0x732   : > { %8630 = vmatpush1.bf16.msra.mxu1 %v8629_v22  ;;  %v2426_v22 = vld [vmem:[#allocation13 + $0x5e8] sm:$0xff] }
 0x733   : > { %8632 = vmatprep.subr.bf16.mxu1 %v8631_v23  ;;  %v2428_v23 = vld [vmem:[#allocation13 + $0x5f8] sm:$0xff] }
 0x734   : > { %v8667_v2 = vpack.c.bf16 %v2428_v23, %v2426_v22  ;;  %v2545_v23 = vld [vmem:[#allocation13 + $0x6e0] sm:$0xff] }
 0x736   : > { %8634 = vmatpush1.bf16.msra.mxu1 %v8633_v27  ;;  %v2518_v27 = vld [vmem:[#allocation13 + $0x608] sm:$0xff] }
 0x737   : > { %8636 = vmatprep.subr.bf16.mxu1 %v8635_v28  ;;  %v2520_v28 = vld [vmem:[#allocation13 + $0x618] sm:$0xff] }
 0x738   : > { %v8671_v30 = vpack.c.bf16 %v2520_v28, %v2518_v27  ;;  %v2549_v28 = vld [vmem:[#allocation13 + $0x700] sm:$0xff] }
 0x73a   : > { %8638 = vmatpush1.bf16.msra.mxu1 %v8637_v33  ;;  %v2522_v33 = vld [vmem:[#allocation13 + $0x628] sm:$0xff] }
 0x73b   : > { %8640 = vmatprep.subr.bf16.mxu1 %v8639_v34  ;;  %v2524_v34 = vld [vmem:[#allocation13 + $0x638] sm:$0xff] }
 0x73e   : > { %8642 = vmatpush1.bf16.msra.mxu1 %v8641_v46  ;;  %v8675_v46 = vpack.c.bf16 %v2524_v34, %v2522_v33  ;;  %v2553_v34 = vld [vmem:[#allocation13 + $0x720] sm:$0xff] }
 0x73f   : > { %8644 = vmatprep.subr.bf16.mxu1 %v8643_v47  ;;  %v2521_v47 = vld [vmem:[#allocation13 + $0x620] sm:$0xff] }
 0x740   : > { %v8677_v37 = vpack.c.bf16 %v2523_v48, %v2521_v47  ;;  %v2557_v47 = vld [vmem:[#allocation13 + $0x740] sm:$0xff]  ;;  %v2559_v48 = vld [vmem:[#allocation13 + $0x750] sm:$0xff] }
 0x741   : > { %v8713_v52 = vpack.c.bf16 %v2559_v48, %v2557_v47  ;;  %v2683_v47 = vld [vmem:[#allocation13 + $0x850] sm:$0xff]  ;;  %v2686_v48 = vld [vmem:[#allocation13 + $0x868] sm:$0xff] }
 0x742   : > { %8646 = vmatpush1.bf16.msra.mxu1 %v8645_v53  ;;  %v2590_v53 = vsel %vm1425_vm8, %v2588_v36, %v2589_v43  ;;  %v2555_v36 = vld [vmem:[#allocation13 + $0x730] sm:$0xff]  ;;  %v2558_v43 = vld [vmem:[#allocation13 + $0x748] sm:$0xff] }
 0x743   : > { %8648 = vmatprep.subr.bf16.mxu1 %v8647_v54  ;;  %v2525_v54 = vld [vmem:[#allocation13 + $0x640] sm:$0xff]  ;;  %v8709_v45 = vpack.c.bf16 %v2555_v36, %v2553_v34  ;;  %v2682_v36 = vld [vmem:[#allocation13 + $0x848] sm:$0xff] }
 0x744   : > { %v8681_v57 = vpack.c.bf16 %v2527_v0, %v2525_v54  ;;  %v2566_v54 = vld [vmem:[#allocation13 + $0x788] sm:$0xff]  ;;  %v2568_v0 = vld [vmem:[#allocation13 + $0x798] sm:$0xff] }
 0x745   : > { %v8719_v56 = vpack.c.bf16 %v2568_v0, %v2566_v54  ;;  %v2692_v54 = vld [vmem:[#allocation13 + $0x898] sm:$0xff] }
 0x746   : > { %8650 = vmatpush1.bf16.msra.mxu1 %v8649_v58  ;;  %v2529_v58 = vld [vmem:[#allocation13 + $0x660] sm:$0xff] }
 0x747   : > { %8652 = vmatprep.subr.bf16.mxu1 %v8651_v59  ;;  %v2534_v59 = vld [vmem:[#allocation13 + $0x688] sm:$0xff]  ;;  %v8685_v61 = vpack.c.bf16 %v2531_v49, %v2529_v58  ;;  %v2572_v49 = vld [vmem:[#allocation13 + $0x7b8] sm:$0xff] }
 0x748   : > { %v8687_v63 = vpack.c.bf16 %v2536_v60, %v2534_v59  ;;  %v2570_v58 = vld [vmem:[#allocation13 + $0x7a8] sm:$0xff] }
 0x749   : > { %v8723_v60 = vpack.c.bf16 %v2572_v49, %v2570_v58  ;;  %v2696_v58 = vld [vmem:[#allocation13 + $0x8b8] sm:$0xff] }
 0x74a   : > { %8654 = vmatpush1.bf16.msra.mxu1 %v8653_v7  ;;  %v2535_v7 = vld [vmem:[#allocation13 + $0x690] sm:$0xff] }
 0x74b   : > { %8656 = vmatprep.subr.bf16.mxu1 %v8655_v62  ;;  %v2538_v62 = vld [vmem:[#allocation13 + $0x6a8] sm:$0xff]  ;;  %v8689_v12 = vpack.c.bf16 %v2535_v7, %v2533_v3  ;;  %v2576_v7 = vld [vmem:[#allocation13 + $0x7d8] sm:$0xff] }
 0x74c   : > { %v8691_v13 = vpack.c.bf16 %v2540_v8, %v2538_v62  ;;  %v2574_v3 = vld [vmem:[#allocation13 + $0x7c8] sm:$0xff] }
 0x74d   : > { %v8727_v8 = vpack.c.bf16 %v2576_v7, %v2574_v3  ;;  %v2700_v3 = vld [vmem:[#allocation13 + $0x8d8] sm:$0xff] }
 0x74e   : > { %8658 = vmatpush1.bf16.msra.mxu1 %v8657_v15  ;;  %v2539_v15 = vld [vmem:[#allocation13 + $0x6b0] sm:$0xff] }
 0x74f   : > { %8660 = vmatprep.subr.bf16.mxu1 %v8659_v16  ;;  %v2542_v16 = vld [vmem:[#allocation13 + $0x6c8] sm:$0xff]  ;;  %v8693_v9 = vpack.c.bf16 %v2539_v15, %v2537_v14  ;;  %v2580_v15 = vld [vmem:[#allocation13 + $0x7f8] sm:$0xff] }
 0x750   : > { %v8695_v17 = vpack.c.bf16 %v2544_v6, %v2542_v16  ;;  %v2578_v14 = vld [vmem:[#allocation13 + $0x7e8] sm:$0xff] }
 0x751   : > { %v8731_v6 = vpack.c.bf16 %v2580_v15, %v2578_v14  ;;  %v2704_v14 = vld [vmem:[#allocation13 + $0x8f8] sm:$0xff] }
 0x752   : > { %8662 = vmatpush1.bf16.msra.mxu1 %v8661_v19  ;;  %v2543_v19 = vld [vmem:[#allocation13 + $0x6d0] sm:$0xff] }
 0x753   : > { %8664 = vmatprep.subr.bf16.mxu1 %v8663_v10  ;;  %v2546_v10 = vld [vmem:[#allocation13 + $0x6e8] sm:$0xff]  ;;  %v8697_v21 = vpack.c.bf16 %v2543_v19, %v2541_v18  ;;  %v2676_v19 = vld [vmem:[#allocation13 + $0x818] sm:$0xff] }
 0x754   : > { %v8699_v22 = vpack.c.bf16 %v2548_v20, %v2546_v10  ;;  %v2674_v18 = vld [vmem:[#allocation13 + $0x808] sm:$0xff]  ;;  %v12056_v20 = vpop.permute.xlu1 %10428 }
 0x755   : > { %v2512_v10 = vld [vmem:[#allocation2] sm:$0xfe] }
 0x756   : > { %8666 = vmatpush1.bf16.msra.mxu1 %v8665_v24  ;;  %v2547_v24 = vld [vmem:[#allocation13 + $0x6f0] sm:$0xff] }
 0x757   : > { %8668 = vmatprep.subr.bf16.mxu1 %v8667_v2  ;;  %v2550_v2 = vld [vmem:[#allocation13 + $0x708] sm:$0xff]  ;;  %v8701_v26 = vpack.c.bf16 %v2547_v24, %v2545_v23  ;;  %v2673_v23 = vld [vmem:[#allocation13 + $0x800] sm:$0xff]  ;;  %v2675_v24 = vld [vmem:[#allocation13 + $0x810] sm:$0xff] }
 0x758   : > { %v8703_v27 = vpack.c.bf16 %v2552_v25, %v2550_v2  ;;  %v2585_v2 = vrot.slane %v2512_v10, 1  ;;  %v2586_v25 = vrot.slane %v12020_v40, 1 }
 0x75a   : > { %8670 = vmatpush1.bf16.msra.mxu1 %v8669_v29  ;;  %v2551_v29 = vld [vmem:[#allocation13 + $0x710] sm:$0xff]  ;;  %v2587_v34 = vsel %vm1425_vm8, %v2585_v2, %v2586_v25 }
 0x75b   : > { %8672 = vmatprep.subr.bf16.mxu1 %v8671_v30  ;;  %v2554_v30 = vld [vmem:[#allocation13 + $0x728] sm:$0xff]  ;;  %v8705_v32 = vpack.c.bf16 %v2551_v29, %v2549_v28  ;;  %v10431_v28 = vunpack.i.h.bf16 %v12056_v20  ;;  %v10430_v29 = vunpack.i.l.bf16 %v12056_v20 }
 0x75c   : > { %v8707_v33 = vpack.c.bf16 %v2556_v31, %v2554_v30  ;;  %v8737_v30 = vpack.c.bf16 %v2675_v24, %v2673_v23  ;;  %v2710_v23 = vld [vmem:[#allocation13 + $0x928] sm:$0xff]  ;;  %v2712_v24 = vld [vmem:[#allocation13 + $0x938] sm:$0xff] }
 0x75d   : > { %2504 = vmatmul.mubr.f32.vlgmr.msra.gmra.mrb[0].mxu1 %v2435_v50  ;;  %v2562_v50 = vld [vmem:[#allocation13 + $0x768] sm:$0xff]  ;;  %v2759_v40 = vsel %vm2217_vm7, %v10430_v29, %v10431_v28  ;;  %v8771_v25 = vpack.c.bf16 %v2712_v24, %v2710_v23  ;;  %v2840_v24 = vld [vmem:[#allocation13 + $0xa20] sm:$0xff] }
 0x75e   : > { %8674 = vmatpush1.bf16.msra.mxu1 %v8673_v44  ;;  %2657 = vmatprep.mubr.f32.mxu1 %v2590_v53  ;;  %v2560_v44 = vld [vmem:[#allocation13 + $0x758] sm:$0xff]  ;;  %v8715_v53 = vpack.c.bf16 %v2564_v51, %v2562_v50  ;;  %v2714_v28 = vld [vmem:[#allocation13 + $0x948] sm:$0xff] }
 0x75f   : > { %8676 = vmatprep.subr.bf16.mxu1 %v8675_v46  ;;  %v8711_v46 = vpack.c.bf16 %v2560_v44, %v2558_v43  ;;  %v2684_v43 = vld [vmem:[#allocation13 + $0x858] sm:$0xff] }
 0x760   : > { %v2688_v50 = vld [vmem:[#allocation13 + $0x878] sm:$0xff] }
 0x762   : > { %8678 = vmatpush1.bf16.msra.mxu1 %v8677_v37  ;;  %v2561_v37 = vld [vmem:[#allocation13 + $0x760] sm:$0xff] }
 0x763   : > { %8680 = vmatprep.subr.bf16.mxu1 %v8679_v38  ;;  %v2563_v38 = vld [vmem:[#allocation13 + $0x770] sm:$0xff] }
 0x764   : > { %v8717_v55 = vpack.c.bf16 %v2563_v38, %v2561_v37  ;;  %v2687_v37 = vld [vmem:[#allocation13 + $0x870] sm:$0xff]  ;;  %v2690_v38 = vld [vmem:[#allocation13 + $0x888] sm:$0xff] }
 0x766   : > { %8682 = vmatpush1.bf16.msra.mxu1 %v8681_v57  ;;  %v2565_v57 = vld [vmem:[#allocation13 + $0x780] sm:$0xff] }
 0x767   : > { %8684 = vmatprep.subr.bf16.mxu1 %v8683_v35  ;;  %v2567_v35 = vld [vmem:[#allocation13 + $0x790] sm:$0xff] }
 0x768   : > { %v8721_v59 = vpack.c.bf16 %v2567_v35, %v2565_v57  ;;  %v2691_v57 = vld [vmem:[#allocation13 + $0x890] sm:$0xff]  ;;  %v2694_v35 = vld [vmem:[#allocation13 + $0x8a8] sm:$0xff] }
 0x76a   : > { %8686 = vmatpush1.bf16.msra.mxu1 %v8685_v61  ;;  %v2569_v61 = vld [vmem:[#allocation13 + $0x7a0] sm:$0xff] }
 0x76b   : > { %8688 = vmatprep.subr.bf16.mxu1 %v8687_v63  ;;  %v2571_v63 = vld [vmem:[#allocation13 + $0x7b0] sm:$0xff] }
 0x76c   : > { %v8725_v62 = vpack.c.bf16 %v2571_v63, %v2569_v61  ;;  %v2695_v61 = vld [vmem:[#allocation13 + $0x8b0] sm:$0xff]  ;;  %v2698_v63 = vld [vmem:[#allocation13 + $0x8c8] sm:$0xff] }
 0x76e   : > { %8690 = vmatpush1.bf16.msra.mxu1 %v8689_v12  ;;  %v2573_v12 = vld [vmem:[#allocation13 + $0x7c0] sm:$0xff] }
 0x76f   : > { %8692 = vmatprep.subr.bf16.mxu1 %v8691_v13  ;;  %v2575_v13 = vld [vmem:[#allocation13 + $0x7d0] sm:$0xff] }
 0x770   : > { %v8729_v16 = vpack.c.bf16 %v2575_v13, %v2573_v12  ;;  %v2699_v12 = vld [vmem:[#allocation13 + $0x8d0] sm:$0xff]  ;;  %v2702_v13 = vld [vmem:[#allocation13 + $0x8e8] sm:$0xff] }
 0x772   : > { %8694 = vmatpush1.bf16.msra.mxu1 %v8693_v9  ;;  %v2577_v9 = vld [vmem:[#allocation13 + $0x7e0] sm:$0xff] }
 0x773   : > { %8696 = vmatprep.subr.bf16.mxu1 %v8695_v17  ;;  %v2579_v17 = vld [vmem:[#allocation13 + $0x7f0] sm:$0xff] }
 0x776   : > { %8698 = vmatpush1.bf16.msra.mxu1 %v8697_v21  ;;  %v8733_v21 = vpack.c.bf16 %v2579_v17, %v2577_v9  ;;  %v2703_v9 = vld [vmem:[#allocation13 + $0x8f0] sm:$0xff]  ;;  %v2706_v17 = vld [vmem:[#allocation13 + $0x908] sm:$0xff] }
 0x777   : > { %8700 = vmatprep.subr.bf16.mxu1 %v8699_v22  ;;  %v8735_v22 = vpack.c.bf16 %v2676_v19, %v2674_v18  ;;  %v2708_v18 = vld [vmem:[#allocation13 + $0x918] sm:$0xff] }
 0x778   : > { %v8767_v10 = vpack.c.bf16 %v2708_v18, %v2706_v17  ;;  %v2841_v17 = vld [vmem:[#allocation13 + $0xa28] sm:$0xff]  ;;  %v2843_v18 = vld [vmem:[#allocation13 + $0xa38] sm:$0xff] }
 0x779   : > { %v8803_v23 = vpack.c.bf16 %v2843_v18, %v2841_v17  ;;  %v2872_v18 = vld [vmem:[#allocation13 + $0xb20] sm:$0xff] }
 0x77a   : > { %8702 = vmatpush1.bf16.msra.mxu1 %v8701_v26  ;;  %v2678_v26 = vld [vmem:[#allocation13 + $0x828] sm:$0xff] }
 0x77b   : > { %8704 = vmatprep.subr.bf16.mxu1 %v8703_v27  ;;  %v2680_v27 = vld [vmem:[#allocation13 + $0x838] sm:$0xff] }
 0x77c   : > { %v8739_v31 = vpack.c.bf16 %v2680_v27, %v2678_v26  ;;  %v2709_v26 = vld [vmem:[#allocation13 + $0x920] sm:$0xff]  ;;  %v2711_v27 = vld [vmem:[#allocation13 + $0x930] sm:$0xff] }
 0x77e   : > { %8706 = vmatpush1.bf16.msra.mxu1 %v8705_v32  ;;  %v2677_v32 = vld [vmem:[#allocation13 + $0x820] sm:$0xff] }
 0x77f   : > { %8708 = vmatprep.subr.bf16.mxu1 %v8707_v33  ;;  %v2679_v33 = vld [vmem:[#allocation13 + $0x830] sm:$0xff] }
 0x780   : > { %v8741_v44 = vpack.c.bf16 %v2679_v33, %v2677_v32  ;;  %v2713_v33 = vld [vmem:[#allocation13 + $0x940] sm:$0xff] }
 0x782   : > { %8710 = vmatpush1.bf16.msra.mxu1 %v8709_v45  ;;  %v8743_v45 = vpack.c.bf16 %v2684_v43, %v2682_v36  ;;  %v2718_v36 = vld [vmem:[#allocation13 + $0x968] sm:$0xff]  ;;  %v2720_v43 = vld [vmem:[#allocation13 + $0x978] sm:$0xff] }
 0x783   : > { %8712 = vmatprep.subr.bf16.mxu1 %v8711_v46  ;;  %v2681_v46 = vld [vmem:[#allocation13 + $0x840] sm:$0xff] }
 0x784   : > { %v8745_v51 = vpack.c.bf16 %v2683_v47, %v2681_v46  ;;  %v2719_v46 = vld [vmem:[#allocation13 + $0x970] sm:$0xff]  ;;  %v2722_v47 = vld [vmem:[#allocation13 + $0x988] sm:$0xff] }
 0x786   : > { %8714 = vmatpush1.bf16.msra.mxu1 %v8713_v52  ;;  %v8747_v52 = vpack.c.bf16 %v2688_v50, %v2686_v48  ;;  %v2724_v48 = vld [vmem:[#allocation13 + $0x998] sm:$0xff] }
 0x787   : > { %8716 = vmatprep.subr.bf16.mxu1 %v8715_v53  ;;  %v2685_v53 = vld [vmem:[#allocation13 + $0x860] sm:$0xff] }
 0x788   : > { %v8749_v0 = vpack.c.bf16 %v2687_v37, %v2685_v53  ;;  %v2723_v53 = vld [vmem:[#allocation13 + $0x990] sm:$0xff]  ;;  %v2726_v37 = vld [vmem:[#allocation13 + $0x9a8] sm:$0xff] }
 0x78a   : > { %8718 = vmatpush1.bf16.msra.mxu1 %v8717_v55  ;;  %v8751_v55 = vpack.c.bf16 %v2692_v54, %v2690_v38  ;;  %v2728_v38 = vld [vmem:[#allocation13 + $0x9b8] sm:$0xff] }
 0x78b   : > { %8720 = vmatprep.subr.bf16.mxu1 %v8719_v56  ;;  %v2689_v56 = vld [vmem:[#allocation13 + $0x880] sm:$0xff] }
 0x78c   : > { %v8753_v49 = vpack.c.bf16 %v2691_v57, %v2689_v56  ;;  %v2727_v56 = vld [vmem:[#allocation13 + $0x9b0] sm:$0xff]  ;;  %v2730_v57 = vld [vmem:[#allocation13 + $0x9c8] sm:$0xff] }
 0x78e   : > { %8722 = vmatpush1.bf16.msra.mxu1 %v8721_v59  ;;  %v8755_v59 = vpack.c.bf16 %v2696_v58, %v2694_v35  ;;  %v2732_v35 = vld [vmem:[#allocation13 + $0x9d8] sm:$0xff] }
 0x78f   : > { %8724 = vmatprep.subr.bf16.mxu1 %v8723_v60  ;;  %v2693_v60 = vld [vmem:[#allocation13 + $0x8a0] sm:$0xff] }
 0x790   : > { %v8757_v7 = vpack.c.bf16 %v2695_v61, %v2693_v60  ;;  %v2731_v60 = vld [vmem:[#allocation13 + $0x9d0] sm:$0xff]  ;;  %v2734_v61 = vld [vmem:[#allocation13 + $0x9e8] sm:$0xff] }
 0x792   : > { %8726 = vmatpush1.bf16.msra.mxu1 %v8725_v62  ;;  %v8759_v62 = vpack.c.bf16 %v2700_v3, %v2698_v63  ;;  %v2736_v63 = vld [vmem:[#allocation13 + $0x9f8] sm:$0xff] }
 0x793   : > { %8728 = vmatprep.subr.bf16.mxu1 %v8727_v8  ;;  %v2697_v8 = vld [vmem:[#allocation13 + $0x8c0] sm:$0xff] }
 0x794   : > { %v8761_v15 = vpack.c.bf16 %v2699_v12, %v2697_v8  ;;  %v2735_v8 = vld [vmem:[#allocation13 + $0x9f0] sm:$0xff]  ;;  %v2837_v12 = vld [vmem:[#allocation13 + $0xa08] sm:$0xff] }
 0x796   : > { %8730 = vmatpush1.bf16.msra.mxu1 %v8729_v16  ;;  %v8763_v16 = vpack.c.bf16 %v2704_v14, %v2702_v13  ;;  %v2839_v13 = vld [vmem:[#allocation13 + $0xa18] sm:$0xff]  ;;  %v12065_v14 = vpop.permute.xlu1 %10433 }
 0x797   : > { %8732 = vmatprep.subr.bf16.mxu1 %v8731_v6  ;;  %v2701_v6 = vld [vmem:[#allocation13 + $0x8e0] sm:$0xff] }
 0x798   : > { %v8765_v19 = vpack.c.bf16 %v2703_v9, %v2701_v6  ;;  %v2836_v6 = vld [vmem:[#allocation13 + $0xa00] sm:$0xff]  ;;  %v2838_v9 = vld [vmem:[#allocation13 + $0xa10] sm:$0xff] }
 0x79a   : > { %8734 = vmatpush1.bf16.msra.mxu1 %v8733_v21  ;;  %v2705_v21 = vld [vmem:[#allocation13 + $0x900] sm:$0xff] }
 0x79b   : > { %8736 = vmatprep.subr.bf16.mxu1 %v8735_v22  ;;  %v2707_v22 = vld [vmem:[#allocation13 + $0x910] sm:$0xff] }
 0x79c   : > { %v8769_v2 = vpack.c.bf16 %v2707_v22, %v2705_v21  ;;  %v8801_v21 = vpack.c.bf16 %v2838_v9, %v2836_v6  ;;  %v2753_v22 = vpop.permute.xlu0 %2752  ;;  %v2875_v6 = vld [vmem:[#allocation13 + $0xb38] sm:$0xff] }
 0x79d   : > { %2658 = vmatmul.mubr.f32.vlgmr.msra.gmra.mrb[0].mxu1 %v2587_v34  ;;  %v2715_v34 = vld [vmem:[#allocation13 + $0x950] sm:$0xff] }
 0x79e   : > { %8738 = vmatpush1.bf16.msra.mxu1 %v8737_v30  ;;  %2826 = vmatprep.mubr.f32.mxu1 %v2759_v40  ;;  %v2716_v30 = vld [vmem:[#allocation13 + $0x958] sm:$0xff]  ;;  %v8777_v40 = vpack.c.bf16 %v2715_v34, %v2713_v33  ;;  %v2846_v33 = vld [vmem:[#allocation13 + $0xa50] sm:$0xff]  ;;  %v2849_v34 = vld [vmem:[#allocation13 + $0xa68] sm:$0xff] }
 0x79f   : > { %8740 = vmatprep.subr.bf16.mxu1 %v8739_v31  ;;  %v8773_v31 = vpack.c.bf16 %v2711_v27, %v2709_v26  ;;  %v8775_v32 = vpack.c.bf16 %v2716_v30, %v2714_v28  ;;  %v2845_v26 = vld [vmem:[#allocation13 + $0xa48] sm:$0xff]  ;;  %v2847_v27 = vld [vmem:[#allocation13 + $0xa58] sm:$0xff] }
 0x7a2   : > { %8742 = vmatpush1.bf16.msra.mxu1 %v8741_v44  ;;  %v8779_v44 = vpack.c.bf16 %v2720_v43, %v2718_v36  ;;  %v2851_v36 = vld [vmem:[#allocation13 + $0xa78] sm:$0xff]  ;;  %v2848_v43 = vld [vmem:[#allocation13 + $0xa60] sm:$0xff] }
 0x7a3   : > { %8744 = vmatprep.subr.bf16.mxu1 %v8743_v45  ;;  %v2717_v45 = vld [vmem:[#allocation13 + $0x960] sm:$0xff] }
 0x7a4   : > { %v8781_v50 = vpack.c.bf16 %v2719_v46, %v2717_v45  ;;  %v2855_v45 = vld [vmem:[#allocation13 + $0xa98] sm:$0xff] }
 0x7a6   : > { %8746 = vmatpush1.bf16.msra.mxu1 %v8745_v51  ;;  %v8783_v51 = vpack.c.bf16 %v2724_v48, %v2722_v47  ;;  %v2852_v48 = vld [vmem:[#allocation13 + $0xa80] sm:$0xff] }
 0x7a7   : > { %8748 = vmatprep.subr.bf16.mxu1 %v8747_v52  ;;  %v2721_v52 = vld [vmem:[#allocation13 + $0x980] sm:$0xff] }
 0x7a8   : > { %v8785_v54 = vpack.c.bf16 %v2723_v53, %v2721_v52  ;;  %v2859_v52 = vld [vmem:[#allocation13 + $0xab8] sm:$0xff] }
 0x7aa   : > { %8750 = vmatpush1.bf16.msra.mxu1 %v8749_v0  ;;  %v8787_v0 = vpack.c.bf16 %v2728_v38, %v2726_v37  ;;  %v2856_v38 = vld [vmem:[#allocation13 + $0xaa0] sm:$0xff] }
 0x7ab   : > { %8752 = vmatprep.subr.bf16.mxu1 %v8751_v55  ;;  %v2725_v55 = vld [vmem:[#allocation13 + $0x9a0] sm:$0xff] }
 0x7ac   : > { %v8789_v58 = vpack.c.bf16 %v2727_v56, %v2725_v55  ;;  %v2863_v55 = vld [vmem:[#allocation13 + $0xad8] sm:$0xff] }
 0x7ae   : > { %8754 = vmatpush1.bf16.msra.mxu1 %v8753_v49  ;;  %v8791_v49 = vpack.c.bf16 %v2732_v35, %v2730_v57  ;;  %v2860_v35 = vld [vmem:[#allocation13 + $0xac0] sm:$0xff] }
 0x7af   : > { %8756 = vmatprep.subr.bf16.mxu1 %v8755_v59  ;;  %v2729_v59 = vld [vmem:[#allocation13 + $0x9c0] sm:$0xff] }
 0x7b0   : > { %v8793_v3 = vpack.c.bf16 %v2731_v60, %v2729_v59  ;;  %v2867_v59 = vld [vmem:[#allocation13 + $0xaf8] sm:$0xff] }
 0x7b2   : > { %8758 = vmatpush1.bf16.msra.mxu1 %v8757_v7  ;;  %v8795_v7 = vpack.c.bf16 %v2736_v63, %v2734_v61  ;;  %v2864_v63 = vld [vmem:[#allocation13 + $0xae0] sm:$0xff] }
 0x7b3   : > { %8760 = vmatprep.subr.bf16.mxu1 %v8759_v62  ;;  %v2733_v62 = vld [vmem:[#allocation13 + $0x9e0] sm:$0xff] }
 0x7b6   : > { %8762 = vmatpush1.bf16.msra.mxu1 %v8761_v15  ;;  %v8797_v15 = vpack.c.bf16 %v2735_v8, %v2733_v62  ;;  %v2871_v62 = vld [vmem:[#allocation13 + $0xb18] sm:$0xff] }
 0x7b7   : > { %8764 = vmatprep.subr.bf16.mxu1 %v8763_v16  ;;  %v8799_v16 = vpack.c.bf16 %v2839_v13, %v2837_v12  ;;  %v2868_v13 = vld [vmem:[#allocation13 + $0xb00] sm:$0xff] }
 0x7ba   : > { %8766 = vmatpush1.bf16.msra.mxu1 %v8765_v19  ;;  %v10436_v19 = vunpack.i.h.bf16 %v12065_v14 }
 0x7bb   : > { %8768 = vmatprep.subr.bf16.mxu1 %v8767_v10  ;;  %v10435_v10 = vunpack.i.l.bf16 %v12065_v14 }
 0x7bd   : > { %v2907_v28 = vsel %vm1147_vm10, %v10435_v10, %v10436_v19  ;;  %v2874_v19 = vld [vmem:[#allocation13 + $0xb30] sm:$0xff] }
 0x7be   : > { %8770 = vmatpush1.bf16.msra.mxu1 %v8769_v2  ;;  %v2842_v2 = vld [vmem:[#allocation13 + $0xa30] sm:$0xff] }
 0x7bf   : > { %8772 = vmatprep.subr.bf16.mxu1 %v8771_v25  ;;  %v2758_v25 = vsel %vm2217_vm7, %v2753_v22, %v10430_v29  ;;  %v8805_v30 = vpack.c.bf16 %v2842_v2, %v2840_v24  ;;  %v8811_v29 = vpack.c.bf16 %v2851_v36, %v2849_v34  ;;  %v2879_v22 = vld [vmem:[#allocation13 + $0xb58] sm:$0xff]  ;;  %v2876_v2 = vld [vmem:[#allocation13 + $0xb40] sm:$0xff] }
 0x7c0   : > { %v2887_v34 = vld [vmem:[#allocation13 + $0xb98] sm:$0xff] }
 0x7c2   : > { %8774 = vmatpush1.bf16.msra.mxu1 %v8773_v31  ;;  %v8807_v31 = vpack.c.bf16 %v2847_v27, %v2845_v26  ;;  %v2881_v26 = vld [vmem:[#allocation13 + $0xb68] sm:$0xff]  ;;  %v2883_v27 = vld [vmem:[#allocation13 + $0xb78] sm:$0xff] }
 0x7c3   : > { %8776 = vmatprep.subr.bf16.mxu1 %v8775_v32  ;;  %v2844_v32 = vld [vmem:[#allocation13 + $0xa40] sm:$0xff] }
 0x7c4   : > { %v8809_v20 = vpack.c.bf16 %v2846_v33, %v2844_v32  ;;  %v2882_v32 = vld [vmem:[#allocation13 + $0xb70] sm:$0xff]  ;;  %v2885_v33 = vld [vmem:[#allocation13 + $0xb88] sm:$0xff] }
 0x7c6   : > { %8778 = vmatpush1.bf16.msra.mxu1 %v8777_v40  ;;  %v2850_v40 = vld [vmem:[#allocation13 + $0xa70] sm:$0xff] }
 0x7c7   : > { %8780 = vmatprep.subr.bf16.mxu1 %v8779_v44  ;;  %v2853_v44 = vld [vmem:[#allocation13 + $0xa88] sm:$0xff]  ;;  %v8813_v46 = vpack.c.bf16 %v2850_v40, %v2848_v43  ;;  %v2886_v43 = vld [vmem:[#allocation13 + $0xb90] sm:$0xff] }
 0x7c8   : > { %v8815_v47 = vpack.c.bf16 %v2855_v45, %v2853_v44  ;;  %v2889_v40 = vld [vmem:[#allocation13 + $0xba8] sm:$0xff]  ;;  %v2891_v44 = vld [vmem:[#allocation13 + $0xbb8] sm:$0xff] }
 0x7ca   : > { %8782 = vmatpush1.bf16.msra.mxu1 %v8781_v50  ;;  %v2854_v50 = vld [vmem:[#allocation13 + $0xa90] sm:$0xff] }
 0x7cb   : > { %8784 = vmatprep.subr.bf16.mxu1 %v8783_v51  ;;  %v2857_v51 = vld [vmem:[#allocation13 + $0xaa8] sm:$0xff]  ;;  %v8817_v53 = vpack.c.bf16 %v2854_v50, %v2852_v48  ;;  %v2890_v48 = vld [vmem:[#allocation13 + $0xbb0] sm:$0xff] }
 0x7cc   : > { %v8819_v37 = vpack.c.bf16 %v2859_v52, %v2857_v51  ;;  %v2893_v50 = vld [vmem:[#allocation13 + $0xbc8] sm:$0xff]  ;;  %v2895_v51 = vld [vmem:[#allocation13 + $0xbd8] sm:$0xff] }
 0x7ce   : > { %8786 = vmatpush1.bf16.msra.mxu1 %v8785_v54  ;;  %v2858_v54 = vld [vmem:[#allocation13 + $0xab0] sm:$0xff] }
 0x7cf   : > { %8788 = vmatprep.subr.bf16.mxu1 %v8787_v0  ;;  %v2861_v0 = vld [vmem:[#allocation13 + $0xac8] sm:$0xff]  ;;  %v8821_v56 = vpack.c.bf16 %v2858_v54, %v2856_v38  ;;  %v2894_v38 = vld [vmem:[#allocation13 + $0xbd0] sm:$0xff] }
 0x7d0   : > { %v8823_v57 = vpack.c.bf16 %v2863_v55, %v2861_v0  ;;  %v2897_v54 = vld [vmem:[#allocation13 + $0xbe8] sm:$0xff]  ;;  %v2899_v0 = vld [vmem:[#allocation13 + $0xbf8] sm:$0xff] }
 0x7d2   : > { %8790 = vmatpush1.bf16.msra.mxu1 %v8789_v58  ;;  %v2862_v58 = vld [vmem:[#allocation13 + $0xad0] sm:$0xff] }
 0x7d3   : > { %8792 = vmatprep.subr.bf16.mxu1 %v8791_v49  ;;  %v2865_v49 = vld [vmem:[#allocation13 + $0xae8] sm:$0xff]  ;;  %v8825_v60 = vpack.c.bf16 %v2862_v58, %v2860_v35  ;;  %v2898_v35 = vld [vmem:[#allocation13 + $0xbf0] sm:$0xff] }
 0x7d4   : > { %v8827_v61 = vpack.c.bf16 %v2867_v59, %v2865_v49  ;;  %v2989_v58 = vld [vmem:[#allocation13 + $0xc08] sm:$0xff]  ;;  %v2991_v49 = vld [vmem:[#allocation13 + $0xc18] sm:$0xff] }
 0x7d6   : > { %8794 = vmatpush1.bf16.msra.mxu1 %v8793_v3  ;;  %v2866_v3 = vld [vmem:[#allocation13 + $0xaf0] sm:$0xff] }
 0x7d7   : > { %8796 = vmatprep.subr.bf16.mxu1 %v8795_v7  ;;  %v2869_v7 = vld [vmem:[#allocation13 + $0xb08] sm:$0xff]  ;;  %v8829_v8 = vpack.c.bf16 %v2866_v3, %v2864_v63  ;;  %v2990_v63 = vld [vmem:[#allocation13 + $0xc10] sm:$0xff] }
 0x7d8   : > { %v8831_v12 = vpack.c.bf16 %v2871_v62, %v2869_v7  ;;  %v2993_v3 = vld [vmem:[#allocation13 + $0xc28] sm:$0xff]  ;;  %v2995_v7 = vld [vmem:[#allocation13 + $0xc38] sm:$0xff]  ;;  %v3059_v62 = vrot.slane %v12018_v39, 2 }
 0x7da   : > { %8798 = vmatpush1.bf16.msra.mxu1 %v8797_v15  ;;  %v2870_v15 = vld [vmem:[#allocation13 + $0xb10] sm:$0xff] }
 0x7db   : > { %8800 = vmatprep.subr.bf16.mxu1 %v8799_v16  ;;  %v2873_v16 = vld [vmem:[#allocation13 + $0xb28] sm:$0xff]  ;;  %v8833_v9 = vpack.c.bf16 %v2870_v15, %v2868_v13  ;;  %v2901_v13 = vpop.permute.xlu0 %2900  ;;  %v8867_v15 = vpack.c.bf16 %v2995_v7, %v2993_v3  ;;  %v3031_v7 = vld [vmem:[#allocation13 + $0xd58] sm:$0xff] }
 0x7dc   : > { %v8835_v17 = vpack.c.bf16 %v2875_v6, %v2873_v16  ;;  %v2992_v16 = vld [vmem:[#allocation13 + $0xc20] sm:$0xff]  ;;  %v2994_v6 = vld [vmem:[#allocation13 + $0xc30] sm:$0xff]  ;;  %v3029_v3 = vld [vmem:[#allocation13 + $0xd48] sm:$0xff] }
 0x7dd   : > { %2827 = vmatmul.mubr.f32.vlgmr.msra.gmra.mrb[0].mxu1 %v2758_v25  ;;  %v2878_v25 = vld [vmem:[#allocation13 + $0xb50] sm:$0xff]  ;;  %v8869_v39 = vpack.c.bf16 %v2994_v6, %v2992_v16  ;;  %v3035_v16 = vld [vmem:[#allocation13 + $0xd78] sm:$0xff] }
 0x7de   : > { %8802 = vmatpush1.bf16.msra.mxu1 %v8801_v21  ;;  %2974 = vmatprep.mubr.f32.mxu1 %v2907_v28  ;;  %v2877_v21 = vld [vmem:[#allocation13 + $0xb48] sm:$0xff]  ;;  %v8841_v28 = vpack.c.bf16 %v2878_v25, %v2876_v2  ;;  %v3000_v25 = vld [vmem:[#allocation13 + $0xc60] sm:$0xff] }
 0x7df   : > { %8804 = vmatprep.subr.bf16.mxu1 %v8803_v23  ;;  %v8837_v23 = vpack.c.bf16 %v2874_v19, %v2872_v18  ;;  %v8839_v24 = vpack.c.bf16 %v2879_v22, %v2877_v21  ;;  %v2999_v18 = vld [vmem:[#allocation13 + $0xc58] sm:$0xff]  ;;  %v2996_v21 = vld [vmem:[#allocation13 + $0xc40] sm:$0xff]  ;;  %v2998_v22 = vld [vmem:[#allocation13 + $0xc50] sm:$0xff] }
 0x7e0   : > { %v8873_v2 = vpack.c.bf16 %v2998_v22, %v2996_v21  ;;  %v3036_v22 = vld [vmem:[#allocation13 + $0xd80] sm:$0xff] }
 0x7e2   : > { %8806 = vmatpush1.bf16.msra.mxu1 %v8805_v30  ;;  %v8843_v30 = vpack.c.bf16 %v2883_v27, %v2881_v26  ;;  %v3005_v26 = vld [vmem:[#allocation13 + $0xc88] sm:$0xff]  ;;  %v3007_v27 = vld [vmem:[#allocation13 + $0xc98] sm:$0xff] }
 0x7e3   : > { %8808 = vmatprep.subr.bf16.mxu1 %v8807_v31  ;;  %v2880_v31 = vld [vmem:[#allocation13 + $0xb60] sm:$0xff] }
 0x7e4   : > { %v8845_v36 = vpack.c.bf16 %v2882_v32, %v2880_v31  ;;  %v3004_v31 = vld [vmem:[#allocation13 + $0xc80] sm:$0xff]  ;;  %v3006_v32 = vld [vmem:[#allocation13 + $0xc90] sm:$0xff] }
 0x7e6   : > { %8810 = vmatpush1.bf16.msra.mxu1 %v8809_v20  ;;  %v8847_v20 = vpack.c.bf16 %v2887_v34, %v2885_v33  ;;  %v3009_v33 = vld [vmem:[#allocation13 + $0xca8] sm:$0xff]  ;;  %v3011_v34 = vld [vmem:[#allocation13 + $0xcb8] sm:$0xff] }
 0x7e7   : > { %8812 = vmatprep.subr.bf16.mxu1 %v8811_v29  ;;  %v2884_v29 = vld [vmem:[#allocation13 + $0xb80] sm:$0xff] }
 0x7e8   : > { %v8849_v45 = vpack.c.bf16 %v2886_v43, %v2884_v29  ;;  %v3008_v29 = vld [vmem:[#allocation13 + $0xca0] sm:$0xff]  ;;  %v3010_v43 = vld [vmem:[#allocation13 + $0xcb0] sm:$0xff] }
 0x7ea   : > { %8814 = vmatpush1.bf16.msra.mxu1 %v8813_v46  ;;  %v8851_v46 = vpack.c.bf16 %v2891_v44, %v2889_v40  ;;  %v3013_v40 = vld [vmem:[#allocation13 + $0xcc8] sm:$0xff]  ;;  %v3015_v44 = vld [vmem:[#allocation13 + $0xcd8] sm:$0xff] }
 0x7eb   : > { %8816 = vmatprep.subr.bf16.mxu1 %v8815_v47  ;;  %v2888_v47 = vld [vmem:[#allocation13 + $0xba0] sm:$0xff] }
 0x7ec   : > { %v8853_v52 = vpack.c.bf16 %v2890_v48, %v2888_v47  ;;  %v3012_v47 = vld [vmem:[#allocation13 + $0xcc0] sm:$0xff]  ;;  %v3014_v48 = vld [vmem:[#allocation13 + $0xcd0] sm:$0xff] }
 0x7ee   : > { %8818 = vmatpush1.bf16.msra.mxu1 %v8817_v53  ;;  %v8855_v53 = vpack.c.bf16 %v2895_v51, %v2893_v50  ;;  %v3017_v50 = vld [vmem:[#allocation13 + $0xce8] sm:$0xff]  ;;  %v3019_v51 = vld [vmem:[#allocation13 + $0xcf8] sm:$0xff] }
 0x7ef   : > { %8820 = vmatprep.subr.bf16.mxu1 %v8819_v37  ;;  %v2892_v37 = vld [vmem:[#allocation13 + $0xbc0] sm:$0xff] }
 0x7f0   : > { %v8857_v55 = vpack.c.bf16 %v2894_v38, %v2892_v37  ;;  %v3016_v37 = vld [vmem:[#allocation13 + $0xce0] sm:$0xff]  ;;  %v3018_v38 = vld [vmem:[#allocation13 + $0xcf0] sm:$0xff] }
 0x7f2   : > { %8822 = vmatpush1.bf16.msra.mxu1 %v8821_v56  ;;  %v8859_v56 = vpack.c.bf16 %v2899_v0, %v2897_v54  ;;  %v3021_v54 = vld [vmem:[#allocation13 + $0xd08] sm:$0xff]  ;;  %v3023_v0 = vld [vmem:[#allocation13 + $0xd18] sm:$0xff] }
 0x7f3   : > { %8824 = vmatprep.subr.bf16.mxu1 %v8823_v57  ;;  %v2896_v57 = vld [vmem:[#allocation13 + $0xbe0] sm:$0xff] }
 0x7f4   : > { %v8861_v59 = vpack.c.bf16 %v2898_v35, %v2896_v57  ;;  %v3020_v57 = vld [vmem:[#allocation13 + $0xd00] sm:$0xff]  ;;  %v3022_v35 = vld [vmem:[#allocation13 + $0xd10] sm:$0xff] }
 0x7f6   : > { %8826 = vmatpush1.bf16.msra.mxu1 %v8825_v60  ;;  %v8863_v60 = vpack.c.bf16 %v2991_v49, %v2989_v58  ;;  %v3025_v58 = vld [vmem:[#allocation13 + $0xd28] sm:$0xff]  ;;  %v3027_v49 = vld [vmem:[#allocation13 + $0xd38] sm:$0xff] }
 0x7f7   : > { %8828 = vmatprep.subr.bf16.mxu1 %v8827_v61  ;;  %v2988_v61 = vld [vmem:[#allocation13 + $0xc00] sm:$0xff] }
 0x7fa   : > { %8830 = vmatpush1.bf16.msra.mxu1 %v8829_v8  ;;  %v3060_v8 = vrot.slane %v12022_v41, 2 }
 0x7fb   : > { %8832 = vmatprep.subr.bf16.mxu1 %v8831_v12  ;;  %v8865_v12 = vpack.c.bf16 %v2990_v63, %v2988_v61  ;;  %v3024_v61 = vld [vmem:[#allocation13 + $0xd20] sm:$0xff]  ;;  %v3026_v63 = vld [vmem:[#allocation13 + $0xd30] sm:$0xff] }
 0x7fc   : > { %v3061_v19 = vsel %vm1737_vm9, %v3059_v62, %v3060_v8  ;;  %v8901_v62 = vpack.c.bf16 %v3026_v63, %v3024_v61  ;;  %v8903_v8 = vpack.c.bf16 %v3031_v7, %v3029_v3  ;;  %v3152_v3 = vld [vmem:[#allocation13 + $0xe40] sm:$0xff]  ;;  %v3154_v7 = vld [vmem:[#allocation13 + $0xe50] sm:$0xff] }
 0x7fe   : > { %8834 = vmatpush1.bf16.msra.mxu1 %v8833_v9  ;;  %v2906_v9 = vsel %vm1147_vm10, %v2901_v13, %v10435_v10  ;;  %v3002_v10 = vld [vmem:[#allocation13 + $0xc70] sm:$0xff] }
 0x7ff   : > { %8836 = vmatprep.subr.bf16.mxu1 %v8835_v17  ;;  %v2997_v17 = vld [vmem:[#allocation13 + $0xc48] sm:$0xff]  ;;  %v3030_v13 = vld [vmem:[#allocation13 + $0xd50] sm:$0xff] }
 0x800   : > { %v8871_v41 = vpack.c.bf16 %v2999_v18, %v2997_v17  ;;  %v3032_v17 = vld [vmem:[#allocation13 + $0xd60] sm:$0xff]  ;;  %v3034_v18 = vld [vmem:[#allocation13 + $0xd70] sm:$0xff] }
 0x802   : > { %8838 = vmatpush1.bf16.msra.mxu1 %v8837_v23  ;;  %v3001_v23 = vld [vmem:[#allocation13 + $0xc68] sm:$0xff] }
 0x803   : > { %8840 = vmatprep.subr.bf16.mxu1 %v8839_v24  ;;  %v3003_v24 = vld [vmem:[#allocation13 + $0xc78] sm:$0xff] }
 0x804   : > { %v8875_v14 = vpack.c.bf16 %v3003_v24, %v3001_v23  ;;  %v3038_v23 = vld [vmem:[#allocation13 + $0xd90] sm:$0xff]  ;;  %v3041_v24 = vld [vmem:[#allocation13 + $0xda8] sm:$0xff] }
 0x806   : > { %8842 = vmatpush1.bf16.msra.mxu1 %v8841_v28  ;;  %v8877_v28 = vpack.c.bf16 %v3002_v10, %v3000_v25  ;;  %v3040_v10 = vld [vmem:[#allocation13 + $0xda0] sm:$0xff] }
 0x807   : > { %8844 = vmatprep.subr.bf16.mxu1 %v8843_v30  ;;  %v8879_v30 = vpack.c.bf16 %v3007_v27, %v3005_v26  ;;  %v3042_v26 = vld [vmem:[#allocation13 + $0xdb0] sm:$0xff]  ;;  %v3045_v27 = vld [vmem:[#allocation13 + $0xdc8] sm:$0xff] }
 0x80a   : > { %8846 = vmatpush1.bf16.msra.mxu1 %v8845_v36  ;;  %v8881_v36 = vpack.c.bf16 %v3006_v32, %v3004_v31  ;;  %v3044_v32 = vld [vmem:[#allocation13 + $0xdc0] sm:$0xff] }
 0x80b   : > { %8848 = vmatprep.subr.bf16.mxu1 %v8847_v20  ;;  %v8883_v20 = vpack.c.bf16 %v3011_v34, %v3009_v33  ;;  %v3046_v33 = vld [vmem:[#allocation13 + $0xdd0] sm:$0xff]  ;;  %v3049_v34 = vld [vmem:[#allocation13 + $0xde8] sm:$0xff] }
 0x80e   : > { %8850 = vmatpush1.bf16.msra.mxu1 %v8849_v45  ;;  %v8885_v45 = vpack.c.bf16 %v3010_v43, %v3008_v29  ;;  %v3048_v43 = vld [vmem:[#allocation13 + $0xde0] sm:$0xff] }
 0x80f   : > { %8852 = vmatprep.subr.bf16.mxu1 %v8851_v46  ;;  %v8887_v46 = vpack.c.bf16 %v3015_v44, %v3013_v40  ;;  %v3050_v40 = vld [vmem:[#allocation13 + $0xdf0] sm:$0xff]  ;;  %v3145_v44 = vld [vmem:[#allocation13 + $0xe08] sm:$0xff] }
 0x812   : > { %8854 = vmatpush1.bf16.msra.mxu1 %v8853_v52  ;;  %v8889_v52 = vpack.c.bf16 %v3014_v48, %v3012_v47  ;;  %v12081_v47 = vpop.permute.xlu1 %10438  ;;  %v8925_v48 = vpack.c.bf16 %v3050_v40, %v3048_v43 }
 0x813   : > { %8856 = vmatprep.subr.bf16.mxu1 %v8855_v53  ;;  %v8891_v53 = vpack.c.bf16 %v3019_v51, %v3017_v50  ;;  %v3144_v51 = vld [vmem:[#allocation13 + $0xe00] sm:$0xff] }
 0x816   : > { %8858 = vmatpush1.bf16.msra.mxu1 %v8857_v55  ;;  %v8893_v55 = vpack.c.bf16 %v3018_v38, %v3016_v37  ;;  %v3057_v37 = vrot.slane %v12026_v42, 2  ;;  %v3149_v38 = vld [vmem:[#allocation13 + $0xe28] sm:$0xff] }
 0x817   : > { %8860 = vmatprep.subr.bf16.mxu1 %v8859_v56  ;;  %v8895_v56 = vpack.c.bf16 %v3023_v0, %v3021_v54  ;;  %v3151_v54 = vld [vmem:[#allocation13 + $0xe38] sm:$0xff]  ;;  %v10441_v0 = vunpack.i.h.bf16 %v12081_v47 }
 0x81a   : > { %8862 = vmatpush1.bf16.msra.mxu1 %v8861_v59  ;;  %v8897_v59 = vpack.c.bf16 %v3022_v35, %v3020_v57  ;;  %v8931_v57 = vpack.c.bf16 %v3151_v54, %v3149_v38  ;;  %v3148_v35 = vld [vmem:[#allocation13 + $0xe20] sm:$0xff]  ;;  %v3187_v38 = vld [vmem:[#allocation13 + $0xf58] sm:$0xff] }
 0x81b   : > { %8864 = vmatprep.subr.bf16.mxu1 %v8863_v60  ;;  %v8899_v60 = vpack.c.bf16 %v3027_v49, %v3025_v58  ;;  %v3150_v58 = vld [vmem:[#allocation13 + $0xe30] sm:$0xff] }
 0x81c   : > { %v8933_v61 = vpack.c.bf16 %v3150_v58, %v3148_v35  ;;  %v3189_v35 = vld [vmem:[#allocation13 + $0xf68] sm:$0xff]  ;;  %v3191_v58 = vld [vmem:[#allocation13 + $0xf78] sm:$0xff] }
 0x81d   : > { %2975 = vmatmul.mubr.f32.vlgmr.msra.gmra.mrb[0].mxu1 %v2906_v9 }
 0x81e   : > { %8866 = vmatpush1.bf16.msra.mxu1 %v8865_v12  ;;  %3128 = vmatprep.mubr.f32.mxu1 %v3061_v19  ;;  %v3028_v12 = vld [vmem:[#allocation13 + $0xd40] sm:$0xff]  ;;  %v3037_v19 = vld [vmem:[#allocation13 + $0xd88] sm:$0xff] }
 0x81f   : > { %8868 = vmatprep.subr.bf16.mxu1 %v8867_v15  ;;  %v3033_v15 = vld [vmem:[#allocation13 + $0xd68] sm:$0xff]  ;;  %v8905_v6 = vpack.c.bf16 %v3030_v13, %v3028_v12  ;;  %v8937_v12 = vpack.c.bf16 %v3154_v7, %v3152_v3 }
 0x820   : > { %v8907_v9 = vpack.c.bf16 %v3035_v16, %v3033_v15  ;;  %v3156_v15 = vld [vmem:[#allocation13 + $0xe60] sm:$0xff]  ;;  %v3158_v16 = vld [vmem:[#allocation13 + $0xe70] sm:$0xff] }
 0x822   : > { %8870 = vmatpush1.bf16.msra.mxu1 %v8869_v39  ;;  %v3039_v39 = vld [vmem:[#allocation13 + $0xd98] sm:$0xff] }
 0x823   : > { %8872 = vmatprep.subr.bf16.mxu1 %v8871_v41  ;;  %v8909_v41 = vpack.c.bf16 %v3034_v18, %v3032_v17  ;;  %v8911_v21 = vpack.c.bf16 %v3039_v39, %v3037_v19  ;;  %v8941_v17 = vpack.c.bf16 %v3158_v16, %v3156_v15  ;;  %v3160_v19 = vld [vmem:[#allocation13 + $0xe80] sm:$0xff]  ;;  %v3162_v39 = vld [vmem:[#allocation13 + $0xe90] sm:$0xff] }
 0x826   : > { %8874 = vmatpush1.bf16.msra.mxu1 %v8873_v2  ;;  %v3043_v2 = vld [vmem:[#allocation13 + $0xdb8] sm:$0xff] }
 0x827   : > { %8876 = vmatprep.subr.bf16.mxu1 %v8875_v14  ;;  %v8913_v14 = vpack.c.bf16 %v3038_v23, %v3036_v22  ;;  %v8915_v25 = vpack.c.bf16 %v3043_v2, %v3041_v24  ;;  %v8945_v22 = vpack.c.bf16 %v3162_v39, %v3160_v19  ;;  %v3164_v24 = vld [vmem:[#allocation13 + $0xea0] sm:$0xff]  ;;  %v3166_v2 = vld [vmem:[#allocation13 + $0xeb0] sm:$0xff] }
 0x82a   : > { %8878 = vmatpush1.bf16.msra.mxu1 %v8877_v28  ;;  %v3047_v28 = vld [vmem:[#allocation13 + $0xdd8] sm:$0xff] }
 0x82b   : > { %8880 = vmatprep.subr.bf16.mxu1 %v8879_v30  ;;  %v8917_v30 = vpack.c.bf16 %v3042_v26, %v3040_v10  ;;  %v8919_v31 = vpack.c.bf16 %v3047_v28, %v3045_v27  ;;  %v8949_v10 = vpack.c.bf16 %v3166_v2, %v3164_v24  ;;  %v3168_v27 = vld [vmem:[#allocation13 + $0xec0] sm:$0xff]  ;;  %v3170_v28 = vld [vmem:[#allocation13 + $0xed0] sm:$0xff] }
 0x82e   : > { %8882 = vmatpush1.bf16.msra.mxu1 %v8881_v36  ;;  %v3051_v36 = vld [vmem:[#allocation13 + $0xdf8] sm:$0xff] }
 0x82f   : > { %8884 = vmatprep.subr.bf16.mxu1 %v8883_v20  ;;  %v8921_v20 = vpack.c.bf16 %v3046_v33, %v3044_v32  ;;  %v8923_v29 = vpack.c.bf16 %v3051_v36, %v3049_v34  ;;  %v8953_v32 = vpack.c.bf16 %v3170_v28, %v3168_v27  ;;  %v3172_v34 = vld [vmem:[#allocation13 + $0xee0] sm:$0xff]  ;;  %v3174_v36 = vld [vmem:[#allocation13 + $0xef0] sm:$0xff]  ;;  %v12090_v27 = vpop.permute.xlu1 %10443 }
 0x830   : > { %v8957_v43 = vpack.c.bf16 %v3174_v36, %v3172_v34  ;;  %v3314_v34 = vld [vmem:[#allocation13 + $0x1038] sm:$0xff]  ;;  %v10446_v36 = vunpack.i.h.bf16 %v12090_v27 }
 0x832   : > { %8886 = vmatpush1.bf16.msra.mxu1 %v8885_v45  ;;  %v3147_v45 = vld [vmem:[#allocation13 + $0xe18] sm:$0xff] }
 0x833   : > { %8888 = vmatprep.subr.bf16.mxu1 %v8887_v46  ;;  %v2983_v46 = vld [vmem:[#allocation2] sm:$0xfc]  ;;  %v8927_v50 = vpack.c.bf16 %v3147_v45, %v3145_v44  ;;  %v3178_v45 = vld [vmem:[#allocation13 + $0xf10] sm:$0xff] }
 0x834   : > { %v3176_v44 = vld [vmem:[#allocation13 + $0xf00] sm:$0xff] }
 0x836   : > { %8890 = vmatpush1.bf16.msra.mxu1 %v8889_v52  ;;  %v3146_v52 = vld [vmem:[#allocation13 + $0xe10] sm:$0xff] }
 0x837   : > { %8892 = vmatprep.subr.bf16.mxu1 %v8891_v53  ;;  %v3056_v53 = vrot.slane %v2983_v46, 2  ;;  %v3181_v46 = vld [vmem:[#allocation13 + $0xf28] sm:$0xff] }
 0x839   : > { %v3058_v49 = vsel %vm1737_vm9, %v3056_v53, %v3057_v37  ;;  %v3182_v53 = vld [vmem:[#allocation13 + $0xf30] sm:$0xff]  ;;  %v3185_v37 = vld [vmem:[#allocation13 + $0xf48] sm:$0xff] }
 0x83a   : > { %8894 = vmatpush1.bf16.msra.mxu1 %v8893_v55  ;;  %v10440_v55 = vunpack.i.l.bf16 %v12081_v47 }
 0x83b   : > { %8896 = vmatprep.subr.bf16.mxu1 %v8895_v56  ;;  %v8929_v56 = vpack.c.bf16 %v3146_v52, %v3144_v51  ;;  %v3180_v52 = vld [vmem:[#allocation13 + $0xf20] sm:$0xff] }
 0x83c   : > { %v3230_v42 = vsel %vm2217_vm7, %v10440_v55, %v10441_v0  ;;  %v8965_v54 = vpack.c.bf16 %v3182_v53, %v3180_v52  ;;  %v8967_v0 = vpack.c.bf16 %v3187_v38, %v3185_v37  ;;  %v3315_v37 = vld [vmem:[#allocation13 + $0x1040] sm:$0xff]  ;;  %v3317_v38 = vld [vmem:[#allocation13 + $0x1050] sm:$0xff] }
 0x83d   : > { %v9001_v47 = vpack.c.bf16 %v3317_v38, %v3315_v37 }
 0x83e   : > { %8898 = vmatpush1.bf16.msra.mxu1 %v8897_v59  ;;  %v3153_v59 = vld [vmem:[#allocation13 + $0xe48] sm:$0xff] }
 0x83f   : > { %8900 = vmatprep.subr.bf16.mxu1 %v8899_v60  ;;  %v3155_v60 = vld [vmem:[#allocation13 + $0xe58] sm:$0xff] }
 0x840   : > { %v8935_v63 = vpack.c.bf16 %v3155_v60, %v3153_v59  ;;  %v8971_v59 = vpack.c.bf16 %v3191_v58, %v3189_v35  ;;  %v3188_v60 = vld [vmem:[#allocation13 + $0xf60] sm:$0xff]  ;;  %v3324_v35 = vld [vmem:[#allocation13 + $0x1088] sm:$0xff]  ;;  %v3326_v58 = vld [vmem:[#allocation13 + $0x1098] sm:$0xff] }
 0x842   : > { %8902 = vmatpush1.bf16.msra.mxu1 %v8901_v62  ;;  %v3157_v62 = vld [vmem:[#allocation13 + $0xe68] sm:$0xff] }
 0x843   : > { %8904 = vmatprep.subr.bf16.mxu1 %v8903_v8  ;;  %v3159_v8 = vld [vmem:[#allocation13 + $0xe78] sm:$0xff] }
 0x844   : > { %v8939_v13 = vpack.c.bf16 %v3159_v8, %v3157_v62  ;;  %v3192_v62 = vld [vmem:[#allocation13 + $0xf80] sm:$0xff]  ;;  %v3194_v8 = vld [vmem:[#allocation13 + $0xf90] sm:$0xff] }
 0x845   : > { %v8977_v15 = vpack.c.bf16 %v3194_v8, %v3192_v62  ;;  %v3327_v62 = vld [vmem:[#allocation13 + $0x10a0] sm:$0xff]  ;;  %v3329_v8 = vld [vmem:[#allocation13 + $0x10b0] sm:$0xff] }
 0x846   : > { %8906 = vmatpush1.bf16.msra.mxu1 %v8905_v6  ;;  %v3161_v6 = vld [vmem:[#allocation13 + $0xe88] sm:$0xff] }
 0x847   : > { %8908 = vmatprep.subr.bf16.mxu1 %v8907_v9  ;;  %v3163_v9 = vld [vmem:[#allocation13 + $0xe98] sm:$0xff] }
 0x848   : > { %v8943_v18 = vpack.c.bf16 %v3163_v9, %v3161_v6  ;;  %v3196_v6 = vld [vmem:[#allocation13 + $0xfa0] sm:$0xff]  ;;  %v3198_v9 = vld [vmem:[#allocation13 + $0xfb0] sm:$0xff] }
 0x849   : > { %v8981_v19 = vpack.c.bf16 %v3198_v9, %v3196_v6  ;;  %v3331_v6 = vld [vmem:[#allocation13 + $0x10c0] sm:$0xff]  ;;  %v3333_v9 = vld [vmem:[#allocation13 + $0x10d0] sm:$0xff] }
 0x84a   : > { %8910 = vmatpush1.bf16.msra.mxu1 %v8909_v41  ;;  %v3165_v41 = vld [vmem:[#allocation13 + $0xea8] sm:$0xff] }
 0x84b   : > { %8912 = vmatprep.subr.bf16.mxu1 %v8911_v21  ;;  %v3167_v21 = vld [vmem:[#allocation13 + $0xeb8] sm:$0xff] }
 0x84c   : > { %v8947_v23 = vpack.c.bf16 %v3167_v21, %v3165_v41  ;;  %v3200_v41 = vld [vmem:[#allocation13 + $0xfc0] sm:$0xff]  ;;  %v3202_v21 = vld [vmem:[#allocation13 + $0xfd0] sm:$0xff] }
 0x84d   : > { %v8985_v24 = vpack.c.bf16 %v3202_v21, %v3200_v41  ;;  %v3335_v41 = vld [vmem:[#allocation13 + $0x10e0] sm:$0xff]  ;;  %v3337_v21 = vld [vmem:[#allocation13 + $0x10f0] sm:$0xff] }
 0x84e   : > { %8914 = vmatpush1.bf16.msra.mxu1 %v8913_v14  ;;  %v3169_v14 = vld [vmem:[#allocation13 + $0xec8] sm:$0xff] }
 0x84f   : > { %8916 = vmatprep.subr.bf16.mxu1 %v8915_v25  ;;  %v3171_v25 = vld [vmem:[#allocation13 + $0xed8] sm:$0xff] }
 0x850   : > { %v8951_v26 = vpack.c.bf16 %v3171_v25, %v3169_v14  ;;  %v3204_v14 = vld [vmem:[#allocation13 + $0xfe0] sm:$0xff]  ;;  %v3206_v25 = vld [vmem:[#allocation13 + $0xff0] sm:$0xff] }
 0x851   : > { %v8989_v28 = vpack.c.bf16 %v3206_v25, %v3204_v14  ;;  %v3339_v14 = vld [vmem:[#allocation13 + $0x1100] sm:$0xff]  ;;  %v3341_v25 = vld [vmem:[#allocation13 + $0x1110] sm:$0xff] }
 0x852   : > { %8918 = vmatpush1.bf16.msra.mxu1 %v8917_v30  ;;  %v3173_v30 = vld [vmem:[#allocation13 + $0xee8] sm:$0xff] }
 0x853   : > { %8920 = vmatprep.subr.bf16.mxu1 %v8919_v31  ;;  %v3175_v31 = vld [vmem:[#allocation13 + $0xef8] sm:$0xff] }
 0x854   : > { %v8955_v33 = vpack.c.bf16 %v3175_v31, %v3173_v30  ;;  %v3307_v31 = vld [vmem:[#allocation13 + $0x1000] sm:$0xff] }
 0x856   : > { %8922 = vmatpush1.bf16.msra.mxu1 %v8921_v20  ;;  %v3177_v20 = vld [vmem:[#allocation13 + $0xf08] sm:$0xff] }
 0x857   : > { %8924 = vmatprep.subr.bf16.mxu1 %v8923_v29  ;;  %v3179_v29 = vld [vmem:[#allocation13 + $0xf18] sm:$0xff] }
 0x858   : > { %v8959_v40 = vpack.c.bf16 %v3179_v29, %v3177_v20  ;;  %v10445_v20 = vunpack.i.l.bf16 %v12090_v27 }
 0x85a   : > { %8926 = vmatpush1.bf16.msra.mxu1 %v8925_v48  ;;  %v3183_v48 = vld [vmem:[#allocation13 + $0xf38] sm:$0xff] }
 0x85b   : > { %8928 = vmatprep.subr.bf16.mxu1 %v8927_v50  ;;  %v8961_v50 = vpack.c.bf16 %v3178_v45, %v3176_v44  ;;  %v8963_v51 = vpack.c.bf16 %v3183_v48, %v3181_v46  ;;  %v3311_v44 = vld [vmem:[#allocation13 + $0x1020] sm:$0xff]  ;;  %v3313_v45 = vld [vmem:[#allocation13 + $0x1030] sm:$0xff]  ;;  %v3316_v48 = vld [vmem:[#allocation13 + $0x1048] sm:$0xff] }
 0x85c   : > { %v8997_v52 = vpack.c.bf16 %v3313_v45, %v3311_v44  ;;  %v3352_v44 = vld [vmem:[#allocation13 + $0x1168] sm:$0xff]  ;;  %v3354_v45 = vld [vmem:[#allocation13 + $0x1178] sm:$0xff] }
 0x85d   : > { %3129 = vmatmul.mubr.f32.vlgmr.msra.gmra.mrb[0].mxu1 %v3058_v49 }
 0x85e   : > { %8930 = vmatpush1.bf16.msra.mxu1 %v8929_v56  ;;  %3297 = vmatprep.mubr.f32.mxu1 %v3230_v42  ;;  %v3184_v56 = vld [vmem:[#allocation13 + $0xf40] sm:$0xff]  ;;  %v3190_v42 = vld [vmem:[#allocation13 + $0xf70] sm:$0xff] }
 0x85f   : > { %8932 = vmatprep.subr.bf16.mxu1 %v8931_v57  ;;  %v3186_v57 = vld [vmem:[#allocation13 + $0xf50] sm:$0xff]  ;;  %v8973_v3 = vpack.c.bf16 %v3190_v42, %v3188_v60  ;;  %v3323_v60 = vld [vmem:[#allocation13 + $0x1080] sm:$0xff] }
 0x860   : > { %v8969_v49 = vpack.c.bf16 %v3186_v57, %v3184_v56  ;;  %v3319_v56 = vld [vmem:[#allocation13 + $0x1060] sm:$0xff]  ;;  %v3321_v57 = vld [vmem:[#allocation13 + $0x1070] sm:$0xff] }
 0x861   : > { %v3325_v42 = vld [vmem:[#allocation13 + $0x1090] sm:$0xff] }
 0x862   : > { %8934 = vmatpush1.bf16.msra.mxu1 %v8933_v61  ;;  %v3193_v61 = vld [vmem:[#allocation13 + $0xf88] sm:$0xff] }
 0x863   : > { %8936 = vmatprep.subr.bf16.mxu1 %v8935_v63  ;;  %v3195_v63 = vld [vmem:[#allocation13 + $0xf98] sm:$0xff] }
 0x864   : > { %v8975_v7 = vpack.c.bf16 %v3195_v63, %v3193_v61  ;;  %v3328_v61 = vld [vmem:[#allocation13 + $0x10a8] sm:$0xff]  ;;  %v3330_v63 = vld [vmem:[#allocation13 + $0x10b8] sm:$0xff] }
 0x866   : > { %8938 = vmatpush1.bf16.msra.mxu1 %v8937_v12  ;;  %v3197_v12 = vld [vmem:[#allocation13 + $0xfa8] sm:$0xff] }
 0x867   : > { %8940 = vmatprep.subr.bf16.mxu1 %v8939_v13  ;;  %v3199_v13 = vld [vmem:[#allocation13 + $0xfb8] sm:$0xff] }
 0x868   : > { %v8979_v16 = vpack.c.bf16 %v3199_v13, %v3197_v12  ;;  %v3332_v12 = vld [vmem:[#allocation13 + $0x10c8] sm:$0xff]  ;;  %v3334_v13 = vld [vmem:[#allocation13 + $0x10d8] sm:$0xff] }
 0x86a   : > { %8942 = vmatpush1.bf16.msra.mxu1 %v8941_v17  ;;  %v3201_v17 = vld [vmem:[#allocation13 + $0xfc8] sm:$0xff] }
 0x86b   : > { %8944 = vmatprep.subr.bf16.mxu1 %v8943_v18  ;;  %v3203_v18 = vld [vmem:[#allocation13 + $0xfd8] sm:$0xff] }
 0x86c   : > { %v8983_v39 = vpack.c.bf16 %v3203_v18, %v3201_v17  ;;  %v3336_v17 = vld [vmem:[#allocation13 + $0x10e8] sm:$0xff]  ;;  %v3338_v18 = vld [vmem:[#allocation13 + $0x10f8] sm:$0xff] }
 0x86e   : > { %8946 = vmatpush1.bf16.msra.mxu1 %v8945_v22  ;;  %v3205_v22 = vld [vmem:[#allocation13 + $0xfe8] sm:$0xff] }
 0x86f   : > { %8948 = vmatprep.subr.bf16.mxu1 %v8947_v23  ;;  %v3207_v23 = vld [vmem:[#allocation13 + $0xff8] sm:$0xff] }
 0x870   : > { %v8987_v2 = vpack.c.bf16 %v3207_v23, %v3205_v22  ;;  %v3340_v22 = vld [vmem:[#allocation13 + $0x1108] sm:$0xff]  ;;  %v3342_v23 = vld [vmem:[#allocation13 + $0x1118] sm:$0xff] }
 0x872   : > { %8950 = vmatpush1.bf16.msra.mxu1 %v8949_v10  ;;  %v3308_v10 = vld [vmem:[#allocation13 + $0x1008] sm:$0xff] }
 0x873   : > { %8952 = vmatprep.subr.bf16.mxu1 %v8951_v26  ;;  %v3310_v26 = vld [vmem:[#allocation13 + $0x1018] sm:$0xff] }
 0x874   : > { %v8991_v30 = vpack.c.bf16 %v3310_v26, %v3308_v10  ;;  %v3344_v10 = vld [vmem:[#allocation13 + $0x1128] sm:$0xff]  ;;  %v3346_v26 = vld [vmem:[#allocation13 + $0x1138] sm:$0xff] }
 0x876   : > { %8954 = vmatpush1.bf16.msra.mxu1 %v8953_v32  ;;  %v3309_v32 = vld [vmem:[#allocation13 + $0x1010] sm:$0xff] }
 0x877   : > { %8956 = vmatprep.subr.bf16.mxu1 %v8955_v33  ;;  %v3312_v33 = vld [vmem:[#allocation13 + $0x1028] sm:$0xff]  ;;  %v8993_v29 = vpack.c.bf16 %v3309_v32, %v3307_v31  ;;  %v3343_v31 = vld [vmem:[#allocation13 + $0x1120] sm:$0xff]  ;;  %v3345_v32 = vld [vmem:[#allocation13 + $0x1130] sm:$0xff] }
 0x87a   : > { %8958 = vmatpush1.bf16.msra.mxu1 %v8957_v43  ;;  %v3224_v43 = vpop.permute.xlu0 %3223 }
 0x87b   : > { %8960 = vmatprep.subr.bf16.mxu1 %v8959_v40  ;;  %v8995_v40 = vpack.c.bf16 %v3314_v34, %v3312_v33  ;;  %v3229_v46 = vsel %vm2217_vm7, %v3224_v43, %v10440_v55  ;;  %v3348_v33 = vld [vmem:[#allocation13 + $0x1148] sm:$0xff]  ;;  %v3350_v34 = vld [vmem:[#allocation13 + $0x1158] sm:$0xff]  ;;  %v3347_v43 = vld [vmem:[#allocation13 + $0x1140] sm:$0xff] }
 0x87e   : > { %8962 = vmatpush1.bf16.msra.mxu1 %v8961_v50  ;;  %v3318_v50 = vld [vmem:[#allocation13 + $0x1058] sm:$0xff] }
 0x87f   : > { %8964 = vmatprep.subr.bf16.mxu1 %v8963_v51  ;;  %v3378_v51 = vsel %vm1147_vm10, %v10445_v20, %v10446_v36  ;;  %v8999_v53 = vpack.c.bf16 %v3318_v50, %v3316_v48  ;;  %v9029_v36 = vpack.c.bf16 %v3345_v32, %v3343_v31  ;;  %v9035_v48 = vpack.c.bf16 %v3354_v45, %v3352_v44  ;;  %v3351_v50 = vld [vmem:[#allocation13 + $0x1160] sm:$0xff] }
 0x882   : > { %8966 = vmatpush1.bf16.msra.mxu1 %v8965_v54  ;;  %v3320_v54 = vld [vmem:[#allocation13 + $0x1068] sm:$0xff] }
 0x883   : > { %8968 = vmatprep.subr.bf16.mxu1 %v8967_v0  ;;  %v3322_v0 = vld [vmem:[#allocation13 + $0x1078] sm:$0xff] }
 0x884   : > { %v9003_v55 = vpack.c.bf16 %v3322_v0, %v3320_v54  ;;  %v3355_v54 = vld [vmem:[#allocation13 + $0x1180] sm:$0xff]  ;;  %v3357_v0 = vld [vmem:[#allocation13 + $0x1190] sm:$0xff] }
 0x886   : > { %8970 = vmatpush1.bf16.msra.mxu1 %v8969_v49  ;;  %v9005_v49 = vpack.c.bf16 %v3321_v57, %v3319_v56  ;;  %v9041_v56 = vpack.c.bf16 %v3357_v0, %v3355_v54  ;;  %v3599_v54 = vld [vmem:[#allocation16 + $0x118] sm:$0xff]  ;;  %v3596_v0 = vld [vmem:[#allocation16 + $0x100] sm:$0xff] }
 0x887   : > { %8972 = vmatprep.subr.bf16.mxu1 %v8971_v59  ;;  %v9007_v59 = vpack.c.bf16 %v3326_v58, %v3324_v35  ;;  %v3359_v35 = vld [vmem:[#allocation13 + $0x11a0] sm:$0xff]  ;;  %v3361_v58 = vld [vmem:[#allocation13 + $0x11b0] sm:$0xff] }
 0x88a   : > { %8974 = vmatpush1.bf16.msra.mxu1 %v8973_v3  ;;  %v9009_v3 = vpack.c.bf16 %v3325_v42, %v3323_v60  ;;  %v9045_v60 = vpack.c.bf16 %v3361_v58, %v3359_v35 }
 0x88b   : > { %8976 = vmatprep.subr.bf16.mxu1 %v8975_v7  ;;  %v9011_v7 = vpack.c.bf16 %v3330_v63, %v3328_v61  ;;  %v3363_v61 = vld [vmem:[#allocation13 + $0x11c0] sm:$0xff]  ;;  %v3365_v63 = vld [vmem:[#allocation13 + $0x11d0] sm:$0xff] }
 0x88e   : > { %8978 = vmatpush1.bf16.msra.mxu1 %v8977_v15  ;;  %v9013_v15 = vpack.c.bf16 %v3329_v8, %v3327_v62  ;;  %v9049_v62 = vpack.c.bf16 %v3365_v63, %v3363_v61 }
 0x88f   : > { %8980 = vmatprep.subr.bf16.mxu1 %v8979_v16  ;;  %v9015_v16 = vpack.c.bf16 %v3334_v13, %v3332_v12  ;;  %v3367_v12 = vld [vmem:[#allocation13 + $0x11e0] sm:$0xff]  ;;  %v3369_v13 = vld [vmem:[#allocation13 + $0x11f0] sm:$0xff] }
 0x892   : > { %8982 = vmatpush1.bf16.msra.mxu1 %v8981_v19  ;;  %v9017_v19 = vpack.c.bf16 %v3333_v9, %v3331_v6  ;;  %v3454_v9 = vld [vmem:[#allocation14] sm:$0x3] }
 0x893   : > { %8984 = vmatprep.subr.bf16.mxu1 %v8983_v39  ;;  %v9019_v39 = vpack.c.bf16 %v3338_v18, %v3336_v17  ;;  %v3459_v17 = vrot.slane %v3454_v9, %v11941_v11  ;;  %v3463_v18 = vrot.slane %v3454_v9, %v11984_v4  ;;  %v3613_v9 = vld [vmem:[#allocation16 + $0x188] sm:$0xff] }
 0x896   : > { %8986 = vmatpush1.bf16.msra.mxu1 %v8985_v24  ;;  %v9021_v24 = vpack.c.bf16 %v3337_v21, %v3335_v41 }
 0x897   : > { %8988 = vmatprep.subr.bf16.mxu1 %v8987_v2  ;;  %v9023_v2 = vpack.c.bf16 %v3342_v23, %v3340_v22 }
 0x89a   : > { %8990 = vmatpush1.bf16.msra.mxu1 %v8989_v28  ;;  %v9025_v28 = vpack.c.bf16 %v3341_v25, %v3339_v14 }
 0x89b   : > { %8992 = vmatprep.subr.bf16.mxu1 %v8991_v30  ;;  %v9027_v30 = vpack.c.bf16 %v3346_v26, %v3344_v10 }
 0x89d   : > { %3298 = vmatmul.mubr.f32.vlgmr.msra.gmra.mrb[0].mxu1 %v3229_v46 }
 0x89e   : > { %8994 = vmatpush1.bf16.msra.mxu1 %v8993_v29  ;;  %3445 = vmatprep.mubr.f32.mxu1 %v3378_v51  ;;  %v9031_v29 = vpack.c.bf16 %v3350_v34, %v3348_v33  ;;  %v3353_v51 = vld [vmem:[#allocation13 + $0x1170] sm:$0xff] }
 0x89f   : > { %8996 = vmatprep.subr.bf16.mxu1 %v8995_v40  ;;  %v3349_v40 = vld [vmem:[#allocation13 + $0x1150] sm:$0xff]  ;;  %v9037_v37 = vpack.c.bf16 %v3353_v51, %v3351_v50 }
 0x8a0   : > { %v9033_v46 = vpack.c.bf16 %v3349_v40, %v3347_v43 }
 0x8a2   : > { %8998 = vmatpush1.bf16.msra.mxu1 %v8997_v52  ;;  %v3356_v52 = vld [vmem:[#allocation13 + $0x1188] sm:$0xff] }
 0x8a3   : > { %9000 = vmatprep.subr.bf16.mxu1 %v8999_v53  ;;  %v3358_v53 = vld [vmem:[#allocation13 + $0x1198] sm:$0xff] }
 0x8a4   : > { %v9039_v38 = vpack.c.bf16 %v3358_v53, %v3356_v52  ;;  %v12118_v53 = vld [vmem:[#allocation2 + $0x20] sm:$0x1] }
 0x8a6   : > { %9002 = vmatpush1.bf16.msra.mxu1 %v9001_v47  ;;  %v3360_v47 = vld [vmem:[#allocation13 + $0x11a8] sm:$0xff] }
 0x8a7   : > { %9004 = vmatprep.subr.bf16.mxu1 %v9003_v55  ;;  %v3362_v55 = vld [vmem:[#allocation13 + $0x11b8] sm:$0xff] }
 0x8a8   : > { %v9043_v57 = vpack.c.bf16 %v3362_v55, %v3360_v47  ;;  %v3598_v55 = vld [vmem:[#allocation16 + $0x110] sm:$0xff] }
 0x8a9   : > { %v9057_v35 = vpack.c.bf16 %v3598_v55, %v3596_v0 }
 0x8aa   : > { %9006 = vmatpush1.bf16.msra.mxu1 %v9005_v49  ;;  %v3364_v49 = vld [vmem:[#allocation13 + $0x11c8] sm:$0xff] }
 0x8ab   : > { %9008 = vmatprep.subr.bf16.mxu1 %v9007_v59  ;;  %v3366_v59 = vld [vmem:[#allocation13 + $0x11d8] sm:$0xff] }
 0x8ac   : > { %v9047_v42 = vpack.c.bf16 %v3366_v59, %v3364_v49  ;;  %v3600_v49 = vld [vmem:[#allocation16 + $0x120] sm:$0xff]  ;;  %v3602_v59 = vld [vmem:[#allocation16 + $0x130] sm:$0xff] }
 0x8ad   : > { %v9061_v61 = vpack.c.bf16 %v3602_v59, %v3600_v49 }
 0x8ae   : > { %9010 = vmatpush1.bf16.msra.mxu1 %v9009_v3  ;;  %v3368_v3 = vld [vmem:[#allocation13 + $0x11e8] sm:$0xff] }
 0x8af   : > { %9012 = vmatprep.subr.bf16.mxu1 %v9011_v7  ;;  %v3370_v7 = vld [vmem:[#allocation13 + $0x11f8] sm:$0xff] }
 0x8b0   : > { %v9051_v8 = vpack.c.bf16 %v3370_v7, %v3368_v3  ;;  %v3604_v3 = vld [vmem:[#allocation16 + $0x140] sm:$0xff]  ;;  %v3606_v7 = vld [vmem:[#allocation16 + $0x150] sm:$0xff] }
 0x8b2   : > { %9014 = vmatpush1.bf16.msra.mxu1 %v9013_v15  ;;  %v9053_v15 = vpack.c.bf16 %v3369_v13, %v3367_v12  ;;  %v9065_v12 = vpack.c.bf16 %v3606_v7, %v3604_v3 }
 0x8b3   : > { %9016 = vmatprep.subr.bf16.mxu1 %v9015_v16  ;;  %v3372_v16 = vpop.permute.xlu0 %3371 }
 0x8b4   : > { %v3377_v6 = vsel %vm1147_vm10, %v3372_v16, %v10445_v20  ;;  %v3610_v16 = vld [vmem:[#allocation16 + $0x170] sm:$0xff] }
 0x8b6   : > { %9018 = vmatpush1.bf16.msra.mxu1 %v9017_v19 }
 0x8b7   : > { %9020 = vmatprep.subr.bf16.mxu1 %v9019_v39 }
 0x8ba   : > { %9022 = vmatpush1.bf16.msra.mxu1 %v9021_v24 }
 0x8bb   : > { %9024 = vmatprep.subr.bf16.mxu1 %v9023_v2 }
 0x8be   : > { %9026 = vmatpush1.bf16.msra.mxu1 %v9025_v28 }
 0x8bf   : > { %9028 = vmatprep.subr.bf16.mxu1 %v9027_v30 }
 0x8c2   : > { %9030 = vmatpush1.bf16.msra.mxu1 %v9029_v36 }
 0x8c3   : > { %9032 = vmatprep.subr.bf16.mxu1 %v9031_v29 }
 0x8c6   : > { %9034 = vmatpush1.bf16.msra.mxu1 %v9033_v46 }
 0x8c7   : > { %9036 = vmatprep.subr.bf16.mxu1 %v9035_v48 }
 0x8ca   : > { %9038 = vmatpush1.bf16.msra.mxu1 %v9037_v37  ;;  %v12120_v37 = vld [vmem:[#allocation2 + $0x20] sm:$0x3] }
 0x8cb   : > { %9040 = vmatprep.subr.bf16.mxu1 %v9039_v38  ;;  %4625 = vst [vmem:[#allocation2 + $0x20] sm:$0x3] %v11980_v1  ;;  %v3597_v38 = vld [vmem:[#allocation16 + $0x108] sm:$0xff] }
 0x8cc   : > { %v9055_v47 = vpack.c.bf16 %v3599_v54, %v3597_v38 }
 0x8ce   : > { %9042 = vmatpush1.bf16.msra.mxu1 %v9041_v56  ;;  %v3601_v56 = vld [vmem:[#allocation16 + $0x128] sm:$0xff]  ;;  %9056 = vmatprep.subr.bf16.mxu0 %v9055_v47 }
 0x8cf   : > { %9044 = vmatprep.subr.bf16.mxu1 %v9043_v57  ;;  %v3603_v57 = vld [vmem:[#allocation16 + $0x138] sm:$0xff]  ;;  %9058 = vmatpush1.bf16.msra.mxu0 %v9057_v35 }
 0x8d0   : > { %v9059_v58 = vpack.c.bf16 %v3603_v57, %v3601_v56  ;;  %v4049_v56 = vrot.slane %v12118_v53, 1 }
 0x8d2   : > { %9046 = vmatpush1.bf16.msra.mxu1 %v9045_v60  ;;  %v3605_v60 = vld [vmem:[#allocation16 + $0x148] sm:$0xff]  ;;  %9060 = vmatprep.subr.bf16.mxu0 %v9059_v58 }
 0x8d3   : > { %9048 = vmatprep.subr.bf16.mxu1 %v9047_v42  ;;  %v3607_v42 = vld [vmem:[#allocation16 + $0x158] sm:$0xff]  ;;  %9062 = vmatpush1.bf16.msra.mxu0 %v9061_v61 }
 0x8d4   : > { %v9063_v63 = vpack.c.bf16 %v3607_v42, %v3605_v60 }
 0x8d6   : > { %9050 = vmatpush1.bf16.msra.mxu1 %v9049_v62  ;;  %v3609_v62 = vld [vmem:[#allocation16 + $0x168] sm:$0xff]  ;;  %9064 = vmatprep.subr.bf16.mxu0 %v9063_v63  ;;  %v4401_v63 = vrot.slane %v12120_v37, 2 }
 0x8d7   : > { %9052 = vmatprep.subr.bf16.mxu1 %v9051_v8  ;;  %v3611_v8 = vld [vmem:[#allocation16 + $0x178] sm:$0xff]  ;;  %9066 = vmatpush1.bf16.msra.mxu0 %v9065_v12 }
 0x8d8   : > { %v9067_v13 = vpack.c.bf16 %v3611_v8, %v3609_v62 }
 0x8da   : > { %9054 = vmatpush1.bf16.msra.mxu1 %v9053_v15  ;;  %v3608_v15 = vld [vmem:[#allocation16 + $0x160] sm:$0xff]  ;;  %9068 = vmatprep.subr.bf16.mxu0 %v9067_v13 }
 0x8dd   : > { %3446 = vmatmul.mubr.f32.vlgmr.msra.gmra.mrb[0].mxu1 %v3377_v6  ;;  %v12123_v6 = vld [vmem:[#allocation2 + $0x18] sm:$0x1] }
 0x8de   : > { %v4046_v54 = vrot.slane %v12123_v6, 1  ;;  %v3564_v6 = vld [vmem:[#allocation16 + $0x10] sm:$0xff] }
 0x9b0   : > { %v3447_v19 = vpop.f32.mrb[0].mxu1 }
 0x9b1   : > { %v3466_v39 = vadd.f32 %v3459_v17, %v3447_v19  ;;  %v3449_v41 = vpop.f32.mrb[1].mxu1  ;;  %v3615_v17 = vld [vmem:[#allocation16 + $0x198] sm:$0xff] }
 0x9b2   : > { %v3467_v21 = vadd.f32 %v3463_v18, %v3449_v41  ;;  %v12125_v18 = vld [vmem:[#allocation2 + $0x18] sm:$0x3]  ;;  %v9069_v41 = vpack.c.bf16 %v3610_v16, %v3608_v15  ;;  %v3562_v16 = vld [vmem:[#allocation16] sm:$0xff] }
 0x9b3   : > { %v3470_v22 = vmin.f32 %v3466_v39, 0.0  ;;  %vm3468_vm12 = vcmp.gt.f32.partialorder %v3466_v39, 0.0  ;;  %v12127_v19 = vld [vmem:[#allocation2 + $0x18] sm:$0x1]  ;;  %v4398_v61 = vrot.slane %v12125_v18, 2 }
 0x9b4   : > { %v3471_v23 = vmin.f32 %v3467_v21, 0.0  ;;  %vm3469_vm13 = vcmp.gt.f32.partialorder %v3467_v21, 0.0  ;;  %9070 = vmatpush1.bf16.msra.mxu0 %v9069_v41 }
 0x9b5   : > { %v3472_v24 = vmul.f32 1.442695, %v3470_v22  ;;  %v3612_v22 = vld [vmem:[#allocation16 + $0x180] sm:$0xff] }
 0x9b6   : > { %v3474_v2 = vmul.f32 1.442695, %v3471_v23  ;;  %v3614_v23 = vld [vmem:[#allocation16 + $0x190] sm:$0xff] }
 0x9b7   : > { %10516 = vpow2.f32 %v3472_v24  ;;  %v3617_v24 = vld [vmem:[#allocation16 + $0x1a8] sm:$0xff] }
 0x9b8   : > { %10518 = vpow2.f32 %v3474_v2  ;;  %v3619_v2 = vld [vmem:[#allocation16 + $0x1b8] sm:$0xff] }
 0x9c1   : > { %v10517_v14 = vpop.eup %10516 }
 0x9c2   : > { %v10519_v27 = vpop.eup %10518  ;;  %v7764_v25 = vadd.f32 -1.0, %v10517_v14  ;;  %v9073_v14 = vpack.c.bf16 %v3614_v23, %v3612_v22  ;;  %v9089_v22 = vpack.c.bf16 %v3564_v6, %v3562_v16  ;;  %v3786_v16 = vld [vmem:[#allocation16 + $0x238] sm:$0xff] }
 0x9c3   : > { %v7765_v20 = vadd.f32 -1.0, %v10519_v27  ;;  %v9075_v27 = vpack.c.bf16 %v3619_v2, %v3617_v24  ;;  %v3566_v24 = vld [vmem:[#allocation16 + $0x20] sm:$0xff]  ;;  %v3568_v2 = vld [vmem:[#allocation16 + $0x30] sm:$0xff] }
 0x9c4   : > { %v3478_v10 = vsel %vm3468_vm12, %v3466_v39, %v7764_v25  ;;  %vm3516_vm12 = vcmask 786048   ;;  %v12129_v39 = vld [vmem:[#allocation2 + $0x18] sm:$0x3]  ;;  %v3616_v25 = vld [vmem:[#allocation16 + $0x1a0] sm:$0xff] }
 0x9c5   : > { %3481 = vrot.lane.b32.xlu1 %v3478_v10, %s11212_s5  ;;  %v3479_v26 = vsel %vm3469_vm13, %v3467_v21, %v7765_v20  ;;  %vm3521_vm13 = vcmask 917248   ;;  %4624 = vst [vmem:[#allocation2 + $0x18] sm:$0x3] %v11980_v1  ;;  %v9071_v21 = vpack.c.bf16 %v3615_v17, %v3613_v9  ;;  %v3618_v20 = vld [vmem:[#allocation16 + $0x1b0] sm:$0xff]  ;;  %v3567_v9 = vld [vmem:[#allocation16 + $0x28] sm:$0xff]  ;;  %v3569_v17 = vld [vmem:[#allocation16 + $0x38] sm:$0xff] }
 0x9c6   : > { %3503 = vrot.lane.b32.xlu0 %v3479_v26, %s11212_s5  ;;  %v9091_v23 = vpack.c.bf16 %v3569_v17, %v3567_v9  ;;  %v3783_v17 = vld [vmem:[#allocation16 + $0x220] sm:$0xff] }
 0x9c7   : > { %9072 = vmatprep.subr.bf16.mxu0 %v9071_v21 }
 0x9c8   : > { %9074 = vmatpush1.bf16.msra.mxu0 %v9073_v14 }
 0x9c9   : > { %9076 = vmatprep.subr.bf16.mxu0 %v9075_v27  ;;  %v3571_v27 = vld [vmem:[#allocation16 + $0x48] sm:$0xff] }
 0xa37   : > { %v3482_v28 = vpop.permute.xlu1 %3481 }
 0xa38   : > { %v3484_v30 = vmax.f32 %v3478_v10, %v3482_v28  ;;  %v3504_v31 = vpop.permute.xlu0 %3503  ;;  %v3621_v10 = vld [vmem:[#allocation16 + $0x1c8] sm:$0xff]  ;;  %v9077_v28 = vpack.c.bf16 %v3618_v20, %v3616_v25  ;;  %v3573_v25 = vld [vmem:[#allocation16 + $0x58] sm:$0xff]  ;;  %v9093_v20 = vpack.c.bf16 %v3568_v2, %v3566_v24  ;;  %v3787_v24 = vld [vmem:[#allocation16 + $0x240] sm:$0xff] }
 0xa39   : > { %v3506_v32 = vmax.f32 %v3479_v26, %v3504_v31  ;;  %v3623_v26 = vld [vmem:[#allocation16 + $0x1d8] sm:$0xff]  ;;  %v3620_v31 = vld [vmem:[#allocation16 + $0x1c0] sm:$0xff]  ;;  %v3789_v2 = vld [vmem:[#allocation16 + $0x250] sm:$0xff] }
 0xa3a   : > { %3485 = vst.msk [vmem:[#allocation2] sm:$0xff] %vm1007_vm3, %v3484_v30  ;;  %3487 = vrot.lane.b32.xlu1 %v3484_v30, %s11212_s5  ;;  %3492 = vrot.lane.b32.xlu0 %v3484_v30, %s11213_s1  ;;  %vm3500_vm3 = vcmask 523648  }
 0xa3b   : > { %9078 = vmatpush1.bf16.msra.mxu0 %v9077_v28  ;;  %v3572_v28 = vld [vmem:[#allocation16 + $0x50] sm:$0xff] }
 0xa3e   : > { %3497 = vrot.lane.b32.xlu1 %v3484_v30, %s11214_s16  ;;  %3508 = vrot.lane.b32.xlu0 %v3506_v32, %s11215_s9  ;;  %v9079_v30 = vpack.c.bf16 %v3623_v26, %v3621_v10  ;;  %v9095_v10 = vpack.c.bf16 %v3573_v25, %v3571_v27  ;;  %v3570_v26 = vld [vmem:[#allocation16 + $0x40] sm:$0xff]  ;;  %v3794_v27 = vld [vmem:[#allocation16 + $0x278] sm:$0xff]  ;;  %v9129_v25 = vpack.c.bf16 %v3789_v2, %v3787_v24 }
 0xa40   : > { %9080 = vmatprep.subr.bf16.mxu0 %v9079_v30  ;;  %v3575_v30 = vld [vmem:[#allocation16 + $0x68] sm:$0xff] }
 0xa42   : > { %3513 = vrot.lane.b32.xlu1 %v3506_v32, %s11216_s28  ;;  %3518 = vrot.lane.b32.xlu0 %v3506_v32, %s11217_s3 }
 0xa46   : > { %3523 = vrot.lane.b32.xlu1 %v3506_v32, %s11211_s2  ;;  %v3622_v32 = vld [vmem:[#allocation16 + $0x1d0] sm:$0xff] }
 0xaac   : > { %v3488_v33 = vpop.permute.xlu1 %3487  ;;  %v3493_v34 = vpop.permute.xlu0 %3492 }
 0xaad   : > { %3491 = vst.msk [vmem:[#allocation2] sm:$0xff] %vm3490_vm14, %v3488_v33  ;;  %v3625_v33 = vld [vmem:[#allocation16 + $0x1e8] sm:$0xff]  ;;  %vm4640_vm14 = vcmask 1047809  }
 0xaae   : > { %3496 = vst.msk [vmem:[#allocation2] sm:$0xff] %vm3495_vm15, %v3493_v34  ;;  %v3627_v34 = vld [vmem:[#allocation16 + $0x1f8] sm:$0xff]  ;;  %vm4645_vm15 = vcmask 1040640  }
 0xab0   : > { %v3498_v36 = vpop.permute.xlu1 %3497  ;;  %v3509_v29 = vpop.permute.xlu0 %3508 }
 0xab1   : > { %3501 = vst.msk [vmem:[#allocation2] sm:$0xff] %vm3500_vm3, %v3498_v36  ;;  %v9081_v36 = vpack.c.bf16 %v3622_v32, %v3620_v31  ;;  %v3577_v31 = vld [vmem:[#allocation16 + $0x78] sm:$0xff]  ;;  %v9097_v32 = vpack.c.bf16 %v3572_v28, %v3570_v26  ;;  %v3793_v26 = vld [vmem:[#allocation16 + $0x270] sm:$0xff]  ;;  %v3796_v28 = vld [vmem:[#allocation16 + $0x288] sm:$0xff]  ;;  %vm4643_vm3 = vcmask 261121  }
 0xab2   : > { %3512 = vst.msk [vmem:[#allocation2] sm:$0xff] %vm3511_vm5, %v3509_v29  ;;  %v9083_v29 = vpack.c.bf16 %v3627_v34, %v3625_v33  ;;  %v9099_v33 = vpack.c.bf16 %v3577_v31, %v3575_v30  ;;  %v3574_v34 = vld [vmem:[#allocation16 + $0x60] sm:$0xff]  ;;  %v3798_v30 = vld [vmem:[#allocation16 + $0x298] sm:$0xff]  ;;  %vm4648_vm5 = vcmask 253952  }
 0xab3   : > { %9082 = vmatpush1.bf16.msra.mxu0 %v9081_v36  ;;  %v3576_v36 = vld [vmem:[#allocation16 + $0x70] sm:$0xff]  ;;  %v9135_v31 = vpack.c.bf16 %v3798_v30, %v3796_v28  ;;  %v3909_v28 = vld [vmem:[#allocation16 + $0x380] sm:$0xff] }
 0xab4   : > { %v3514_v43 = vpop.permute.xlu1 %3513  ;;  %v3519_v40 = vpop.permute.xlu0 %3518  ;;  %9084 = vmatprep.subr.bf16.mxu0 %v9083_v29  ;;  %v3579_v29 = vld [vmem:[#allocation16 + $0x88] sm:$0xff]  ;;  %v3911_v30 = vld [vmem:[#allocation16 + $0x390] sm:$0xff] }
 0xab5   : > { %3517 = vst.msk [vmem:[#allocation2] sm:$0xff] %vm3516_vm12, %v3514_v43  ;;  %v3624_v43 = vld [vmem:[#allocation16 + $0x1e0] sm:$0xff]  ;;  %vm6079_vm12 = vcmask 1048320  }
 0xab6   : > { %3522 = vst.msk [vmem:[#allocation2] sm:$0xff] %vm3521_vm13, %v3519_v40  ;;  %v3626_v40 = vld [vmem:[#allocation16 + $0x1f0] sm:$0xff] }
 0xab8   : > { %v3524_v44 = vpop.permute.xlu1 %3523 }
 0xab9   : > { %3527 = vst.msk [vmem:[#allocation2] sm:$0xff] %vm3526_vm2, %v3524_v44  ;;  %v9085_v44 = vpack.c.bf16 %v3626_v40, %v3624_v43  ;;  %v3581_v43 = vld [vmem:[#allocation16 + $0x98] sm:$0xff]  ;;  %v9101_v40 = vpack.c.bf16 %v3576_v36, %v3574_v34  ;;  %v3800_v34 = vld [vmem:[#allocation16 + $0x2a8] sm:$0xff]  ;;  %vm4622_vm2 = vcmask 523264  }
 0xaba   : > { %v3802_v36 = vld [vmem:[#allocation16 + $0x2b8] sm:$0xff]  ;;  %4623 = vst.msk [vmem:[#allocation2 + $0x10] sm:$0xff] %vm4622_vm2, %v11980_v1 }
 0xabb   : > { %9086 = vmatpush1.bf16.msra.mxu0 %v9085_v44  ;;  %v9103_v44 = vpack.c.bf16 %v3581_v43, %v3579_v29  ;;  %v9139_v43 = vpack.c.bf16 %v3802_v36, %v3800_v34  ;;  %v3913_v34 = vld [vmem:[#allocation16 + $0x3a0] sm:$0xff]  ;;  %v3915_v36 = vld [vmem:[#allocation16 + $0x3b0] sm:$0xff] }
 0xac0   : > { %v3528_v45 = vld [vmem:[#allocation2] sm:$0xff] }
 0xac1   : > { %v3534_v46 = vrot.slane %v3528_v45, 1  ;;  %3529 = vst [vmem:[#allocation2] sm:$0xff] %v11980_v1 }
 0xac3   : > { %v3536_v48 = vmax.f32 %v3528_v45, %v3534_v46 }
 0xac5   : > { %3538 = vrot.lane.b32.xlu0 %v3536_v48, %s11211_s2  ;;  %v3543_v50 = vrot.slane %v3536_v48, 2  ;;  %v3549_v51 = vrot.slane %v3536_v48, 4  ;;  %v3555_v52 = vrot.slane %v3536_v48, 6 }
 0xac7   : > { %3544 = vrot.lane.b32.xlu1 %v3543_v50, %s11211_s2  ;;  %v3563_v50 = vld [vmem:[#allocation16 + $0x8] sm:$0xff] }
 0xac9   : > { %3550 = vrot.lane.b32.xlu0 %v3549_v51, %s11211_s2  ;;  %v3565_v51 = vld [vmem:[#allocation16 + $0x18] sm:$0xff] }
 0xacb   : > { %3556 = vrot.lane.b32.xlu1 %v3555_v52, %s11211_s2  ;;  %v9087_v52 = vpack.c.bf16 %v3565_v51, %v3563_v50  ;;  %v3585_v50 = vld [vmem:[#allocation16 + $0xb8] sm:$0xff] }
 0xacd   : > { %9088 = vmatprep.subr.bf16.mxu0 %v9087_v52 }
 0xb37   : > { %v3539_v45 = vpop.permute.xlu0 %3538 }
 0xb38   : > { %3541 = vst.msk [vmem:[#allocation2 + $0x3] sm:$0x1] %vm2071_vm4, %v3539_v45 }
 0xb39   : > { %3542 = vst.msk [vmem:[#allocation2 + $0xb] sm:$0x1] %vm2074_vm6, %v3539_v45  ;;  %v3545_v46 = vpop.permute.xlu1 %3544  ;;  %v3578_v45 = vld [vmem:[#allocation16 + $0x80] sm:$0xff] }
 0xb3a   : > { %3547 = vst.msk [vmem:[#allocation2 + $0x4] sm:$0x1] %vm2071_vm4, %v3545_v46 }
 0xb3b   : > { %3548 = vst.msk [vmem:[#allocation2 + $0xc] sm:$0x1] %vm2074_vm6, %v3545_v46  ;;  %v3551_v48 = vpop.permute.xlu0 %3550  ;;  %v3580_v46 = vld [vmem:[#allocation16 + $0x90] sm:$0xff] }
 0xb3c   : > { %3553 = vst.msk [vmem:[#allocation2 + $0x5] sm:$0x1] %vm2071_vm4, %v3551_v48  ;;  %v9105_v51 = vpack.c.bf16 %v3580_v46, %v3578_v45  ;;  %v3804_v45 = vld [vmem:[#allocation16 + $0x2c8] sm:$0xff]  ;;  %v3806_v46 = vld [vmem:[#allocation16 + $0x2d8] sm:$0xff] }
 0xb3d   : > { %3554 = vst.msk [vmem:[#allocation2 + $0xd] sm:$0x1] %vm2074_vm6, %v3551_v48  ;;  %v3557_v38 = vpop.permute.xlu1 %3556  ;;  %v3583_v48 = vld [vmem:[#allocation16 + $0xa8] sm:$0xff] }
 0xb3e   : > { %3559 = vst.msk [vmem:[#allocation2 + $0x6] sm:$0x1] %vm2071_vm4, %v3557_v38  ;;  %v9107_v52 = vpack.c.bf16 %v3585_v50, %v3583_v48  ;;  %v9143_v50 = vpack.c.bf16 %v3806_v46, %v3804_v45  ;;  %v3917_v45 = vld [vmem:[#allocation16 + $0x3c0] sm:$0xff]  ;;  %v3919_v46 = vld [vmem:[#allocation16 + $0x3d0] sm:$0xff]  ;;  %vm4626_vm4 = vcmask 517120  }
 0xb3f   : > { %3560 = vst.msk [vmem:[#allocation2 + $0xe] sm:$0x1] %vm2074_vm6, %v3557_v38  ;;  %v3582_v38 = vld [vmem:[#allocation16 + $0xa0] sm:$0xff] }
 0xb40   : > { %4627 = vst.msk [vmem:[#allocation2 + $0x28] sm:$0x3] %vm4626_vm4, %v11980_v1  ;;  %vm12564_vm4 = vcmask 39936  }
 0xb45   : > { %v12141_v0 = vld [vmem:[#allocation2] sm:$0xff] }
 0xb46   : > { %v3594_v47 = vld [vmem:[#allocation2 + $0x8] sm:$0xff]  ;;  %v4004_v55 = vld [vmem:[#allocation2] sm:$0xfe] }
 0xb47   : > { %v10452_v57 = vpack.i.bf16 %v3594_v47, %v12141_v0  ;;  %v4005_v35 = vld [vmem:[#allocation2 + $0x8] sm:$0xfe]  ;;  %v4045_v58 = vrot.slane %v4004_v55, 1  ;;  %v4356_v49 = vld [vmem:[#allocation2] sm:$0xfc]  ;;  %v3589_v55 = vld [vmem:[#allocation16 + $0xd8] sm:$0xff] }
 0xb48   : > { %v4048_v59 = vrot.slane %v4005_v35, 1  ;;  %v4357_v60 = vld [vmem:[#allocation2 + $0x8] sm:$0xfc]  ;;  %v4397_v42 = vrot.slane %v4356_v49, 2  ;;  %v12152_v62 = vld [vmem:[#allocation2] sm:$0xfe] }
 0xb49   : > { %10453 = vrot.lane.b32.xlu1 %v10452_v57, %s11213_s1  ;;  %10448 = vrot.lane.b32.xlu0 %v10452_v57, %s11212_s5  ;;  %v4047_v3 = vsel %vm1425_vm8, %v4045_v58, %v4046_v54  ;;  %v4400_v7 = vrot.slane %v4357_v60, 2  ;;  %4621 = vst [vmem:[#allocation2 + $0x8] sm:$0xff] %v11980_v1  ;;  %v12154_v8 = vld [vmem:[#allocation2] sm:$0xfc]  ;;  %v3584_v54 = vld [vmem:[#allocation16 + $0xb0] sm:$0xff] }
 0xb4a   : > { %v4050_v53 = vsel %vm1425_vm8, %v4048_v59, %v4049_v56  ;;  %4620 = vst [vmem:[#allocation2] sm:$0xff] %v11980_v1  ;;  %v4399_v37 = vsel %vm1737_vm9, %v4397_v42, %v4398_v61  ;;  %v3587_v47 = vld [vmem:[#allocation16 + $0xc8] sm:$0xff]  ;;  %v9109_v56 = vpack.c.bf16 %v3584_v54, %v3582_v38  ;;  %v3586_v35 = vld [vmem:[#allocation16 + $0xc0] sm:$0xff]  ;;  %v3588_v58 = vld [vmem:[#allocation16 + $0xd0] sm:$0xff] }
 0xb4b   : > { %v10462_v12 = vpack.i.bf16 %v4050_v53, %v4047_v3  ;;  %v4402_v13 = vsel %vm1737_vm9, %v4400_v7, %v4401_v63  ;;  %v9111_v57 = vpack.c.bf16 %v3589_v55, %v3587_v47  ;;  %v3591_v49 = vld [vmem:[#allocation16 + $0xe8] sm:$0xff]  ;;  %v3593_v59 = vld [vmem:[#allocation16 + $0xf8] sm:$0xff]  ;;  %v9113_v60 = vpack.c.bf16 %v3588_v58, %v3586_v35  ;;  %v3590_v61 = vld [vmem:[#allocation16 + $0xe0] sm:$0xff] }
 0xb4c   : > { %v10472_v15 = vpack.i.bf16 %v4402_v13, %v4399_v37  ;;  %v9115_v42 = vpack.c.bf16 %v3593_v59, %v3591_v49  ;;  %v3592_v63 = vld [vmem:[#allocation16 + $0xf0] sm:$0xff]  ;;  %v3780_v3 = vld [vmem:[#allocation16 + $0x208] sm:$0xff]  ;;  %v3782_v7 = vld [vmem:[#allocation16 + $0x218] sm:$0xff] }
 0xb4d   : > { %10463 = vrot.lane.b32.xlu1 %v10462_v12, %s11213_s1  ;;  %10458 = vrot.lane.b32.xlu0 %v10462_v12, %s11212_s5  ;;  %v9117_v53 = vpack.c.bf16 %v3592_v63, %v3590_v61  ;;  %v9119_v12 = vpack.c.bf16 %v3782_v7, %v3780_v3  ;;  %v3779_v37 = vld [vmem:[#allocation16 + $0x200] sm:$0xff]  ;;  %v3781_v13 = vld [vmem:[#allocation16 + $0x210] sm:$0xff]  ;;  %v3808_v38 = vld [vmem:[#allocation16 + $0x2e8] sm:$0xff] }
 0xb4e   : > { %v9121_v6 = vpack.c.bf16 %v3781_v13, %v3779_v37  ;;  %v3810_v54 = vld [vmem:[#allocation16 + $0x2f8] sm:$0xff]  ;;  %v3894_v35 = vld [vmem:[#allocation16 + $0x308] sm:$0xff]  ;;  %v3895_v61 = vld [vmem:[#allocation16 + $0x310] sm:$0xff] }
 0xb4f   : > { %v9147_v55 = vpack.c.bf16 %v3810_v54, %v3808_v38  ;;  %v3896_v58 = vld [vmem:[#allocation16 + $0x318] sm:$0xff]  ;;  %v3898_v7 = vld [vmem:[#allocation16 + $0x328] sm:$0xff]  ;;  %v3897_v13 = vld [vmem:[#allocation16 + $0x320] sm:$0xff] }
 0xb50   : > { %v3921_v38 = vld [vmem:[#allocation16 + $0x3e0] sm:$0xff]  ;;  %v3923_v54 = vld [vmem:[#allocation16 + $0x3f0] sm:$0xff] }
 0xb51   : > { %10473 = vrot.lane.b32.xlu1 %v10472_v15, %s11213_s1  ;;  %10468 = vrot.lane.b32.xlu0 %v10472_v15, %s11212_s5  ;;  %v3784_v15 = vld [vmem:[#allocation16 + $0x228] sm:$0xff] }
 0xb52   : > { %v9123_v9 = vpack.c.bf16 %v3786_v16, %v3784_v15  ;;  %v3899_v15 = vld [vmem:[#allocation16 + $0x330] sm:$0xff] }
 0xbbb   : > { %v10449_v18 = vpop.permute.xlu0 %10448  ;;  %v10454_v49 = vpop.permute.xlu1 %10453 }
 0xbbc   : > { %v10451_v41 = vunpack.i.h.bf16 %v10449_v18  ;;  %v10450_v21 = vunpack.i.l.bf16 %v10449_v18  ;;  %v3785_v18 = vld [vmem:[#allocation16 + $0x230] sm:$0xff]  ;;  %v10456_v63 = vunpack.i.h.bf16 %v10454_v49  ;;  %v10455_v3 = vunpack.i.l.bf16 %v10454_v49 }
 0xbbd   : > { %v3927_v49 = vrot.slane %v12152_v62, 1 }
 0xbbe   : > { %v3634_v14 = vsel %vm2217_vm7, %v10450_v21, %v10451_v41  ;;  %v3788_v41 = vld [vmem:[#allocation16 + $0x248] sm:$0xff]  ;;  %v3790_v21 = vld [vmem:[#allocation16 + $0x258] sm:$0xff]  ;;  %v3815_v16 = vsel %vm1147_vm10, %v10455_v3, %v10456_v63  ;;  %v4013_v3 = vld [vmem:[#allocation16 + $0x420] sm:$0xff] }
 0xbbf   : > { %3701 = vmatmul.mubr.f32.vlgmr.msra.gmra.mrb[6].mxu0 %v3634_v14  ;;  %v3792_v14 = vld [vmem:[#allocation16 + $0x268] sm:$0xff] }
 0xbc0   : > { %9090 = vmatpush1.bf16.msra.mxu0 %v9089_v22  ;;  %3771 = vmatprep.mubr.f32.mxu0 %v11980_v1  ;;  %v9125_v22 = vpack.c.bf16 %v3785_v18, %v3783_v17  ;;  %v9157_v17 = vpack.c.bf16 %v3899_v15, %v3897_v13  ;;  %v4019_v15 = vld [vmem:[#allocation16 + $0x450] sm:$0xff] }
 0xbc1   : > { %9092 = vmatprep.subr.bf16.mxu0 %v9091_v23  ;;  %v9127_v23 = vpack.c.bf16 %v3790_v21, %v3788_v41  ;;  %v3901_v41 = vld [vmem:[#allocation16 + $0x340] sm:$0xff]  ;;  %v3903_v21 = vld [vmem:[#allocation16 + $0x350] sm:$0xff] }
 0xbc2   : > { %v9161_v24 = vpack.c.bf16 %v3903_v21, %v3901_v41  ;;  %v4023_v41 = vld [vmem:[#allocation16 + $0x470] sm:$0xff]  ;;  %v4026_v21 = vld [vmem:[#allocation16 + $0x488] sm:$0xff] }
 0xbc4   : > { %9094 = vmatpush1.bf16.msra.mxu0 %v9093_v20  ;;  %v9131_v20 = vpack.c.bf16 %v3794_v27, %v3792_v14  ;;  %v3905_v14 = vld [vmem:[#allocation16 + $0x360] sm:$0xff]  ;;  %v3907_v27 = vld [vmem:[#allocation16 + $0x370] sm:$0xff] }
 0xbc5   : > { %9096 = vmatprep.subr.bf16.mxu0 %v9095_v10  ;;  %v3791_v10 = vld [vmem:[#allocation16 + $0x260] sm:$0xff] }
 0xbc8   : > { %9098 = vmatpush1.bf16.msra.mxu0 %v9097_v32  ;;  %v3795_v32 = vld [vmem:[#allocation16 + $0x280] sm:$0xff] }
 0xbc9   : > { %9100 = vmatprep.subr.bf16.mxu0 %v9099_v33  ;;  %v3797_v33 = vld [vmem:[#allocation16 + $0x290] sm:$0xff] }
 0xbca   : > { %v9137_v29 = vpack.c.bf16 %v3797_v33, %v3795_v32  ;;  %v9169_v32 = vpack.c.bf16 %v3911_v30, %v3909_v28  ;;  %v4031_v28 = vld [vmem:[#allocation16 + $0x4b0] sm:$0xff]  ;;  %v4034_v30 = vld [vmem:[#allocation16 + $0x4c8] sm:$0xff] }
 0xbcc   : > { %9102 = vmatpush1.bf16.msra.mxu0 %v9101_v40  ;;  %v3799_v40 = vld [vmem:[#allocation16 + $0x2a0] sm:$0xff] }
 0xbcd   : > { %9104 = vmatprep.subr.bf16.mxu0 %v9103_v44  ;;  %v3801_v44 = vld [vmem:[#allocation16 + $0x2b0] sm:$0xff] }
 0xbce   : > { %v9141_v48 = vpack.c.bf16 %v3801_v44, %v3799_v40  ;;  %v9173_v40 = vpack.c.bf16 %v3915_v36, %v3913_v34  ;;  %v4035_v34 = vld [vmem:[#allocation16 + $0x4d0] sm:$0xff]  ;;  %v4038_v36 = vld [vmem:[#allocation16 + $0x4e8] sm:$0xff] }
 0xbd0   : > { %9106 = vmatpush1.bf16.msra.mxu0 %v9105_v51  ;;  %v3803_v51 = vld [vmem:[#allocation16 + $0x2c0] sm:$0xff] }
 0xbd1   : > { %9108 = vmatprep.subr.bf16.mxu0 %v9107_v52  ;;  %v3805_v52 = vld [vmem:[#allocation16 + $0x2d0] sm:$0xff] }
 0xbd2   : > { %v9145_v47 = vpack.c.bf16 %v3805_v52, %v3803_v51  ;;  %v9177_v51 = vpack.c.bf16 %v3919_v46, %v3917_v45  ;;  %v4039_v45 = vld [vmem:[#allocation16 + $0x4f0] sm:$0xff]  ;;  %v4132_v46 = vld [vmem:[#allocation16 + $0x508] sm:$0xff] }
 0xbd4   : > { %9110 = vmatpush1.bf16.msra.mxu0 %v9109_v56  ;;  %v3807_v56 = vld [vmem:[#allocation16 + $0x2e0] sm:$0xff] }
 0xbd5   : > { %9112 = vmatprep.subr.bf16.mxu0 %v9111_v57  ;;  %v3809_v57 = vld [vmem:[#allocation16 + $0x2f0] sm:$0xff] }
 0xbd6   : > { %v9149_v59 = vpack.c.bf16 %v3809_v57, %v3807_v56  ;;  %v9181_v56 = vpack.c.bf16 %v3923_v54, %v3921_v38  ;;  %v4131_v38 = vld [vmem:[#allocation16 + $0x500] sm:$0xff]  ;;  %v4133_v54 = vld [vmem:[#allocation16 + $0x510] sm:$0xff] }
 0xbd8   : > { %9114 = vmatpush1.bf16.msra.mxu0 %v9113_v60  ;;  %v9151_v60 = vpack.c.bf16 %v3896_v58, %v3894_v35  ;;  %v4009_v35 = vld [vmem:[#allocation16 + $0x400] sm:$0xff]  ;;  %v4011_v58 = vld [vmem:[#allocation16 + $0x410] sm:$0xff] }
 0xbd9   : > { %9116 = vmatprep.subr.bf16.mxu0 %v9115_v42  ;;  %v3893_v42 = vld [vmem:[#allocation16 + $0x300] sm:$0xff] }
 0xbdc   : > { %9118 = vmatpush1.bf16.msra.mxu0 %v9117_v53  ;;  %v3900_v53 = vld [vmem:[#allocation16 + $0x338] sm:$0xff] }
 0xbdd   : > { %9120 = vmatprep.subr.bf16.mxu0 %v9119_v12  ;;  %v9153_v12 = vpack.c.bf16 %v3895_v61, %v3893_v42  ;;  %v9155_v37 = vpack.c.bf16 %v3900_v53, %v3898_v7  ;;  %v4016_v42 = vld [vmem:[#allocation16 + $0x438] sm:$0xff]  ;;  %v9185_v61 = vpack.c.bf16 %v4011_v58, %v4009_v35  ;;  %v4015_v7 = vld [vmem:[#allocation16 + $0x430] sm:$0xff]  ;;  %v9217_v35 = vpack.c.bf16 %v4133_v54, %v4131_v38 }
 0xbde   : > { %v9189_v13 = vpack.c.bf16 %v4015_v7, %v4013_v3  ;;  %v4139_v7 = vld [vmem:[#allocation16 + $0x540] sm:$0xff] }
 0xbdf   : > { %3772 = vmatmul.mubr.f32.vlgmr.msra.gmra.mrb[6].mxu0 %v12141_v0  ;;  %v9133_v0 = vpack.c.bf16 %v3793_v26, %v3791_v10  ;;  %v9165_v10 = vpack.c.bf16 %v3907_v27, %v3905_v14  ;;  %v4027_v14 = vld [vmem:[#allocation16 + $0x490] sm:$0xff]  ;;  %v4030_v27 = vld [vmem:[#allocation16 + $0x4a8] sm:$0xff] }
 0xbe0   : > { %9122 = vmatpush1.bf16.msra.mxu0 %v9121_v6  ;;  %3881 = vmatprep.mubr.f32.mxu0 %v11980_v1  ;;  %v3902_v6 = vld [vmem:[#allocation16 + $0x348] sm:$0xff] }
 0xbe1   : > { %9124 = vmatprep.subr.bf16.mxu0 %v9123_v9  ;;  %v3904_v9 = vld [vmem:[#allocation16 + $0x358] sm:$0xff] }
 0xbe2   : > { %v9159_v18 = vpack.c.bf16 %v3904_v9, %v3902_v6  ;;  %v4024_v6 = vld [vmem:[#allocation16 + $0x478] sm:$0xff] }
 0xbe4   : > { %9126 = vmatpush1.bf16.msra.mxu0 %v9125_v22  ;;  %v3906_v22 = vld [vmem:[#allocation16 + $0x368] sm:$0xff] }
 0xbe5   : > { %9128 = vmatprep.subr.bf16.mxu0 %v9127_v23  ;;  %v3908_v23 = vld [vmem:[#allocation16 + $0x378] sm:$0xff] }
 0xbe6   : > { %v9163_v2 = vpack.c.bf16 %v3908_v23, %v3906_v22  ;;  %v4028_v22 = vld [vmem:[#allocation16 + $0x498] sm:$0xff] }
 0xbe8   : > { %9130 = vmatpush1.bf16.msra.mxu0 %v9129_v25  ;;  %v3910_v25 = vld [vmem:[#allocation16 + $0x388] sm:$0xff] }
 0xbe9   : > { %9132 = vmatprep.subr.bf16.mxu0 %v9131_v20  ;;  %v3912_v20 = vld [vmem:[#allocation16 + $0x398] sm:$0xff] }
 0xbea   : > { %v9167_v26 = vpack.c.bf16 %v3912_v20, %v3910_v25  ;;  %v4032_v25 = vld [vmem:[#allocation16 + $0x4b8] sm:$0xff] }
 0xbec   : > { %9134 = vmatpush1.bf16.msra.mxu0 %v9133_v0  ;;  %v3914_v0 = vld [vmem:[#allocation16 + $0x3a8] sm:$0xff] }
 0xbed   : > { %9136 = vmatprep.subr.bf16.mxu0 %v9135_v31  ;;  %v3916_v31 = vld [vmem:[#allocation16 + $0x3b8] sm:$0xff] }
 0xbee   : > { %v9171_v33 = vpack.c.bf16 %v3916_v31, %v3914_v0  ;;  %v4036_v0 = vld [vmem:[#allocation16 + $0x4d8] sm:$0xff] }
 0xbf0   : > { %9138 = vmatpush1.bf16.msra.mxu0 %v9137_v29  ;;  %v3918_v29 = vld [vmem:[#allocation16 + $0x3c8] sm:$0xff] }
 0xbf1   : > { %9140 = vmatprep.subr.bf16.mxu0 %v9139_v43  ;;  %v3920_v43 = vld [vmem:[#allocation16 + $0x3d8] sm:$0xff] }
 0xbf2   : > { %v9175_v44 = vpack.c.bf16 %v3920_v43, %v3918_v29  ;;  %v4040_v29 = vld [vmem:[#allocation16 + $0x4f8] sm:$0xff] }
 0xbf4   : > { %9142 = vmatpush1.bf16.msra.mxu0 %v9141_v48  ;;  %v3922_v48 = vld [vmem:[#allocation16 + $0x3e8] sm:$0xff] }
 0xbf5   : > { %9144 = vmatprep.subr.bf16.mxu0 %v9143_v50  ;;  %v3924_v50 = vld [vmem:[#allocation16 + $0x3f8] sm:$0xff] }
 0xbf6   : > { %v9179_v52 = vpack.c.bf16 %v3924_v50, %v3922_v48  ;;  %v4134_v48 = vld [vmem:[#allocation16 + $0x518] sm:$0xff]  ;;  %v10459_v50 = vpop.permute.xlu0 %10458 }
 0xbf8   : > { %9146 = vmatpush1.bf16.msra.mxu0 %v9145_v47  ;;  %v4010_v47 = vld [vmem:[#allocation16 + $0x408] sm:$0xff] }
 0xbf9   : > { %9148 = vmatprep.subr.bf16.mxu0 %v9147_v55  ;;  %v4012_v55 = vld [vmem:[#allocation16 + $0x418] sm:$0xff] }
 0xbfa   : > { %v9183_v57 = vpack.c.bf16 %v4012_v55, %v4010_v47  ;;  %v10461_v47 = vunpack.i.h.bf16 %v10459_v50  ;;  %v10460_v55 = vunpack.i.l.bf16 %v10459_v50 }
 0xbfc   : > { %9150 = vmatpush1.bf16.msra.mxu0 %v9149_v59  ;;  %v3928_v59 = vrot.slane %v12127_v19, 1  ;;  %v4017_v19 = vld [vmem:[#allocation16 + $0x440] sm:$0xff] }
 0xbfd   : > { %9152 = vmatprep.subr.bf16.mxu0 %v9151_v60  ;;  %v4014_v60 = vld [vmem:[#allocation16 + $0x428] sm:$0xff]  ;;  %v9193_v9 = vpack.c.bf16 %v4019_v15, %v4017_v19  ;;  %v4143_v19 = vld [vmem:[#allocation16 + $0x560] sm:$0xff]  ;;  %v4145_v15 = vld [vmem:[#allocation16 + $0x570] sm:$0xff] }
 0xbfe   : > { %v9187_v63 = vpack.c.bf16 %v4016_v42, %v4014_v60  ;;  %v3929_v53 = vsel %vm1425_vm8, %v3927_v49, %v3928_v59  ;;  %v4135_v49 = vld [vmem:[#allocation16 + $0x520] sm:$0xff]  ;;  %v4137_v59 = vld [vmem:[#allocation16 + $0x530] sm:$0xff]  ;;  %v4055_v60 = vsel %vm2217_vm7, %v10460_v55, %v10461_v47  ;;  %v4140_v42 = vld [vmem:[#allocation16 + $0x548] sm:$0xff] }
 0xbff   : > { %3882 = vmatmul.mubr.f32.vlgmr.msra.gmra.mrb[6].mxu0 %v3815_v16  ;;  %v4022_v16 = vld [vmem:[#allocation16 + $0x468] sm:$0xff]  ;;  %v4249_v47 = vld [vmem:[#allocation16 + $0x620] sm:$0xff]  ;;  %v4251_v55 = vld [vmem:[#allocation16 + $0x630] sm:$0xff] }
 0xc00   : > { %9154 = vmatpush1.bf16.msra.mxu0 %v9153_v12  ;;  %3995 = vmatprep.mubr.f32.mxu0 %v11980_v1  ;;  %v4018_v12 = vld [vmem:[#allocation16 + $0x448] sm:$0xff] }
 0xc01   : > { %9156 = vmatprep.subr.bf16.mxu0 %v9155_v37  ;;  %v4020_v37 = vld [vmem:[#allocation16 + $0x458] sm:$0xff] }
 0xc02   : > { %v9191_v62 = vpack.c.bf16 %v4020_v37, %v4018_v12  ;;  %v4144_v12 = vld [vmem:[#allocation16 + $0x568] sm:$0xff]  ;;  %v4146_v37 = vld [vmem:[#allocation16 + $0x578] sm:$0xff] }
 0xc04   : > { %9158 = vmatpush1.bf16.msra.mxu0 %v9157_v17  ;;  %v9195_v17 = vpack.c.bf16 %v4024_v6, %v4022_v16  ;;  %v4148_v16 = vld [vmem:[#allocation16 + $0x588] sm:$0xff]  ;;  %v4150_v6 = vld [vmem:[#allocation16 + $0x598] sm:$0xff] }
 0xc05   : > { %9160 = vmatprep.subr.bf16.mxu0 %v9159_v18  ;;  %v4021_v18 = vld [vmem:[#allocation16 + $0x460] sm:$0xff] }
 0xc06   : > { %v9197_v23 = vpack.c.bf16 %v4023_v41, %v4021_v18  ;;  %v4147_v18 = vld [vmem:[#allocation16 + $0x580] sm:$0xff]  ;;  %v4149_v41 = vld [vmem:[#allocation16 + $0x590] sm:$0xff] }
 0xc08   : > { %9162 = vmatpush1.bf16.msra.mxu0 %v9161_v24  ;;  %v9199_v24 = vpack.c.bf16 %v4028_v22, %v4026_v21  ;;  %v4152_v21 = vld [vmem:[#allocation16 + $0x5a8] sm:$0xff]  ;;  %v4154_v22 = vld [vmem:[#allocation16 + $0x5b8] sm:$0xff] }
 0xc09   : > { %9164 = vmatprep.subr.bf16.mxu0 %v9163_v2  ;;  %v4025_v2 = vld [vmem:[#allocation16 + $0x480] sm:$0xff] }
 0xc0a   : > { %v9201_v20 = vpack.c.bf16 %v4027_v14, %v4025_v2  ;;  %v4151_v2 = vld [vmem:[#allocation16 + $0x5a0] sm:$0xff]  ;;  %v4153_v14 = vld [vmem:[#allocation16 + $0x5b0] sm:$0xff] }
 0xc0c   : > { %9166 = vmatpush1.bf16.msra.mxu0 %v9165_v10  ;;  %v9203_v10 = vpack.c.bf16 %v4032_v25, %v4030_v27  ;;  %v4156_v27 = vld [vmem:[#allocation16 + $0x5c8] sm:$0xff]  ;;  %v4158_v25 = vld [vmem:[#allocation16 + $0x5d8] sm:$0xff] }
 0xc0d   : > { %9168 = vmatprep.subr.bf16.mxu0 %v9167_v26  ;;  %v4029_v26 = vld [vmem:[#allocation16 + $0x4a0] sm:$0xff] }
 0xc0e   : > { %v9205_v31 = vpack.c.bf16 %v4031_v28, %v4029_v26  ;;  %v4155_v26 = vld [vmem:[#allocation16 + $0x5c0] sm:$0xff]  ;;  %v4157_v28 = vld [vmem:[#allocation16 + $0x5d0] sm:$0xff] }
 0xc10   : > { %9170 = vmatpush1.bf16.msra.mxu0 %v9169_v32  ;;  %v9207_v32 = vpack.c.bf16 %v4036_v0, %v4034_v30  ;;  %v4160_v30 = vld [vmem:[#allocation16 + $0x5e8] sm:$0xff]  ;;  %v4162_v0 = vld [vmem:[#allocation16 + $0x5f8] sm:$0xff] }
 0xc11   : > { %9172 = vmatprep.subr.bf16.mxu0 %v9171_v33  ;;  %v4033_v33 = vld [vmem:[#allocation16 + $0x4c0] sm:$0xff] }
 0xc12   : > { %v9209_v43 = vpack.c.bf16 %v4035_v34, %v4033_v33  ;;  %v4159_v33 = vld [vmem:[#allocation16 + $0x5e0] sm:$0xff]  ;;  %v4161_v34 = vld [vmem:[#allocation16 + $0x5f0] sm:$0xff] }
 0xc14   : > { %9174 = vmatpush1.bf16.msra.mxu0 %v9173_v40  ;;  %v9211_v40 = vpack.c.bf16 %v4040_v29, %v4038_v36  ;;  %v4246_v36 = vld [vmem:[#allocation16 + $0x608] sm:$0xff]  ;;  %v4248_v29 = vld [vmem:[#allocation16 + $0x618] sm:$0xff] }
 0xc15   : > { %9176 = vmatprep.subr.bf16.mxu0 %v9175_v44  ;;  %v4037_v44 = vld [vmem:[#allocation16 + $0x4e0] sm:$0xff] }
 0xc18   : > { %9178 = vmatpush1.bf16.msra.mxu0 %v9177_v51  ;;  %v9213_v51 = vpack.c.bf16 %v4039_v45, %v4037_v44  ;;  %v9247_v44 = vpack.c.bf16 %v4248_v29, %v4246_v36  ;;  %v4245_v45 = vld [vmem:[#allocation16 + $0x600] sm:$0xff]  ;;  %v4279_v36 = vrot.slane %v12154_v8, 2  ;;  %v4280_v29 = vrot.slane %v12129_v39, 2 }
 0xc19   : > { %9180 = vmatprep.subr.bf16.mxu0 %v9179_v52  ;;  %v9215_v52 = vpack.c.bf16 %v4134_v48, %v4132_v46  ;;  %v4247_v46 = vld [vmem:[#allocation16 + $0x610] sm:$0xff]  ;;  %v4369_v39 = vld [vmem:[#allocation16 + $0x740] sm:$0xff] }
 0xc1a   : > { %v9249_v38 = vpack.c.bf16 %v4247_v46, %v4245_v45  ;;  %v4365_v46 = vld [vmem:[#allocation16 + $0x720] sm:$0xff] }
 0xc1c   : > { %9182 = vmatpush1.bf16.msra.mxu0 %v9181_v56  ;;  %v4136_v56 = vld [vmem:[#allocation16 + $0x528] sm:$0xff] }
 0xc1d   : > { %9184 = vmatprep.subr.bf16.mxu0 %v9183_v57  ;;  %v4138_v57 = vld [vmem:[#allocation16 + $0x538] sm:$0xff] }
 0xc1e   : > { %v9219_v58 = vpack.c.bf16 %v4138_v57, %v4136_v56  ;;  %v4254_v57 = vld [vmem:[#allocation16 + $0x648] sm:$0xff] }
 0xc1f   : > { %3996 = vmatmul.mubr.f32.vlgmr.msra.gmra.mrb[6].mxu0 %v3929_v53  ;;  %v4141_v53 = vld [vmem:[#allocation16 + $0x550] sm:$0xff] }
 0xc20   : > { %9186 = vmatpush1.bf16.msra.mxu0 %v9185_v61  ;;  %4121 = vmatprep.mubr.f32.mxu0 %v11980_v1  ;;  %v4142_v61 = vld [vmem:[#allocation16 + $0x558] sm:$0xff] }
 0xc21   : > { %9188 = vmatprep.subr.bf16.mxu0 %v9187_v63  ;;  %v9221_v63 = vpack.c.bf16 %v4137_v59, %v4135_v49  ;;  %v9223_v3 = vpack.c.bf16 %v4142_v61, %v4140_v42  ;;  %v4253_v59 = vld [vmem:[#allocation16 + $0x640] sm:$0xff]  ;;  %v4258_v42 = vld [vmem:[#allocation16 + $0x668] sm:$0xff]  ;;  %v4260_v61 = vld [vmem:[#allocation16 + $0x678] sm:$0xff] }
 0xc24   : > { %9190 = vmatpush1.bf16.msra.mxu0 %v9189_v13  ;;  %v9225_v13 = vpack.c.bf16 %v4141_v53, %v4139_v7  ;;  %v4257_v7 = vld [vmem:[#allocation16 + $0x660] sm:$0xff]  ;;  %v4259_v53 = vld [vmem:[#allocation16 + $0x670] sm:$0xff] }
 0xc25   : > { %9192 = vmatprep.subr.bf16.mxu0 %v9191_v62  ;;  %v9227_v62 = vpack.c.bf16 %v4146_v37, %v4144_v12  ;;  %v4262_v12 = vld [vmem:[#allocation16 + $0x688] sm:$0xff]  ;;  %v4264_v37 = vld [vmem:[#allocation16 + $0x698] sm:$0xff] }
 0xc28   : > { %9194 = vmatpush1.bf16.msra.mxu0 %v9193_v9  ;;  %v9229_v9 = vpack.c.bf16 %v4145_v15, %v4143_v19  ;;  %v4261_v19 = vld [vmem:[#allocation16 + $0x680] sm:$0xff]  ;;  %v4263_v15 = vld [vmem:[#allocation16 + $0x690] sm:$0xff] }
 0xc29   : > { %9196 = vmatprep.subr.bf16.mxu0 %v9195_v17  ;;  %v9231_v17 = vpack.c.bf16 %v4150_v6, %v4148_v16  ;;  %v4266_v16 = vld [vmem:[#allocation16 + $0x6a8] sm:$0xff]  ;;  %v4268_v6 = vld [vmem:[#allocation16 + $0x6b8] sm:$0xff] }
 0xc2c   : > { %9198 = vmatpush1.bf16.msra.mxu0 %v9197_v23  ;;  %v9233_v23 = vpack.c.bf16 %v4149_v41, %v4147_v18  ;;  %v4265_v18 = vld [vmem:[#allocation16 + $0x6a0] sm:$0xff]  ;;  %v4267_v41 = vld [vmem:[#allocation16 + $0x6b0] sm:$0xff] }
 0xc2d   : > { %9200 = vmatprep.subr.bf16.mxu0 %v9199_v24  ;;  %v9235_v24 = vpack.c.bf16 %v4154_v22, %v4152_v21  ;;  %v4270_v21 = vld [vmem:[#allocation16 + $0x6c8] sm:$0xff]  ;;  %v4272_v22 = vld [vmem:[#allocation16 + $0x6d8] sm:$0xff] }
 0xc30   : > { %9202 = vmatpush1.bf16.msra.mxu0 %v9201_v20  ;;  %v9237_v20 = vpack.c.bf16 %v4153_v14, %v4151_v2  ;;  %v4269_v2 = vld [vmem:[#allocation16 + $0x6c0] sm:$0xff]  ;;  %v4271_v14 = vld [vmem:[#allocation16 + $0x6d0] sm:$0xff] }
 0xc31   : > { %9204 = vmatprep.subr.bf16.mxu0 %v9203_v10  ;;  %v9239_v10 = vpack.c.bf16 %v4158_v25, %v4156_v27  ;;  %v4274_v27 = vld [vmem:[#allocation16 + $0x6e8] sm:$0xff]  ;;  %v4276_v25 = vld [vmem:[#allocation16 + $0x6f8] sm:$0xff] }
 0xc34   : > { %9206 = vmatpush1.bf16.msra.mxu0 %v9205_v31  ;;  %v9241_v31 = vpack.c.bf16 %v4157_v28, %v4155_v26  ;;  %v4273_v26 = vld [vmem:[#allocation16 + $0x6e0] sm:$0xff]  ;;  %v4275_v28 = vld [vmem:[#allocation16 + $0x6f0] sm:$0xff] }
 0xc35   : > { %9208 = vmatprep.subr.bf16.mxu0 %v9207_v32  ;;  %v9243_v32 = vpack.c.bf16 %v4162_v0, %v4160_v30  ;;  %v4362_v30 = vld [vmem:[#allocation16 + $0x708] sm:$0xff]  ;;  %v4364_v0 = vld [vmem:[#allocation16 + $0x718] sm:$0xff] }
 0xc38   : > { %9210 = vmatpush1.bf16.msra.mxu0 %v9209_v43  ;;  %v10464_v43 = vpop.permute.xlu1 %10463 }
 0xc39   : > { %9212 = vmatprep.subr.bf16.mxu0 %v9211_v40  ;;  %v9245_v40 = vpack.c.bf16 %v4161_v34, %v4159_v33  ;;  %v10466_v48 = vunpack.i.h.bf16 %v10464_v43  ;;  %v10465_v50 = vunpack.i.l.bf16 %v10464_v43  ;;  %v4361_v33 = vld [vmem:[#allocation16 + $0x700] sm:$0xff]  ;;  %v4363_v34 = vld [vmem:[#allocation16 + $0x710] sm:$0xff]  ;;  %v4366_v43 = vld [vmem:[#allocation16 + $0x728] sm:$0xff] }
 0xc3b   : > { %v4167_v56 = vsel %vm1147_vm10, %v10465_v50, %v10466_v48  ;;  %v4367_v48 = vld [vmem:[#allocation16 + $0x730] sm:$0xff]  ;;  %v4281_v50 = vsel %vm1737_vm9, %v4279_v36, %v4280_v29  ;;  %v4492_v29 = vld [vmem:[#allocation16 + $0x848] sm:$0xff] }
 0xc3c   : > { %9214 = vmatpush1.bf16.msra.mxu0 %v9213_v51  ;;  %v4250_v51 = vld [vmem:[#allocation16 + $0x628] sm:$0xff] }
 0xc3d   : > { %9216 = vmatprep.subr.bf16.mxu0 %v9215_v52  ;;  %v4252_v52 = vld [vmem:[#allocation16 + $0x638] sm:$0xff] }
 0xc3e   : > { %v9251_v54 = vpack.c.bf16 %v4252_v52, %v4250_v51  ;;  %v4370_v51 = vld [vmem:[#allocation16 + $0x748] sm:$0xff]  ;;  %v4372_v52 = vld [vmem:[#allocation16 + $0x758] sm:$0xff] }
 0xc3f   : > { %4122 = vmatmul.mubr.f32.vlgmr.msra.gmra.mrb[6].mxu0 %v4055_v60  ;;  %v4255_v60 = vld [vmem:[#allocation16 + $0x650] sm:$0xff]  ;;  %v9287_v8 = vpack.c.bf16 %v4372_v52, %v4370_v51 }
 0xc40   : > { %9218 = vmatpush1.bf16.msra.mxu0 %v9217_v35  ;;  %4233 = vmatprep.mubr.f32.mxu0 %v11980_v1  ;;  %v4256_v35 = vld [vmem:[#allocation16 + $0x658] sm:$0xff] }
 0xc41   : > { %9220 = vmatprep.subr.bf16.mxu0 %v9219_v58  ;;  %v9253_v58 = vpack.c.bf16 %v4251_v55, %v4249_v47  ;;  %v9255_v49 = vpack.c.bf16 %v4256_v35, %v4254_v57  ;;  %v4374_v47 = vld [vmem:[#allocation16 + $0x768] sm:$0xff]  ;;  %v4376_v55 = vld [vmem:[#allocation16 + $0x778] sm:$0xff]  ;;  %v4373_v35 = vld [vmem:[#allocation16 + $0x760] sm:$0xff] }
 0xc42   : > { %v9291_v57 = vpack.c.bf16 %v4376_v55, %v4374_v47 }
 0xc44   : > { %9222 = vmatpush1.bf16.msra.mxu0 %v9221_v63  ;;  %v9257_v63 = vpack.c.bf16 %v4255_v60, %v4253_v59  ;;  %v4380_v59 = vld [vmem:[#allocation16 + $0x798] sm:$0xff] }
 0xc45   : > { %9224 = vmatprep.subr.bf16.mxu0 %v9223_v3  ;;  %v9259_v3 = vpack.c.bf16 %v4260_v61, %v4258_v42  ;;  %v4377_v61 = vld [vmem:[#allocation16 + $0x780] sm:$0xff] }
 0xc48   : > { %9226 = vmatpush1.bf16.msra.mxu0 %v9225_v13  ;;  %v9261_v13 = vpack.c.bf16 %v4259_v53, %v4257_v7  ;;  %v4384_v7 = vld [vmem:[#allocation16 + $0x7b8] sm:$0xff] }
 0xc49   : > { %9228 = vmatprep.subr.bf16.mxu0 %v9227_v62  ;;  %v9263_v62 = vpack.c.bf16 %v4264_v37, %v4262_v12  ;;  %v4381_v37 = vld [vmem:[#allocation16 + $0x7a0] sm:$0xff] }
 0xc4c   : > { %9230 = vmatpush1.bf16.msra.mxu0 %v9229_v9  ;;  %v9265_v9 = vpack.c.bf16 %v4263_v15, %v4261_v19  ;;  %v4388_v19 = vld [vmem:[#allocation16 + $0x7d8] sm:$0xff] }
 0xc4d   : > { %9232 = vmatprep.subr.bf16.mxu0 %v9231_v17  ;;  %v9267_v17 = vpack.c.bf16 %v4268_v6, %v4266_v16  ;;  %v4385_v6 = vld [vmem:[#allocation16 + $0x7c0] sm:$0xff] }
 0xc50   : > { %9234 = vmatpush1.bf16.msra.mxu0 %v9233_v23  ;;  %v9269_v23 = vpack.c.bf16 %v4267_v41, %v4265_v18  ;;  %v4392_v18 = vld [vmem:[#allocation16 + $0x7f8] sm:$0xff] }
 0xc51   : > { %9236 = vmatprep.subr.bf16.mxu0 %v9235_v24  ;;  %v9271_v24 = vpack.c.bf16 %v4272_v22, %v4270_v21  ;;  %v4389_v22 = vld [vmem:[#allocation16 + $0x7e0] sm:$0xff] }
 0xc54   : > { %9238 = vmatpush1.bf16.msra.mxu0 %v9237_v20  ;;  %v9273_v20 = vpack.c.bf16 %v4271_v14, %v4269_v2  ;;  %v4486_v2 = vld [vmem:[#allocation16 + $0x818] sm:$0xff]  ;;  %v10469_v14 = vpop.permute.xlu0 %10468 }
 0xc55   : > { %9240 = vmatprep.subr.bf16.mxu0 %v9239_v10  ;;  %v9275_v10 = vpack.c.bf16 %v4276_v25, %v4274_v27 }
 0xc58   : > { %9242 = vmatpush1.bf16.msra.mxu0 %v9241_v31  ;;  %v9277_v31 = vpack.c.bf16 %v4275_v28, %v4273_v26  ;;  %v10471_v26 = vunpack.i.h.bf16 %v10469_v14  ;;  %v10470_v28 = vunpack.i.l.bf16 %v10469_v14 }
 0xc59   : > { %9244 = vmatprep.subr.bf16.mxu0 %v9243_v32  ;;  %v9279_v32 = vpack.c.bf16 %v4364_v0, %v4362_v30  ;;  %v4488_v30 = vld [vmem:[#allocation16 + $0x828] sm:$0xff]  ;;  %v4490_v0 = vld [vmem:[#allocation16 + $0x838] sm:$0xff] }
 0xc5a   : > { %v4407_v36 = vsel %vm2217_vm7, %v10470_v28, %v10471_v26 }
 0xc5c   : > { %9246 = vmatpush1.bf16.msra.mxu0 %v9245_v40  ;;  %v4368_v40 = vld [vmem:[#allocation16 + $0x738] sm:$0xff] }
 0xc5d   : > { %9248 = vmatprep.subr.bf16.mxu0 %v9247_v44  ;;  %v9281_v44 = vpack.c.bf16 %v4363_v34, %v4361_v33  ;;  %v9283_v45 = vpack.c.bf16 %v4368_v40, %v4366_v43  ;;  %v4487_v33 = vld [vmem:[#allocation16 + $0x820] sm:$0xff]  ;;  %v4489_v34 = vld [vmem:[#allocation16 + $0x830] sm:$0xff]  ;;  %v4494_v43 = vld [vmem:[#allocation16 + $0x858] sm:$0xff] }
 0xc5e   : > { %v9317_v40 = vpack.c.bf16 %v4489_v34, %v4487_v33 }
 0xc5f   : > { %4234 = vmatmul.mubr.f32.vlgmr.msra.gmra.mrb[6].mxu0 %v4167_v56 }
 0xc60   : > { %9250 = vmatpush1.bf16.msra.mxu0 %v9249_v38  ;;  %4347 = vmatprep.mubr.f32.mxu0 %v11980_v1  ;;  %v9285_v38 = vpack.c.bf16 %v4367_v48, %v4365_v46  ;;  %v4493_v46 = vld [vmem:[#allocation16 + $0x850] sm:$0xff]  ;;  %v4496_v48 = vld [vmem:[#allocation16 + $0x868] sm:$0xff] }
 0xc61   : > { %9252 = vmatprep.subr.bf16.mxu0 %v9251_v54  ;;  %v4371_v54 = vld [vmem:[#allocation16 + $0x750] sm:$0xff] }
 0xc62   : > { %v9289_v56 = vpack.c.bf16 %v4371_v54, %v4369_v39  ;;  %v4500_v39 = vld [vmem:[#allocation16 + $0x888] sm:$0xff]  ;;  %v4502_v54 = vld [vmem:[#allocation16 + $0x898] sm:$0xff] }
 0xc63   : > { %v9327_v55 = vpack.c.bf16 %v4502_v54, %v4500_v39  ;;  %v4949_v39 = vld [vmem:[#allocation19 + $0x458] sm:$0xff] }
 0xc64   : > { %9254 = vmatpush1.bf16.msra.mxu0 %v9253_v58  ;;  %v4375_v58 = vld [vmem:[#allocation16 + $0x770] sm:$0xff] }
 0xc65   : > { %9256 = vmatprep.subr.bf16.mxu0 %v9255_v49  ;;  %v4378_v49 = vld [vmem:[#allocation16 + $0x788] sm:$0xff]  ;;  %v9293_v60 = vpack.c.bf16 %v4375_v58, %v4373_v35  ;;  %v4506_v58 = vld [vmem:[#allocation16 + $0x8b8] sm:$0xff] }
 0xc66   : > { %v9295_v42 = vpack.c.bf16 %v4380_v59, %v4378_v49  ;;  %v4504_v35 = vld [vmem:[#allocation16 + $0x8a8] sm:$0xff] }
 0xc67   : > { %v9331_v59 = vpack.c.bf16 %v4506_v58, %v4504_v35  ;;  %v4719_v35 = vld [vmem:[#allocation19 + $0x208] sm:$0xff]  ;;  %v4721_v58 = vld [vmem:[#allocation19 + $0x218] sm:$0xff] }
 0xc68   : > { %9258 = vmatpush1.bf16.msra.mxu0 %v9257_v63  ;;  %v4379_v63 = vld [vmem:[#allocation16 + $0x790] sm:$0xff] }
 0xc69   : > { %9260 = vmatprep.subr.bf16.mxu0 %v9259_v3  ;;  %v4382_v3 = vld [vmem:[#allocation16 + $0x7a8] sm:$0xff]  ;;  %v9297_v53 = vpack.c.bf16 %v4379_v63, %v4377_v61  ;;  %v4510_v63 = vld [vmem:[#allocation16 + $0x8d8] sm:$0xff] }
 0xc6a   : > { %v9299_v12 = vpack.c.bf16 %v4384_v7, %v4382_v3  ;;  %v4508_v61 = vld [vmem:[#allocation16 + $0x8c8] sm:$0xff] }
 0xc6b   : > { %v9335_v7 = vpack.c.bf16 %v4510_v63, %v4508_v61 }
 0xc6c   : > { %9262 = vmatpush1.bf16.msra.mxu0 %v9261_v13  ;;  %v4383_v13 = vld [vmem:[#allocation16 + $0x7b0] sm:$0xff] }
 0xc6d   : > { %9264 = vmatprep.subr.bf16.mxu0 %v9263_v62  ;;  %v4386_v62 = vld [vmem:[#allocation16 + $0x7c8] sm:$0xff]  ;;  %v9301_v15 = vpack.c.bf16 %v4383_v13, %v4381_v37  ;;  %v4514_v13 = vld [vmem:[#allocation16 + $0x8f8] sm:$0xff] }
 0xc6e   : > { %v9303_v16 = vpack.c.bf16 %v4388_v19, %v4386_v62  ;;  %v4512_v37 = vld [vmem:[#allocation16 + $0x8e8] sm:$0xff] }
 0xc6f   : > { %v9339_v19 = vpack.c.bf16 %v4514_v13, %v4512_v37  ;;  %v4950_v37 = vld [vmem:[#allocation19 + $0x460] sm:$0xff]  ;;  %v4952_v13 = vld [vmem:[#allocation19 + $0x470] sm:$0xff] }
 0xc70   : > { %9266 = vmatpush1.bf16.msra.mxu0 %v9265_v9  ;;  %v4387_v9 = vld [vmem:[#allocation16 + $0x7d0] sm:$0xff] }
 0xc71   : > { %9268 = vmatprep.subr.bf16.mxu0 %v9267_v17  ;;  %v4390_v17 = vld [vmem:[#allocation16 + $0x7e8] sm:$0xff]  ;;  %v9305_v41 = vpack.c.bf16 %v4387_v9, %v4385_v6  ;;  %v10474_v6 = vpop.permute.xlu1 %10473 }
 0xc72   : > { %v9307_v21 = vpack.c.bf16 %v4392_v18, %v4390_v17  ;;  %v10476_v17 = vunpack.i.h.bf16 %v10474_v6  ;;  %v10475_v18 = vunpack.i.l.bf16 %v10474_v6 }
 0xc74   : > { %9270 = vmatpush1.bf16.msra.mxu0 %v9269_v23  ;;  %v4391_v23 = vld [vmem:[#allocation16 + $0x7f0] sm:$0xff] }
 0xc75   : > { %9272 = vmatprep.subr.bf16.mxu0 %v9271_v24  ;;  %v4484_v24 = vld [vmem:[#allocation16 + $0x808] sm:$0xff]  ;;  %v9309_v27 = vpack.c.bf16 %v4391_v23, %v4389_v22 }
 0xc76   : > { %v9311_v25 = vpack.c.bf16 %v4486_v2, %v4484_v24 }
 0xc78   : > { %9274 = vmatpush1.bf16.msra.mxu0 %v9273_v20  ;;  %v4483_v20 = vld [vmem:[#allocation16 + $0x800] sm:$0xff] }
 0xc79   : > { %9276 = vmatprep.subr.bf16.mxu0 %v9275_v10  ;;  %v4485_v10 = vld [vmem:[#allocation16 + $0x810] sm:$0xff] }
 0xc7c   : > { %9278 = vmatpush1.bf16.msra.mxu0 %v9277_v31  ;;  %v9313_v31 = vpack.c.bf16 %v4485_v10, %v4483_v20 }
 0xc7d   : > { %9280 = vmatprep.subr.bf16.mxu0 %v9279_v32  ;;  %v9315_v32 = vpack.c.bf16 %v4490_v0, %v4488_v30 }
 0xc7f   : > { %4348 = vmatmul.mubr.f32.vlgmr.msra.gmra.mrb[6].mxu0 %v4281_v50  ;;  %v4498_v50 = vld [vmem:[#allocation16 + $0x878] sm:$0xff] }
 0xc80   : > { %9282 = vmatpush1.bf16.msra.mxu0 %v9281_v44  ;;  %4473 = vmatprep.mubr.f32.mxu0 %v11980_v1  ;;  %v9319_v44 = vpack.c.bf16 %v4494_v43, %v4492_v29  ;;  %v9323_v52 = vpack.c.bf16 %v4498_v50, %v4496_v48  ;;  %v4939_v29 = vld [vmem:[#allocation19 + $0x408] sm:$0xff]  ;;  %v4941_v43 = vld [vmem:[#allocation19 + $0x418] sm:$0xff] }
 0xc81   : > { %9284 = vmatprep.subr.bf16.mxu0 %v9283_v45  ;;  %v4491_v45 = vld [vmem:[#allocation16 + $0x840] sm:$0xff] }
 0xc82   : > { %v9321_v51 = vpack.c.bf16 %v4493_v46, %v4491_v45  ;;  %v4940_v45 = vld [vmem:[#allocation19 + $0x410] sm:$0xff]  ;;  %v4943_v46 = vld [vmem:[#allocation19 + $0x428] sm:$0xff]  ;;  %v4945_v48 = vld [vmem:[#allocation19 + $0x438] sm:$0xff] }
 0xc84   : > { %9286 = vmatpush1.bf16.msra.mxu0 %v9285_v38  ;;  %v4495_v38 = vld [vmem:[#allocation16 + $0x860] sm:$0xff] }
 0xc85   : > { %9288 = vmatprep.subr.bf16.mxu0 %v9287_v8  ;;  %v4497_v8 = vld [vmem:[#allocation16 + $0x870] sm:$0xff] }
 0xc86   : > { %v9325_v47 = vpack.c.bf16 %v4497_v8, %v4495_v38  ;;  %v4944_v38 = vld [vmem:[#allocation19 + $0x430] sm:$0xff]  ;;  %v4947_v8 = vld [vmem:[#allocation19 + $0x448] sm:$0xff] }
 0xc88   : > { %9290 = vmatpush1.bf16.msra.mxu0 %v9289_v56  ;;  %v4499_v56 = vld [vmem:[#allocation16 + $0x880] sm:$0xff] }
 0xc89   : > { %9292 = vmatprep.subr.bf16.mxu0 %v9291_v57  ;;  %v4501_v57 = vld [vmem:[#allocation16 + $0x890] sm:$0xff] }
 0xc8a   : > { %v9329_v49 = vpack.c.bf16 %v4501_v57, %v4499_v56  ;;  %v9479_v56 = vpack.c.bf16 %v4949_v39, %v4947_v8  ;;  %v4951_v57 = vld [vmem:[#allocation19 + $0x468] sm:$0xff]  ;;  %v4964_v8 = vld [vmem:[#allocation19 + $0x4d0] sm:$0xff] }
 0xc8b   : > { %v4967_v39 = vld [vmem:[#allocation19 + $0x4e8] sm:$0xff] }
 0xc8c   : > { %9294 = vmatpush1.bf16.msra.mxu0 %v9293_v60  ;;  %v4503_v60 = vld [vmem:[#allocation16 + $0x8a0] sm:$0xff] }
 0xc8d   : > { %9296 = vmatprep.subr.bf16.mxu0 %v9295_v42  ;;  %v4505_v42 = vld [vmem:[#allocation16 + $0x8b0] sm:$0xff] }
 0xc8e   : > { %v9333_v3 = vpack.c.bf16 %v4505_v42, %v4503_v60  ;;  %v4718_v60 = vld [vmem:[#allocation19 + $0x200] sm:$0xff]  ;;  %v4720_v42 = vld [vmem:[#allocation19 + $0x210] sm:$0xff] }
 0xc8f   : > { %v9345_v61 = vpack.c.bf16 %v4720_v42, %v4718_v60  ;;  %v4966_v60 = vld [vmem:[#allocation19 + $0x4e0] sm:$0xff]  ;;  %v4968_v42 = vld [vmem:[#allocation19 + $0x4f0] sm:$0xff] }
 0xc90   : > { %9298 = vmatpush1.bf16.msra.mxu0 %v9297_v53  ;;  %v4507_v53 = vld [vmem:[#allocation16 + $0x8c0] sm:$0xff] }
 0xc91   : > { %9300 = vmatprep.subr.bf16.mxu0 %v9299_v12  ;;  %v4509_v12 = vld [vmem:[#allocation16 + $0x8d0] sm:$0xff] }
 0xc92   : > { %v9337_v62 = vpack.c.bf16 %v4509_v12, %v4507_v53  ;;  %v4722_v53 = vld [vmem:[#allocation19 + $0x220] sm:$0xff] }
 0xc94   : > { %9302 = vmatpush1.bf16.msra.mxu0 %v9301_v15  ;;  %v4511_v15 = vld [vmem:[#allocation16 + $0x8e0] sm:$0xff] }
 0xc95   : > { %9304 = vmatprep.subr.bf16.mxu0 %v9303_v16  ;;  %v4513_v16 = vld [vmem:[#allocation16 + $0x8f0] sm:$0xff] }
 0xc96   : > { %v9341_v9 = vpack.c.bf16 %v4513_v16, %v4511_v15  ;;  %v4955_v15 = vld [vmem:[#allocation19 + $0x488] sm:$0xff]  ;;  %v4957_v16 = vld [vmem:[#allocation19 + $0x498] sm:$0xff] }
 0xc98   : > { %9306 = vmatpush1.bf16.msra.mxu0 %v9305_v41  ;;  %v4519_v41 = vsel %vm1147_vm10, %v10475_v18, %v10476_v17  ;;  %v4729_v17 = vld [vmem:[#allocation19 + $0x258] sm:$0xff]  ;;  %v4726_v18 = vld [vmem:[#allocation19 + $0x240] sm:$0xff] }
 0xc99   : > { %9308 = vmatprep.subr.bf16.mxu0 %v9307_v21  ;;  %v4594_v21 = vld [vmem:[#allocation17] sm:$0x3] }
 0xc9a   : > { %v4599_v22 = vrot.slane %v4594_v21, %v11941_v11  ;;  %v4603_v23 = vrot.slane %v4594_v21, %v11984_v4  ;;  %v9485_v21 = vpack.c.bf16 %v4952_v13, %v4950_v37  ;;  %v4747_v37 = vld [vmem:[#allocation19 + $0x2e8] sm:$0xff]  ;;  %v4749_v13 = vld [vmem:[#allocation19 + $0x2f8] sm:$0xff] }
 0xc9c   : > { %9310 = vmatpush1.bf16.msra.mxu0 %v9309_v27 }
 0xc9d   : > { %9312 = vmatprep.subr.bf16.mxu0 %v9311_v25 }
 0xc9f   : > { %4474 = vmatmul.mubr.f32.vlgmr.msra.gmra.mrb[6].mxu0 %v4407_v36 }
 0xca0   : > { %9314 = vmatpush1.bf16.msra.mxu0 %v9313_v31  ;;  %4585 = vmatprep.mubr.f32.mxu0 %v11980_v1 }
 0xca1   : > { %9316 = vmatprep.subr.bf16.mxu0 %v9315_v32 }
 0xca4   : > { %9318 = vmatpush1.bf16.msra.mxu0 %v9317_v40  ;;  %v4938_v40 = vld [vmem:[#allocation19 + $0x400] sm:$0xff] }
 0xca5   : > { %9320 = vmatprep.subr.bf16.mxu0 %v9319_v44  ;;  %v9471_v44 = vpack.c.bf16 %v4941_v43, %v4939_v29  ;;  %v9473_v50 = vpack.c.bf16 %v4940_v45, %v4938_v40  ;;  %v4963_v29 = vld [vmem:[#allocation19 + $0x4c8] sm:$0xff]  ;;  %v4965_v40 = vld [vmem:[#allocation19 + $0x4d8] sm:$0xff]  ;;  %v4734_v45 = vld [vmem:[#allocation19 + $0x280] sm:$0xff] }
 0xca8   : > { %9322 = vmatpush1.bf16.msra.mxu0 %v9321_v51  ;;  %v9475_v51 = vpack.c.bf16 %v4945_v48, %v4943_v46  ;;  %v4736_v46 = vld [vmem:[#allocation19 + $0x290] sm:$0xff]  ;;  %v4739_v48 = vld [vmem:[#allocation19 + $0x2a8] sm:$0xff] }
 0xca9   : > { %9324 = vmatprep.subr.bf16.mxu0 %v9323_v52  ;;  %v4942_v52 = vld [vmem:[#allocation19 + $0x420] sm:$0xff] }
 0xcaa   : > { %v9477_v54 = vpack.c.bf16 %v4944_v38, %v4942_v52  ;;  %v9495_v52 = vpack.c.bf16 %v4965_v40, %v4963_v29  ;;  %v4962_v38 = vld [vmem:[#allocation19 + $0x4c0] sm:$0xff]  ;;  %v4983_v29 = vld [vmem:[#allocation19 + $0x568] sm:$0xff]  ;;  %v4985_v40 = vld [vmem:[#allocation19 + $0x578] sm:$0xff] }
 0xcac   : > { %9326 = vmatpush1.bf16.msra.mxu0 %v9325_v47  ;;  %v4946_v47 = vld [vmem:[#allocation19 + $0x440] sm:$0xff] }
 0xcad   : > { %9328 = vmatprep.subr.bf16.mxu0 %v9327_v55  ;;  %v4948_v55 = vld [vmem:[#allocation19 + $0x450] sm:$0xff] }
 0xcae   : > { %v9481_v63 = vpack.c.bf16 %v4948_v55, %v4946_v47  ;;  %v4969_v47 = vld [vmem:[#allocation19 + $0x4f8] sm:$0xff] }
 0xcb0   : > { %9330 = vmatpush1.bf16.msra.mxu0 %v9329_v49  ;;  %v4953_v49 = vld [vmem:[#allocation19 + $0x478] sm:$0xff] }
 0xcb1   : > { %9332 = vmatprep.subr.bf16.mxu0 %v9331_v59  ;;  %v9343_v59 = vpack.c.bf16 %v4721_v58, %v4719_v35  ;;  %v9483_v12 = vpack.c.bf16 %v4953_v49, %v4951_v57  ;;  %v4740_v57 = vld [vmem:[#allocation19 + $0x2b0] sm:$0xff]  ;;  %v4743_v35 = vld [vmem:[#allocation19 + $0x2c8] sm:$0xff]  ;;  %v4745_v58 = vld [vmem:[#allocation19 + $0x2d8] sm:$0xff]  ;;  %v9497_v49 = vpack.c.bf16 %v4964_v8, %v4962_v38 }
 0xcb2   : > { %v4982_v38 = vld [vmem:[#allocation19 + $0x560] sm:$0xff]  ;;  %v4984_v8 = vld [vmem:[#allocation19 + $0x570] sm:$0xff] }
 0xcb3   : > { %9344 = vmatprep.subr.bf16.mxu1 %v9343_v59  ;;  %v9499_v59 = vpack.c.bf16 %v4969_v47, %v4967_v39  ;;  %v4987_v39 = vld [vmem:[#allocation19 + $0x588] sm:$0xff]  ;;  %v4989_v47 = vld [vmem:[#allocation19 + $0x598] sm:$0xff] }
 0xcb4   : > { %9334 = vmatpush1.bf16.msra.mxu0 %v9333_v3  ;;  %v4723_v3 = vld [vmem:[#allocation19 + $0x228] sm:$0xff]  ;;  %9346 = vmatpush1.bf16.msra.mxu1 %v9345_v61 }
 0xcb5   : > { %9336 = vmatprep.subr.bf16.mxu0 %v9335_v7  ;;  %v4725_v7 = vld [vmem:[#allocation19 + $0x238] sm:$0xff]  ;;  %v4971_v61 = vld [vmem:[#allocation19 + $0x508] sm:$0xff] }
 0xcb8   : > { %9338 = vmatpush1.bf16.msra.mxu0 %v9337_v62  ;;  %v9347_v62 = vpack.c.bf16 %v4725_v7, %v4723_v3  ;;  %v4973_v3 = vld [vmem:[#allocation19 + $0x518] sm:$0xff]  ;;  %v9367_v7 = vpack.c.bf16 %v4745_v58, %v4743_v35  ;;  %v9517_v35 = vpack.c.bf16 %v4984_v8, %v4982_v38  ;;  %v9519_v58 = vpack.c.bf16 %v4989_v47, %v4987_v39 }
 0xcb9   : > { %9340 = vmatprep.subr.bf16.mxu0 %v9339_v19  ;;  %v4724_v19 = vld [vmem:[#allocation19 + $0x230] sm:$0xff] }
 0xcba   : > { %v9349_v6 = vpack.c.bf16 %v4724_v19, %v4722_v53  ;;  %9348 = vmatprep.subr.bf16.mxu1 %v9347_v62  ;;  %v4742_v53 = vld [vmem:[#allocation19 + $0x2c0] sm:$0xff]  ;;  %v9501_v62 = vpack.c.bf16 %v4968_v42, %v4966_v60  ;;  %v9503_v19 = vpack.c.bf16 %v4973_v3, %v4971_v61  ;;  %v4991_v42 = vld [vmem:[#allocation19 + $0x5a8] sm:$0xff]  ;;  %v4993_v61 = vld [vmem:[#allocation19 + $0x5b8] sm:$0xff] }
 0xcbb   : > { %v9523_v3 = vpack.c.bf16 %v4993_v61, %v4991_v42 }
 0xcbc   : > { %9342 = vmatpush1.bf16.msra.mxu0 %v9341_v9  ;;  %v4727_v9 = vld [vmem:[#allocation19 + $0x248] sm:$0xff]  ;;  %9350 = vmatpush1.bf16.msra.mxu1 %v9349_v6 }
 0xcbd   : > { %9472 = vmatprep.subr.bf16.mxu0 %v9471_v44  ;;  %v4975_v6 = vld [vmem:[#allocation19 + $0x528] sm:$0xff] }
 0xcbf   : > { %4586 = vmatmul.mubr.f32.vlgmr.msra.gmra.mrb[6].mxu0 %v4519_v41  ;;  %v4728_v41 = vld [vmem:[#allocation19 + $0x250] sm:$0xff] }
 0xcc0   : > { %9474 = vmatpush1.bf16.msra.mxu0 %v9473_v50  ;;  %v4741_v50 = vld [vmem:[#allocation19 + $0x2b8] sm:$0xff] }
 0xcc1   : > { %9476 = vmatprep.subr.bf16.mxu0 %v9475_v51  ;;  %v9363_v55 = vpack.c.bf16 %v4741_v50, %v4739_v48  ;;  %v4759_v48 = vld [vmem:[#allocation19 + $0x348] sm:$0xff]  ;;  %v4761_v50 = vld [vmem:[#allocation19 + $0x358] sm:$0xff] }
 0xcc4   : > { %9478 = vmatpush1.bf16.msra.mxu0 %v9477_v54  ;;  %v9361_v54 = vpack.c.bf16 %v4736_v46, %v4734_v45  ;;  %v4754_v45 = vld [vmem:[#allocation19 + $0x320] sm:$0xff]  ;;  %v4756_v46 = vld [vmem:[#allocation19 + $0x330] sm:$0xff] }
 0xcc5   : > { %9480 = vmatprep.subr.bf16.mxu0 %v9479_v56  ;;  %v4738_v56 = vld [vmem:[#allocation19 + $0x2a0] sm:$0xff] }
 0xcc8   : > { %9482 = vmatpush1.bf16.msra.mxu0 %v9481_v63  ;;  %v9365_v63 = vpack.c.bf16 %v4740_v57, %v4738_v56  ;;  %v4758_v56 = vld [vmem:[#allocation19 + $0x340] sm:$0xff]  ;;  %v4760_v57 = vld [vmem:[#allocation19 + $0x350] sm:$0xff] }
 0xcc9   : > { %9484 = vmatprep.subr.bf16.mxu0 %v9483_v12  ;;  %v4744_v12 = vld [vmem:[#allocation19 + $0x2d0] sm:$0xff]  ;;  %v9385_v60 = vpack.c.bf16 %v4760_v57, %v4758_v56 }
 0xccc   : > { %9486 = vmatpush1.bf16.msra.mxu0 %v9485_v21  ;;  %v4748_v21 = vld [vmem:[#allocation19 + $0x2f0] sm:$0xff] }
 0xd92   : > { %v4587_v24 = vpop.f32.mrb[6].mxu0 }
 0xd93   : > { %v4606_v2 = vadd.f32 %v4599_v22, %v4587_v24  ;;  %v4589_v14 = vpop.f32.mrb[7].mxu0  ;;  %v4954_v22 = vld [vmem:[#allocation19 + $0x480] sm:$0xff]  ;;  %v9351_v24 = vpack.c.bf16 %v4729_v17, %v4727_v9  ;;  %v9369_v9 = vpack.c.bf16 %v4744_v12, %v4742_v53  ;;  %v4977_v17 = vld [vmem:[#allocation19 + $0x538] sm:$0xff]  ;;  %v4992_v53 = vld [vmem:[#allocation19 + $0x5b0] sm:$0xff] }
 0xd94   : > { %v4607_v27 = vadd.f32 %v4603_v23, %v4589_v14  ;;  %v4956_v23 = vld [vmem:[#allocation19 + $0x490] sm:$0xff]  ;;  %v4959_v14 = vld [vmem:[#allocation19 + $0x4a8] sm:$0xff] }
 0xd95   : > { %v4610_v25 = vmin.f32 %v4606_v2, 0.0  ;;  %vm4608_vm6 = vcmp.gt.f32.partialorder %v4606_v2, 0.0  ;;  %9352 = vmatprep.subr.bf16.mxu1 %v9351_v24  ;;  %v4995_v12 = vld [vmem:[#allocation19 + $0x5c8] sm:$0xff] }
 0xd96   : > { %v4611_v20 = vmin.f32 %v4607_v27, 0.0  ;;  %vm4609_vm7 = vcmp.gt.f32.partialorder %v4607_v27, 0.0 }
 0xd97   : > { %v4612_v10 = vmul.f32 1.442695, %v4610_v25  ;;  %v4731_v25 = vld [vmem:[#allocation19 + $0x268] sm:$0xff] }
 0xd98   : > { %v4614_v26 = vmul.f32 1.442695, %v4611_v20  ;;  %v4733_v20 = vld [vmem:[#allocation19 + $0x278] sm:$0xff] }
 0xd99   : > { %10520 = vpow2.f32 %v4612_v10  ;;  %v4961_v10 = vld [vmem:[#allocation19 + $0x4b8] sm:$0xff] }
 0xd9a   : > { %10522 = vpow2.f32 %v4614_v26  ;;  %v9355_v26 = vpack.c.bf16 %v4733_v20, %v4731_v25  ;;  %v4979_v25 = vld [vmem:[#allocation19 + $0x548] sm:$0xff] }
 0xda3   : > { %v10521_v28 = vpop.eup %10520 }
 0xda4   : > { %v10523_v30 = vpop.eup %10522  ;;  %v7766_v0 = vadd.f32 -1.0, %v10521_v28  ;;  %v4730_v28 = vld [vmem:[#allocation19 + $0x260] sm:$0xff] }
 0xda5   : > { %v7767_v31 = vadd.f32 -1.0, %v10523_v30  ;;  %v4732_v30 = vld [vmem:[#allocation19 + $0x270] sm:$0xff] }
 0xda6   : > { %v4618_v32 = vsel %vm4608_vm6, %v4606_v2, %v7766_v0  ;;  %v9487_v2 = vpack.c.bf16 %v4957_v16, %v4955_v15  ;;  %v9489_v0 = vpack.c.bf16 %v4956_v23, %v4954_v22  ;;  %v9357_v43 = vpack.c.bf16 %v4732_v30, %v4730_v28  ;;  %v4970_v15 = vld [vmem:[#allocation19 + $0x500] sm:$0xff]  ;;  %v4972_v16 = vld [vmem:[#allocation19 + $0x510] sm:$0xff]  ;;  %v4751_v22 = vld [vmem:[#allocation19 + $0x308] sm:$0xff] }
 0xda7   : > { %v4630_v33 = vrot.slane %v4618_v32, 7  ;;  %v4619_v34 = vsel %vm4609_vm7, %v4607_v27, %v7767_v31  ;;  %v9353_v27 = vpack.c.bf16 %v4728_v41, %v4726_v18  ;;  %v4735_v31 = vld [vmem:[#allocation19 + $0x288] sm:$0xff]  ;;  %v4737_v32 = vld [vmem:[#allocation19 + $0x298] sm:$0xff]  ;;  %v9371_v18 = vpack.c.bf16 %v4749_v13, %v4747_v37  ;;  %v4746_v41 = vld [vmem:[#allocation19 + $0x2e0] sm:$0xff] }
 0xda8   : > { %v4631_v36 = vrot.slane %v4619_v34, 7  ;;  %9488 = vmatprep.subr.bf16.mxu0 %v9487_v2  ;;  %v4958_v34 = vld [vmem:[#allocation19 + $0x4a0] sm:$0xff]  ;;  %v9359_v44 = vpack.c.bf16 %v4737_v32, %v4735_v31  ;;  %v4753_v23 = vld [vmem:[#allocation19 + $0x318] sm:$0xff]  ;;  %v9505_v24 = vpack.c.bf16 %v4972_v16, %v4970_v15  ;;  %v9507_v2 = vpack.c.bf16 %v4977_v17, %v4975_v6  ;;  %v4752_v30 = vld [vmem:[#allocation19 + $0x310] sm:$0xff] }
 0xda9   : > { %4632 = vrot.lane.b32.xlu0 %v4630_v33, %s11217_s3  ;;  %v9491_v33 = vpack.c.bf16 %v4961_v10, %v4959_v14  ;;  %9354 = vmatpush1.bf16.msra.mxu1 %v9353_v27  ;;  %v4974_v14 = vld [vmem:[#allocation19 + $0x520] sm:$0xff]  ;;  %v4976_v27 = vld [vmem:[#allocation19 + $0x530] sm:$0xff]  ;;  %v9373_v20 = vpack.c.bf16 %v4748_v21, %v4746_v41  ;;  %v4981_v10 = vld [vmem:[#allocation19 + $0x558] sm:$0xff] }
 0xdaa   : > { %4634 = vrot.lane.b32.xlu1 %v4631_v36, %s11217_s3  ;;  %v4960_v36 = vld [vmem:[#allocation19 + $0x4b0] sm:$0xff]  ;;  %9356 = vmatprep.subr.bf16.mxu1 %v9355_v26  ;;  %v9375_v26 = vpack.c.bf16 %v4753_v23, %v4751_v22  ;;  %v4750_v28 = vld [vmem:[#allocation19 + $0x300] sm:$0xff]  ;;  %v4757_v31 = vld [vmem:[#allocation19 + $0x338] sm:$0xff]  ;;  %v9509_v32 = vpack.c.bf16 %v4976_v27, %v4974_v14 }
 0xdab   : > { %9490 = vmatpush1.bf16.msra.mxu0 %v9489_v0  ;;  %v9493_v51 = vpack.c.bf16 %v4960_v36, %v4958_v34  ;;  %v4755_v0 = vld [vmem:[#allocation19 + $0x328] sm:$0xff]  ;;  %v4978_v34 = vld [vmem:[#allocation19 + $0x540] sm:$0xff]  ;;  %v4980_v36 = vld [vmem:[#allocation19 + $0x550] sm:$0xff] }
 0xdac   : > { %9492 = vmatprep.subr.bf16.mxu0 %v9491_v33  ;;  %v9511_v33 = vpack.c.bf16 %v4981_v10, %v4979_v25  ;;  %v4997_v37 = vld [vmem:[#allocation19 + $0x5d8] sm:$0xff]  ;;  %v4996_v15 = vld [vmem:[#allocation19 + $0x5d0] sm:$0xff]  ;;  %v4763_v16 = vld [vmem:[#allocation19 + $0x368] sm:$0xff] }
 0xdad   : > { %9358 = vmatpush1.bf16.msra.mxu1 %v9357_v43  ;;  %v9377_v43 = vpack.c.bf16 %v4752_v30, %v4750_v28  ;;  %v4762_v17 = vld [vmem:[#allocation19 + $0x360] sm:$0xff]  ;;  %v4999_v22 = vld [vmem:[#allocation19 + $0x5e8] sm:$0xff]  ;;  %v5001_v23 = vld [vmem:[#allocation19 + $0x5f8] sm:$0xff] }
 0xdae   : > { %9360 = vmatprep.subr.bf16.mxu1 %v9359_v44  ;;  %v9379_v44 = vpack.c.bf16 %v4757_v31, %v4755_v0  ;;  %v4998_v14 = vld [vmem:[#allocation19 + $0x5e0] sm:$0xff]  ;;  %v5000_v27 = vld [vmem:[#allocation19 + $0x5f0] sm:$0xff]  ;;  %v4767_v25 = vld [vmem:[#allocation19 + $0x388] sm:$0xff] }
 0xdaf   : > { %9494 = vmatpush1.bf16.msra.mxu0 %v9493_v51  ;;  %v9513_v51 = vpack.c.bf16 %v4980_v36, %v4978_v34  ;;  %v9533_v10 = vpack.c.bf16 %v5000_v27, %v4998_v14  ;;  %v4766_v28 = vld [vmem:[#allocation19 + $0x380] sm:$0xff]  ;;  %v4768_v30 = vld [vmem:[#allocation19 + $0x390] sm:$0xff]  ;;  %v5093_v34 = vld [vmem:[#allocation19 + $0x618] sm:$0xff] }
 0xdb0   : > { %9496 = vmatprep.subr.bf16.mxu0 %v9495_v52  ;;  %v9515_v52 = vpack.c.bf16 %v4985_v40, %v4983_v29  ;;  %v4771_v29 = vld [vmem:[#allocation19 + $0x3a8] sm:$0xff]  ;;  %v4770_v40 = vld [vmem:[#allocation19 + $0x3a0] sm:$0xff]  ;;  %v4781_v14 = vld [vmem:[#allocation19 + $0x3f8] sm:$0xff] }
 0xdb1   : > { %9362 = vmatpush1.bf16.msra.mxu1 %v9361_v54  ;;  %v9381_v54 = vpack.c.bf16 %v4756_v46, %v4754_v45  ;;  %v4772_v45 = vld [vmem:[#allocation19 + $0x3b0] sm:$0xff]  ;;  %v4778_v27 = vld [vmem:[#allocation19 + $0x3e0] sm:$0xff] }
 0xdb2   : > { %9364 = vmatprep.subr.bf16.mxu1 %v9363_v55  ;;  %v9383_v55 = vpack.c.bf16 %v4761_v50, %v4759_v48  ;;  %v9397_v46 = vpack.c.bf16 %v4772_v45, %v4770_v40  ;;  %v5092_v40 = vld [vmem:[#allocation19 + $0x610] sm:$0xff]  ;;  %v5095_v45 = vld [vmem:[#allocation19 + $0x628] sm:$0xff] }
 0xdb3   : > { %9498 = vmatpush1.bf16.msra.mxu0 %v9497_v49  ;;  %v4986_v49 = vld [vmem:[#allocation19 + $0x580] sm:$0xff] }
 0xdb4   : > { %9500 = vmatprep.subr.bf16.mxu0 %v9499_v59  ;;  %v4988_v59 = vld [vmem:[#allocation19 + $0x590] sm:$0xff] }
 0xdb5   : > { %9366 = vmatpush1.bf16.msra.mxu1 %v9365_v63  ;;  %v9521_v63 = vpack.c.bf16 %v4988_v59, %v4986_v49 }
 0xdb6   : > { %9368 = vmatprep.subr.bf16.mxu1 %v9367_v7  ;;  %v4990_v7 = vld [vmem:[#allocation19 + $0x5a0] sm:$0xff] }
 0xdb7   : > { %9502 = vmatpush1.bf16.msra.mxu0 %v9501_v62  ;;  %v9525_v13 = vpack.c.bf16 %v4992_v53, %v4990_v7  ;;  %v9527_v62 = vpack.c.bf16 %v4997_v37, %v4995_v12 }
 0xdb8   : > { %9504 = vmatprep.subr.bf16.mxu0 %v9503_v19  ;;  %v4994_v19 = vld [vmem:[#allocation19 + $0x5c0] sm:$0xff] }
 0xdb9   : > { %9370 = vmatpush1.bf16.msra.mxu1 %v9369_v9  ;;  %v9529_v6 = vpack.c.bf16 %v4996_v15, %v4994_v19  ;;  %v4765_v9 = vld [vmem:[#allocation19 + $0x378] sm:$0xff] }
 0xdba   : > { %9372 = vmatprep.subr.bf16.mxu1 %v9371_v18  ;;  %v4764_v18 = vld [vmem:[#allocation19 + $0x370] sm:$0xff]  ;;  %v9387_v41 = vpack.c.bf16 %v4765_v9, %v4763_v16  ;;  %v4775_v9 = vld [vmem:[#allocation19 + $0x3c8] sm:$0xff] }
 0xdbb   : > { %9506 = vmatpush1.bf16.msra.mxu0 %v9505_v24  ;;  %v9389_v21 = vpack.c.bf16 %v4764_v18, %v4762_v17  ;;  %v9531_v24 = vpack.c.bf16 %v5001_v23, %v4999_v22  ;;  %v4777_v17 = vld [vmem:[#allocation19 + $0x3d8] sm:$0xff] }
 0xdbc   : > { %9508 = vmatprep.subr.bf16.mxu0 %v9507_v2  ;;  %v9399_v22 = vpack.c.bf16 %v4777_v17, %v4775_v9  ;;  %v5109_v9 = vld [vmem:[#allocation19 + $0x698] sm:$0xff] }
 0xdbd   : > { %9374 = vmatpush1.bf16.msra.mxu1 %v9373_v20 }
 0xdbe   : > { %9376 = vmatprep.subr.bf16.mxu1 %v9375_v26  ;;  %v4769_v26 = vld [vmem:[#allocation19 + $0x398] sm:$0xff] }
 0xdbf   : > { %9510 = vmatpush1.bf16.msra.mxu0 %v9509_v32  ;;  %v9391_v31 = vpack.c.bf16 %v4769_v26, %v4767_v25  ;;  %v9393_v32 = vpack.c.bf16 %v4768_v30, %v4766_v28  ;;  %v4780_v26 = vld [vmem:[#allocation19 + $0x3f0] sm:$0xff]  ;;  %v4653_v28 = vld [vmem:[#allocation19 + $0x8] sm:$0xff] }
 0xdc0   : > { %9512 = vmatprep.subr.bf16.mxu0 %v9511_v33  ;;  %v5091_v33 = vld [vmem:[#allocation19 + $0x608] sm:$0xff]  ;;  %v9405_v30 = vpack.c.bf16 %v4780_v26, %v4778_v27  ;;  %v5108_v27 = vld [vmem:[#allocation19 + $0x690] sm:$0xff] }
 0xdc1   : > { %9378 = vmatpush1.bf16.msra.mxu1 %v9377_v43  ;;  %v9535_v36 = vpack.c.bf16 %v5093_v34, %v5091_v33  ;;  %v4773_v43 = vld [vmem:[#allocation19 + $0x3b8] sm:$0xff]  ;;  %v5111_v26 = vld [vmem:[#allocation19 + $0x6a8] sm:$0xff] }
 0xdc2   : > { %9380 = vmatprep.subr.bf16.mxu1 %v9379_v44  ;;  %v9395_v44 = vpack.c.bf16 %v4773_v43, %v4771_v29  ;;  %v5090_v43 = vld [vmem:[#allocation19 + $0x600] sm:$0xff] }
 0xdc3   : > { %9514 = vmatpush1.bf16.msra.mxu0 %v9513_v51 }
 0xdc4   : > { %9516 = vmatprep.subr.bf16.mxu0 %v9515_v52 }
 0xdc5   : > { %9382 = vmatpush1.bf16.msra.mxu1 %v9381_v54 }
 0xdc6   : > { %9384 = vmatprep.subr.bf16.mxu1 %v9383_v55 }
 0xdc7   : > { %9518 = vmatpush1.bf16.msra.mxu0 %v9517_v35 }
 0xdc8   : > { %9520 = vmatprep.subr.bf16.mxu0 %v9519_v58 }
 0xdc9   : > { %9386 = vmatpush1.bf16.msra.mxu1 %v9385_v60 }
 0xdca   : > { %9388 = vmatprep.subr.bf16.mxu1 %v9387_v41  ;;  %v4774_v41 = vld [vmem:[#allocation19 + $0x3c0] sm:$0xff] }
 0xdcb   : > { %9522 = vmatpush1.bf16.msra.mxu0 %v9521_v63 }
 0xdcc   : > { %9524 = vmatprep.subr.bf16.mxu0 %v9523_v3 }
 0xdcd   : > { %9390 = vmatpush1.bf16.msra.mxu1 %v9389_v21  ;;  %v4776_v21 = vld [vmem:[#allocation19 + $0x3d0] sm:$0xff] }
 0xdce   : > { %9392 = vmatprep.subr.bf16.mxu1 %v9391_v31 }
 0xdcf   : > { %9526 = vmatpush1.bf16.msra.mxu0 %v9525_v13 }
 0xdd0   : > { %9528 = vmatprep.subr.bf16.mxu0 %v9527_v62 }
 0xdd1   : > { %9394 = vmatpush1.bf16.msra.mxu1 %v9393_v32 }
 0xdd2   : > { %9396 = vmatprep.subr.bf16.mxu1 %v9395_v44 }
 0xdd3   : > { %9530 = vmatpush1.bf16.msra.mxu0 %v9529_v6 }
 0xdd4   : > { %9532 = vmatprep.subr.bf16.mxu0 %v9531_v24  ;;  %v9401_v24 = vpack.c.bf16 %v4776_v21, %v4774_v41 }
 0xdd5   : > { %9398 = vmatpush1.bf16.msra.mxu1 %v9397_v46  ;;  %v5097_v46 = vld [vmem:[#allocation19 + $0x638] sm:$0xff] }
 0xdd6   : > { %9400 = vmatprep.subr.bf16.mxu1 %v9399_v22  ;;  %v4652_v22 = vld [vmem:[#allocation19] sm:$0xff] }
 0xdd7   : > { %9534 = vmatpush1.bf16.msra.mxu0 %v9533_v10 }
 0xdd8   : > { %9536 = vmatprep.subr.bf16.mxu0 %v9535_v36 }
 0xdd9   : > { %9402 = vmatpush1.bf16.msra.mxu1 %v9401_v24  ;;  %v5106_v24 = vld [vmem:[#allocation19 + $0x680] sm:$0xff] }
 0xe1b   : > { %v4633_v2 = vpop.permute.xlu0 %4632 }
 0xe1c   : > { %v4635_v20 = vpop.permute.xlu1 %4634  ;;  %4641 = vst.msk [vmem:[#allocation2] sm:$0xfe] %vm4640_vm14, %v4633_v2 }
 0xe1d   : > { %4646 = vst.msk [vmem:[#allocation2 + $0x18] sm:$0x1] %vm4645_vm15, %v4633_v2  ;;  %v4636_v0 = vsel %vm2048_vm11, %v4633_v2, %v4635_v20  ;;  %v4779_v2 = vld [vmem:[#allocation19 + $0x3e8] sm:$0xff] }
 0xe1e   : > { %4644 = vst.msk [vmem:[#allocation2 + $0x10] sm:$0xfe] %vm4643_vm3, %v4635_v20  ;;  %4642 = vst [vmem:[#allocation2 + $0x8] sm:$0xfe] %v4636_v0  ;;  %v9403_v10 = vpack.c.bf16 %v4781_v14, %v4779_v2 }
 0xe1f   : > { %4649 = vst.msk [vmem:[#allocation2 + $0x28] sm:$0x1] %vm4648_vm5, %v4635_v20  ;;  %4647 = vst [vmem:[#allocation2 + $0x20] sm:$0x1] %v4636_v0  ;;  %v4655_v0 = vld [vmem:[#allocation19 + $0x18] sm:$0xff] }
 0xe20   : > { %9404 = vmatprep.subr.bf16.mxu1 %v9403_v10  ;;  %v9407_v31 = vpack.c.bf16 %v4655_v0, %v4653_v28  ;;  %v5113_v28 = vld [vmem:[#allocation19 + $0x6b8] sm:$0xff] }
 0xe21   : > { %9406 = vmatpush1.bf16.msra.mxu1 %v9405_v30 }
 0xe22   : > { %9408 = vmatprep.subr.bf16.mxu1 %v9407_v31 }
 0xe23   : > { %v12194_v48 = vld [vmem:[#allocation2] sm:$0xff] }
 0xe24   : > { %v5239_v50 = vld [vmem:[#allocation2] sm:$0xfe]  ;;  %v5242_v51 = vld [vmem:[#allocation2 + $0x18] sm:$0x1]  ;;  %5002 = vrot.lane.b32.xlu1 %v12194_v48, %s11215_s9 }
 0xe25   : > { %v4716_v52 = vld [vmem:[#allocation2 + $0x10] sm:$0xff]  ;;  %v5316_v38 = vrot.slane %v5239_v50, 1  ;;  %v5317_v8 = vrot.slane %v5242_v51, 1  ;;  %v12198_v54 = vld [vmem:[#allocation2 + $0x8] sm:$0xff]  ;;  %v5710_v6 = vld [vmem:[#allocation2] sm:$0xfc] }
 0xe26   : > { %v5241_v39 = vld [vmem:[#allocation2 + $0x10] sm:$0xfe]  ;;  %v5240_v47 = vld [vmem:[#allocation2 + $0x8] sm:$0xfe]  ;;  %v5243_v55 = vld [vmem:[#allocation2 + $0x20] sm:$0x1]  ;;  %v10477_v57 = vpack.i.bf16 %v4716_v52, %v12198_v54 }
 0xe27   : > { %v5322_v56 = vrot.slane %v5241_v39, 1  ;;  %v5318_v35 = vsel %vm1425_vm8, %v5316_v38, %v5317_v8  ;;  %v5244_v58 = vld [vmem:[#allocation2 + $0x28] sm:$0x1]  ;;  %v5319_v49 = vrot.slane %v5240_v47, 1  ;;  %v5320_v59 = vrot.slane %v5243_v55, 1 }
 0xe28   : > { %v5711_v60 = vld [vmem:[#allocation2 + $0x8] sm:$0xfc]  ;;  %v5323_v42 = vrot.slane %v5244_v58, 1  ;;  %v5712_v61 = vld [vmem:[#allocation2 + $0x10] sm:$0xfc]  ;;  %10478 = vrot.lane.b32.xlu0 %v10477_v57, %s11215_s9  ;;  %5325 = vrot.lane.b32.xlu1 %v5318_v35, %s11213_s1  ;;  %v5787_v25 = vrot.slane %v5710_v6, 2  ;;  %v9537_v39 = vpack.c.bf16 %v5092_v40, %v5090_v43 }
 0xe29   : > { %v5714_v63 = vld [vmem:[#allocation2 + $0x20] sm:$0x3]  ;;  %v5790_v3 = vrot.slane %v5711_v60, 2  ;;  %v5321_v7 = vsel %vm1425_vm8, %v5319_v49, %v5320_v59  ;;  %v5715_v53 = vld [vmem:[#allocation2 + $0x28] sm:$0x3]  ;;  %v5793_v37 = vrot.slane %v5712_v61, 2 }
 0xe2a   : > { %v5791_v12 = vrot.slane %v5714_v63, 2  ;;  %v5324_v13 = vsel %vm1425_vm8, %v5322_v56, %v5323_v42  ;;  %v5794_v62 = vrot.slane %v5715_v53, 2  ;;  %v5713_v18 = vld [vmem:[#allocation2 + $0x18] sm:$0x3]  ;;  %v5086_v36 = vld [vmem:[#allocation2 + $0x8] sm:$0xfe]  ;;  %v9539_v56 = vpack.c.bf16 %v5097_v46, %v5095_v45 }
 0xe2b   : > { %v10482_v19 = vpack.i.bf16 %v5324_v13, %v5321_v7  ;;  %v5788_v20 = vrot.slane %v5713_v18, 2  ;;  %v5088_v29 = vld [vmem:[#allocation2 + $0x20] sm:$0x1]  ;;  %v5161_v52 = vrot.slane %v5086_v36, 1  ;;  %v5099_v49 = vld [vmem:[#allocation19 + $0x648] sm:$0xff]  ;;  %v5101_v59 = vld [vmem:[#allocation19 + $0x658] sm:$0xff] }
 0xe2c   : > { %v5792_v15 = vsel %vm1737_vm9, %v5790_v3, %v5791_v12  ;;  %v5795_v16 = vsel %vm1737_vm9, %v5793_v37, %v5794_v62  ;;  %5473 = vrot.lane.b32.xlu1 %v5318_v35, %s11215_s9  ;;  %v5162_v38 = vrot.slane %v5088_v29, 1  ;;  %v5096_v35 = vld [vmem:[#allocation19 + $0x630] sm:$0xff]  ;;  %v9543_v61 = vpack.c.bf16 %v5101_v59, %v5099_v49  ;;  %v5098_v63 = vld [vmem:[#allocation19 + $0x640] sm:$0xff]  ;;  %v5103_v12 = vld [vmem:[#allocation19 + $0x668] sm:$0xff] }
 0xe2d   : > { %10483 = vrot.lane.b32.xlu0 %v10482_v19, %s11213_s1  ;;  %v10497_v23 = vpack.i.bf16 %v5795_v16, %v5792_v15  ;;  %v5789_v32 = vsel %vm1737_vm9, %v5787_v25, %v5788_v20  ;;  %v5100_v3 = vld [vmem:[#allocation19 + $0x650] sm:$0xff]  ;;  %v5105_v37 = vld [vmem:[#allocation19 + $0x678] sm:$0xff]  ;;  %v5107_v6 = vld [vmem:[#allocation19 + $0x688] sm:$0xff] }
 0xe2e   : > { %v10502_v33 = vpack.i.bf16 %v5789_v32, %v12194_v48  ;;  %v5163_v60 = vsel %vm1425_vm8, %v5161_v52, %v5162_v38  ;;  %v9545_v13 = vpack.c.bf16 %v5100_v3, %v5098_v63  ;;  %v9547_v62 = vpack.c.bf16 %v5105_v37, %v5103_v12  ;;  %v5104_v15 = vld [vmem:[#allocation19 + $0x670] sm:$0xff]  ;;  %v4657_v25 = vld [vmem:[#allocation19 + $0x28] sm:$0xff]  ;;  %v4659_v20 = vld [vmem:[#allocation19 + $0x38] sm:$0xff] }
 0xe2f   : > { %v9551_v14 = vpack.c.bf16 %v5109_v9, %v5107_v6  ;;  %v4656_v36 = vld [vmem:[#allocation19 + $0x20] sm:$0xff]  ;;  %v4658_v29 = vld [vmem:[#allocation19 + $0x30] sm:$0xff]  ;;  %v4661_v46 = vld [vmem:[#allocation19 + $0x48] sm:$0xff] }
 0xe30   : > { %10498 = vrot.lane.b32.xlu1 %v10497_v23, %s11213_s1  ;;  %v5110_v43 = vld [vmem:[#allocation19 + $0x6a0] sm:$0xff]  ;;  %v5112_v45 = vld [vmem:[#allocation19 + $0x6b0] sm:$0xff]  ;;  %v5115_v52 = vld [vmem:[#allocation19 + $0x6c8] sm:$0xff] }
 0xe31   : > { %10488 = vrot.lane.b32.xlu0 %v10482_v19, %s11215_s9  ;;  %v5102_v19 = vld [vmem:[#allocation19 + $0x660] sm:$0xff]  ;;  %v5117_v38 = vld [vmem:[#allocation19 + $0x6d8] sm:$0xff]  ;;  %v5116_v59 = vld [vmem:[#allocation19 + $0x6d0] sm:$0xff] }
 0xe32   : > { %v9549_v21 = vpack.c.bf16 %v5104_v15, %v5102_v19  ;;  %v9559_v49 = vpack.c.bf16 %v5117_v38, %v5115_v52  ;;  %v5121_v63 = vld [vmem:[#allocation19 + $0x6f8] sm:$0xff]  ;;  %v4664_v37 = vld [vmem:[#allocation19 + $0x60] sm:$0xff]  ;;  %v5120_v15 = vld [vmem:[#allocation19 + $0x6f0] sm:$0xff] }
 0xe33   : > { %v4671_v6 = vld [vmem:[#allocation19 + $0x98] sm:$0xff]  ;;  %v5123_v9 = vld [vmem:[#allocation19 + $0x708] sm:$0xff]  ;;  %v4676_v38 = vld [vmem:[#allocation19 + $0xc0] sm:$0xff] }
 0xe34   : > { %10508 = vrot.lane.b32.xlu1 %v10497_v23, %s11215_s9  ;;  %v4654_v23 = vld [vmem:[#allocation19 + $0x10] sm:$0xff] }
 0xe35   : > { %10493 = vrot.lane.b32.xlu0 %v10477_v57, %s11213_s1  ;;  %v5094_v57 = vld [vmem:[#allocation19 + $0x620] sm:$0xff] }
 0xe36   : > { %v9541_v42 = vpack.c.bf16 %v5096_v35, %v5094_v57  ;;  %v4662_v57 = vld [vmem:[#allocation19 + $0x50] sm:$0xff]  ;;  %v5114_v35 = vld [vmem:[#allocation19 + $0x6c0] sm:$0xff] }
 0xe39   : > { %10503 = vrot.lane.b32.xlu0 %v10502_v33, %s11213_s1  ;;  %v9553_v33 = vpack.c.bf16 %v5108_v27, %v5106_v24  ;;  %v4670_v24 = vld [vmem:[#allocation19 + $0x90] sm:$0xff] }
 0xe3a   : > { %v5124_v27 = vld [vmem:[#allocation19 + $0x710] sm:$0xff] }
 0xe3d   : > { %5944 = vrot.lane.b32.xlu0 %v5789_v32, %s11215_s9  ;;  %v9409_v32 = vpack.c.bf16 %v4654_v23, %v4652_v22  ;;  %v4668_v23 = vld [vmem:[#allocation19 + $0x80] sm:$0xff] }
 0xe96   : > { %v5003_v34 = vpop.permute.xlu1 %5002 }
 0xe9a   : > { %v10479_v44 = vpop.permute.xlu0 %10478  ;;  %v12218_v8 = vpop.permute.xlu1 %5325 }
 0xe9b   : > { %v10481_v50 = vunpack.i.h.bf16 %v10479_v44  ;;  %v10480_v51 = vunpack.i.l.bf16 %v10479_v44  ;;  %v9555_v44 = vpack.c.bf16 %v5113_v28, %v5111_v26  ;;  %v5129_v26 = vld [vmem:[#allocation19 + $0x738] sm:$0xff]  ;;  %v9425_v28 = vpack.c.bf16 %v4670_v24, %v4668_v23  ;;  %v5140_v23 = vld [vmem:[#allocation19 + $0x790] sm:$0xff]  ;;  %v4689_v24 = vld [vmem:[#allocation19 + $0x128] sm:$0xff] }
 0xe9d   : > { %v5009_v47 = vsel %vm4622_vm2, %v10480_v51, %v10481_v50  ;;  %v5008_v55 = vsel %vm4622_vm2, %v5003_v34, %v10480_v51  ;;  %v9411_v34 = vpack.c.bf16 %v4659_v20, %v4657_v25  ;;  %v4663_v50 = vld [vmem:[#allocation19 + $0x58] sm:$0xff]  ;;  %v4673_v25 = vld [vmem:[#allocation19 + $0xa8] sm:$0xff] }
 0xe9e   : > { %5076 = vmatprep.mubr.f32.mxu0 %v5009_v47  ;;  %v12225_v7 = vpop.permute.xlu1 %5473  ;;  %v9557_v47 = vpack.c.bf16 %v5112_v45, %v5110_v43  ;;  %v4675_v20 = vld [vmem:[#allocation19 + $0xb8] sm:$0xff]  ;;  %v4677_v43 = vld [vmem:[#allocation19 + $0xc8] sm:$0xff] }
 0xe9f   : > { %v12222_v58 = vpop.permute.xlu0 %10483  ;;  %5077 = vmatmul.mubr.f32.vlgmr.msra.gmra.mrb[8].mxu0 %v5008_v55  ;;  %v9415_v55 = vpack.c.bf16 %v4663_v50, %v4661_v46  ;;  %v5133_v45 = vld [vmem:[#allocation19 + $0x758] sm:$0xff] }
 0xea0   : > { %9538 = vmatpush1.bf16.msra.mxu0 %v9537_v39  ;;  %5230 = vmatprep.mubr.f32.mxu0 %v5163_v60  ;;  %v9413_v39 = vpack.c.bf16 %v4658_v29, %v4656_v36  ;;  %v4665_v60 = vld [vmem:[#allocation19 + $0x68] sm:$0xff]  ;;  %v5128_v29 = vld [vmem:[#allocation19 + $0x730] sm:$0xff] }
 0xea1   : > { %9540 = vmatprep.subr.bf16.mxu0 %v9539_v56  ;;  %v4660_v56 = vld [vmem:[#allocation19 + $0x40] sm:$0xff] }
 0xea2   : > { %v12229_v41 = vpop.permute.xlu1 %10498  ;;  %v9417_v3 = vpack.c.bf16 %v4662_v57, %v4660_v56  ;;  %v5132_v56 = vld [vmem:[#allocation19 + $0x750] sm:$0xff]  ;;  %v4681_v57 = vld [vmem:[#allocation19 + $0xe8] sm:$0xff] }
 0xea3   : > { %v12227_v53 = vpop.permute.xlu0 %10488  ;;  %v10500_v30 = vunpack.i.l.bf16 %v12229_v41 }
 0xea4   : > { %9542 = vmatpush1.bf16.msra.mxu0 %v9541_v42  ;;  %v4667_v42 = vld [vmem:[#allocation19 + $0x78] sm:$0xff] }
 0xea5   : > { %9544 = vmatprep.subr.bf16.mxu0 %v9543_v61  ;;  %v5119_v61 = vld [vmem:[#allocation19 + $0x6e8] sm:$0xff]  ;;  %v9419_v12 = vpack.c.bf16 %v4667_v42, %v4665_v60 }
 0xea6   : > { %v9563_v19 = vpack.c.bf16 %v5121_v63, %v5119_v61  ;;  %v4680_v63 = vld [vmem:[#allocation19 + $0xe0] sm:$0xff] }
 0xea7   : > { %v10494_v16 = vpop.permute.xlu0 %10493 }
 0xea8   : > { %v10496_v17 = vunpack.i.h.bf16 %v10494_v16  ;;  %v10495_v18 = vunpack.i.l.bf16 %v10494_v16  ;;  %9546 = vmatpush1.bf16.msra.mxu0 %v9545_v13  ;;  %v4666_v13 = vld [vmem:[#allocation19 + $0x70] sm:$0xff]  ;;  %v4669_v16 = vld [vmem:[#allocation19 + $0x88] sm:$0xff] }
 0xea9   : > { %9548 = vmatprep.subr.bf16.mxu0 %v9547_v62  ;;  %v5118_v62 = vld [vmem:[#allocation19 + $0x6e0] sm:$0xff]  ;;  %v9423_v22 = vpack.c.bf16 %v4671_v6, %v4669_v16 }
 0xeaa   : > { %v4792_v2 = vsel %vm1147_vm10, %v10495_v18, %v10496_v17  ;;  %v5125_v17 = vld [vmem:[#allocation19 + $0x718] sm:$0xff] }
 0xeab   : > { %4859 = vmatprep.mubr.f32.mxu1 %v4792_v2  ;;  %v10504_v10 = vpop.permute.xlu0 %10503  ;;  %v5122_v2 = vld [vmem:[#allocation19 + $0x700] sm:$0xff] }
 0xeac   : > { %v10506_v0 = vunpack.i.h.bf16 %v10504_v10  ;;  %v10505_v31 = vunpack.i.l.bf16 %v10504_v10  ;;  %9550 = vmatpush1.bf16.msra.mxu0 %v9549_v21  ;;  %v9565_v21 = vpack.c.bf16 %v5120_v15, %v5118_v62  ;;  %v5127_v10 = vld [vmem:[#allocation19 + $0x728] sm:$0xff]  ;;  %v4687_v62 = vld [vmem:[#allocation19 + $0x118] sm:$0xff] }
 0xead   : > { %9552 = vmatprep.subr.bf16.mxu0 %v9551_v14  ;;  %v9567_v14 = vpack.c.bf16 %v5125_v17, %v5123_v9  ;;  %v9571_v36 = vpack.c.bf16 %v5129_v26, %v5127_v10  ;;  %v5141_v15 = vld [vmem:[#allocation19 + $0x798] sm:$0xff]  ;;  %v4684_v17 = vld [vmem:[#allocation19 + $0x100] sm:$0xff] }
 0xeae   : > { %v4791_v40 = vsel %vm1147_vm10, %v10505_v31, %v10495_v18  ;;  %v12237_v51 = vsel %vm1147_vm10, %v10506_v0, %v10500_v30  ;;  %v9421_v18 = vpack.c.bf16 %v4666_v13, %v4664_v37  ;;  %v9569_v0 = vpack.c.bf16 %v5124_v27, %v5122_v2  ;;  %v5136_v37 = vld [vmem:[#allocation19 + $0x770] sm:$0xff]  ;;  %v4685_v13 = vld [vmem:[#allocation19 + $0x108] sm:$0xff]  ;;  %v4691_v2 = vld [vmem:[#allocation19 + $0x138] sm:$0xff] }
 0xeaf   : > { %4860 = vmatmul.mubr.f32.vlgmr.msra.gmra.mrb[2].mxu1 %v4791_v40  ;;  %v9427_v31 = vpack.c.bf16 %v4675_v20, %v4673_v25  ;;  %v4679_v40 = vld [vmem:[#allocation19 + $0xd8] sm:$0xff]  ;;  %v9439_v9 = vpack.c.bf16 %v4687_v62, %v4685_v13  ;;  %v9443_v10 = vpack.c.bf16 %v4691_v2, %v4689_v24  ;;  %v4688_v26 = vld [vmem:[#allocation19 + $0x120] sm:$0xff] }
 0xeb0   : > { %9410 = vmatpush1.bf16.msra.mxu1 %v9409_v32  ;;  %4930 = vmatprep.mubr.f32.mxu1 %v12198_v54  ;;  %v9561_v54 = vpack.c.bf16 %v5116_v59, %v5114_v35  ;;  %v4672_v32 = vld [vmem:[#allocation19 + $0xa0] sm:$0xff]  ;;  %v9431_v52 = vpack.c.bf16 %v4679_v40, %v4677_v43  ;;  %v4683_v35 = vld [vmem:[#allocation19 + $0xf8] sm:$0xff] }
 0xeb1   : > { %9554 = vmatpush1.bf16.msra.mxu0 %v9553_v33  ;;  %9412 = vmatprep.subr.bf16.mxu1 %v9411_v34  ;;  %v4674_v33 = vld [vmem:[#allocation19 + $0xb0] sm:$0xff]  ;;  %v5126_v34 = vld [vmem:[#allocation19 + $0x720] sm:$0xff]  ;;  %v5137_v59 = vld [vmem:[#allocation19 + $0x778] sm:$0xff]  ;;  %v9435_v61 = vpack.c.bf16 %v4683_v35, %v4681_v57 }
 0xeb2   : > { %9556 = vmatprep.subr.bf16.mxu0 %v9555_v44  ;;  %v5131_v44 = vld [vmem:[#allocation19 + $0x748] sm:$0xff]  ;;  %v9429_v46 = vpack.c.bf16 %v4674_v33, %v4672_v32  ;;  %v9573_v50 = vpack.c.bf16 %v5128_v29, %v5126_v34  ;;  %v5145_v27 = vld [vmem:[#allocation19 + $0x7b8] sm:$0xff]  ;;  %v5144_v32 = vld [vmem:[#allocation19 + $0x7b0] sm:$0xff] }
 0xeb3   : > { %v4693_v33 = vld [vmem:[#allocation19 + $0x148] sm:$0xff]  ;;  %v4695_v34 = vld [vmem:[#allocation19 + $0x158] sm:$0xff]  ;;  %v5085_v62 = vld [vmem:[#allocation2] sm:$0xfe] }
 0xeb4   : > { %9414 = vmatpush1.bf16.msra.mxu1 %v9413_v39  ;;  %v4678_v39 = vld [vmem:[#allocation19 + $0xd0] sm:$0xff]  ;;  %v5149_v29 = vld [vmem:[#allocation19 + $0x7d8] sm:$0xff] }
 0xeb5   : > { %9558 = vmatpush1.bf16.msra.mxu0 %v9557_v47  ;;  %9416 = vmatprep.subr.bf16.mxu1 %v9415_v55  ;;  %v5130_v47 = vld [vmem:[#allocation19 + $0x740] sm:$0xff]  ;;  %v9575_v55 = vpack.c.bf16 %v5133_v45, %v5131_v44  ;;  %v9433_v60 = vpack.c.bf16 %v4678_v39, %v4676_v38  ;;  %v9447_v44 = vpack.c.bf16 %v4695_v34, %v4693_v33  ;;  %v5148_v38 = vld [vmem:[#allocation19 + $0x7d0] sm:$0xff]  ;;  %v4697_v39 = vld [vmem:[#allocation19 + $0x168] sm:$0xff] }
 0xeb6   : > { %9560 = vmatprep.subr.bf16.mxu0 %v9559_v49  ;;  %v5135_v49 = vld [vmem:[#allocation19 + $0x768] sm:$0xff]  ;;  %v9577_v42 = vpack.c.bf16 %v5132_v56, %v5130_v47  ;;  %v4692_v45 = vld [vmem:[#allocation19 + $0x140] sm:$0xff]  ;;  %v4699_v47 = vld [vmem:[#allocation19 + $0x178] sm:$0xff] }
 0xeb7   : > { %v5153_v56 = vld [vmem:[#allocation19 + $0x7f8] sm:$0xff]  ;;  %v5252_v34 = vld [vmem:[#allocation19 + $0x830] sm:$0xff] }
 0xeb8   : > { %9418 = vmatpush1.bf16.msra.mxu1 %v9417_v3  ;;  %v4682_v3 = vld [vmem:[#allocation19 + $0xf0] sm:$0xff]  ;;  %v4707_v2 = vld [vmem:[#allocation19 + $0x1b8] sm:$0xff] }
 0xeb9   : > { %9562 = vmatpush1.bf16.msra.mxu0 %v9561_v54  ;;  %9420 = vmatprep.subr.bf16.mxu1 %v9419_v12  ;;  %v5134_v54 = vld [vmem:[#allocation19 + $0x760] sm:$0xff]  ;;  %v9579_v12 = vpack.c.bf16 %v5137_v59, %v5135_v49  ;;  %v9437_v16 = vpack.c.bf16 %v4682_v3, %v4680_v63  ;;  %v9451_v49 = vpack.c.bf16 %v4699_v47, %v4697_v39  ;;  %v5152_v63 = vld [vmem:[#allocation19 + $0x7f0] sm:$0xff]  ;;  %v4701_v3 = vld [vmem:[#allocation19 + $0x188] sm:$0xff] }
 0xeba   : > { %9564 = vmatprep.subr.bf16.mxu0 %v9563_v19  ;;  %v5139_v19 = vld [vmem:[#allocation19 + $0x788] sm:$0xff]  ;;  %v9581_v6 = vpack.c.bf16 %v5136_v37, %v5134_v54  ;;  %v4696_v59 = vld [vmem:[#allocation19 + $0x160] sm:$0xff]  ;;  %v4703_v54 = vld [vmem:[#allocation19 + $0x198] sm:$0xff] }
 0xebb   : > { %v5249_v37 = vld [vmem:[#allocation19 + $0x818] sm:$0xff]  ;;  %v4710_v39 = vld [vmem:[#allocation19 + $0x1d0] sm:$0xff]  ;;  %v5254_v47 = vld [vmem:[#allocation19 + $0x840] sm:$0xff] }
 0xebc   : > { %9422 = vmatpush1.bf16.msra.mxu1 %v9421_v18  ;;  %v4686_v18 = vld [vmem:[#allocation19 + $0x110] sm:$0xff] }
 0xebd   : > { %9566 = vmatpush1.bf16.msra.mxu0 %v9565_v21  ;;  %9424 = vmatprep.subr.bf16.mxu1 %v9423_v22  ;;  %v5138_v21 = vld [vmem:[#allocation19 + $0x780] sm:$0xff]  ;;  %v9583_v22 = vpack.c.bf16 %v5141_v15, %v5139_v19  ;;  %v9441_v25 = vpack.c.bf16 %v4686_v18, %v4684_v17  ;;  %v5087_v19 = vld [vmem:[#allocation2 + $0x18] sm:$0x1] }
 0xebe   : > { %9568 = vmatprep.subr.bf16.mxu0 %v9567_v14  ;;  %v5143_v14 = vld [vmem:[#allocation19 + $0x7a8] sm:$0xff]  ;;  %v9585_v20 = vpack.c.bf16 %v5140_v23, %v5138_v21  ;;  %v5246_v18 = vld [vmem:[#allocation19 + $0x800] sm:$0xff]  ;;  %v5248_v21 = vld [vmem:[#allocation19 + $0x810] sm:$0xff]  ;;  %v5158_v23 = vrot.slane %v5085_v62, 1  ;;  %v5159_v24 = vrot.slane %v5087_v19, 1 }
 0xebf   : > { %v5265_v62 = vld [vmem:[#allocation19 + $0x898] sm:$0xff] }
 0xec0   : > { %9426 = vmatpush1.bf16.msra.mxu1 %v9425_v28  ;;  %v4690_v28 = vld [vmem:[#allocation19 + $0x130] sm:$0xff] }
 0xec1   : > { %9570 = vmatpush1.bf16.msra.mxu0 %v9569_v0  ;;  %9428 = vmatprep.subr.bf16.mxu1 %v9427_v31  ;;  %v5142_v0 = vld [vmem:[#allocation19 + $0x7a0] sm:$0xff]  ;;  %v9587_v31 = vpack.c.bf16 %v5145_v27, %v5143_v14  ;;  %v9445_v43 = vpack.c.bf16 %v4690_v28, %v4688_v26  ;;  %v5251_v14 = vld [vmem:[#allocation19 + $0x828] sm:$0xff]  ;;  %v5253_v27 = vld [vmem:[#allocation19 + $0x838] sm:$0xff]  ;;  %v9601_v26 = vpack.c.bf16 %v5248_v21, %v5246_v18 }
 0xec2   : > { %9572 = vmatprep.subr.bf16.mxu0 %v9571_v36  ;;  %v5147_v36 = vld [vmem:[#allocation19 + $0x7c8] sm:$0xff]  ;;  %v9589_v40 = vpack.c.bf16 %v5144_v32, %v5142_v0  ;;  %v4704_v28 = vld [vmem:[#allocation19 + $0x1a0] sm:$0xff]  ;;  %v4706_v0 = vld [vmem:[#allocation19 + $0x1b0] sm:$0xff]  ;;  %v9603_v33 = vpack.c.bf16 %v5253_v27, %v5251_v14 }
 0xec3   : > { %v5269_v18 = vld [vmem:[#allocation19 + $0x8b8] sm:$0xff] }
 0xec4   : > { %9430 = vmatpush1.bf16.msra.mxu1 %v9429_v46  ;;  %v4694_v46 = vld [vmem:[#allocation19 + $0x150] sm:$0xff]  ;;  %v5273_v14 = vld [vmem:[#allocation19 + $0x8d8] sm:$0xff] }
 0xec5   : > { %9574 = vmatpush1.bf16.msra.mxu0 %v9573_v50  ;;  %9432 = vmatprep.subr.bf16.mxu1 %v9431_v52  ;;  %v5146_v50 = vld [vmem:[#allocation19 + $0x7c0] sm:$0xff]  ;;  %v9591_v52 = vpack.c.bf16 %v5149_v29, %v5147_v36  ;;  %v9449_v57 = vpack.c.bf16 %v4694_v46, %v4692_v45  ;;  %v4709_v36 = vld [vmem:[#allocation19 + $0x1c8] sm:$0xff]  ;;  %v4711_v29 = vld [vmem:[#allocation19 + $0x1d8] sm:$0xff]  ;;  %v9461_v46 = vpack.c.bf16 %v4706_v0, %v4704_v28 }
 0xec6   : > { %9576 = vmatprep.subr.bf16.mxu0 %v9575_v55  ;;  %v5151_v55 = vld [vmem:[#allocation19 + $0x7e8] sm:$0xff]  ;;  %v9593_v35 = vpack.c.bf16 %v5148_v38, %v5146_v50  ;;  %v4708_v38 = vld [vmem:[#allocation19 + $0x1c0] sm:$0xff]  ;;  %v5277_v0 = vld [vmem:[#allocation19 + $0x8f8] sm:$0xff] }
 0xec7   : > { %v5275_v28 = vld [vmem:[#allocation19 + $0x8e8] sm:$0xff] }
 0xec8   : > { %9434 = vmatpush1.bf16.msra.mxu1 %v9433_v60  ;;  %v4698_v60 = vld [vmem:[#allocation19 + $0x170] sm:$0xff] }
 0xec9   : > { %9578 = vmatpush1.bf16.msra.mxu0 %v9577_v42  ;;  %9436 = vmatprep.subr.bf16.mxu1 %v9435_v61  ;;  %v5150_v42 = vld [vmem:[#allocation19 + $0x7e0] sm:$0xff]  ;;  %v9595_v61 = vpack.c.bf16 %v5153_v56, %v5151_v55  ;;  %v9453_v13 = vpack.c.bf16 %v4698_v60, %v4696_v59  ;;  %v5256_v56 = vld [vmem:[#allocation19 + $0x850] sm:$0xff]  ;;  %v5261_v59 = vld [vmem:[#allocation19 + $0x878] sm:$0xff]  ;;  %v9465_v60 = vpack.c.bf16 %v4710_v39, %v4708_v38 }
 0xeca   : > { %9580 = vmatprep.subr.bf16.mxu0 %v9579_v12  ;;  %v5247_v12 = vld [vmem:[#allocation19 + $0x808] sm:$0xff]  ;;  %v9597_v15 = vpack.c.bf16 %v5152_v63, %v5150_v42  ;;  %v9609_v42 = vpack.c.bf16 %v5256_v56, %v5254_v47  ;;  %v4712_v63 = vld [vmem:[#allocation19 + $0x1e0] sm:$0xff]  ;;  %v5284_v39 = vld [vmem:[#allocation19 + $0x930] sm:$0xff] }
 0xecb   : > { %v9599_v17 = vpack.c.bf16 %v5249_v37, %v5247_v12  ;;  %v5258_v12 = vld [vmem:[#allocation19 + $0x860] sm:$0xff]  ;;  %v5260_v37 = vld [vmem:[#allocation19 + $0x870] sm:$0xff]  ;;  %v5287_v47 = vld [vmem:[#allocation19 + $0x948] sm:$0xff] }
 0xecc   : > { %9438 = vmatpush1.bf16.msra.mxu1 %v9437_v16  ;;  %v9455_v16 = vpack.c.bf16 %v4703_v54, %v4701_v3  ;;  %v4714_v3 = vld [vmem:[#allocation19 + $0x1f0] sm:$0xff]  ;;  %v5282_v38 = vld [vmem:[#allocation19 + $0x920] sm:$0xff] }
 0xecd   : > { %9582 = vmatpush1.bf16.msra.mxu0 %v9581_v6  ;;  %9440 = vmatprep.subr.bf16.mxu1 %v9439_v9  ;;  %v4700_v6 = vld [vmem:[#allocation19 + $0x180] sm:$0xff]  ;;  %v4702_v9 = vld [vmem:[#allocation19 + $0x190] sm:$0xff]  ;;  %v9469_v19 = vpack.c.bf16 %v4714_v3, %v4712_v63  ;;  %v9637_v56 = vpack.c.bf16 %v5284_v39, %v5282_v38  ;;  %v5418_v39 = vld [vmem:[#allocation19 + $0xa48] sm:$0xff] }
 0xece   : > { %9584 = vmatprep.subr.bf16.mxu0 %v9583_v22  ;;  %v4705_v22 = vld [vmem:[#allocation19 + $0x1a8] sm:$0xff]  ;;  %v5290_v63 = vld [vmem:[#allocation19 + $0x960] sm:$0xff]  ;;  %v5292_v3 = vld [vmem:[#allocation19 + $0x970] sm:$0xff] }
 0xecf   : > { %v9459_v32 = vpack.c.bf16 %v4707_v2, %v4705_v22  ;;  %v5271_v2 = vld [vmem:[#allocation19 + $0x8c8] sm:$0xff] }
 0xed0   : > { %9442 = vmatpush1.bf16.msra.mxu1 %v9441_v25  ;;  %v10486_v25 = vunpack.i.h.bf16 %v12222_v58 }
 0xed1   : > { %9586 = vmatpush1.bf16.msra.mxu0 %v9585_v20  ;;  %9444 = vmatprep.subr.bf16.mxu1 %v9443_v10  ;;  %v10485_v20 = vunpack.i.l.bf16 %v12222_v58  ;;  %v9457_v10 = vpack.c.bf16 %v4702_v9, %v4700_v6  ;;  %v5262_v6 = vld [vmem:[#allocation19 + $0x880] sm:$0xff]  ;;  %v5264_v9 = vld [vmem:[#allocation19 + $0x890] sm:$0xff] }
 0xed2   : > { %9588 = vmatprep.subr.bf16.mxu0 %v9587_v31  ;;  %v5250_v31 = vld [vmem:[#allocation19 + $0x820] sm:$0xff]  ;;  %v9617_v21 = vpack.c.bf16 %v5264_v9, %v5262_v6 }
 0xed3   : > { %v5332_v45 = vsel %vm1147_vm10, %v10485_v20, %v10486_v25  ;;  %v9605_v50 = vpack.c.bf16 %v5252_v34, %v5250_v31  ;;  %v9623_v25 = vpack.c.bf16 %v5273_v14, %v5271_v2  ;;  %v5276_v34 = vld [vmem:[#allocation19 + $0x8f0] sm:$0xff]  ;;  %v5302_v2 = vld [vmem:[#allocation19 + $0x9c0] sm:$0xff]  ;;  %v5331_v38 = vsel %vm1147_vm10, %v12218_v8, %v10485_v20 }
 0xed4   : > { %9446 = vmatpush1.bf16.msra.mxu1 %v9445_v43  ;;  %v5160_v43 = vsel %vm1425_vm8, %v5158_v23, %v5159_v24  ;;  %v5266_v23 = vld [vmem:[#allocation19 + $0x8a0] sm:$0xff]  ;;  %v5268_v24 = vld [vmem:[#allocation19 + $0x8b0] sm:$0xff] }
 0xed5   : > { %9590 = vmatpush1.bf16.msra.mxu0 %v9589_v40  ;;  %9448 = vmatprep.subr.bf16.mxu1 %v9447_v44  ;;  %v5255_v40 = vld [vmem:[#allocation19 + $0x848] sm:$0xff]  ;;  %v5257_v44 = vld [vmem:[#allocation19 + $0x858] sm:$0xff]  ;;  %v9621_v27 = vpack.c.bf16 %v5268_v24, %v5266_v23  ;;  %v5304_v14 = vld [vmem:[#allocation19 + $0x9d0] sm:$0xff] }
 0xed6   : > { %9592 = vmatprep.subr.bf16.mxu0 %v9591_v52  ;;  %v9463_v52 = vpack.c.bf16 %v4711_v29, %v4709_v36  ;;  %v9607_v55 = vpack.c.bf16 %v5257_v44, %v5255_v40  ;;  %v5281_v36 = vld [vmem:[#allocation19 + $0x918] sm:$0xff]  ;;  %v5278_v40 = vld [vmem:[#allocation19 + $0x900] sm:$0xff]  ;;  %v5280_v44 = vld [vmem:[#allocation19 + $0x910] sm:$0xff] }
 0xed7   : > { %v5421_v20 = vld [vmem:[#allocation19 + $0xa60] sm:$0xff] }
 0xed8   : > { %9450 = vmatpush1.bf16.msra.mxu1 %v9449_v57  ;;  %v4713_v57 = vld [vmem:[#allocation19 + $0x1e8] sm:$0xff] }
 0xed9   : > { %9594 = vmatpush1.bf16.msra.mxu0 %v9593_v35  ;;  %9452 = vmatprep.subr.bf16.mxu1 %v9451_v49  ;;  %v4715_v35 = vld [vmem:[#allocation19 + $0x1f8] sm:$0xff]  ;;  %v5259_v49 = vld [vmem:[#allocation19 + $0x868] sm:$0xff] }
 0xeda   : > { %9596 = vmatprep.subr.bf16.mxu0 %v9595_v61  ;;  %v9467_v61 = vpack.c.bf16 %v4715_v35, %v4713_v57  ;;  %v9611_v54 = vpack.c.bf16 %v5261_v59, %v5259_v49  ;;  %v5286_v35 = vld [vmem:[#allocation19 + $0x940] sm:$0xff]  ;;  %v5288_v49 = vld [vmem:[#allocation19 + $0x950] sm:$0xff]  ;;  %v5291_v59 = vld [vmem:[#allocation19 + $0x968] sm:$0xff] }
 0xedc   : > { %9454 = vmatpush1.bf16.msra.mxu1 %v9453_v13  ;;  %v5263_v13 = vld [vmem:[#allocation19 + $0x888] sm:$0xff] }
 0xedd   : > { %9598 = vmatpush1.bf16.msra.mxu0 %v9597_v15  ;;  %9456 = vmatprep.subr.bf16.mxu1 %v9455_v16  ;;  %v9613_v15 = vpack.c.bf16 %v5260_v37, %v5258_v12  ;;  %v9615_v16 = vpack.c.bf16 %v5265_v62, %v5263_v13  ;;  %v5297_v12 = vld [vmem:[#allocation19 + $0x998] sm:$0xff]  ;;  %v9645_v37 = vpack.c.bf16 %v5292_v3, %v5290_v63  ;;  %v5294_v62 = vld [vmem:[#allocation19 + $0x980] sm:$0xff] }
 0xede   : > { %9600 = vmatprep.subr.bf16.mxu0 %v9599_v17  ;;  %v5267_v17 = vld [vmem:[#allocation19 + $0x8a8] sm:$0xff]  ;;  %v5428_v63 = vld [vmem:[#allocation19 + $0xa98] sm:$0xff] }
 0xedf   : > { %v9619_v22 = vpack.c.bf16 %v5269_v18, %v5267_v17  ;;  %v5298_v17 = vld [vmem:[#allocation19 + $0x9a0] sm:$0xff]  ;;  %v5300_v18 = vld [vmem:[#allocation19 + $0x9b0] sm:$0xff] }
 0xee0   : > { %9458 = vmatpush1.bf16.msra.mxu1 %v9457_v10  ;;  %5231 = vmatmul.mubr.f32.vlgmr.msra.gmra.mrb[8].mxu0 %v5160_v43  ;;  %v5270_v10 = vld [vmem:[#allocation19 + $0x8c0] sm:$0xff]  ;;  %v9653_v23 = vpack.c.bf16 %v5300_v18, %v5298_v17  ;;  %v5436_v17 = vld [vmem:[#allocation19 + $0xad8] sm:$0xff] }
 0xee1   : > { %9602 = vmatpush1.bf16.msra.mxu0 %v9601_v26  ;;  %5399 = vmatprep.mubr.f32.mxu0 %v5332_v45  ;;  %v5272_v26 = vld [vmem:[#allocation19 + $0x8d0] sm:$0xff]  ;;  %v5283_v45 = vld [vmem:[#allocation19 + $0x928] sm:$0xff] }
 0xee2   : > { %9460 = vmatprep.subr.bf16.mxu1 %v9459_v32  ;;  %9604 = vmatprep.subr.bf16.mxu0 %v9603_v33  ;;  %v9625_v31 = vpack.c.bf16 %v5272_v26, %v5270_v10  ;;  %v9627_v32 = vpack.c.bf16 %v5277_v0, %v5275_v28  ;;  %v5274_v33 = vld [vmem:[#allocation19 + $0x8e0] sm:$0xff]  ;;  %v9657_v10 = vpack.c.bf16 %v5304_v14, %v5302_v2  ;;  %v5308_v0 = vld [vmem:[#allocation19 + $0x9f0] sm:$0xff]  ;;  %v5440_v2 = vld [vmem:[#allocation19 + $0xaf8] sm:$0xff] }
 0xee3   : > { %v9629_v29 = vpack.c.bf16 %v5276_v34, %v5274_v33  ;;  %v5306_v28 = vld [vmem:[#allocation19 + $0x9e0] sm:$0xff] }
 0xee4   : > { %9462 = vmatpush1.bf16.msra.mxu1 %v9461_v46  ;;  %v5285_v46 = vld [vmem:[#allocation19 + $0x938] sm:$0xff]  ;;  %v9661_v33 = vpack.c.bf16 %v5308_v0, %v5306_v28 }
 0xee5   : > { %9606 = vmatpush1.bf16.msra.mxu0 %v9605_v50  ;;  %9464 = vmatprep.subr.bf16.mxu1 %v9463_v52  ;;  %v9633_v50 = vpack.c.bf16 %v5280_v44, %v5278_v40  ;;  %v9635_v52 = vpack.c.bf16 %v5285_v46, %v5283_v45  ;;  %v10491_v40 = vunpack.i.h.bf16 %v12227_v53  ;;  %v10490_v44 = vunpack.i.l.bf16 %v12227_v53  ;;  %v5444_v28 = vld [vmem:[#allocation19 + $0xb18] sm:$0xff] }
 0xee6   : > { %9608 = vmatprep.subr.bf16.mxu0 %v9607_v55  ;;  %v5289_v55 = vld [vmem:[#allocation19 + $0x958] sm:$0xff] }
 0xee7   : > { %v9639_v57 = vpack.c.bf16 %v5289_v55, %v5287_v47  ;;  %v5420_v47 = vld [vmem:[#allocation19 + $0xa58] sm:$0xff]  ;;  %v5480_v55 = vsel %vm4622_vm2, %v10490_v44, %v10491_v40  ;;  %v5447_v40 = vld [vmem:[#allocation19 + $0xb30] sm:$0xff] }
 0xee8   : > { %9466 = vmatpush1.bf16.msra.mxu1 %v9465_v60  ;;  %v5293_v60 = vld [vmem:[#allocation19 + $0x978] sm:$0xff] }
 0xee9   : > { %9610 = vmatpush1.bf16.msra.mxu0 %v9609_v42  ;;  %9468 = vmatprep.subr.bf16.mxu1 %v9467_v61  ;;  %v9641_v42 = vpack.c.bf16 %v5288_v49, %v5286_v35  ;;  %v9643_v61 = vpack.c.bf16 %v5293_v60, %v5291_v59  ;;  %v5417_v35 = vld [vmem:[#allocation19 + $0xa40] sm:$0xff]  ;;  %v5419_v49 = vld [vmem:[#allocation19 + $0xa50] sm:$0xff]  ;;  %v5422_v59 = vld [vmem:[#allocation19 + $0xa68] sm:$0xff] }
 0xeea   : > { %9612 = vmatprep.subr.bf16.mxu0 %v9611_v54  ;;  %v5295_v54 = vld [vmem:[#allocation19 + $0x988] sm:$0xff]  ;;  %v5424_v60 = vld [vmem:[#allocation19 + $0xa78] sm:$0xff]  ;;  %v9673_v58 = vpack.c.bf16 %v5419_v49, %v5417_v35  ;;  %v5453_v35 = vld [vmem:[#allocation19 + $0xb60] sm:$0xff] }
 0xeeb   : > { %v9647_v13 = vpack.c.bf16 %v5297_v12, %v5295_v54  ;;  %v9675_v8 = vpack.c.bf16 %v5424_v60, %v5422_v59  ;;  %v5425_v12 = vld [vmem:[#allocation19 + $0xa80] sm:$0xff]  ;;  %v5455_v49 = vld [vmem:[#allocation19 + $0xb70] sm:$0xff]  ;;  %v5458_v59 = vld [vmem:[#allocation19 + $0xb88] sm:$0xff] }
 0xeec   : > { %9470 = vmatpush1.bf16.msra.mxu1 %v9469_v19  ;;  %v5296_v19 = vld [vmem:[#allocation19 + $0x990] sm:$0xff]  ;;  %v5460_v60 = vld [vmem:[#allocation19 + $0xb98] sm:$0xff] }
 0xeed   : > { %9614 = vmatpush1.bf16.msra.mxu0 %v9613_v15  ;;  %9919 = vmatprep.subr.bf16.mxu1 %v11207_v5  ;;  %v5299_v15 = vld [vmem:[#allocation19 + $0x9a8] sm:$0xff]  ;;  %v9649_v6 = vpack.c.bf16 %v5296_v19, %v5294_v62  ;;  %v5432_v62 = vld [vmem:[#allocation19 + $0xab8] sm:$0xff] }
 0xeee   : > { %9616 = vmatprep.subr.bf16.mxu0 %v9615_v16  ;;  %v5301_v16 = vld [vmem:[#allocation19 + $0x9b8] sm:$0xff] }
 0xeef   : > { %4931 = vmatmul.mubr.f32.vlgmr.msra.gmra.mrb[2].mxu1 %v12194_v48  ;;  %v5279_v48 = vld [vmem:[#allocation19 + $0x908] sm:$0xff]  ;;  %v9651_v9 = vpack.c.bf16 %v5301_v16, %v5299_v15  ;;  %v5429_v16 = vld [vmem:[#allocation19 + $0xaa0] sm:$0xff] }
 0xef0   : > { %7970 = vmatprep.mubr.msk.f32.mxu1 %vm11206_vm0, %v11980_v1  ;;  %v9631_v43 = vpack.c.bf16 %v5281_v36, %v5279_v48  ;;  %v5409_v48 = vld [vmem:[#allocation19 + $0xa00] sm:$0xff]  ;;  %v5411_v36 = vld [vmem:[#allocation19 + $0xa10] sm:$0xff] }
 0xef1   : > { %9618 = vmatpush1.bf16.msra.mxu0 %v9617_v21  ;;  %v5303_v21 = vld [vmem:[#allocation19 + $0x9c8] sm:$0xff]  ;;  %v9665_v45 = vpack.c.bf16 %v5411_v36, %v5409_v48  ;;  %v5448_v48 = vld [vmem:[#allocation19 + $0xb38] sm:$0xff] }
 0xef2   : > { %9620 = vmatprep.subr.bf16.mxu0 %v9619_v22  ;;  %v5305_v22 = vld [vmem:[#allocation19 + $0x9d8] sm:$0xff] }
 0xef3   : > { %v9655_v24 = vpack.c.bf16 %v5305_v22, %v5303_v21  ;;  %v5433_v22 = vld [vmem:[#allocation19 + $0xac0] sm:$0xff] }
 0xef5   : > { %9622 = vmatpush1.bf16.msra.mxu0 %v9621_v27  ;;  %v5307_v27 = vld [vmem:[#allocation19 + $0x9e8] sm:$0xff] }
 0xef6   : > { %9624 = vmatprep.subr.bf16.mxu0 %v9623_v25  ;;  %v5309_v25 = vld [vmem:[#allocation19 + $0x9f8] sm:$0xff] }
 0xef7   : > { %v9659_v26 = vpack.c.bf16 %v5309_v25, %v5307_v27  ;;  %v5437_v25 = vld [vmem:[#allocation19 + $0xae0] sm:$0xff] }
 0xef9   : > { %9626 = vmatpush1.bf16.msra.mxu0 %v9625_v31  ;;  %v5410_v31 = vld [vmem:[#allocation19 + $0xa08] sm:$0xff] }
 0xefa   : > { %9628 = vmatprep.subr.bf16.mxu0 %v9627_v32  ;;  %v5412_v32 = vld [vmem:[#allocation19 + $0xa18] sm:$0xff] }
 0xefb   : > { %v9663_v34 = vpack.c.bf16 %v5412_v32, %v5410_v31  ;;  %v5441_v32 = vld [vmem:[#allocation19 + $0xb00] sm:$0xff] }
 0xefd   : > { %9630 = vmatpush1.bf16.msra.mxu0 %v9629_v29  ;;  %v5414_v29 = vld [vmem:[#allocation19 + $0xa28] sm:$0xff] }
 0xefe   : > { %9632 = vmatprep.subr.bf16.mxu0 %v9631_v43  ;;  %v5416_v43 = vld [vmem:[#allocation19 + $0xa38] sm:$0xff] }
 0xeff   : > { %v9667_v46 = vpack.c.bf16 %v5416_v43, %v5414_v29  ;;  %v5445_v43 = vld [vmem:[#allocation19 + $0xb20] sm:$0xff] }
 0xf01   : > { %9634 = vmatpush1.bf16.msra.mxu0 %v9633_v50  ;;  %v5413_v50 = vld [vmem:[#allocation19 + $0xa20] sm:$0xff] }
 0xf02   : > { %9636 = vmatprep.subr.bf16.mxu0 %v9635_v52  ;;  %v5415_v52 = vld [vmem:[#allocation19 + $0xa30] sm:$0xff] }
 0xf05   : > { %9638 = vmatpush1.bf16.msra.mxu0 %v9637_v56  ;;  %v9669_v56 = vpack.c.bf16 %v5415_v52, %v5413_v50  ;;  %v9701_v50 = vpack.c.bf16 %v5447_v40, %v5445_v43  ;;  %v5479_v43 = vsel %vm4622_vm2, %v12225_v7, %v10490_v44  ;;  %v5570_v40 = vld [vmem:[#allocation19 + $0xc48] sm:$0xff]  ;;  %v5575_v7 = vld [vmem:[#allocation19 + $0xc70] sm:$0xff] }
 0xf06   : > { %9640 = vmatprep.subr.bf16.mxu0 %v9639_v57  ;;  %v9671_v57 = vpack.c.bf16 %v5420_v47, %v5418_v39  ;;  %v5451_v39 = vld [vmem:[#allocation19 + $0xb50] sm:$0xff]  ;;  %v5454_v47 = vld [vmem:[#allocation19 + $0xb68] sm:$0xff] }
 0xf07   : > { %v5578_v44 = vld [vmem:[#allocation19 + $0xc88] sm:$0xff] }
 0xf09   : > { %9642 = vmatpush1.bf16.msra.mxu0 %v9641_v42  ;;  %v5423_v42 = vld [vmem:[#allocation19 + $0xa70] sm:$0xff] }
 0xf0a   : > { %9644 = vmatprep.subr.bf16.mxu0 %v9643_v61  ;;  %v5426_v61 = vld [vmem:[#allocation19 + $0xa88] sm:$0xff]  ;;  %v9677_v3 = vpack.c.bf16 %v5423_v42, %v5421_v20  ;;  %v5457_v20 = vld [vmem:[#allocation19 + $0xb80] sm:$0xff]  ;;  %v5459_v42 = vld [vmem:[#allocation19 + $0xb90] sm:$0xff] }
 0xf0b   : > { %v9679_v54 = vpack.c.bf16 %v5428_v63, %v5426_v61  ;;  %v5462_v61 = vld [vmem:[#allocation19 + $0xba8] sm:$0xff]  ;;  %v5464_v63 = vld [vmem:[#allocation19 + $0xbb8] sm:$0xff] }
 0xf0d   : > { %9646 = vmatpush1.bf16.msra.mxu0 %v9645_v37  ;;  %v5427_v37 = vld [vmem:[#allocation19 + $0xa90] sm:$0xff] }
 0xf0e   : > { %9648 = vmatprep.subr.bf16.mxu0 %v9647_v13  ;;  %v5430_v13 = vld [vmem:[#allocation19 + $0xaa8] sm:$0xff]  ;;  %v9681_v19 = vpack.c.bf16 %v5427_v37, %v5425_v12  ;;  %v5461_v12 = vld [vmem:[#allocation19 + $0xba0] sm:$0xff]  ;;  %v5463_v37 = vld [vmem:[#allocation19 + $0xbb0] sm:$0xff] }
 0xf0f   : > { %v9683_v15 = vpack.c.bf16 %v5432_v62, %v5430_v13  ;;  %v5466_v13 = vld [vmem:[#allocation19 + $0xbc8] sm:$0xff]  ;;  %v5468_v62 = vld [vmem:[#allocation19 + $0xbd8] sm:$0xff] }
 0xf11   : > { %9650 = vmatpush1.bf16.msra.mxu0 %v9649_v6  ;;  %v5431_v6 = vld [vmem:[#allocation19 + $0xab0] sm:$0xff] }
 0xf12   : > { %9652 = vmatprep.subr.bf16.mxu0 %v9651_v9  ;;  %v5434_v9 = vld [vmem:[#allocation19 + $0xac8] sm:$0xff]  ;;  %v9685_v18 = vpack.c.bf16 %v5431_v6, %v5429_v16  ;;  %v5465_v16 = vld [vmem:[#allocation19 + $0xbc0] sm:$0xff]  ;;  %v5467_v6 = vld [vmem:[#allocation19 + $0xbd0] sm:$0xff] }
 0xf13   : > { %v9687_v21 = vpack.c.bf16 %v5436_v17, %v5434_v9  ;;  %v5470_v9 = vld [vmem:[#allocation19 + $0xbe8] sm:$0xff]  ;;  %v5472_v17 = vld [vmem:[#allocation19 + $0xbf8] sm:$0xff] }
 0xf15   : > { %9654 = vmatpush1.bf16.msra.mxu0 %v9653_v23  ;;  %v5435_v23 = vld [vmem:[#allocation19 + $0xad0] sm:$0xff] }
 0xf16   : > { %9656 = vmatprep.subr.bf16.mxu0 %v9655_v24  ;;  %v5438_v24 = vld [vmem:[#allocation19 + $0xae8] sm:$0xff]  ;;  %v9689_v14 = vpack.c.bf16 %v5435_v23, %v5433_v22  ;;  %v5469_v22 = vld [vmem:[#allocation19 + $0xbe0] sm:$0xff]  ;;  %v5471_v23 = vld [vmem:[#allocation19 + $0xbf0] sm:$0xff] }
 0xf17   : > { %v9691_v27 = vpack.c.bf16 %v5440_v2, %v5438_v24  ;;  %v5562_v24 = vld [vmem:[#allocation19 + $0xc08] sm:$0xff]  ;;  %v5564_v2 = vld [vmem:[#allocation19 + $0xc18] sm:$0xff] }
 0xf19   : > { %9658 = vmatpush1.bf16.msra.mxu0 %v9657_v10  ;;  %v5439_v10 = vld [vmem:[#allocation19 + $0xaf0] sm:$0xff] }
 0xf1a   : > { %9660 = vmatprep.subr.bf16.mxu0 %v9659_v26  ;;  %v5442_v26 = vld [vmem:[#allocation19 + $0xb08] sm:$0xff]  ;;  %v9693_v0 = vpack.c.bf16 %v5439_v10, %v5437_v25  ;;  %v5559_v25 = vld [vmem:[#allocation2 + $0x20] sm:$0x3]  ;;  %v9727_v10 = vpack.c.bf16 %v5564_v2, %v5562_v24 }
 0xf1b   : > { %v9695_v31 = vpack.c.bf16 %v5444_v28, %v5442_v26  ;;  %v5561_v26 = vld [vmem:[#allocation19 + $0xc00] sm:$0xff]  ;;  %v5563_v28 = vld [vmem:[#allocation19 + $0xc10] sm:$0xff] }
 0xf1c   : > { %v5593_v2 = vld [vmem:[#allocation19 + $0xd00] sm:$0xff] }
 0xf1d   : > { %9662 = vmatpush1.bf16.msra.mxu0 %v9661_v33  ;;  %v5443_v33 = vld [vmem:[#allocation19 + $0xb10] sm:$0xff] }
 0xf1e   : > { %9664 = vmatprep.subr.bf16.mxu0 %v9663_v34  ;;  %v5446_v34 = vld [vmem:[#allocation19 + $0xb28] sm:$0xff]  ;;  %v9697_v36 = vpack.c.bf16 %v5443_v33, %v5441_v32  ;;  %v5633_v33 = vrot.slane %v5559_v25, 2  ;;  %v5600_v25 = vld [vmem:[#allocation19 + $0xd38] sm:$0xff] }
 0xf1f   : > { %v9699_v29 = vpack.c.bf16 %v5448_v48, %v5446_v34  ;;  %v9729_v34 = vpack.c.bf16 %v5563_v28, %v5561_v26  ;;  %v5597_v28 = vld [vmem:[#allocation19 + $0xd20] sm:$0xff] }
 0xf20   : > { %5400 = vmatmul.mubr.f32.vlgmr.msra.gmra.mrb[8].mxu0 %v5331_v38  ;;  %v5449_v38 = vld [vmem:[#allocation19 + $0xb40] sm:$0xff] }
 0xf21   : > { %9666 = vmatpush1.bf16.msra.mxu0 %v9665_v45  ;;  %5547 = vmatprep.mubr.f32.mxu0 %v5480_v55  ;;  %v5450_v45 = vld [vmem:[#allocation19 + $0xb48] sm:$0xff]  ;;  %v5456_v55 = vld [vmem:[#allocation19 + $0xb78] sm:$0xff] }
 0xf22   : > { %9668 = vmatprep.subr.bf16.mxu0 %v9667_v46  ;;  %v5452_v46 = vld [vmem:[#allocation19 + $0xb58] sm:$0xff] }
 0xf23   : > { %v9703_v52 = vpack.c.bf16 %v5452_v46, %v5450_v45  ;;  %v5572_v45 = vld [vmem:[#allocation19 + $0xc58] sm:$0xff] }
 0xf25   : > { %9670 = vmatpush1.bf16.msra.mxu0 %v9669_v56  ;;  %v9705_v56 = vpack.c.bf16 %v5451_v39, %v5449_v38  ;;  %v5569_v38 = vld [vmem:[#allocation19 + $0xc40] sm:$0xff]  ;;  %v5571_v39 = vld [vmem:[#allocation19 + $0xc50] sm:$0xff] }
 0xf26   : > { %9672 = vmatprep.subr.bf16.mxu0 %v9671_v57  ;;  %v9707_v57 = vpack.c.bf16 %v5456_v55, %v5454_v47  ;;  %v5574_v47 = vld [vmem:[#allocation19 + $0xc68] sm:$0xff]  ;;  %v5576_v55 = vld [vmem:[#allocation19 + $0xc78] sm:$0xff] }
 0xf27   : > { %v9739_v53 = vpack.c.bf16 %v5576_v55, %v5574_v47  ;;  %v5609_v55 = vld [vmem:[#allocation19 + $0xd80] sm:$0xff] }
 0xf29   : > { %9674 = vmatpush1.bf16.msra.mxu0 %v9673_v58  ;;  %v9709_v58 = vpack.c.bf16 %v5455_v49, %v5453_v35  ;;  %v5580_v35 = vld [vmem:[#allocation19 + $0xc98] sm:$0xff] }
 0xf2a   : > { %9676 = vmatprep.subr.bf16.mxu0 %v9675_v8  ;;  %v9711_v8 = vpack.c.bf16 %v5460_v60, %v5458_v59  ;;  %v9743_v59 = vpack.c.bf16 %v5580_v35, %v5578_v44  ;;  %v5577_v60 = vld [vmem:[#allocation19 + $0xc80] sm:$0xff] }
 0xf2b   : > { %v5613_v35 = vld [vmem:[#allocation19 + $0xda0] sm:$0xff] }
 0xf2d   : > { %9678 = vmatpush1.bf16.msra.mxu0 %v9677_v3  ;;  %v9713_v3 = vpack.c.bf16 %v5459_v42, %v5457_v20  ;;  %v5584_v20 = vld [vmem:[#allocation19 + $0xcb8] sm:$0xff] }
 0xf2e   : > { %9680 = vmatprep.subr.bf16.mxu0 %v9679_v54  ;;  %v9715_v54 = vpack.c.bf16 %v5464_v63, %v5462_v61  ;;  %v5581_v63 = vld [vmem:[#allocation19 + $0xca0] sm:$0xff] }
 0xf31   : > { %9682 = vmatpush1.bf16.msra.mxu0 %v9681_v19  ;;  %v9717_v19 = vpack.c.bf16 %v5463_v37, %v5461_v12  ;;  %v5588_v12 = vld [vmem:[#allocation19 + $0xcd8] sm:$0xff] }
 0xf32   : > { %9684 = vmatprep.subr.bf16.mxu0 %v9683_v15  ;;  %v9719_v15 = vpack.c.bf16 %v5468_v62, %v5466_v13  ;;  %v5585_v62 = vld [vmem:[#allocation19 + $0xcc0] sm:$0xff] }
 0xf35   : > { %9686 = vmatpush1.bf16.msra.mxu0 %v9685_v18  ;;  %v9721_v18 = vpack.c.bf16 %v5467_v6, %v5465_v16  ;;  %v5592_v16 = vld [vmem:[#allocation19 + $0xcf8] sm:$0xff] }
 0xf36   : > { %9688 = vmatprep.subr.bf16.mxu0 %v9687_v21  ;;  %v9723_v21 = vpack.c.bf16 %v5472_v17, %v5470_v9  ;;  %v5589_v17 = vld [vmem:[#allocation19 + $0xce0] sm:$0xff] }
 0xf39   : > { %9690 = vmatpush1.bf16.msra.mxu0 %v9689_v14  ;;  %v9725_v14 = vpack.c.bf16 %v5471_v23, %v5469_v22  ;;  %v5596_v22 = vld [vmem:[#allocation19 + $0xd18] sm:$0xff] }
 0xf3a   : > { %9692 = vmatprep.subr.bf16.mxu0 %v9691_v27  ;;  %v5557_v27 = vld [vmem:[#allocation2 + $0x8] sm:$0xfc] }
 0xf3b   : > { %v5632_v32 = vrot.slane %v5557_v27, 2  ;;  %v5598_v27 = vld [vmem:[#allocation19 + $0xd28] sm:$0xff] }
 0xf3c   : > { %v9763_v26 = vpack.c.bf16 %v5600_v25, %v5598_v27  ;;  %v5721_v27 = vld [vmem:[#allocation19 + $0xe20] sm:$0xff]  ;;  %v5723_v25 = vld [vmem:[#allocation19 + $0xe30] sm:$0xff] }
 0xf3d   : > { %9694 = vmatpush1.bf16.msra.mxu0 %v9693_v0  ;;  %v5566_v0 = vld [vmem:[#allocation19 + $0xc28] sm:$0xff]  ;;  %v5634_v46 = vsel %vm1737_vm9, %v5632_v32, %v5633_v33  ;;  %v5604_v32 = vld [vmem:[#allocation19 + $0xd58] sm:$0xff] }
 0xf3e   : > { %9696 = vmatprep.subr.bf16.mxu0 %v9695_v31  ;;  %v5568_v31 = vld [vmem:[#allocation19 + $0xc38] sm:$0xff] }
 0xf3f   : > { %v9731_v48 = vpack.c.bf16 %v5568_v31, %v5566_v0  ;;  %v5599_v0 = vld [vmem:[#allocation19 + $0xd30] sm:$0xff]  ;;  %v5602_v31 = vld [vmem:[#allocation19 + $0xd48] sm:$0xff] }
 0xf40   : > { %v9765_v33 = vpack.c.bf16 %v5599_v0, %v5597_v28  ;;  %v5728_v28 = vld [vmem:[#allocation19 + $0xe58] sm:$0xff] }
 0xf41   : > { %9698 = vmatpush1.bf16.msra.mxu0 %v9697_v36  ;;  %v5565_v36 = vld [vmem:[#allocation19 + $0xc20] sm:$0xff] }
 0xf42   : > { %9700 = vmatprep.subr.bf16.mxu0 %v9699_v29  ;;  %v5567_v29 = vld [vmem:[#allocation19 + $0xc30] sm:$0xff] }
 0xf45   : > { %9702 = vmatpush1.bf16.msra.mxu0 %v9701_v50  ;;  %v9733_v50 = vpack.c.bf16 %v5567_v29, %v5565_v36  ;;  %v5603_v36 = vld [vmem:[#allocation19 + $0xd50] sm:$0xff]  ;;  %v5606_v29 = vld [vmem:[#allocation19 + $0xd68] sm:$0xff] }
 0xf46   : > { %9704 = vmatprep.subr.bf16.mxu0 %v9703_v52  ;;  %v9735_v52 = vpack.c.bf16 %v5572_v45, %v5570_v40 }
 0xf49   : > { %9706 = vmatpush1.bf16.msra.mxu0 %v9705_v56  ;;  %v9737_v56 = vpack.c.bf16 %v5571_v39, %v5569_v38  ;;  %v5612_v38 = vld [vmem:[#allocation19 + $0xd98] sm:$0xff] }
 0xf4a   : > { %9708 = vmatprep.subr.bf16.mxu0 %v9707_v57  ;;  %v5573_v57 = vld [vmem:[#allocation19 + $0xc60] sm:$0xff] }
 0xf4b   : > { %v9741_v49 = vpack.c.bf16 %v5575_v7, %v5573_v57  ;;  %v5616_v57 = vld [vmem:[#allocation19 + $0xdb8] sm:$0xff] }
 0xf4d   : > { %9710 = vmatpush1.bf16.msra.mxu0 %v9709_v58  ;;  %v5579_v58 = vld [vmem:[#allocation19 + $0xc90] sm:$0xff] }
 0xf4e   : > { %9712 = vmatprep.subr.bf16.mxu0 %v9711_v8  ;;  %v5582_v8 = vld [vmem:[#allocation19 + $0xca8] sm:$0xff]  ;;  %v9745_v42 = vpack.c.bf16 %v5579_v58, %v5577_v60  ;;  %v5620_v60 = vld [vmem:[#allocation19 + $0xdd8] sm:$0xff] }
 0xf4f   : > { %v9747_v61 = vpack.c.bf16 %v5584_v20, %v5582_v8  ;;  %v5617_v20 = vld [vmem:[#allocation19 + $0xdc0] sm:$0xff] }
 0xf51   : > { %9714 = vmatpush1.bf16.msra.mxu0 %v9713_v3  ;;  %v5583_v3 = vld [vmem:[#allocation19 + $0xcb0] sm:$0xff] }
 0xf52   : > { %9716 = vmatprep.subr.bf16.mxu0 %v9715_v54  ;;  %v5586_v54 = vld [vmem:[#allocation19 + $0xcc8] sm:$0xff]  ;;  %v9749_v37 = vpack.c.bf16 %v5583_v3, %v5581_v63  ;;  %v5624_v63 = vld [vmem:[#allocation19 + $0xdf8] sm:$0xff] }
 0xf53   : > { %v9751_v13 = vpack.c.bf16 %v5588_v12, %v5586_v54  ;;  %v5621_v12 = vld [vmem:[#allocation19 + $0xde0] sm:$0xff] }
 0xf55   : > { %9718 = vmatpush1.bf16.msra.mxu0 %v9717_v19  ;;  %v5587_v19 = vld [vmem:[#allocation19 + $0xcd0] sm:$0xff] }
 0xf56   : > { %9720 = vmatprep.subr.bf16.mxu0 %v9719_v15  ;;  %v5590_v15 = vld [vmem:[#allocation19 + $0xce8] sm:$0xff]  ;;  %v9753_v6 = vpack.c.bf16 %v5587_v19, %v5585_v62  ;;  %v5720_v62 = vld [vmem:[#allocation19 + $0xe18] sm:$0xff]  ;;  %v5556_v19 = vld [vmem:[#allocation2] sm:$0xfc] }
 0xf57   : > { %v9755_v9 = vpack.c.bf16 %v5592_v16, %v5590_v15  ;;  %v5558_v15 = vld [vmem:[#allocation2 + $0x18] sm:$0x3] }
 0xf59   : > { %9722 = vmatpush1.bf16.msra.mxu0 %v9721_v18  ;;  %v5591_v18 = vld [vmem:[#allocation19 + $0xcf0] sm:$0xff] }
 0xf5a   : > { %9724 = vmatprep.subr.bf16.mxu0 %v9723_v21  ;;  %v5594_v21 = vld [vmem:[#allocation19 + $0xd08] sm:$0xff]  ;;  %v9757_v23 = vpack.c.bf16 %v5591_v18, %v5589_v17  ;;  %v5719_v17 = vld [vmem:[#allocation19 + $0xe10] sm:$0xff]  ;;  %v5629_v18 = vrot.slane %v5556_v19, 2 }
 0xf5b   : > { %v9759_v24 = vpack.c.bf16 %v5596_v22, %v5594_v21  ;;  %v5630_v21 = vrot.slane %v5558_v15, 2  ;;  %v5722_v22 = vld [vmem:[#allocation19 + $0xe28] sm:$0xff]  ;;  %v5756_v15 = vld [vmem:[#allocation19 + $0xf38] sm:$0xff] }
 0xf5c   : > { %v5754_v19 = vld [vmem:[#allocation19 + $0xf28] sm:$0xff] }
 0xf5d   : > { %9726 = vmatpush1.bf16.msra.mxu0 %v9725_v14  ;;  %v5595_v14 = vld [vmem:[#allocation19 + $0xd10] sm:$0xff] }
 0xf5e   : > { %9728 = vmatprep.subr.bf16.mxu0 %v9727_v10  ;;  %v9761_v10 = vpack.c.bf16 %v5595_v14, %v5593_v2 }
 0xf60   : > { %5548 = vmatmul.mubr.f32.vlgmr.msra.gmra.mrb[8].mxu0 %v5479_v43  ;;  %v5608_v43 = vld [vmem:[#allocation19 + $0xd78] sm:$0xff] }
 0xf61   : > { %9730 = vmatpush1.bf16.msra.mxu0 %v9729_v34  ;;  %5701 = vmatprep.mubr.f32.mxu0 %v5634_v46  ;;  %v9767_v34 = vpack.c.bf16 %v5604_v32, %v5602_v31  ;;  %v9771_v45 = vpack.c.bf16 %v5608_v43, %v5606_v29  ;;  %v5605_v46 = vld [vmem:[#allocation19 + $0xd60] sm:$0xff]  ;;  %v9797_v31 = vpack.c.bf16 %v5723_v25, %v5721_v27  ;;  %v5762_v25 = vld [vmem:[#allocation19 + $0xf68] sm:$0xff] }
 0xf62   : > { %9732 = vmatprep.subr.bf16.mxu0 %v9731_v48  ;;  %v5601_v48 = vld [vmem:[#allocation19 + $0xd40] sm:$0xff] }
 0xf63   : > { %v9769_v40 = vpack.c.bf16 %v5603_v36, %v5601_v48  ;;  %v5730_v48 = vld [vmem:[#allocation19 + $0xe68] sm:$0xff]  ;;  %v5732_v36 = vld [vmem:[#allocation19 + $0xe78] sm:$0xff] }
 0xf64   : > { %v9803_v43 = vpack.c.bf16 %v5732_v36, %v5730_v48  ;;  %v5765_v36 = vld [vmem:[#allocation19 + $0xf80] sm:$0xff] }
 0xf65   : > { %9734 = vmatpush1.bf16.msra.mxu0 %v9733_v50  ;;  %v5607_v50 = vld [vmem:[#allocation19 + $0xd70] sm:$0xff] }
 0xf66   : > { %9736 = vmatprep.subr.bf16.mxu0 %v9735_v52  ;;  %v5610_v52 = vld [vmem:[#allocation19 + $0xd88] sm:$0xff]  ;;  %v9773_v39 = vpack.c.bf16 %v5607_v50, %v5605_v46  ;;  %v5736_v50 = vld [vmem:[#allocation19 + $0xe98] sm:$0xff] }
 0xf67   : > { %v9775_v47 = vpack.c.bf16 %v5612_v38, %v5610_v52  ;;  %v5734_v46 = vld [vmem:[#allocation19 + $0xe88] sm:$0xff]  ;;  %v5733_v52 = vld [vmem:[#allocation19 + $0xe80] sm:$0xff]  ;;  %v5735_v38 = vld [vmem:[#allocation19 + $0xe90] sm:$0xff] }
 0xf69   : > { %9738 = vmatpush1.bf16.msra.mxu0 %v9737_v56  ;;  %v5611_v56 = vld [vmem:[#allocation19 + $0xd90] sm:$0xff] }
 0xf6a   : > { %9740 = vmatprep.subr.bf16.mxu0 %v9739_v53  ;;  %v5614_v53 = vld [vmem:[#allocation19 + $0xda8] sm:$0xff]  ;;  %v9777_v7 = vpack.c.bf16 %v5611_v56, %v5609_v55  ;;  %v9809_v55 = vpack.c.bf16 %v5735_v38, %v5733_v52  ;;  %v5776_v52 = vld [vmem:[#allocation19 + $0xfd8] sm:$0xff] }
 0xf6b   : > { %v9779_v44 = vpack.c.bf16 %v5616_v57, %v5614_v53  ;;  %v5737_v53 = vld [vmem:[#allocation19 + $0xea0] sm:$0xff]  ;;  %v5739_v57 = vld [vmem:[#allocation19 + $0xeb0] sm:$0xff] }
 0xf6d   : > { %9742 = vmatpush1.bf16.msra.mxu0 %v9741_v49  ;;  %v5615_v49 = vld [vmem:[#allocation19 + $0xdb0] sm:$0xff] }
 0xf6e   : > { %9744 = vmatprep.subr.bf16.mxu0 %v9743_v59  ;;  %v5618_v59 = vld [vmem:[#allocation19 + $0xdc8] sm:$0xff]  ;;  %v9781_v58 = vpack.c.bf16 %v5615_v49, %v5613_v35  ;;  %v9813_v35 = vpack.c.bf16 %v5739_v57, %v5737_v53  ;;  %v5780_v53 = vld [vmem:[#allocation19 + $0xff8] sm:$0xff] }
 0xf6f   : > { %v9783_v8 = vpack.c.bf16 %v5620_v60, %v5618_v59  ;;  %v5741_v59 = vld [vmem:[#allocation19 + $0xec0] sm:$0xff]  ;;  %v5743_v60 = vld [vmem:[#allocation19 + $0xed0] sm:$0xff] }
 0xf71   : > { %9746 = vmatpush1.bf16.msra.mxu0 %v9745_v42  ;;  %v5619_v42 = vld [vmem:[#allocation19 + $0xdd0] sm:$0xff] }
 0xf72   : > { %9748 = vmatprep.subr.bf16.mxu0 %v9747_v61  ;;  %v5622_v61 = vld [vmem:[#allocation19 + $0xde8] sm:$0xff]  ;;  %v9785_v3 = vpack.c.bf16 %v5619_v42, %v5617_v20  ;;  %v9817_v20 = vpack.c.bf16 %v5743_v60, %v5741_v59  ;;  %v5883_v59 = vld [vmem:[#allocation19 + $0x1018] sm:$0xff]  ;;  %v12273_v60 = vpop.permute.xlu1 %10508 }
 0xf73   : > { %v9787_v54 = vpack.c.bf16 %v5624_v63, %v5622_v61  ;;  %v5745_v61 = vld [vmem:[#allocation19 + $0xee0] sm:$0xff]  ;;  %v5747_v63 = vld [vmem:[#allocation19 + $0xef0] sm:$0xff] }
 0xf75   : > { %9750 = vmatpush1.bf16.msra.mxu0 %v9749_v37  ;;  %v5623_v37 = vld [vmem:[#allocation19 + $0xdf0] sm:$0xff] }
 0xf76   : > { %9752 = vmatprep.subr.bf16.mxu0 %v9751_v13  ;;  %v5718_v13 = vld [vmem:[#allocation19 + $0xe08] sm:$0xff]  ;;  %v9789_v16 = vpack.c.bf16 %v5623_v37, %v5621_v12  ;;  %v9821_v12 = vpack.c.bf16 %v5747_v63, %v5745_v61  ;;  %v5887_v63 = vld [vmem:[#allocation19 + $0x1038] sm:$0xff] }
 0xf77   : > { %v5885_v61 = vld [vmem:[#allocation19 + $0x1028] sm:$0xff] }
 0xf79   : > { %9754 = vmatpush1.bf16.msra.mxu0 %v9753_v6  ;;  %v9791_v6 = vpack.c.bf16 %v5720_v62, %v5718_v13  ;;  %v5749_v13 = vld [vmem:[#allocation19 + $0xf00] sm:$0xff]  ;;  %v5751_v62 = vld [vmem:[#allocation19 + $0xf10] sm:$0xff] }
 0xf7a   : > { %9756 = vmatprep.subr.bf16.mxu0 %v9755_v9  ;;  %v5717_v9 = vld [vmem:[#allocation19 + $0xe00] sm:$0xff] }
 0xf7b   : > { %v9793_v2 = vpack.c.bf16 %v5719_v17, %v5717_v9  ;;  %v5753_v9 = vld [vmem:[#allocation19 + $0xf20] sm:$0xff]  ;;  %v5755_v17 = vld [vmem:[#allocation19 + $0xf30] sm:$0xff] }
 0xf7d   : > { %9758 = vmatpush1.bf16.msra.mxu0 %v9757_v23  ;;  %v5724_v23 = vld [vmem:[#allocation19 + $0xe38] sm:$0xff] }
 0xf7e   : > { %9760 = vmatprep.subr.bf16.mxu0 %v9759_v24  ;;  %v10501_v24 = vunpack.i.h.bf16 %v12229_v41  ;;  %v9795_v14 = vpack.c.bf16 %v5724_v23, %v5722_v22  ;;  %v9829_v22 = vpack.c.bf16 %v5755_v17, %v5753_v9  ;;  %v5888_v17 = vld [vmem:[#allocation19 + $0x1040] sm:$0xff] }
 0xf80   : > { %v5803_v0 = vsel %vm1147_vm10, %v10500_v30, %v10501_v24  ;;  %v9807_v30 = vpack.c.bf16 %v5736_v50, %v5734_v46  ;;  %v5769_v50 = vld [vmem:[#allocation19 + $0xfa0] sm:$0xff]  ;;  %vm6063_vm10 = vcmask 523520  }
 0xf81   : > { %9762 = vmatpush1.bf16.msra.mxu0 %v9761_v10  ;;  %v5631_v10 = vsel %vm1737_vm9, %v5629_v18, %v5630_v21  ;;  %v5758_v18 = vld [vmem:[#allocation19 + $0xf48] sm:$0xff]  ;;  %v5760_v21 = vld [vmem:[#allocation19 + $0xf58] sm:$0xff] }
 0xf82   : > { %9764 = vmatprep.subr.bf16.mxu0 %v9763_v26  ;;  %v5726_v26 = vld [vmem:[#allocation19 + $0xe48] sm:$0xff]  ;;  %v9831_v24 = vpack.c.bf16 %v5760_v21, %v5758_v18  ;;  %v5890_v18 = vld [vmem:[#allocation19 + $0x1050] sm:$0xff] }
 0xf83   : > { %v9799_v32 = vpack.c.bf16 %v5728_v28, %v5726_v26  ;;  %v5893_v21 = vld [vmem:[#allocation19 + $0x1068] sm:$0xff] }
 0xf85   : > { %9766 = vmatpush1.bf16.msra.mxu0 %v9765_v33  ;;  %v5725_v33 = vld [vmem:[#allocation19 + $0xe40] sm:$0xff] }
 0xf86   : > { %9768 = vmatprep.subr.bf16.mxu0 %v9767_v34  ;;  %v5727_v34 = vld [vmem:[#allocation19 + $0xe50] sm:$0xff] }
 0xf87   : > { %v9801_v29 = vpack.c.bf16 %v5727_v34, %v5725_v33  ;;  %v5768_v33 = vld [vmem:[#allocation19 + $0xf98] sm:$0xff] }
 0xf89   : > { %9770 = vmatpush1.bf16.msra.mxu0 %v9769_v40  ;;  %v5729_v40 = vld [vmem:[#allocation19 + $0xe60] sm:$0xff] }
 0xf8a   : > { %9772 = vmatprep.subr.bf16.mxu0 %v9771_v45  ;;  %v5731_v45 = vld [vmem:[#allocation19 + $0xe70] sm:$0xff] }
 0xf8b   : > { %v9805_v41 = vpack.c.bf16 %v5731_v45, %v5729_v40  ;;  %v5772_v40 = vld [vmem:[#allocation19 + $0xfb8] sm:$0xff] }
 0xf8d   : > { %9774 = vmatpush1.bf16.msra.mxu0 %v9773_v39  ;;  %v5738_v39 = vld [vmem:[#allocation19 + $0xea8] sm:$0xff] }
 0xf8e   : > { %9776 = vmatprep.subr.bf16.mxu0 %v9775_v47  ;;  %v5740_v47 = vld [vmem:[#allocation19 + $0xeb8] sm:$0xff] }
 0xf8f   : > { %v9811_v56 = vpack.c.bf16 %v5740_v47, %v5738_v39  ;;  %v5773_v47 = vld [vmem:[#allocation19 + $0xfc0] sm:$0xff] }
 0xf91   : > { %9778 = vmatpush1.bf16.msra.mxu0 %v9777_v7  ;;  %v5742_v7 = vld [vmem:[#allocation19 + $0xec8] sm:$0xff] }
 0xf92   : > { %9780 = vmatprep.subr.bf16.mxu0 %v9779_v44  ;;  %v5744_v44 = vld [vmem:[#allocation19 + $0xed8] sm:$0xff] }
 0xf93   : > { %v9815_v49 = vpack.c.bf16 %v5744_v44, %v5742_v7  ;;  %v5777_v44 = vld [vmem:[#allocation19 + $0xfe0] sm:$0xff] }
 0xf95   : > { %9782 = vmatpush1.bf16.msra.mxu0 %v9781_v58  ;;  %v5746_v58 = vld [vmem:[#allocation19 + $0xee8] sm:$0xff] }
 0xf96   : > { %9784 = vmatprep.subr.bf16.mxu0 %v9783_v8  ;;  %v5748_v8 = vld [vmem:[#allocation19 + $0xef8] sm:$0xff] }
 0xf97   : > { %v9819_v42 = vpack.c.bf16 %v5748_v8, %v5746_v58 }
 0xf99   : > { %9786 = vmatpush1.bf16.msra.mxu0 %v9785_v3  ;;  %v5750_v3 = vld [vmem:[#allocation19 + $0xf08] sm:$0xff] }
 0xf9a   : > { %9788 = vmatprep.subr.bf16.mxu0 %v9787_v54  ;;  %v5752_v54 = vld [vmem:[#allocation19 + $0xf18] sm:$0xff] }
 0xf9b   : > { %v9823_v37 = vpack.c.bf16 %v5752_v54, %v5750_v3  ;;  %v10511_v3 = vunpack.i.h.bf16 %v12273_v60  ;;  %v10510_v54 = vunpack.i.l.bf16 %v12273_v60 }
 0xf9d   : > { %9790 = vmatpush1.bf16.msra.mxu0 %v9789_v16  ;;  %v9825_v16 = vpack.c.bf16 %v5751_v62, %v5749_v13  ;;  %v5884_v13 = vld [vmem:[#allocation19 + $0x1020] sm:$0xff]  ;;  %v5886_v62 = vld [vmem:[#allocation19 + $0x1030] sm:$0xff] }
 0xf9e   : > { %9792 = vmatprep.subr.bf16.mxu0 %v9791_v6  ;;  %v9827_v6 = vpack.c.bf16 %v5756_v15, %v5754_v19  ;;  %v5889_v19 = vld [vmem:[#allocation19 + $0x1048] sm:$0xff]  ;;  %v5891_v15 = vld [vmem:[#allocation19 + $0x1058] sm:$0xff] }
 0xf9f   : > { %v9863_v9 = vpack.c.bf16 %v5891_v15, %v5889_v19  ;;  %v5927_v19 = vld [vmem:[#allocation19 + $0x1178] sm:$0xff] }
 0xfa0   : > { %5702 = vmatmul.mubr.f32.vlgmr.msra.gmra.mrb[8].mxu0 %v5631_v10  ;;  %v5764_v10 = vld [vmem:[#allocation19 + $0xf78] sm:$0xff] }
 0xfa1   : > { %9794 = vmatpush1.bf16.msra.mxu0 %v9793_v2  ;;  %5870 = vmatprep.mubr.f32.mxu0 %v5803_v0  ;;  %v5757_v2 = vld [vmem:[#allocation19 + $0xf40] sm:$0xff]  ;;  %v9835_v28 = vpack.c.bf16 %v5764_v10, %v5762_v25  ;;  %v5894_v25 = vld [vmem:[#allocation19 + $0x1070] sm:$0xff]  ;;  %v5899_v10 = vld [vmem:[#allocation19 + $0x1098] sm:$0xff] }
 0xfa2   : > { %9796 = vmatprep.subr.bf16.mxu0 %v9795_v14  ;;  %v5759_v14 = vld [vmem:[#allocation19 + $0xf50] sm:$0xff]  ;;  %v5761_v0 = vld [vmem:[#allocation19 + $0xf60] sm:$0xff] }
 0xfa3   : > { %v9833_v26 = vpack.c.bf16 %v5759_v14, %v5757_v2  ;;  %v5892_v14 = vld [vmem:[#allocation19 + $0x1060] sm:$0xff] }
 0xfa5   : > { %9798 = vmatpush1.bf16.msra.mxu0 %v9797_v31  ;;  %v5763_v31 = vld [vmem:[#allocation19 + $0xf70] sm:$0xff] }
 0xfa6   : > { %9800 = vmatprep.subr.bf16.mxu0 %v9799_v32  ;;  %v5766_v32 = vld [vmem:[#allocation19 + $0xf88] sm:$0xff]  ;;  %v9837_v34 = vpack.c.bf16 %v5763_v31, %v5761_v0  ;;  %v5896_v0 = vld [vmem:[#allocation19 + $0x1080] sm:$0xff]  ;;  %v5898_v31 = vld [vmem:[#allocation19 + $0x1090] sm:$0xff] }
 0xfa7   : > { %v9839_v48 = vpack.c.bf16 %v5768_v33, %v5766_v32  ;;  %v5901_v32 = vld [vmem:[#allocation19 + $0x10a8] sm:$0xff]  ;;  %v5903_v33 = vld [vmem:[#allocation19 + $0x10b8] sm:$0xff] }
 0xfa9   : > { %9802 = vmatpush1.bf16.msra.mxu0 %v9801_v29  ;;  %v5767_v29 = vld [vmem:[#allocation19 + $0xf90] sm:$0xff] }
 0xfaa   : > { %9804 = vmatprep.subr.bf16.mxu0 %v9803_v43  ;;  %v5770_v43 = vld [vmem:[#allocation19 + $0xfa8] sm:$0xff]  ;;  %v9841_v45 = vpack.c.bf16 %v5767_v29, %v5765_v36  ;;  %v5900_v36 = vld [vmem:[#allocation19 + $0x10a0] sm:$0xff]  ;;  %v5902_v29 = vld [vmem:[#allocation19 + $0x10b0] sm:$0xff] }
 0xfab   : > { %v9843_v46 = vpack.c.bf16 %v5772_v40, %v5770_v43  ;;  %v5905_v43 = vld [vmem:[#allocation19 + $0x10c8] sm:$0xff]  ;;  %v5907_v40 = vld [vmem:[#allocation19 + $0x10d8] sm:$0xff] }
 0xfad   : > { %9806 = vmatpush1.bf16.msra.mxu0 %v9805_v41  ;;  %v5771_v41 = vld [vmem:[#allocation19 + $0xfb0] sm:$0xff] }
 0xfae   : > { %9808 = vmatprep.subr.bf16.mxu0 %v9807_v30  ;;  %v5774_v30 = vld [vmem:[#allocation19 + $0xfc8] sm:$0xff]  ;;  %v9845_v38 = vpack.c.bf16 %v5771_v41, %v5769_v50  ;;  %v5904_v50 = vld [vmem:[#allocation19 + $0x10c0] sm:$0xff]  ;;  %v5906_v41 = vld [vmem:[#allocation19 + $0x10d0] sm:$0xff] }
 0xfaf   : > { %v9847_v39 = vpack.c.bf16 %v5776_v52, %v5774_v30  ;;  %v5909_v30 = vld [vmem:[#allocation19 + $0x10e8] sm:$0xff]  ;;  %v5911_v52 = vld [vmem:[#allocation19 + $0x10f8] sm:$0xff] }
 0xfb1   : > { %9810 = vmatpush1.bf16.msra.mxu0 %v9809_v55  ;;  %v5775_v55 = vld [vmem:[#allocation19 + $0xfd0] sm:$0xff] }
 0xfb2   : > { %9812 = vmatprep.subr.bf16.mxu0 %v9811_v56  ;;  %v5778_v56 = vld [vmem:[#allocation19 + $0xfe8] sm:$0xff]  ;;  %v9849_v57 = vpack.c.bf16 %v5775_v55, %v5773_v47  ;;  %v5908_v47 = vld [vmem:[#allocation19 + $0x10e0] sm:$0xff]  ;;  %v5910_v55 = vld [vmem:[#allocation19 + $0x10f0] sm:$0xff] }
 0xfb3   : > { %v9851_v7 = vpack.c.bf16 %v5780_v53, %v5778_v56  ;;  %v5913_v56 = vld [vmem:[#allocation19 + $0x1108] sm:$0xff]  ;;  %v5915_v53 = vld [vmem:[#allocation19 + $0x1118] sm:$0xff] }
 0xfb5   : > { %9814 = vmatpush1.bf16.msra.mxu0 %v9813_v35  ;;  %v5779_v35 = vld [vmem:[#allocation19 + $0xff0] sm:$0xff] }
 0xfb6   : > { %9816 = vmatprep.subr.bf16.mxu0 %v9815_v49  ;;  %v5881_v49 = vld [vmem:[#allocation19 + $0x1008] sm:$0xff]  ;;  %v9853_v58 = vpack.c.bf16 %v5779_v35, %v5777_v44  ;;  %v5912_v44 = vld [vmem:[#allocation19 + $0x1100] sm:$0xff]  ;;  %v5914_v35 = vld [vmem:[#allocation19 + $0x1110] sm:$0xff] }
 0xfb7   : > { %v9855_v8 = vpack.c.bf16 %v5883_v59, %v5881_v49  ;;  %v5917_v49 = vld [vmem:[#allocation19 + $0x1128] sm:$0xff]  ;;  %v5919_v59 = vld [vmem:[#allocation19 + $0x1138] sm:$0xff] }
 0xfb9   : > { %9818 = vmatpush1.bf16.msra.mxu0 %v9817_v20  ;;  %v5880_v20 = vld [vmem:[#allocation19 + $0x1000] sm:$0xff] }
 0xfba   : > { %9820 = vmatprep.subr.bf16.mxu0 %v9819_v42  ;;  %v5882_v42 = vld [vmem:[#allocation19 + $0x1010] sm:$0xff] }
 0xfbd   : > { %9822 = vmatpush1.bf16.msra.mxu0 %v9821_v12  ;;  %v9857_v12 = vpack.c.bf16 %v5882_v42, %v5880_v20  ;;  %v5916_v20 = vld [vmem:[#allocation19 + $0x1120] sm:$0xff]  ;;  %v5918_v42 = vld [vmem:[#allocation19 + $0x1130] sm:$0xff] }
 0xfbe   : > { %9824 = vmatprep.subr.bf16.mxu0 %v9823_v37  ;;  %v9859_v37 = vpack.c.bf16 %v5887_v63, %v5885_v61  ;;  %v5921_v61 = vld [vmem:[#allocation19 + $0x1148] sm:$0xff]  ;;  %v5923_v63 = vld [vmem:[#allocation19 + $0x1158] sm:$0xff] }
 0xfc1   : > { %9826 = vmatpush1.bf16.msra.mxu0 %v9825_v16  ;;  %v5951_v16 = vsel %vm4622_vm2, %v10510_v54, %v10511_v3  ;;  %v9893_v3 = vpack.c.bf16 %v5918_v42, %v5916_v20 }
 0xfc2   : > { %v12269_v23 = vpop.f32.mrb[2].mxu1  ;;  %9828 = vmatprep.subr.bf16.mxu0 %v9827_v6  ;;  %v9861_v6 = vpack.c.bf16 %v5886_v62, %v5884_v13  ;;  %v5922_v13 = vld [vmem:[#allocation19 + $0x1150] sm:$0xff]  ;;  %v5925_v62 = vld [vmem:[#allocation19 + $0x1168] sm:$0xff] }
 0xfc3   : > { %v12271_v27 = vpop.f32.mrb[3].mxu1 }
 0xfc5   : > { %9830 = vmatpush1.bf16.msra.mxu0 %v9829_v22  ;;  %v5895_v22 = vld [vmem:[#allocation19 + $0x1078] sm:$0xff] }
 0xfc6   : > { %9832 = vmatprep.subr.bf16.mxu0 %v9831_v24  ;;  %v9865_v24 = vpack.c.bf16 %v5890_v18, %v5888_v17  ;;  %v9867_v2 = vpack.c.bf16 %v5895_v22, %v5893_v21  ;;  %v5929_v17 = vld [vmem:[#allocation19 + $0x1188] sm:$0xff]  ;;  %v5931_v18 = vld [vmem:[#allocation19 + $0x1198] sm:$0xff] }
 0xfc7   : > { %v9903_v22 = vpack.c.bf16 %v5931_v18, %v5929_v17 }
 0xfc9   : > { %9834 = vmatpush1.bf16.msra.mxu0 %v9833_v26  ;;  %v9869_v26 = vpack.c.bf16 %v5894_v25, %v5892_v14  ;;  %v5933_v14 = vld [vmem:[#allocation19 + $0x11a8] sm:$0xff]  ;;  %v5935_v25 = vld [vmem:[#allocation19 + $0x11b8] sm:$0xff] }
 0xfca   : > { %9836 = vmatprep.subr.bf16.mxu0 %v9835_v28 }
 0xfcd   : > { %9838 = vmatpush1.bf16.msra.mxu0 %v9837_v34  ;;  %v9873_v34 = vpack.c.bf16 %v5898_v31, %v5896_v0  ;;  %v5937_v0 = vld [vmem:[#allocation19 + $0x11c8] sm:$0xff]  ;;  %v5939_v31 = vld [vmem:[#allocation19 + $0x11d8] sm:$0xff] }
 0xfce   : > { %9840 = vmatprep.subr.bf16.mxu0 %v9839_v48  ;;  %v9875_v48 = vpack.c.bf16 %v5903_v33, %v5901_v32  ;;  %v9911_v33 = vpack.c.bf16 %v5939_v31, %v5937_v0 }
 0xfd1   : > { %9842 = vmatpush1.bf16.msra.mxu0 %v9841_v45  ;;  %v9877_v45 = vpack.c.bf16 %v5902_v29, %v5900_v36  ;;  %v5941_v36 = vld [vmem:[#allocation19 + $0x11e8] sm:$0xff]  ;;  %v5943_v29 = vld [vmem:[#allocation19 + $0x11f8] sm:$0xff] }
 0xfd2   : > { %9844 = vmatprep.subr.bf16.mxu0 %v9843_v46  ;;  %v9879_v46 = vpack.c.bf16 %v5907_v40, %v5905_v43  ;;  %v9915_v40 = vpack.c.bf16 %v5943_v29, %v5941_v36  ;;  %v6101_v36 = vld [vmem:[#allocation22 + $0x18] sm:$0xff] }
 0xfd5   : > { %9846 = vmatpush1.bf16.msra.mxu0 %v9845_v38  ;;  %v9881_v38 = vpack.c.bf16 %v5906_v41, %v5904_v50  ;;  %v5945_v41 = vpop.permute.xlu0 %5944 }
 0xfd6   : > { %9848 = vmatprep.subr.bf16.mxu0 %v9847_v39  ;;  %v9883_v39 = vpack.c.bf16 %v5911_v52, %v5909_v30  ;;  %v5950_v30 = vsel %vm4622_vm2, %v5945_v41, %v10510_v54  ;;  %v6027_v52 = vld [vmem:[#allocation20] sm:$0x3] }
 0xfd7   : > { %v6105_v41 = vld [vmem:[#allocation22 + $0x38] sm:$0xff] }
 0xfd9   : > { %9850 = vmatpush1.bf16.msra.mxu0 %v9849_v57  ;;  %v9885_v57 = vpack.c.bf16 %v5910_v55, %v5908_v47  ;;  %v6036_v47 = vrot.slane %v6027_v52, %v11984_v4 }
 0xfda   : > { %9852 = vmatprep.subr.bf16.mxu0 %v9851_v7  ;;  %v9887_v7 = vpack.c.bf16 %v5915_v53, %v5913_v56 }
 0xfdd   : > { %9854 = vmatpush1.bf16.msra.mxu0 %v9853_v58  ;;  %v9889_v58 = vpack.c.bf16 %v5914_v35, %v5912_v44 }
 0xfde   : > { %9856 = vmatprep.subr.bf16.mxu0 %v9855_v8  ;;  %v9891_v8 = vpack.c.bf16 %v5919_v59, %v5917_v49 }
 0xfe0   : > { %5871 = vmatmul.mubr.f32.vlgmr.msra.gmra.mrb[8].mxu0 %v12237_v51  ;;  %v5897_v51 = vld [vmem:[#allocation19 + $0x1088] sm:$0xff] }
 0xfe1   : > { %9858 = vmatpush1.bf16.msra.mxu0 %v9857_v12  ;;  %6018 = vmatprep.mubr.f32.mxu0 %v5951_v16  ;;  %v9871_v28 = vpack.c.bf16 %v5899_v10, %v5897_v51  ;;  %v9895_v12 = vpack.c.bf16 %v5923_v63, %v5921_v61  ;;  %v9899_v16 = vpack.c.bf16 %v5927_v19, %v5925_v62  ;;  %v6107_v61 = vld [vmem:[#allocation22 + $0x40] sm:$0xff]  ;;  %v6108_v63 = vld [vmem:[#allocation22 + $0x48] sm:$0xff] }
 0xfe2   : > { %9860 = vmatprep.subr.bf16.mxu0 %v9859_v37  ;;  %v5920_v37 = vld [vmem:[#allocation19 + $0x1140] sm:$0xff]  ;;  %v9907_v10 = vpack.c.bf16 %v5935_v25, %v5933_v14  ;;  %v6112_v19 = vld [vmem:[#allocation22 + $0x68] sm:$0xff] }
 0xfe3   : > { %v9897_v15 = vpack.c.bf16 %v5922_v13, %v5920_v37  ;;  %v6110_v37 = vld [vmem:[#allocation22 + $0x58] sm:$0xff]  ;;  %v6111_v62 = vld [vmem:[#allocation22 + $0x60] sm:$0xff] }
 0xfe5   : > { %9862 = vmatpush1.bf16.msra.mxu0 %v9861_v6  ;;  %v5924_v6 = vld [vmem:[#allocation19 + $0x1160] sm:$0xff] }
 0xfe6   : > { %9864 = vmatprep.subr.bf16.mxu0 %v9863_v9  ;;  %v5926_v9 = vld [vmem:[#allocation19 + $0x1170] sm:$0xff] }
 0xfe7   : > { %v9901_v21 = vpack.c.bf16 %v5926_v9, %v5924_v6  ;;  %v6114_v6 = vld [vmem:[#allocation22 + $0x78] sm:$0xff] }
 0xfe9   : > { %9866 = vmatpush1.bf16.msra.mxu0 %v9865_v24  ;;  %v5928_v24 = vld [vmem:[#allocation19 + $0x1180] sm:$0xff] }
 0xfea   : > { %9868 = vmatprep.subr.bf16.mxu0 %v9867_v2  ;;  %v5930_v2 = vld [vmem:[#allocation19 + $0x1190] sm:$0xff] }
 0xfeb   : > { %v9905_v51 = vpack.c.bf16 %v5930_v2, %v5928_v24 }
 0xfed   : > { %9870 = vmatpush1.bf16.msra.mxu0 %v9869_v26  ;;  %v5932_v26 = vld [vmem:[#allocation19 + $0x11a0] sm:$0xff] }
 0xfee   : > { %9872 = vmatprep.subr.bf16.mxu0 %v9871_v28  ;;  %v5934_v28 = vld [vmem:[#allocation19 + $0x11b0] sm:$0xff] }
 0xfef   : > { %v9909_v32 = vpack.c.bf16 %v5934_v28, %v5932_v26 }
 0xff1   : > { %9874 = vmatpush1.bf16.msra.mxu0 %v9873_v34  ;;  %v5936_v34 = vld [vmem:[#allocation19 + $0x11c0] sm:$0xff] }
 0xff2   : > { %9876 = vmatprep.subr.bf16.mxu0 %v9875_v48  ;;  %v5938_v48 = vld [vmem:[#allocation19 + $0x11d0] sm:$0xff] }
 0xff3   : > { %v9913_v43 = vpack.c.bf16 %v5938_v48, %v5936_v34  ;;  %v6100_v48 = vld [vmem:[#allocation22 + $0x10] sm:$0xff] }
 0xff5   : > { %9878 = vmatpush1.bf16.msra.mxu0 %v9877_v45  ;;  %v5940_v45 = vld [vmem:[#allocation19 + $0x11e0] sm:$0xff] }
 0xff6   : > { %9880 = vmatprep.subr.bf16.mxu0 %v9879_v46  ;;  %v5942_v46 = vld [vmem:[#allocation19 + $0x11f0] sm:$0xff] }
 0xff7   : > { %v9917_v50 = vpack.c.bf16 %v5942_v46, %v5940_v45  ;;  %v6103_v45 = vld [vmem:[#allocation22 + $0x28] sm:$0xff] }
 0xff9   : > { %9882 = vmatpush1.bf16.msra.mxu0 %v9881_v38  ;;  %v6032_v38 = vrot.slane %v6027_v52, %v11941_v11  ;;  %v6263_v52 = vld [vmem:[#allocation22 + $0x80] sm:$0xff] }
 0xffa   : > { %9884 = vmatprep.subr.bf16.mxu0 %v9883_v39 }
 0xffd   : > { %9886 = vmatpush1.bf16.msra.mxu0 %v9885_v57 }
 0xffe   : > { %9888 = vmatprep.subr.bf16.mxu0 %v9887_v7 }
0x1001   : > { %9890 = vmatpush1.bf16.msra.mxu0 %v9889_v58 }
0x1002   : > { %9892 = vmatprep.subr.bf16.mxu0 %v9891_v8 }
0x1005   : > { %9894 = vmatpush1.bf16.msra.mxu0 %v9893_v3  ;;  %v6109_v3 = vld [vmem:[#allocation22 + $0x50] sm:$0xff] }
0x1006   : > { %9896 = vmatprep.subr.bf16.mxu0 %v9895_v12  ;;  %v9920_v12 = vpack.c.bf16 %v6108_v63, %v6107_v61  ;;  %v9923_v13 = vpack.c.bf16 %v6110_v37, %v6109_v3  ;;  %v6355_v61 = vld [vmem:[#allocation22 + $0xf8] sm:$0xff]  ;;  %v6432_v3 = vld [vmem:[#allocation22 + $0x100] sm:$0xff] }
0x1008   : > { %9921 = vmatpush3.bf16.msra.mxu1 %v9920_v12  ;;  %v6433_v12 = vld [vmem:[#allocation22 + $0x108] sm:$0xff] }
0x1009   : > { %9898 = vmatpush1.bf16.msra.mxu0 %v9897_v15  ;;  %9922 = vmatprep.subr.bf16.mxu1 %v11207_v5  ;;  %v9926_v15 = vpack.c.bf16 %v6112_v19, %v6111_v62  ;;  %v9968_v37 = vpack.c.bf16 %v6433_v12, %v6432_v3  ;;  %v6435_v62 = vld [vmem:[#allocation22 + $0x118] sm:$0xff] }
0x100a   : > { %9900 = vmatprep.subr.bf16.mxu0 %v9899_v16  ;;  %v6113_v16 = vld [vmem:[#allocation22 + $0x70] sm:$0xff] }
0x100b   : > { %v9929_v9 = vpack.c.bf16 %v6114_v6, %v6113_v16  ;;  %v6437_v16 = vld [vmem:[#allocation22 + $0x128] sm:$0xff] }
0x100c   : > { %9924 = vmatpush3.bf16.msra.mxu1 %v9923_v13  ;;  %v6434_v13 = vld [vmem:[#allocation22 + $0x110] sm:$0xff] }
0x100d   : > { %9902 = vmatpush1.bf16.msra.mxu0 %v9901_v21  ;;  %9925 = vmatprep.subr.bf16.mxu1 %v11207_v5  ;;  %v9971_v19 = vpack.c.bf16 %v6435_v62, %v6434_v13 }
0x100e   : > { %9904 = vmatprep.subr.bf16.mxu0 %v9903_v22 }
0x1010   : > { %9927 = vmatpush3.bf16.msra.mxu1 %v9926_v15  ;;  %v6436_v15 = vld [vmem:[#allocation22 + $0x120] sm:$0xff] }
0x1011   : > { %9906 = vmatpush1.bf16.msra.mxu0 %v9905_v51  ;;  %9928 = vmatprep.subr.bf16.mxu1 %v11207_v5  ;;  %v9974_v6 = vpack.c.bf16 %v6437_v16, %v6436_v15  ;;  %v6875_v16 = vld [vmem:[#allocation25 + $0x40] sm:$0xff] }
0x1012   : > { %9908 = vmatprep.subr.bf16.mxu0 %v9907_v10 }
0x1014   : > { %9930 = vmatpush3.bf16.msra.mxu1 %v9929_v9  ;;  %v6438_v9 = vld [vmem:[#allocation22 + $0x130] sm:$0xff] }
0x1015   : > { %9910 = vmatpush1.bf16.msra.mxu0 %v9909_v32  ;;  %9931 = vmatprep.subr.bf16.mxu1 %v11207_v5  ;;  %v6098_v32 = vld [vmem:[#allocation22] sm:$0xff] }
0x1016   : > { %9912 = vmatprep.subr.bf16.mxu0 %v9911_v33  ;;  %v6099_v33 = vld [vmem:[#allocation22 + $0x8] sm:$0xff] }
0x1017   : > { %v9932_v34 = vpack.c.bf16 %v6099_v33, %v6098_v32  ;;  %v6523_v32 = vld [vmem:[#allocation22 + $0x178] sm:$0xff] }
0x1019   : > { %9914 = vmatpush1.bf16.msra.mxu0 %v9913_v43  ;;  %v9935_v43 = vpack.c.bf16 %v6101_v36, %v6100_v48  ;;  %v6602_v48 = vld [vmem:[#allocation22 + $0x188] sm:$0xff] }
0x101a   : > { %9916 = vmatprep.subr.bf16.mxu0 %v9915_v40  ;;  %v6102_v40 = vld [vmem:[#allocation22 + $0x20] sm:$0xff] }
0x101b   : > { %v9938_v46 = vpack.c.bf16 %v6103_v45, %v6102_v40 }
0x101d   : > { %9918 = vmatpush1.bf16.msra.mxu0 %v9917_v50  ;;  %v6104_v50 = vld [vmem:[#allocation22 + $0x30] sm:$0xff] }
0x101e   : > { %8220 = vmatprep.subr.mxu0 %v11980_v1 }
0x1020   : > { %6019 = vmatmul.mubr.f32.vlgmr.msra.gmra.mrb[8].mxu0 %v5950_v30  ;;  %v9941_v30 = vpack.c.bf16 %v6105_v41, %v6104_v50  ;;  %v6606_v50 = vld [vmem:[#allocation22 + $0x1a8] sm:$0xff] }
0x1021   : > { %8222 = vmatprep.mubr.msk.f32.mxu0 %vm11206_vm0, %v11980_v1 }
0x10f3   : > { %v6020_v39 = vpop.f32.mrb[8].mxu0 }
0x10f4   : > { %v10111_v55 = vadd.f32 %v6020_v39, %v12269_v23  ;;  %v6022_v56 = vpop.f32.mrb[9].mxu0 }
0x10f5   : > { %v10112_v53 = vadd.f32 %v6022_v56, %v12271_v27 }
0x10f6   : > { %v6039_v57 = vadd.f32 %v10111_v55, %v6032_v38  ;;  %v6264_v38 = vld [vmem:[#allocation22 + $0x88] sm:$0xff]  ;;  %v6266_v55 = vld [vmem:[#allocation22 + $0x98] sm:$0xff] }
0x10f7   : > { %v6040_v7 = vadd.f32 %v10112_v53, %v6036_v47  ;;  %v9944_v39 = vpack.c.bf16 %v6264_v38, %v6263_v52  ;;  %v6265_v47 = vld [vmem:[#allocation22 + $0x90] sm:$0xff]  ;;  %v6267_v53 = vld [vmem:[#allocation22 + $0xa0] sm:$0xff]  ;;  %v6608_v52 = vld [vmem:[#allocation22 + $0x1b8] sm:$0xff] }
0x10f8   : > { %v6043_v60 = vmin.f32 %v6039_v57, 0.0  ;;  %vm6041_vm8 = vcmp.gt.f32.partialorder %v6039_v57, 0.0  ;;  %v9947_v56 = vpack.c.bf16 %v6266_v55, %v6265_v47  ;;  %v6686_v47 = vld [vmem:[#allocation22 + $0x1c8] sm:$0xff] }
0x10f9   : > { %v6044_v44 = vmin.f32 %v6040_v7, 0.0  ;;  %vm6042_vm9 = vcmp.gt.f32.partialorder %v6040_v7, 0.0 }
0x10fa   : > { %v6045_v54 = vmul.f32 1.442695, %v6043_v60  ;;  %v6269_v60 = vld [vmem:[#allocation22 + $0xb0] sm:$0xff] }
0x10fb   : > { %v6047_v35 = vmul.f32 1.442695, %v6044_v44  ;;  %v6270_v44 = vld [vmem:[#allocation22 + $0xb8] sm:$0xff] }
0x10fc   : > { %10524 = vpow2.f32 %v6045_v54  ;;  %v9953_v54 = vpack.c.bf16 %v6270_v44, %v6269_v60  ;;  %v6690_v60 = vld [vmem:[#allocation22 + $0x1e8] sm:$0xff] }
0x10fd   : > { %10526 = vpow2.f32 %v6047_v35  ;;  %v6348_v35 = vld [vmem:[#allocation22 + $0xc0] sm:$0xff] }
0x1106   : > { %v10525_v49 = vpop.eup %10524 }
0x1107   : > { %v10527_v59 = vpop.eup %10526  ;;  %v7768_v58 = vadd.f32 -1.0, %v10525_v49  ;;  %v6349_v49 = vld [vmem:[#allocation22 + $0xc8] sm:$0xff] }
0x1108   : > { %v7769_v11 = vadd.f32 -1.0, %v10527_v59  ;;  %v9956_v59 = vpack.c.bf16 %v6349_v49, %v6348_v35  ;;  %v6692_v35 = vld [vmem:[#allocation22 + $0x1f8] sm:$0xff] }
0x1109   : > { %v6051_v8 = vsel %vm6041_vm8, %v6039_v57, %v7768_v58  ;;  %v6268_v57 = vld [vmem:[#allocation22 + $0xa8] sm:$0xff]  ;;  %v6350_v58 = vld [vmem:[#allocation22 + $0xd0] sm:$0xff] }
0x110a   : > { %6054 = vrot.lane.b32.xlu1 %v6051_v8, %s11213_s1  ;;  %v6052_v4 = vsel %vm6042_vm9, %v6040_v7, %v7769_v11  ;;  %v9950_v7 = vpack.c.bf16 %v6268_v57, %v6267_v53  ;;  %v6351_v11 = vld [vmem:[#allocation22 + $0xd8] sm:$0xff] }
0x110b   : > { %6066 = vrot.lane.b32.xlu0 %v6052_v4, %s11213_s1  ;;  %v6688_v53 = vld [vmem:[#allocation22 + $0x1d8] sm:$0xff] }
0x117c   : > { %v6055_v23 = vpop.permute.xlu1 %6054 }
0x117d   : > { %v6057_v27 = vmax.f32 %v6051_v8, %v6055_v23  ;;  %v6067_v20 = vpop.permute.xlu0 %6066  ;;  %v6352_v23 = vld [vmem:[#allocation22 + $0xe0] sm:$0xff] }
0x117e   : > { %v6069_v42 = vmax.f32 %v6052_v4, %v6067_v20  ;;  %v9959_v4 = vpack.c.bf16 %v6351_v11, %v6350_v58  ;;  %v6771_v11 = vld [vmem:[#allocation22 + $0x210] sm:$0xff] }
0x117f   : > { %6058 = vst.msk [vmem:[#allocation2] sm:$0xff] %vm2048_vm11, %v6057_v27  ;;  %6060 = vrot.lane.b32.xlu1 %v6057_v27, %s11213_s1  ;;  %vm6074_vm11 = vcmask 785920   ;;  %v6353_v27 = vld [vmem:[#allocation22 + $0xe8] sm:$0xff] }
0x1180   : > { %6071 = vrot.lane.b32.xlu0 %v6069_v42, %s11215_s9  ;;  %v9962_v20 = vpack.c.bf16 %v6353_v27, %v6352_v23  ;;  %v6773_v27 = vld [vmem:[#allocation22 + $0x220] sm:$0xff] }
0x1183   : > { %6076 = vrot.lane.b32.xlu1 %v6069_v42, %s11217_s3  ;;  %v6354_v42 = vld [vmem:[#allocation22 + $0xf0] sm:$0xff] }
0x1184   : > { %v9965_v63 = vpack.c.bf16 %v6355_v61, %v6354_v42  ;;  %v6775_v61 = vld [vmem:[#allocation22 + $0x230] sm:$0xff] }
0x11f1   : > { %v6061_v17 = vpop.permute.xlu1 %6060 }
0x11f2   : > { %6064 = vst.msk [vmem:[#allocation2] sm:$0xff] %vm6063_vm10, %v6061_v17  ;;  %v6072_v18 = vpop.permute.xlu0 %6071  ;;  %v6439_v17 = vld [vmem:[#allocation22 + $0x138] sm:$0xff] }
0x11f3   : > { %6075 = vst.msk [vmem:[#allocation2] sm:$0xff] %vm6074_vm11, %v6072_v18  ;;  %v9977_v18 = vpack.c.bf16 %v6439_v17, %v6438_v9  ;;  %v6877_v9 = vld [vmem:[#allocation25 + $0x50] sm:$0xff] }
0x11f5   : > { %v6077_v21 = vpop.permute.xlu1 %6076 }
0x11f6   : > { %6080 = vst.msk [vmem:[#allocation2] sm:$0xff] %vm6079_vm12, %v6077_v21  ;;  %v6516_v21 = vld [vmem:[#allocation22 + $0x140] sm:$0xff] }
0x11fd   : > { %v6081_v22 = vld [vmem:[#allocation2] sm:$0xff] }
0x11fe   : > { %v6083_v24 = vrot.slane %v6081_v22, 1 }
0x1200   : > { %v6085_v2 = vmax.f32 %v6081_v22, %v6083_v24  ;;  %v6517_v22 = vld [vmem:[#allocation22 + $0x148] sm:$0xff] }
0x1201   : > { %v9980_v24 = vpack.c.bf16 %v6517_v22, %v6516_v21  ;;  %v6879_v22 = vld [vmem:[#allocation25 + $0x60] sm:$0xff] }
0x1202   : > { %6086 = vst [vmem:[#allocation2] sm:$0x1] %v6085_v2  ;;  %v6088_v14 = vrot.slane %v6085_v2, 2  ;;  %v6091_v25 = vrot.slane %v6085_v2, 4  ;;  %v6094_v51 = vrot.slane %v6085_v2, 6  ;;  %v6518_v2 = vld [vmem:[#allocation22 + $0x150] sm:$0xff] }
0x1204   : > { %6090 = vst [vmem:[#allocation2 + $0x1] sm:$0x1] %v6088_v14  ;;  %6093 = vst [vmem:[#allocation2 + $0x2] sm:$0x1] %v6091_v25  ;;  %v6519_v14 = vld [vmem:[#allocation22 + $0x158] sm:$0xff] }
0x1205   : > { %6096 = vst [vmem:[#allocation2 + $0x3] sm:$0x1] %v6094_v51  ;;  %v9983_v51 = vpack.c.bf16 %v6519_v14, %v6518_v2 }
0x120b   : > { %v6097_v10 = vld [vmem:[#allocation2] sm:$0x3] }
0x120c   : > { %v6346_v26 = vld [vmem:[#allocation2] sm:$0x6]  ;;  %6271 = vrot.lane.b32.xlu1 %v6097_v10, %s11215_s9  ;;  %6116 = vrot.lane.b32.xlu0 %v6097_v10, %s11213_s1 }
0x120d   : > { %v12303_v28 = vrot.slane %v6346_v26, 1  ;;  %v6599_v0 = vld [vmem:[#allocation2] sm:$0xc]  ;;  %v6521_v26 = vld [vmem:[#allocation22 + $0x168] sm:$0xff] }
0x120e   : > { %v12309_v31 = vrot.slane %v6599_v0, 2  ;;  %v6522_v0 = vld [vmem:[#allocation22 + $0x170] sm:$0xff] }
0x120f   : > { %v9989_v33 = vpack.c.bf16 %v6523_v32, %v6522_v0 }
0x1210   : > { %6524 = vrot.lane.b32.xlu1 %v12303_v28, %s11215_s9  ;;  %6440 = vrot.lane.b32.xlu0 %v12303_v28, %s11213_s1 }
0x1214   : > { %6777 = vrot.lane.b32.xlu1 %v12309_v31, %s11215_s9  ;;  %6693 = vrot.lane.b32.xlu0 %v12309_v31, %s11213_s1 }
0x127e   : > { %v6117_v29 = vpop.permute.xlu0 %6116  ;;  %v6272_v8 = vpop.permute.xlu1 %6271 }
0x127f   : > { %7971 = vmatmul.mubr.msk.f32.vlgmr.msra.gmra.mrb[4].mxu1 %vm4622_vm2, %v6117_v29  ;;  %v6603_v29 = vld [vmem:[#allocation22 + $0x190] sm:$0xff] }
0x1280   : > { %9933 = vmatpush3.bf16.msra.mxu1 %v9932_v34  ;;  %7989 = vmatprep.mubr.msk.f32.mxu1 %vm11206_vm0, %v11980_v1  ;;  %v6601_v34 = vld [vmem:[#allocation22 + $0x180] sm:$0xff] }
0x1281   : > { %9934 = vmatprep.subr.bf16.mxu1 %v11207_v5  ;;  %v9992_v36 = vpack.c.bf16 %v6602_v48, %v6601_v34 }
0x1282   : > { %v6441_v25 = vpop.permute.xlu0 %6440  ;;  %v6525_v40 = vpop.permute.xlu1 %6524 }
0x1284   : > { %9936 = vmatpush3.bf16.msra.mxu1 %v9935_v43  ;;  %v6604_v43 = vld [vmem:[#allocation22 + $0x198] sm:$0xff] }
0x1285   : > { %9937 = vmatprep.subr.bf16.mxu1 %v11207_v5  ;;  %v9995_v45 = vpack.c.bf16 %v6604_v43, %v6603_v29 }
0x1286   : > { %v6778_v12 = vpop.permute.xlu1 %6777 }
0x1288   : > { %9939 = vmatpush3.bf16.msra.mxu1 %v9938_v46  ;;  %v6605_v46 = vld [vmem:[#allocation22 + $0x1a0] sm:$0xff] }
0x1289   : > { %9940 = vmatprep.subr.bf16.mxu1 %v11207_v5  ;;  %v9998_v41 = vpack.c.bf16 %v6606_v50, %v6605_v46 }
0x128c   : > { %9942 = vmatpush3.bf16.msra.mxu1 %v9941_v30  ;;  %v6607_v30 = vld [vmem:[#allocation22 + $0x1b0] sm:$0xff] }
0x128d   : > { %9943 = vmatprep.subr.bf16.mxu1 %v11207_v5  ;;  %v10001_v38 = vpack.c.bf16 %v6608_v52, %v6607_v30 }
0x128f   : > { %7990 = vmatmul.mubr.msk.f32.vlgmr.msra.gmra.mrb[6].mxu1 %vm4622_vm2, %v6097_v10  ;;  %v6520_v10 = vld [vmem:[#allocation22 + $0x160] sm:$0xff] }
0x1290   : > { %9945 = vmatpush3.bf16.msra.mxu1 %v9944_v39  ;;  %8008 = vmatprep.mubr.msk.f32.mxu1 %vm11206_vm0, %v11980_v1  ;;  %v6685_v39 = vld [vmem:[#allocation22 + $0x1c0] sm:$0xff] }
0x1291   : > { %9946 = vmatprep.subr.bf16.mxu1 %v11207_v5  ;;  %v10004_v55 = vpack.c.bf16 %v6686_v47, %v6685_v39  ;;  %v7779_v39 = vld [vmem:[#allocation23] ss:$0 sm:$0xff] }
0x1294   : > { %9948 = vmatpush3.bf16.msra.mxu1 %v9947_v56  ;;  %v6687_v56 = vld [vmem:[#allocation22 + $0x1d0] sm:$0xff] }
0x1295   : > { %9949 = vmatprep.subr.bf16.mxu1 %v11207_v5  ;;  %v10007_v57 = vpack.c.bf16 %v6688_v53, %v6687_v56 }
0x1298   : > { %9951 = vmatpush3.bf16.msra.mxu1 %v9950_v7  ;;  %v6689_v7 = vld [vmem:[#allocation22 + $0x1e0] sm:$0xff] }
0x1299   : > { %9952 = vmatprep.subr.bf16.mxu1 %v11207_v5  ;;  %v10010_v44 = vpack.c.bf16 %v6690_v60, %v6689_v7 }
0x129c   : > { %9954 = vmatpush3.bf16.msra.mxu1 %v9953_v54  ;;  %v6691_v54 = vld [vmem:[#allocation22 + $0x1f0] sm:$0xff] }
0x129d   : > { %9955 = vmatprep.subr.bf16.mxu1 %v11207_v5  ;;  %v10013_v49 = vpack.c.bf16 %v6692_v35, %v6691_v54  ;;  %v6866_v35 = vld [vmem:[#allocation25] sm:$0xff] }
0x129f   : > { %8009 = vmatmul.mubr.msk.f32.vlgmr.msra.gmra.mrb[8].mxu1 %vm4622_vm2, %v6272_v8  ;;  %v6772_v8 = vld [vmem:[#allocation22 + $0x218] sm:$0xff] }
0x12a0   : > { %9957 = vmatpush3.bf16.msra.mxu1 %v9956_v59  ;;  %8027 = vmatprep.mubr.msk.f32.mxu1 %vm11206_vm0, %v11980_v1  ;;  %v6770_v59 = vld [vmem:[#allocation22 + $0x208] sm:$0xff]  ;;  %v10019_v23 = vpack.c.bf16 %v6772_v8, %v6771_v11 }
0x12a1   : > { %9958 = vmatprep.subr.bf16.mxu1 %v11207_v5 }
0x12a4   : > { %9960 = vmatpush3.bf16.msra.mxu1 %v9959_v4  ;;  %v6694_v4 = vpop.permute.xlu0 %6693 }
0x12a5   : > { %9961 = vmatprep.subr.bf16.mxu1 %v11207_v5 }
0x12a8   : > { %9963 = vmatpush3.bf16.msra.mxu1 %v9962_v20  ;;  %v6774_v20 = vld [vmem:[#allocation22 + $0x228] sm:$0xff] }
0x12a9   : > { %9964 = vmatprep.subr.bf16.mxu1 %v11207_v5  ;;  %v10022_v42 = vpack.c.bf16 %v6774_v20, %v6773_v27  ;;  %v6872_v20 = vld [vmem:[#allocation25 + $0x30] sm:$0xff] }
0x12ac   : > { %9966 = vmatpush3.bf16.msra.mxu1 %v9965_v63  ;;  %v6776_v63 = vld [vmem:[#allocation22 + $0x238] sm:$0xff] }
0x12ad   : > { %9967 = vmatprep.subr.bf16.mxu1 %v11207_v5  ;;  %v10025_v3 = vpack.c.bf16 %v6776_v63, %v6775_v61  ;;  %v7031_v63 = vld [vmem:[#allocation25 + $0x80] sm:$0xff] }
0x12af   : > { %8028 = vmatmul.mubr.msk.f32.vlgmr.msra.gmra.mrb[10].mxu1 %vm4622_vm2, %v12303_v28  ;;  %v9986_v28 = vpack.c.bf16 %v6521_v26, %v6520_v10  ;;  %v6881_v10 = vld [vmem:[#allocation25 + $0x70] sm:$0xff]  ;;  %v6882_v26 = vld [vmem:[#allocation25 + $0x78] sm:$0xff] }
0x12b0   : > { %9969 = vmatpush3.bf16.msra.mxu1 %v9968_v37  ;;  %8046 = vmatprep.mubr.msk.f32.mxu1 %vm11206_vm0, %v11980_v1 }
0x12b1   : > { %9970 = vmatprep.subr.bf16.mxu1 %v11207_v5 }
0x12b4   : > { %9972 = vmatpush3.bf16.msra.mxu1 %v9971_v19 }
0x12b5   : > { %9973 = vmatprep.subr.bf16.mxu1 %v11207_v5 }
0x12b8   : > { %9975 = vmatpush3.bf16.msra.mxu1 %v9974_v6  ;;  %v6876_v6 = vld [vmem:[#allocation25 + $0x48] sm:$0xff] }
0x12b9   : > { %9976 = vmatprep.subr.bf16.mxu1 %v11207_v5  ;;  %v10028_v17 = vpack.c.bf16 %v6876_v6, %v6875_v16  ;;  %v7037_v6 = vld [vmem:[#allocation25 + $0xb0] sm:$0xff] }
0x12bc   : > { %9978 = vmatpush3.bf16.msra.mxu1 %v9977_v18  ;;  %v6878_v18 = vld [vmem:[#allocation25 + $0x58] sm:$0xff] }
0x12bd   : > { %9979 = vmatprep.subr.bf16.mxu1 %v11207_v5  ;;  %v10031_v21 = vpack.c.bf16 %v6878_v18, %v6877_v9  ;;  %v7038_v9 = vld [vmem:[#allocation25 + $0xb8] sm:$0xff]  ;;  %v7114_v18 = vld [vmem:[#allocation25 + $0xc0] sm:$0xff] }
0x12bf   : > { %8047 = vmatmul.mubr.msk.f32.vlgmr.msra.gmra.mrb[12].mxu1 %vm4622_vm2, %v6441_v25 }
0x12c0   : > { %9981 = vmatpush3.bf16.msra.mxu1 %v9980_v24  ;;  %8065 = vmatprep.mubr.msk.f32.mxu1 %vm11206_vm0, %v11980_v1  ;;  %v6880_v24 = vld [vmem:[#allocation25 + $0x68] sm:$0xff] }
0x12c1   : > { %9982 = vmatprep.subr.bf16.mxu1 %v11207_v5  ;;  %v10034_v14 = vpack.c.bf16 %v6880_v24, %v6879_v22  ;;  %v7116_v24 = vld [vmem:[#allocation25 + $0xd0] sm:$0xff] }
0x12c4   : > { %9984 = vmatpush3.bf16.msra.mxu1 %v9983_v51 }
0x12c5   : > { %9985 = vmatprep.subr.bf16.mxu1 %v11207_v5 }
0x12c8   : > { %9987 = vmatpush3.bf16.msra.mxu1 %v9986_v28  ;;  %v10037_v28 = vpack.c.bf16 %v6882_v26, %v6881_v10  ;;  %v7120_v26 = vld [vmem:[#allocation25 + $0xf0] sm:$0xff] }
0x12c9   : > { %9988 = vmatprep.subr.bf16.mxu1 %v11207_v5 }
0x12cc   : > { %9990 = vmatpush3.bf16.msra.mxu1 %v9989_v33 }
0x12cd   : > { %9991 = vmatprep.subr.bf16.mxu1 %v11207_v5 }
0x12cf   : > { %8066 = vmatmul.mubr.msk.f32.vlgmr.msra.gmra.mrb[14].mxu1 %vm4622_vm2, %v6525_v40 }
0x12d0   : > { %9993 = vmatpush3.bf16.msra.mxu1 %v9992_v36  ;;  %8084 = vmatprep.mubr.msk.f32.mxu1 %vm11206_vm0, %v11980_v1 }
0x12d1   : > { %9994 = vmatprep.subr.bf16.mxu1 %v11207_v5 }
0x12d4   : > { %9996 = vmatpush3.bf16.msra.mxu1 %v9995_v45 }
0x12d5   : > { %9997 = vmatprep.subr.bf16.mxu1 %v11207_v5 }
0x12d8   : > { %9999 = vmatpush3.bf16.msra.mxu1 %v9998_v41 }
0x12d9   : > { %10000 = vmatprep.subr.bf16.mxu1 %v11207_v5 }
0x12dc   : > { %10002 = vmatpush3.bf16.msra.mxu1 %v10001_v38 }
0x12dd   : > { %10003 = vmatprep.subr.bf16.mxu1 %v11207_v5 }
0x12df   : > { %8085 = vmatmul.mubr.msk.f32.vlgmr.msra.gmra.mrb[16].mxu1 %vm4622_vm2, %v12309_v31  ;;  %v6769_v31 = vld [vmem:[#allocation22 + $0x200] sm:$0xff] }
0x12e0   : > { %10005 = vmatpush3.bf16.msra.mxu1 %v10004_v55  ;;  %8103 = vmatprep.mubr.msk.f32.mxu1 %vm11206_vm0, %v11980_v1  ;;  %v10016_v58 = vpack.c.bf16 %v6770_v59, %v6769_v31  ;;  %v6868_v59 = vld [vmem:[#allocation25 + $0x10] sm:$0xff] }
0x12e1   : > { %10006 = vmatprep.subr.bf16.mxu1 %v11207_v5 }
0x12e4   : > { %10008 = vmatpush3.bf16.msra.mxu1 %v10007_v57 }
0x12e5   : > { %10009 = vmatprep.subr.bf16.mxu1 %v11207_v5 }
0x12e8   : > { %10011 = vmatpush3.bf16.msra.mxu1 %v10010_v44 }
0x12e9   : > { %10012 = vmatprep.subr.bf16.mxu1 %v11207_v5 }
0x12ec   : > { %10014 = vmatpush3.bf16.msra.mxu1 %v10013_v49  ;;  %v6867_v49 = vld [vmem:[#allocation25 + $0x8] sm:$0xff] }
0x12ed   : > { %10015 = vmatprep.subr.bf16.mxu1 %v11207_v5  ;;  %v10040_v31 = vpack.c.bf16 %v6867_v49, %v6866_v35 }
0x12ef   : > { %8104 = vmatmul.mubr.msk.f32.vlgmr.msra.gmra.mrb[18].mxu1 %vm4622_vm2, %v6694_v4  ;;  %v6870_v4 = vld [vmem:[#allocation25 + $0x20] sm:$0xff] }
0x12f0   : > { %10017 = vmatpush3.bf16.msra.mxu1 %v10016_v58  ;;  %8122 = vmatprep.mubr.msk.f32.mxu1 %vm11206_vm0, %v11980_v1  ;;  %v6869_v58 = vld [vmem:[#allocation25 + $0x18] sm:$0xff] }
0x12f1   : > { %10018 = vmatprep.subr.bf16.mxu1 %v11207_v5  ;;  %v10043_v8 = vpack.c.bf16 %v6869_v58, %v6868_v59 }
0x12f4   : > { %10020 = vmatpush3.bf16.msra.mxu1 %v10019_v23  ;;  %v6871_v23 = vld [vmem:[#allocation25 + $0x28] sm:$0xff] }
0x12f5   : > { %10021 = vmatprep.subr.bf16.mxu1 %v11207_v5  ;;  %v10046_v27 = vpack.c.bf16 %v6871_v23, %v6870_v4 }
0x12f8   : > { %10023 = vmatpush3.bf16.msra.mxu1 %v10022_v42  ;;  %v6873_v42 = vld [vmem:[#allocation25 + $0x38] sm:$0xff] }
0x12f9   : > { %10024 = vmatprep.subr.bf16.mxu1 %v11207_v5  ;;  %v10049_v61 = vpack.c.bf16 %v6873_v42, %v6872_v20  ;;  %v7370_v20 = vld [vmem:[#allocation31 + $0x10] sm:$0xff]  ;;  %v7371_v42 = vld [vmem:[#allocation31 + $0x18] sm:$0xff] }
0x12fc   : > { %10026 = vmatpush3.bf16.msra.mxu1 %v10025_v3  ;;  %v7032_v3 = vld [vmem:[#allocation25 + $0x88] sm:$0xff] }
0x12fd   : > { %10027 = vmatprep.subr.bf16.mxu1 %v11207_v5 }
0x12ff   : > { %8123 = vmatmul.mubr.msk.f32.vlgmr.msra.gmra.mrb[20].mxu1 %vm4622_vm2, %v6778_v12  ;;  %v10052_v12 = vpack.c.bf16 %v7032_v3, %v7031_v63  ;;  %v10091_v63 = vpack.c.bf16 %v7371_v42, %v7370_v20 }
0x1300   : > { %8141 = vmatprep.mubr.msk.f32.mxu1 %vm11206_vm0, %v11980_v1  ;;  %10029 = vmatpush3.bf16.msra.mxu1 %v10028_v17  ;;  %v10061_v17 = vpack.c.bf16 %v7038_v9, %v7037_v6  ;;  %v7376_v6 = vld [vmem:[#allocation31 + $0x40] sm:$0xff]  ;;  %v7377_v9 = vld [vmem:[#allocation31 + $0x48] sm:$0xff] }
0x1301   : > { %10030 = vmatprep.subr.bf16.mxu1 %v11207_v5 }
0x1304   : > { %10032 = vmatpush3.bf16.msra.mxu1 %v10031_v21  ;;  %v7115_v21 = vld [vmem:[#allocation25 + $0xc8] sm:$0xff] }
0x1305   : > { %10033 = vmatprep.subr.bf16.mxu1 %v11207_v5  ;;  %v10064_v22 = vpack.c.bf16 %v7115_v21, %v7114_v18  ;;  %v7379_v18 = vld [vmem:[#allocation31 + $0x58] sm:$0xff] }
0x1308   : > { %10035 = vmatpush3.bf16.msra.mxu1 %v10034_v14 }
0x1309   : > { %10036 = vmatprep.subr.bf16.mxu1 %v11207_v5 }
0x130c   : > { %10038 = vmatpush3.bf16.msra.mxu1 %v10037_v28  ;;  %v7121_v28 = vld [vmem:[#allocation25 + $0xf8] sm:$0xff] }
0x130d   : > { %10039 = vmatprep.subr.bf16.mxu1 %v11207_v5 }
0x1352   : > { %v6186_v37 = vpop.f32.mrb[4].mxu1 }
0x1353   : > { %v7972_v13 = vpop.f32.mrb[5].mxu1 }
0x1354   : > { %v7034_v13 = vld [vmem:[#allocation25 + $0x98] sm:$0xff] }
0x1362   : > { %v6258_v62 = vpop.f32.mrb[6].mxu1 }
0x1363   : > { %v6259_v19 = vadd.f32 %v6258_v62, %v6186_v37  ;;  %v7991_v15 = vpop.f32.mrb[7].mxu1  ;;  %v7033_v37 = vld [vmem:[#allocation25 + $0x90] sm:$0xff] }
0x1364   : > { %v10055_v62 = vpack.c.bf16 %v7034_v13, %v7033_v37  ;;  %v7036_v15 = vld [vmem:[#allocation25 + $0xa8] sm:$0xff]  ;;  %v7373_v13 = vld [vmem:[#allocation31 + $0x28] sm:$0xff] }
0x1365   : > { %v7372_v37 = vld [vmem:[#allocation31 + $0x20] sm:$0xff] }
0x1372   : > { %v6341_v2 = vpop.f32.mrb[8].mxu1 }
0x1373   : > { %v6345_v25 = vadd.f32 %v6341_v2, %v6259_v19  ;;  %v8010_v51 = vpop.f32.mrb[9].mxu1  ;;  %v7035_v19 = vld [vmem:[#allocation25 + $0xa0] sm:$0xff]  ;;  %v7117_v2 = vld [vmem:[#allocation25 + $0xd8] sm:$0xff] }
0x1374   : > { %v10058_v16 = vpack.c.bf16 %v7036_v15, %v7035_v19  ;;  %v10067_v14 = vpack.c.bf16 %v7117_v2, %v7116_v24  ;;  %v7119_v51 = vld [vmem:[#allocation25 + $0xe8] sm:$0xff]  ;;  %v10094_v19 = vpack.c.bf16 %v7373_v13, %v7372_v37  ;;  %v7381_v24 = vld [vmem:[#allocation31 + $0x68] sm:$0xff] }
0x1375   : > { %v7375_v15 = vld [vmem:[#allocation31 + $0x38] sm:$0xff] }
0x1382   : > { %v6426_v0 = vpop.f32.mrb[10].mxu1 }
0x1383   : > { %v6430_v32 = vadd.f32 %v6426_v0, %v6345_v25  ;;  %v8029_v33 = vpop.f32.mrb[11].mxu1  ;;  %v7118_v25 = vld [vmem:[#allocation25 + $0xe0] sm:$0xff]  ;;  %v10073_v0 = vpack.c.bf16 %v7121_v28, %v7120_v26  ;;  %v7360_v26 = vld [vmem:[#allocation29] sm:$0x1] }
0x1384   : > { %v10070_v10 = vpack.c.bf16 %v7119_v51, %v7118_v25  ;;  %v7206_v33 = vld [vmem:[#allocation28 + $0x5] sm:$0xff] }
0x1385   : > { %v7383_v25 = vld [vmem:[#allocation31 + $0x78] sm:$0xff] }
0x1392   : > { %v6510_v34 = vpop.f32.mrb[12].mxu1 }
0x1393   : > { %v6514_v48 = vadd.f32 %v6510_v34, %v6430_v32  ;;  %v8048_v36 = vpop.f32.mrb[13].mxu1  ;;  %v7207_v34 = vld [vmem:[#allocation28 + $0xd] sm:$0xff] }
0x1394   : > { %v10076_v36 = vpack.c.bf16 %v7207_v34, %v7206_v33 }
0x13a2   : > { %v6594_v29 = vpop.f32.mrb[14].mxu1 }
0x13a3   : > { %v6598_v43 = vadd.f32 %v6594_v29, %v6514_v48  ;;  %v8067_v40 = vpop.f32.mrb[15].mxu1  ;;  %v7208_v48 = vld [vmem:[#allocation28 + $0x15] sm:$0xff]  ;;  %v7209_v29 = vld [vmem:[#allocation28 + $0x1d] sm:$0xff] }
0x13a4   : > { %v10079_v40 = vpack.c.bf16 %v7209_v29, %v7208_v48 }
0x13b2   : > { %v6679_v45 = vpop.f32.mrb[16].mxu1 }
0x13b3   : > { %v6683_v46 = vadd.f32 %v6679_v45, %v6598_v43  ;;  %v8086_v50 = vpop.f32.mrb[17].mxu1  ;;  %v7205_v43 = vld [vmem:[#allocation28] sm:$0x1f]  ;;  %v7210_v45 = vld [vmem:[#allocation28 + $0x25] sm:$0xff] }
0x13b4   : > { %8221 = vmatpush3.msk.msra.mxu0 %vm929_vm1, %v7205_v43  ;;  %v10536_v50 = vld [vmem:[%s777_s23] sm:$0x1]  ;;  %v7384_v43 = vld [vmem:[#allocation32] sm:$0x1] }
0x13b5   : > { %8223 = vmatmul.mubr.msk.f32.vlgmr.msra.gmra.mrb[10].mxu0 %vm12564_vm4, %v10536_v50 }
0x13c2   : > { %v6763_v41 = vpop.f32.mrb[18].mxu1 }
0x13c3   : > { %v6767_v30 = vadd.f32 %v6763_v41, %v6683_v46  ;;  %v8105_v52 = vpop.f32.mrb[19].mxu1  ;;  %v7211_v46 = vld [vmem:[#allocation28 + $0x2d] sm:$0xff] }
0x13c4   : > { %v10082_v41 = vpack.c.bf16 %v7211_v46, %v7210_v45  ;;  %v7213_v52 = vld [vmem:[#allocation28 + $0x3d] sm:$0xff] }
0x13d2   : > { %v6847_v38 = vpop.f32.mrb[20].mxu1 }
0x13d3   : > { %v6851_v47 = vadd.f32 %v6847_v38, %v6767_v30  ;;  %v8124_v55 = vpop.f32.mrb[21].mxu1  ;;  %v7212_v30 = vld [vmem:[#allocation28 + $0x35] sm:$0xff] }
0x13d4   : > { %v10085_v38 = vpack.c.bf16 %v7213_v52, %v7212_v30 }
0x13d5   : > { %v6859_v56 = vadd.f32 %v7779_v39, %v6851_v47 }
0x13d7   : > { %v6861_v53 = vmin.f32 %v6859_v56, 0.0  ;;  %vm6860_vm13 = vcmp.gt.f32.partialorder %v6859_v56, 0.0 }
0x13d9   : > { %v6862_v57 = vmul.f32 1.442695, %v6861_v53 }
0x13db   : > { %10528 = vpow2.f32 %v6862_v57 }
0x13e5   : > { %v10529_v7 = vpop.eup %10528 }
0x13e6   : > { %v7780_v60 = vadd.f32 -1.0, %v10529_v7 }
0x13e8   : > { %v6865_v44 = vsel %vm6860_vm13, %v6859_v56, %v7780_v60 }
0x13e9   : > { %6884 = vrot.lane.b32.xlu0 %v6865_v44, %s11215_s9  ;;  %v7039_v54 = vrot.slane %v6865_v44, 1 }
0x13eb   : > { %7122 = vrot.lane.b32.xlu1 %v7039_v54, %s11215_s9 }
0x145b   : > { %v6885_v11 = vpop.permute.xlu0 %6884 }
0x145c   : > { %8142 = vmatmul.mubr.msk.f32.vlgmr.msra.gmra.mrb[22].mxu1 %vm4622_vm2, %v6885_v11  ;;  %v7368_v11 = vld [vmem:[#allocation31] sm:$0xff] }
0x145d   : > { %10041 = vmatpush3.bf16.msra.mxu1 %v10040_v31  ;;  %8160 = vmatprep.mubr.msk.f32.mxu1 %vm11206_vm0, %v11980_v1  ;;  %v7123_v32 = vpop.permute.xlu1 %7122 }
0x145e   : > { %10042 = vmatprep.subr.bf16.mxu1 %v11207_v5 }
0x1461   : > { %10044 = vmatpush3.bf16.msra.mxu1 %v10043_v8  ;;  %v7369_v8 = vld [vmem:[#allocation31 + $0x8] sm:$0xff] }
0x1462   : > { %10045 = vmatprep.subr.bf16.mxu1 %v11207_v5 }
0x1465   : > { %10047 = vmatpush3.bf16.msra.mxu1 %v10046_v27  ;;  %v10088_v27 = vpack.c.bf16 %v7369_v8, %v7368_v11 }
0x1466   : > { %10048 = vmatprep.subr.bf16.mxu1 %v11207_v5 }
0x1469   : > { %10050 = vmatpush3.bf16.msra.mxu1 %v10049_v61 }
0x146a   : > { %10051 = vmatprep.subr.bf16.mxu1 %v11207_v5 }
0x146c   : > { %8161 = vmatmul.mubr.msk.f32.vlgmr.msra.gmra.mrb[24].mxu1 %vm4622_vm2, %v6865_v44 }
0x146d   : > { %10053 = vmatpush3.bf16.msra.mxu1 %v10052_v12  ;;  %8179 = vmatprep.mubr.msk.f32.mxu1 %vm11206_vm0, %v11980_v1 }
0x146e   : > { %10054 = vmatprep.subr.bf16.mxu1 %v11207_v5 }
0x1471   : > { %10056 = vmatpush3.bf16.msra.mxu1 %v10055_v62  ;;  %v7374_v62 = vld [vmem:[#allocation31 + $0x30] sm:$0xff] }
0x1472   : > { %10057 = vmatprep.subr.bf16.mxu1 %v11207_v5 }
0x1475   : > { %10059 = vmatpush3.bf16.msra.mxu1 %v10058_v16  ;;  %v10097_v16 = vpack.c.bf16 %v7375_v15, %v7374_v62 }
0x1476   : > { %10060 = vmatprep.subr.bf16.mxu1 %v11207_v5 }
0x1479   : > { %10062 = vmatpush3.bf16.msra.mxu1 %v10061_v17  ;;  %v7378_v17 = vld [vmem:[#allocation31 + $0x50] sm:$0xff] }
0x147a   : > { %10063 = vmatprep.subr.bf16.mxu1 %v11207_v5  ;;  %v10103_v21 = vpack.c.bf16 %v7379_v18, %v7378_v17 }
0x147c   : > { %8180 = vmatmul.mubr.msk.f32.vlgmr.msra.gmra.mrb[26].mxu1 %vm4622_vm2, %v7039_v54  ;;  %v7197_v54 = vld [vmem:[#allocation26] sm:$0x1] }
0x147d   : > { %10065 = vmatpush3.bf16.msra.mxu1 %v10064_v22  ;;  %8198 = vmatprep.mubr.msk.f32.mxu1 %vm11206_vm0, %v11980_v1  ;;  %v7380_v22 = vld [vmem:[#allocation31 + $0x60] sm:$0xff] }
0x147e   : > { %10066 = vmatprep.subr.bf16.mxu1 %v11207_v5  ;;  %v10106_v2 = vpack.c.bf16 %v7381_v24, %v7380_v22 }
0x1481   : > { %10068 = vmatpush3.bf16.msra.mxu1 %v10067_v14  ;;  %v7382_v14 = vld [vmem:[#allocation31 + $0x70] sm:$0xff] }
0x1482   : > { %10069 = vmatprep.subr.bf16.mxu1 %v11207_v5  ;;  %v10109_v51 = vpack.c.bf16 %v7383_v25, %v7382_v14 }
0x1485   : > { %10071 = vmatpush3.bf16.msra.mxu1 %v10070_v10 }
0x1486   : > { %10072 = vmatprep.subr.bf16.mxu1 %v11207_v5 }
0x1488   : > { %v7356_v3 = vpop.f32.mrb[10].mxu0 }
0x1489   : > { %10074 = vmatpush3.bf16.msra.mxu1 %v10073_v0  ;;  %v8224_v12 = vpop.f32.mrb[11].mxu0 }
0x148a   : > { %10075 = vmatprep.subr.bf16.mxu1 %v11207_v5 }
0x148c   : > { %8199 = vmatmul.mubr.msk.f32.vlgmr.msra.gmra.mrb[28].mxu1 %vm4622_vm2, %v7123_v32 }
0x148d   : > { %8217 = vmatprep.mubr.msk.f32.mxu1 %vm11206_vm0, %v11980_v1  ;;  %10077 = vmatpush3.bf16.msra.mxu1 %v10076_v36 }
0x148e   : > { %10078 = vmatprep.subr.bf16.mxu1 %v11207_v5 }
0x1491   : > { %10080 = vmatpush3.bf16.msra.mxu1 %v10079_v40 }
0x1492   : > { %10081 = vmatprep.subr.bf16.mxu1 %v11207_v5 }
0x1495   : > { %10083 = vmatpush3.bf16.msra.mxu1 %v10082_v41 }
0x1496   : > { %10084 = vmatprep.subr.bf16.mxu1 %v11207_v5 }
0x1499   : > { %10086 = vmatpush3.bf16.msra.mxu1 %v10085_v38 }
0x149a   : > { %10087 = vmatprep.subr.bf16.mxu1 %v11207_v5 }
0x152f   : > { %v6954_v39 = vpop.f32.mrb[22].mxu1 }
0x1530   : > { %v8143_v47 = vpop.f32.mrb[23].mxu1 }
0x153f   : > { %v7026_v55 = vpop.f32.mrb[24].mxu1 }
0x1540   : > { %v7027_v56 = vadd.f32 %v7026_v55, %v6954_v39  ;;  %v8162_v53 = vpop.f32.mrb[25].mxu1 }
0x154f   : > { %v7108_v57 = vpop.f32.mrb[26].mxu1 }
0x1550   : > { %v7112_v7 = vadd.f32 %v7108_v57, %v7027_v56  ;;  %v8181_v60 = vpop.f32.mrb[27].mxu1 }
0x155f   : > { %v7192_v44 = vpop.f32.mrb[28].mxu1 }
0x1560   : > { %v7196_v35 = vadd.f32 %v7192_v44, %v7112_v7  ;;  %v8200_v49 = vpop.f32.mrb[29].mxu1 }
0x1562   : > { %v7198_v31 = vadd.f32 %v7197_v54, %v7196_v35 }
0x1564   : > { %v7200_v59 = vmin.f32 %v7198_v31, 0.0  ;;  %vm7199_vm1 = vcmp.gt.f32.partialorder %v7198_v31, 0.0 }
0x1566   : > { %v7201_v58 = vmul.f32 1.442695, %v7200_v59 }
0x1568   : > { %10530 = vpow2.f32 %v7201_v58 }
0x1572   : > { %v10531_v4 = vpop.eup %10530 }
0x1573   : > { %v7785_v23 = vadd.f32 -1.0, %v10531_v4 }
0x1575   : > { %v7204_v61 = vsel %vm7199_vm1, %v7198_v31, %v7785_v23 }
0x1576   : > { %8218 = vmatmul.mubr.msk.f32.vlgmr.msra.gmra.mrb[30].mxu1 %vm4622_vm2, %v7204_v61 }
0x1577   : > { %10089 = vmatpush3.bf16.msra.mxu1 %v10088_v27  ;;  %8257 = vmatprep.mubr.msk.f32.mxu1 %vm11206_vm0, %v11980_v1  ;;  %v10100_v1 = vpack.c.bf16 %v7377_v9, %v7376_v6 }
0x1578   : > { %10090 = vmatprep.subr.bf16.mxu1 %v11207_v5 }
0x157b   : > { %10092 = vmatpush3.bf16.msra.mxu1 %v10091_v63 }
0x157c   : > { %10093 = vmatprep.subr.bf16.mxu1 %v11207_v5 }
0x157f   : > { %10095 = vmatpush3.bf16.msra.mxu1 %v10094_v19 }
0x1580   : > { %10096 = vmatprep.subr.bf16.mxu1 %v11207_v5 }
0x1583   : > { %10098 = vmatpush3.bf16.msra.mxu1 %v10097_v16 }
0x1584   : > { %10099 = vmatprep.subr.bf16.mxu1 %v11207_v5 }
0x1587   : > { %10101 = vmatpush3.bf16.msra.mxu1 %v10100_v1 }
0x1588   : > { %10102 = vmatprep.subr.bf16.mxu1 %v11207_v5 }
0x158b   : > { %10104 = vmatpush3.bf16.msra.mxu1 %v10103_v21 }
0x158c   : > { %10105 = vmatprep.subr.bf16.mxu1 %v11207_v5 }
0x158f   : > { %10107 = vmatpush3.bf16.msra.mxu1 %v10106_v2 }
0x1590   : > { %10108 = vmatprep.subr.bf16.mxu1 %v11207_v5 }
0x1593   : > { %10110 = vmatpush3.bf16.msra.mxu1 %v10109_v51 }
0x1649   : > { %v7283_v10 = vpop.f32.mrb[30].mxu1 }
0x164a   : > { %v7357_v28 = vadd.f32 %v7356_v3, %v7283_v10  ;;  %v8219_v0 = vpop.f32.mrb[31].mxu1 }
0x164c   : > { %v7361_v32 = vadd.f32 %v7360_v26, %v7357_v28 }
0x164e   : > { %v7363_v33 = vmin.f32 %v7361_v32, 0.0  ;;  %vm7362_vm0 = vcmp.gt.f32.partialorder %v7361_v32, 0.0 }
0x1650   : > { %v7364_v34 = vmul.f32 1.442695, %v7363_v33 }
0x1652   : > { %10532 = vpow2.f32 %v7364_v34 }
0x165c   : > { %v10533_v48 = vpop.eup %10532 }
0x165d   : > { %v7789_v36 = vadd.f32 -1.0, %v10533_v48 }
0x165f   : > { %v7367_v29 = vsel %vm7362_vm0, %v7361_v32, %v7789_v36 }
0x1660   : > { %8258 = vmatmul.mubr.f32.vlgmr.msra.gmra.mrb[32].mxu1 %v7367_v29 }
0x1733   : > { %v7451_v5 = vpop.f32.mrb[32].mxu1 }
0x1734   : > { %v7452_v40 = vadd.f32 %v7451_v5, %v7384_v43  ;;  %v8259_v45 = vpop.f32.mrb[33].mxu1 }
0x1736   : > { %7455 = vst [vmem:[%s919_s21] sm:$0x1] %v7452_v40 }
0x1737 PF: > { %s12566_s1 = sld [smem:[#allocation47_spill]]  ;;  %s12567_s4 = sld [smem:[#allocation48_spill]] }
0x1738   : > { %s12568_s6 = smov %s11769_s22  ;;  %p42_p13 = scmp.ge.s32.totalorder %s11769_s22, 4  }
0x1739   : > { %s12570_s23 = smov %s11781_s25  ;;  %s12571_s24 = smov %s12568_s6 }
0x173a   :  { %44 = sbr.rel (!%p42_p13) target bundleno = 29 (0x1d), region = 268 }
0x173d   : > { %s12569_s22 = smov %s12567_s4 }
0x1741   :  { %7473 = vsyncpa [#allocation4], 1 }
0x1742   :  { %7475 = vsyncpa [#allocation4 + $0x1], 1 }
0x1743   :  { %7476 = vsyncpa [#allocation6], 1 }
0x1744   :  { %7478 = vsyncpa [#allocation6 + $0x1], 1 }
0x1745   :  { %7479 = vsyncpa [#allocation9], 1 }
0x1746   :  { %7480 = vsyncpa [#allocation12], 1 }
0x1747   :  { %7481 = vsyncpa [#allocation15], 1 }
0x1748   :  { %7482 = vsyncpa [#allocation18], 1 }
0x1749   :  { %7483 = vsyncpa [#allocation21], 1 }
0x174a   :  { %7484 = vsyncpa [#allocation24], 1 }
0x174b   :  { %7485 = vsyncpa [#allocation27], 1 }
0x174c   :  { %7486 = vsyncpa [#allocation30], 1 }
0x174d   :  { %7487 = vsyncpa [#allocation33], 1 }

</bundles_post_ra>
